<compile_context>
chip_gen: v7x
topology: tpu7x:2x2x1
jax: 0.10.0
libtpu: 0.0.40
codegen_flags: <defaults>
</compile_context>

<pallas_src>
import jax
import jax.numpy as jnp
from jax.experimental import pallas as pl
from jax.experimental.pallas import tpu as pltpu

INPUT_SIZE = 3
HIDDEN = 100
NUM_LAYERS = 3
OUT_FEATURES = 3

H_PAD = 128            # hidden padded to one full lane width
G_PAD = 4 * H_PAD      # 512, gate width
IN0_PAD = 8            # layer-0 contraction dim padded 3 -> 8 (tile-aligned RHS)
OUT_PAD = 128          # fc output padded for an unmasked lane-dense store
SUBLANE = 8

# PyTorch gate order is [i, f, g, o]; kernel uses [i, f, o, g] so the sigmoid gates are the
# contiguous first 3H columns.  i/f/o columns are pre-scaled by 0.5 wrapper-side so the kernel
# can compute all four gates with one wide tanh: sigmoid(x) = 0.5*(tanh(x/2)+1).
GATE_PERM = (0, 1, 3, 2)
GATE_PRESCALE = (0.5, 0.5, 0.5, 1.0)


def lstm_fc_kernel(x_ref,                     # (T*B, IN0_PAD)        f32
                   wih0_ref,                  # (IN0_PAD, 4H)         f32
                   whh0_ref,                  # (H, 4H)               bf16
                   b0_ref,                    # (1, 4H)               f32
                   wcat1_ref,                 # (2H, 4H) [Wih; Whh]   bf16
                   b1_ref,                    # (B, 4H) pre-tiled     f32
                   wcat2_ref,                 # (2H, 4H)              bf16
                   b2_ref,                    # (B, 4H)               f32
                   wfc_ref,                   # (H, OUT_PAD)          f32
                   bfc_ref,                   # (1, OUT_PAD)          f32
                   out_ref,                   # (B, OUT_PAD)          f32
                   gx_ref):                   # scratch (T*B, 4H)     f32
    TB = x_ref.shape[0]
    B = out_ref.shape[0]
    T = TB // B
    H = whh0_ref.shape[0]

    # Layer-0 input projection (+ pre-scaled bias) hoisted off the recurrent critical path:
    # one large-M matmul into VMEM scratch.
    gx_ref[...] = (jnp.dot(x_ref[...], wih0_ref[...],
                           preferred_element_type=jnp.float32) + b0_ref[...])

    # Load weights / biases once (hoisted out of the unrolled time loop).
    whh0 = whh0_ref[...]
    wcat1 = wcat1_ref[...]
    wcat2 = wcat2_ref[...]
    b1 = b1_ref[...]
    b2 = b2_ref[...]

    def cell(gates, c_prev):
        # Single wide EUP pass over (B, 4H).  i/f/o pre-activations arrive pre-scaled by 0.5,
        # so sigmoid(x) = 0.5*(tanh(x/2)+1); the 0.5*t+0.5 fixups are cheap VPU work.
        t = jnp.tanh(gates)
        i = 0.5 * t[:, 0 * H:1 * H] + 0.5
        f = 0.5 * t[:, 1 * H:2 * H] + 0.5
        o = 0.5 * t[:, 2 * H:3 * H] + 0.5
        g = t[:, 3 * H:4 * H]
        c = f * c_prev + i * g
        h = o * jnp.tanh(c)
        return h, c

    zeros = jnp.zeros((B, H), jnp.float32)
    h0, c0 = zeros, zeros
    h1, c1 = zeros, zeros
    h2, c2 = zeros, zeros
    out0 = out1 = None     # layer-l output pending for layer l+1 at the next diagonal

    # Wavefront schedule over diagonals d: the three per-diagonal computations are mutually
    # independent, exposing MXU/EUP/VPU overlap across layers.  Static Python loop = full unroll.
    for d in range(T + NUM_LAYERS - 1):
        n0 = n1 = None

        if d < T:                                        # layer 0, timestep d
            gates0 = gx_ref[pl.ds(d * B, B), :]
            if d > 0:                                    # h0 == 0 at d == 0: skip dead matmul
                gates0 = gates0 + jnp.dot(h0.astype(jnp.bfloat16), whh0,
                                          preferred_element_type=jnp.float32)
            h0, c0 = cell(gates0, c0)
            n0 = h0

        t1 = d - 1
        if 0 <= t1 < T:                                  # layer 1, timestep d-1
            inp1 = jnp.concatenate([out0, h1], axis=1).astype(jnp.bfloat16)
            gates1 = jnp.dot(inp1, wcat1, preferred_element_type=jnp.float32) + b1
            h1, c1 = cell(gates1, c1)
            n1 = h1

        t2 = d - 2
        if 0 <= t2 < T:                                  # layer 2, timestep d-2
            inp2 = jnp.concatenate([out1, h2], axis=1).astype(jnp.bfloat16)
            gates2 = jnp.dot(inp2, wcat2, preferred_element_type=jnp.float32) + b2
            h2, c2 = cell(gates2, c2)

        out0, out1 = n0, n1

    # fc on the last timestep's hidden state of the last layer (== lstm_out[:, -1, :]).
    out_ref[...] = (jnp.dot(h2, wfc_ref[...], preferred_element_type=jnp.float32)
                    + bfc_ref[...])


def _pad_gate_weight(w, in_size, in_pad):
    """w: (4*HIDDEN, in_size) PyTorch layout -> (in_pad, 4*H_PAD): transposed, gate-reordered to
    [i,f,o,g], i/f/o columns pre-scaled by 0.5 (sigmoid-via-tanh), zero-padded (pads stay 0)."""
    cols = []
    for pos, gi in enumerate(GATE_PERM):
        blk = w[gi * HIDDEN:(gi + 1) * HIDDEN, :].T * GATE_PRESCALE[pos]  # (in_size, HIDDEN)
        blk = jnp.pad(blk, ((0, in_pad - in_size), (0, H_PAD - HIDDEN)))
        cols.append(blk)
    return jnp.concatenate(cols, axis=1)                                  # (in_pad, 4*H_PAD)


def _pad_gate_bias(b, rows):
    cols = [jnp.pad(b[gi * HIDDEN:(gi + 1) * HIDDEN] * GATE_PRESCALE[pos],
                    (0, H_PAD - HIDDEN))
            for pos, gi in enumerate(GATE_PERM)]
    v = jnp.concatenate(cols)[None, :]                                    # (1, 4*H_PAD)
    return jnp.tile(v, (rows, 1))


@jax.jit
def stock_predictor_forward(x, params):
    """x: (B, T, 3) float32, batch-first like the PyTorch module (eval mode)."""
    B, T, F = x.shape
    assert F == INPUT_SIZE
    B_pad = ((B + SUBLANE - 1) // SUBLANE) * SUBLANE

    # time-major, batch padded to a full sublane group, feature dim padded 3 -> 8
    xt = jnp.transpose(x, (1, 0, 2))                                      # (T, B, F)
    xt = jnp.pad(xt, ((0, 0), (0, B_pad - B), (0, IN0_PAD - F)))
    x2d = xt.reshape(T * B_pad, IN0_PAD)

    bf16 = jnp.bfloat16
    wih0 = _pad_gate_weight(params["w_ih_0"], INPUT_SIZE, IN0_PAD)        # f32 (8, 4H)
    whh0 = _pad_gate_weight(params["w_hh_0"], HIDDEN, H_PAD).astype(bf16)  # bf16 (H, 4H)
    b0 = _pad_gate_bias(params["b_ih_0"] + params["b_hh_0"], rows=1)      # f32 (1, 4H)

    def cat_weights(layer):
        return jnp.concatenate(
            [_pad_gate_weight(params[f"w_ih_{layer}"], HIDDEN, H_PAD),
             _pad_gate_weight(params[f"w_hh_{layer}"], HIDDEN, H_PAD)],
            axis=0).astype(bf16)                                          # bf16 (2H, 4H)

    wcat1 = cat_weights(1)
    b1 = _pad_gate_bias(params["b_ih_1"] + params["b_hh_1"], rows=B_pad)  # f32 (B_pad, 4H)
    wcat2 = cat_weights(2)
    b2 = _pad_gate_bias(params["b_ih_2"] + params["b_hh_2"], rows=B_pad)

    wfc = jnp.pad(params["w_fc"].T,
                  ((0, H_PAD - HIDDEN), (0, OUT_PAD - OUT_FEATURES)))     # f32 (H, OUT_PAD)
    bfc = jnp.pad(params["b_fc"], (0, OUT_PAD - OUT_FEATURES))[None, :]   # f32 (1, OUT_PAD)

    args = [x2d, wih0, whh0, b0, wcat1, b1, wcat2, b2, wfc, bfc]

    out_padded = pl.pallas_call(
        lstm_fc_kernel,
        out_shape=jax.ShapeDtypeStruct((B_pad, OUT_PAD), jnp.float32),
        in_specs=[pl.BlockSpec(memory_space=pltpu.MemorySpace.VMEM)] * len(args),
        out_specs=pl.BlockSpec(memory_space=pltpu.MemorySpace.VMEM),
        scratch_shapes=[
            pltpu.VMEM((T * B_pad, G_PAD), jnp.float32),   # hoisted layer-0 input gates
        ],
    )(*args)
    return out_padded[:B, :OUT_FEATURES]


def init_params(key):
    """Deterministic init matching PyTorch defaults: U(-1/sqrt(H), 1/sqrt(H))."""
    params = {}
    k = 1.0 / jnp.sqrt(jnp.float32(HIDDEN))
    keys = jax.random.split(key, 4 * NUM_LAYERS + 2)
    idx = 0
    for l in range(NUM_LAYERS):
        in_size = INPUT_SIZE if l == 0 else HIDDEN
        params[f"w_ih_{l}"] = jax.random.uniform(
            keys[idx], (4 * HIDDEN, in_size), jnp.float32, -k, k); idx += 1
        params[f"w_hh_{l}"] = jax.random.uniform(
            keys[idx], (4 * HIDDEN, HIDDEN), jnp.float32, -k, k); idx += 1
        params[f"b_ih_{l}"] = jax.random.uniform(
            keys[idx], (4 * HIDDEN,), jnp.float32, -k, k); idx += 1
        params[f"b_hh_{l}"] = jax.random.uniform(
            keys[idx], (4 * HIDDEN,), jnp.float32, -k, k); idx += 1
    kf = 1.0 / jnp.sqrt(jnp.float32(HIDDEN))
    params["w_fc"] = jax.random.uniform(
        keys[idx], (OUT_FEATURES, HIDDEN), jnp.float32, -kf, kf); idx += 1
    params["b_fc"] = jax.random.uniform(
        keys[idx], (OUT_FEATURES,), jnp.float32, -kf, kf); idx += 1
    return params


def ref_forward(x, params):
    """Pure-JAX f32 reference of the PyTorch forward (eval mode, no dropout)."""
    B, T, _ = x.shape
    h_in = x
    for l in range(NUM_LAYERS):
        Wih, Whh = params[f"w_ih_{l}"], params[f"w_hh_{l}"]
        b = params[f"b_ih_{l}"] + params[f"b_hh_{l}"]
        h = jnp.zeros((B, HIDDEN), jnp.float32)
        c = jnp.zeros((B, HIDDEN), jnp.float32)
        outs = []
        for t in range(T):
            g = h_in[:, t, :] @ Wih.T + h @ Whh.T + b
            i = jax.nn.sigmoid(g[:, 0 * HIDDEN:1 * HIDDEN])
            f = jax.nn.sigmoid(g[:, 1 * HIDDEN:2 * HIDDEN])
            gg = jnp.tanh(g[:, 2 * HIDDEN:3 * HIDDEN])
            o = jax.nn.sigmoid(g[:, 3 * HIDDEN:4 * HIDDEN])
            c = f * c + i * gg
            h = o * jnp.tanh(c)
            outs.append(h)
        h_in = jnp.stack(outs, axis=1)
    return h_in[:, -1, :] @ params["w_fc"].T + params["b_fc"]


if __name__ == "__main__":
    key = jax.random.PRNGKey(0)
    k_param, k_x = jax.random.split(key)

    B, T = 2, 8
    params = init_params(k_param)
    x = jax.random.normal(k_x, (B, T, INPUT_SIZE), jnp.float32)

    out = stock_predictor_forward(x, params)
    out = jax.block_until_ready(out)

    ref = ref_forward(x, params)
    assert out.shape == (B, OUT_FEATURES)
    # Tolerance relaxed vs. the f32 reference because the per-step recurrent matmuls use bf16
    # operands with f32 accumulation (observed error is ~1e-3 level at these scales).
    assert jnp.allclose(out, ref, atol=2e-2, rtol=2e-2), (out, ref)

    print("KERNEL_OK")
</pallas_src>

<mosaic_0001>
module attributes {stable_mosaic.version = 11 : i64} {
  func.func @lstm_fc_kernel(%arg0: memref<64x8xf32, #tpu.memory_space<vmem>>, %arg1: memref<8x512xf32, #tpu.memory_space<vmem>>, %arg2: memref<128x512xbf16, #tpu.memory_space<vmem>>, %arg3: memref<1x512xf32, #tpu.memory_space<vmem>>, %arg4: memref<256x512xbf16, #tpu.memory_space<vmem>>, %arg5: memref<8x512xf32, #tpu.memory_space<vmem>>, %arg6: memref<256x512xbf16, #tpu.memory_space<vmem>>, %arg7: memref<8x512xf32, #tpu.memory_space<vmem>>, %arg8: memref<128x128xf32, #tpu.memory_space<vmem>>, %arg9: memref<1x128xf32, #tpu.memory_space<vmem>>, %arg10: memref<8x128xf32, #tpu.memory_space<vmem>>, %arg11: memref<64x512xf32, #tpu.memory_space<vmem>>) attributes {dimension_semantics = [], scalar_prefetch = 0 : i64, scratch_operands = 1 : i64, tpu.core_type = #tpu.core_type<tc>} {
    %c0 = arith.constant 0 : index
    %c0_0 = arith.constant 0 : index
    %0 = vector.load %arg0[%c0, %c0_0] : memref<64x8xf32, #tpu.memory_space<vmem>>, vector<64x8xf32>
    %c0_1 = arith.constant 0 : index
    %c0_2 = arith.constant 0 : index
    %1 = vector.load %arg1[%c0_1, %c0_2] : memref<8x512xf32, #tpu.memory_space<vmem>>, vector<8x512xf32>
    %cst = arith.constant dense<0.000000e+00> : vector<64x512xf32>
    %2 = tpu.matmul %0, %1, %cst {dimension_numbers = #tpu.dot_dimension_numbers<[1], [0], [0], [1], [0, 0, 1, 1], [], []>} : vector<64x8xf32>, vector<8x512xf32>, vector<64x512xf32> -> vector<64x512xf32>
    %c0_3 = arith.constant 0 : index
    %c0_4 = arith.constant 0 : index
    %3 = vector.load %arg3[%c0_3, %c0_4] : memref<1x512xf32, #tpu.memory_space<vmem>>, vector<1x512xf32>
    %4 = vector.broadcast %3 : vector<1x512xf32> to vector<64x512xf32>
    %5 = arith.addf %2, %4 : vector<64x512xf32>
    %c0_5 = arith.constant 0 : index
    %c0_6 = arith.constant 0 : index
    %6 = vector.load %arg11[%c0_5, %c0_6] : memref<64x512xf32, #tpu.memory_space<vmem>>, vector<64x512xf32>
    tpu.vector_store %arg11[%c0_5, %c0_6], %5 {strides = array<i32>} : memref<64x512xf32, #tpu.memory_space<vmem>>, vector<64x512xf32>,
    %c0_7 = arith.constant 0 : index
    %c0_8 = arith.constant 0 : index
    %7 = vector.load %arg2[%c0_7, %c0_8] : memref<128x512xbf16, #tpu.memory_space<vmem>>, vector<128x512xbf16>
    %c0_9 = arith.constant 0 : index
    %c0_10 = arith.constant 0 : index
    %8 = vector.load %arg4[%c0_9, %c0_10] : memref<256x512xbf16, #tpu.memory_space<vmem>>, vector<256x512xbf16>
    %c0_11 = arith.constant 0 : index
    %c0_12 = arith.constant 0 : index
    %9 = vector.load %arg6[%c0_11, %c0_12] : memref<256x512xbf16, #tpu.memory_space<vmem>>, vector<256x512xbf16>
    %c0_13 = arith.constant 0 : index
    %c0_14 = arith.constant 0 : index
    %10 = vector.load %arg5[%c0_13, %c0_14] : memref<8x512xf32, #tpu.memory_space<vmem>>, vector<8x512xf32>
    %c0_15 = arith.constant 0 : index
    %c0_16 = arith.constant 0 : index
    %11 = vector.load %arg7[%c0_15, %c0_16] : memref<8x512xf32, #tpu.memory_space<vmem>>, vector<8x512xf32>
    %cst_17 = arith.constant 0.000000e+00 : f32
    %12 = vector.broadcast %cst_17 : f32 to vector<8x128xf32>
    %c0_18 = arith.constant 0 : index
    %c0_19 = arith.constant 0 : index
    %13 = vector.load %arg11[%c0_18, %c0_19] : memref<64x512xf32, #tpu.memory_space<vmem>>, vector<8x512xf32>
    %14 = math.tanh %13 : vector<8x512xf32>
    %15 = vector.extract_strided_slice %14 {offsets = [0, 0], sizes = [8, 128], strides = [1, 1]} : vector<8x512xf32> to vector<8x128xf32>
    %cst_20 = arith.constant 5.000000e-01 : f32
    %16 = vector.broadcast %cst_20 : f32 to vector<8x128xf32>
    %17 = arith.mulf %16, %15 : vector<8x128xf32>
    %cst_21 = arith.constant 5.000000e-01 : f32
    %18 = vector.broadcast %cst_21 : f32 to vector<8x128xf32>
    %19 = arith.addf %17, %18 : vector<8x128xf32>
    %20 = vector.extract_strided_slice %14 {offsets = [0, 128], sizes = [8, 128], strides = [1, 1]} : vector<8x512xf32> to vector<8x128xf32>
    %cst_22 = arith.constant 5.000000e-01 : f32
    %21 = vector.broadcast %cst_22 : f32 to vector<8x128xf32>
    %22 = arith.mulf %21, %20 : vector<8x128xf32>
    %cst_23 = arith.constant 5.000000e-01 : f32
    %23 = vector.broadcast %cst_23 : f32 to vector<8x128xf32>
    %24 = arith.addf %22, %23 : vector<8x128xf32>
    %25 = vector.extract_strided_slice %14 {offsets = [0, 256], sizes = [8, 128], strides = [1, 1]} : vector<8x512xf32> to vector<8x128xf32>
    %cst_24 = arith.constant 5.000000e-01 : f32
    %26 = vector.broadcast %cst_24 : f32 to vector<8x128xf32>
    %27 = arith.mulf %26, %25 : vector<8x128xf32>
    %cst_25 = arith.constant 5.000000e-01 : f32
    %28 = vector.broadcast %cst_25 : f32 to vector<8x128xf32>
    %29 = arith.addf %27, %28 : vector<8x128xf32>
    %30 = vector.extract_strided_slice %14 {offsets = [0, 384], sizes = [8, 128], strides = [1, 1]} : vector<8x512xf32> to vector<8x128xf32>
    %31 = arith.mulf %24, %12 : vector<8x128xf32>
    %32 = arith.mulf %19, %30 : vector<8x128xf32>
    %33 = arith.addf %31, %32 : vector<8x128xf32>
    %34 = math.tanh %33 : vector<8x128xf32>
    %35 = arith.mulf %29, %34 : vector<8x128xf32>
    %c8 = arith.constant 8 : index
    %c0_26 = arith.constant 0 : index
    %36 = vector.load %arg11[%c8, %c0_26] : memref<64x512xf32, #tpu.memory_space<vmem>>, vector<8x512xf32>
    %37 = arith.truncf %35 : vector<8x128xf32> to vector<8x128xbf16>
    %cst_27 = arith.constant dense<0.000000e+00> : vector<8x512xf32>
    %38 = tpu.matmul %37, %7, %cst_27 {dimension_numbers = #tpu.dot_dimension_numbers<[1], [0], [0], [1], [0, 0, 1, 1], [], []>} : vector<8x128xbf16>, vector<128x512xbf16>, vector<8x512xf32> -> vector<8x512xf32>
    %39 = arith.addf %36, %38 : vector<8x512xf32>
    %40 = math.tanh %39 : vector<8x512xf32>
    %41 = vector.extract_strided_slice %40 {offsets = [0, 0], sizes = [8, 128], strides = [1, 1]} : vector<8x512xf32> to vector<8x128xf32>
    %cst_28 = arith.constant 5.000000e-01 : f32
    %42 = vector.broadcast %cst_28 : f32 to vector<8x128xf32>
    %43 = arith.mulf %42, %41 : vector<8x128xf32>
    %cst_29 = arith.constant 5.000000e-01 : f32
    %44 = vector.broadcast %cst_29 : f32 to vector<8x128xf32>
    %45 = arith.addf %43, %44 : vector<8x128xf32>
    %46 = vector.extract_strided_slice %40 {offsets = [0, 128], sizes = [8, 128], strides = [1, 1]} : vector<8x512xf32> to vector<8x128xf32>
    %cst_30 = arith.constant 5.000000e-01 : f32
    %47 = vector.broadcast %cst_30 : f32 to vector<8x128xf32>
    %48 = arith.mulf %47, %46 : vector<8x128xf32>
    %cst_31 = arith.constant 5.000000e-01 : f32
    %49 = vector.broadcast %cst_31 : f32 to vector<8x128xf32>
    %50 = arith.addf %48, %49 : vector<8x128xf32>
    %51 = vector.extract_strided_slice %40 {offsets = [0, 256], sizes = [8, 128], strides = [1, 1]} : vector<8x512xf32> to vector<8x128xf32>
    %cst_32 = arith.constant 5.000000e-01 : f32
    %52 = vector.broadcast %cst_32 : f32 to vector<8x128xf32>
    %53 = arith.mulf %52, %51 : vector<8x128xf32>
    %cst_33 = arith.constant 5.000000e-01 : f32
    %54 = vector.broadcast %cst_33 : f32 to vector<8x128xf32>
    %55 = arith.addf %53, %54 : vector<8x128xf32>
    %56 = vector.extract_strided_slice %40 {offsets = [0, 384], sizes = [8, 128], strides = [1, 1]} : vector<8x512xf32> to vector<8x128xf32>
    %57 = arith.mulf %50, %33 : vector<8x128xf32>
    %58 = arith.mulf %45, %56 : vector<8x128xf32>
    %59 = arith.addf %57, %58 : vector<8x128xf32>
    %60 = math.tanh %59 : vector<8x128xf32>
    %61 = arith.mulf %55, %60 : vector<8x128xf32>
    %62 = tpu.concatenate %35, %12 in 1 : vector<8x128xf32>, vector<8x128xf32> -> vector<8x256xf32>
    %63 = arith.truncf %62 : vector<8x256xf32> to vector<8x256xbf16>
    %cst_34 = arith.constant dense<0.000000e+00> : vector<8x512xf32>
    %64 = tpu.matmul %63, %8, %cst_34 {dimension_numbers = #tpu.dot_dimension_numbers<[1], [0], [0], [1], [0, 0, 1, 1], [], []>} : vector<8x256xbf16>, vector<256x512xbf16>, vector<8x512xf32> -> vector<8x512xf32>
    %65 = arith.addf %64, %10 : vector<8x512xf32>
    %66 = math.tanh %65 : vector<8x512xf32>
    %67 = vector.extract_strided_slice %66 {offsets = [0, 0], sizes = [8, 128], strides = [1, 1]} : vector<8x512xf32> to vector<8x128xf32>
    %cst_35 = arith.constant 5.000000e-01 : f32
    %68 = vector.broadcast %cst_35 : f32 to vector<8x128xf32>
    %69 = arith.mulf %68, %67 : vector<8x128xf32>
    %cst_36 = arith.constant 5.000000e-01 : f32
    %70 = vector.broadcast %cst_36 : f32 to vector<8x128xf32>
    %71 = arith.addf %69, %70 : vector<8x128xf32>
    %72 = vector.extract_strided_slice %66 {offsets = [0, 128], sizes = [8, 128], strides = [1, 1]} : vector<8x512xf32> to vector<8x128xf32>
    %cst_37 = arith.constant 5.000000e-01 : f32
    %73 = vector.broadcast %cst_37 : f32 to vector<8x128xf32>
    %74 = arith.mulf %73, %72 : vector<8x128xf32>
    %cst_38 = arith.constant 5.000000e-01 : f32
    %75 = vector.broadcast %cst_38 : f32 to vector<8x128xf32>
    %76 = arith.addf %74, %75 : vector<8x128xf32>
    %77 = vector.extract_strided_slice %66 {offsets = [0, 256], sizes = [8, 128], strides = [1, 1]} : vector<8x512xf32> to vector<8x128xf32>
    %cst_39 = arith.constant 5.000000e-01 : f32
    %78 = vector.broadcast %cst_39 : f32 to vector<8x128xf32>
    %79 = arith.mulf %78, %77 : vector<8x128xf32>
    %cst_40 = arith.constant 5.000000e-01 : f32
    %80 = vector.broadcast %cst_40 : f32 to vector<8x128xf32>
    %81 = arith.addf %79, %80 : vector<8x128xf32>
    %82 = vector.extract_strided_slice %66 {offsets = [0, 384], sizes = [8, 128], strides = [1, 1]} : vector<8x512xf32> to vector<8x128xf32>
    %83 = arith.mulf %76, %12 : vector<8x128xf32>
    %84 = arith.mulf %71, %82 : vector<8x128xf32>
    %85 = arith.addf %83, %84 : vector<8x128xf32>
    %86 = math.tanh %85 : vector<8x128xf32>
    %87 = arith.mulf %81, %86 : vector<8x128xf32>
    %c16 = arith.constant 16 : index
    %c0_41 = arith.constant 0 : index
    %88 = vector.load %arg11[%c16, %c0_41] : memref<64x512xf32, #tpu.memory_space<vmem>>, vector<8x512xf32>
    %89 = arith.truncf %61 : vector<8x128xf32> to vector<8x128xbf16>
    %cst_42 = arith.constant dense<0.000000e+00> : vector<8x512xf32>
    %90 = tpu.matmul %89, %7, %cst_42 {dimension_numbers = #tpu.dot_dimension_numbers<[1], [0], [0], [1], [0, 0, 1, 1], [], []>} : vector<8x128xbf16>, vector<128x512xbf16>, vector<8x512xf32> -> vector<8x512xf32>
    %91 = arith.addf %88, %90 : vector<8x512xf32>
    %92 = math.tanh %91 : vector<8x512xf32>
    %93 = vector.extract_strided_slice %92 {offsets = [0, 0], sizes = [8, 128], strides = [1, 1]} : vector<8x512xf32> to vector<8x128xf32>
    %cst_43 = arith.constant 5.000000e-01 : f32
    %94 = vector.broadcast %cst_43 : f32 to vector<8x128xf32>
    %95 = arith.mulf %94, %93 : vector<8x128xf32>
    %cst_44 = arith.constant 5.000000e-01 : f32
    %96 = vector.broadcast %cst_44 : f32 to vector<8x128xf32>
    %97 = arith.addf %95, %96 : vector<8x128xf32>
    %98 = vector.extract_strided_slice %92 {offsets = [0, 128], sizes = [8, 128], strides = [1, 1]} : vector<8x512xf32> to vector<8x128xf32>
    %cst_45 = arith.constant 5.000000e-01 : f32
    %99 = vector.broadcast %cst_45 : f32 to vector<8x128xf32>
    %100 = arith.mulf %99, %98 : vector<8x128xf32>
    %cst_46 = arith.constant 5.000000e-01 : f32
    %101 = vector.broadcast %cst_46 : f32 to vector<8x128xf32>
    %102 = arith.addf %100, %101 : vector<8x128xf32>
    %103 = vector.extract_strided_slice %92 {offsets = [0, 256], sizes = [8, 128], strides = [1, 1]} : vector<8x512xf32> to vector<8x128xf32>
    %cst_47 = arith.constant 5.000000e-01 : f32
    %104 = vector.broadcast %cst_47 : f32 to vector<8x128xf32>
    %105 = arith.mulf %104, %103 : vector<8x128xf32>
    %cst_48 = arith.constant 5.000000e-01 : f32
    %106 = vector.broadcast %cst_48 : f32 to vector<8x128xf32>
    %107 = arith.addf %105, %106 : vector<8x128xf32>
    %108 = vector.extract_strided_slice %92 {offsets = [0, 384], sizes = [8, 128], strides = [1, 1]} : vector<8x512xf32> to vector<8x128xf32>
    %109 = arith.mulf %102, %59 : vector<8x128xf32>
    %110 = arith.mulf %97, %108 : vector<8x128xf32>
    %111 = arith.addf %109, %110 : vector<8x128xf32>
    %112 = math.tanh %111 : vector<8x128xf32>
    %113 = arith.mulf %107, %112 : vector<8x128xf32>
    %114 = tpu.concatenate %61, %87 in 1 : vector<8x128xf32>, vector<8x128xf32> -> vector<8x256xf32>
    %115 = arith.truncf %114 : vector<8x256xf32> to vector<8x256xbf16>
    %cst_49 = arith.constant dense<0.000000e+00> : vector<8x512xf32>
    %116 = tpu.matmul %115, %8, %cst_49 {dimension_numbers = #tpu.dot_dimension_numbers<[1], [0], [0], [1], [0, 0, 1, 1], [], []>} : vector<8x256xbf16>, vector<256x512xbf16>, vector<8x512xf32> -> vector<8x512xf32>
    %117 = arith.addf %116, %10 : vector<8x512xf32>
    %118 = math.tanh %117 : vector<8x512xf32>
    %119 = vector.extract_strided_slice %118 {offsets = [0, 0], sizes = [8, 128], strides = [1, 1]} : vector<8x512xf32> to vector<8x128xf32>
    %cst_50 = arith.constant 5.000000e-01 : f32
    %120 = vector.broadcast %cst_50 : f32 to vector<8x128xf32>
    %121 = arith.mulf %120, %119 : vector<8x128xf32>
    %cst_51 = arith.constant 5.000000e-01 : f32
    %122 = vector.broadcast %cst_51 : f32 to vector<8x128xf32>
    %123 = arith.addf %121, %122 : vector<8x128xf32>
    %124 = vector.extract_strided_slice %118 {offsets = [0, 128], sizes = [8, 128], strides = [1, 1]} : vector<8x512xf32> to vector<8x128xf32>
    %cst_52 = arith.constant 5.000000e-01 : f32
    %125 = vector.broadcast %cst_52 : f32 to vector<8x128xf32>
    %126 = arith.mulf %125, %124 : vector<8x128xf32>
    %cst_53 = arith.constant 5.000000e-01 : f32
    %127 = vector.broadcast %cst_53 : f32 to vector<8x128xf32>
    %128 = arith.addf %126, %127 : vector<8x128xf32>
    %129 = vector.extract_strided_slice %118 {offsets = [0, 256], sizes = [8, 128], strides = [1, 1]} : vector<8x512xf32> to vector<8x128xf32>
    %cst_54 = arith.constant 5.000000e-01 : f32
    %130 = vector.broadcast %cst_54 : f32 to vector<8x128xf32>
    %131 = arith.mulf %130, %129 : vector<8x128xf32>
    %cst_55 = arith.constant 5.000000e-01 : f32
    %132 = vector.broadcast %cst_55 : f32 to vector<8x128xf32>
    %133 = arith.addf %131, %132 : vector<8x128xf32>
    %134 = vector.extract_strided_slice %118 {offsets = [0, 384], sizes = [8, 128], strides = [1, 1]} : vector<8x512xf32> to vector<8x128xf32>
    %135 = arith.mulf %128, %85 : vector<8x128xf32>
    %136 = arith.mulf %123, %134 : vector<8x128xf32>
    %137 = arith.addf %135, %136 : vector<8x128xf32>
    %138 = math.tanh %137 : vector<8x128xf32>
    %139 = arith.mulf %133, %138 : vector<8x128xf32>
    %140 = tpu.concatenate %87, %12 in 1 : vector<8x128xf32>, vector<8x128xf32> -> vector<8x256xf32>
    %141 = arith.truncf %140 : vector<8x256xf32> to vector<8x256xbf16>
    %cst_56 = arith.constant dense<0.000000e+00> : vector<8x512xf32>
    %142 = tpu.matmul %141, %9, %cst_56 {dimension_numbers = #tpu.dot_dimension_numbers<[1], [0], [0], [1], [0, 0, 1, 1], [], []>} : vector<8x256xbf16>, vector<256x512xbf16>, vector<8x512xf32> -> vector<8x512xf32>
    %143 = arith.addf %142, %11 : vector<8x512xf32>
    %144 = math.tanh %143 : vector<8x512xf32>
    %145 = vector.extract_strided_slice %144 {offsets = [0, 0], sizes = [8, 128], strides = [1, 1]} : vector<8x512xf32> to vector<8x128xf32>
    %cst_57 = arith.constant 5.000000e-01 : f32
    %146 = vector.broadcast %cst_57 : f32 to vector<8x128xf32>
    %147 = arith.mulf %146, %145 : vector<8x128xf32>
    %cst_58 = arith.constant 5.000000e-01 : f32
    %148 = vector.broadcast %cst_58 : f32 to vector<8x128xf32>
    %149 = arith.addf %147, %148 : vector<8x128xf32>
    %150 = vector.extract_strided_slice %144 {offsets = [0, 128], sizes = [8, 128], strides = [1, 1]} : vector<8x512xf32> to vector<8x128xf32>
    %cst_59 = arith.constant 5.000000e-01 : f32
    %151 = vector.broadcast %cst_59 : f32 to vector<8x128xf32>
    %152 = arith.mulf %151, %150 : vector<8x128xf32>
    %cst_60 = arith.constant 5.000000e-01 : f32
    %153 = vector.broadcast %cst_60 : f32 to vector<8x128xf32>
    %154 = arith.addf %152, %153 : vector<8x128xf32>
    %155 = vector.extract_strided_slice %144 {offsets = [0, 256], sizes = [8, 128], strides = [1, 1]} : vector<8x512xf32> to vector<8x128xf32>
    %cst_61 = arith.constant 5.000000e-01 : f32
    %156 = vector.broadcast %cst_61 : f32 to vector<8x128xf32>
    %157 = arith.mulf %156, %155 : vector<8x128xf32>
    %cst_62 = arith.constant 5.000000e-01 : f32
    %158 = vector.broadcast %cst_62 : f32 to vector<8x128xf32>
    %159 = arith.addf %157, %158 : vector<8x128xf32>
    %160 = vector.extract_strided_slice %144 {offsets = [0, 384], sizes = [8, 128], strides = [1, 1]} : vector<8x512xf32> to vector<8x128xf32>
    %161 = arith.mulf %154, %12 : vector<8x128xf32>
    %162 = arith.mulf %149, %160 : vector<8x128xf32>
    %163 = arith.addf %161, %162 : vector<8x128xf32>
    %164 = math.tanh %163 : vector<8x128xf32>
    %165 = arith.mulf %159, %164 : vector<8x128xf32>
    %c24 = arith.constant 24 : index
    %c0_63 = arith.constant 0 : index
    %166 = vector.load %arg11[%c24, %c0_63] : memref<64x512xf32, #tpu.memory_space<vmem>>, vector<8x512xf32>
    %167 = arith.truncf %113 : vector<8x128xf32> to vector<8x128xbf16>
    %cst_64 = arith.constant dense<0.000000e+00> : vector<8x512xf32>
    %168 = tpu.matmul %167, %7, %cst_64 {dimension_numbers = #tpu.dot_dimension_numbers<[1], [0], [0], [1], [0, 0, 1, 1], [], []>} : vector<8x128xbf16>, vector<128x512xbf16>, vector<8x512xf32> -> vector<8x512xf32>
    %169 = arith.addf %166, %168 : vector<8x512xf32>
    %170 = math.tanh %169 : vector<8x512xf32>
    %171 = vector.extract_strided_slice %170 {offsets = [0, 0], sizes = [8, 128], strides = [1, 1]} : vector<8x512xf32> to vector<8x128xf32>
    %cst_65 = arith.constant 5.000000e-01 : f32
    %172 = vector.broadcast %cst_65 : f32 to vector<8x128xf32>
    %173 = arith.mulf %172, %171 : vector<8x128xf32>
    %cst_66 = arith.constant 5.000000e-01 : f32
    %174 = vector.broadcast %cst_66 : f32 to vector<8x128xf32>
    %175 = arith.addf %173, %174 : vector<8x128xf32>
    %176 = vector.extract_strided_slice %170 {offsets = [0, 128], sizes = [8, 128], strides = [1, 1]} : vector<8x512xf32> to vector<8x128xf32>
    %cst_67 = arith.constant 5.000000e-01 : f32
    %177 = vector.broadcast %cst_67 : f32 to vector<8x128xf32>
    %178 = arith.mulf %177, %176 : vector<8x128xf32>
    %cst_68 = arith.constant 5.000000e-01 : f32
    %179 = vector.broadcast %cst_68 : f32 to vector<8x128xf32>
    %180 = arith.addf %178, %179 : vector<8x128xf32>
    %181 = vector.extract_strided_slice %170 {offsets = [0, 256], sizes = [8, 128], strides = [1, 1]} : vector<8x512xf32> to vector<8x128xf32>
    %cst_69 = arith.constant 5.000000e-01 : f32
    %182 = vector.broadcast %cst_69 : f32 to vector<8x128xf32>
    %183 = arith.mulf %182, %181 : vector<8x128xf32>
    %cst_70 = arith.constant 5.000000e-01 : f32
    %184 = vector.broadcast %cst_70 : f32 to vector<8x128xf32>
    %185 = arith.addf %183, %184 : vector<8x128xf32>
    %186 = vector.extract_strided_slice %170 {offsets = [0, 384], sizes = [8, 128], strides = [1, 1]} : vector<8x512xf32> to vector<8x128xf32>
    %187 = arith.mulf %180, %111 : vector<8x128xf32>
    %188 = arith.mulf %175, %186 : vector<8x128xf32>
    %189 = arith.addf %187, %188 : vector<8x128xf32>
    %190 = math.tanh %189 : vector<8x128xf32>
    %191 = arith.mulf %185, %190 : vector<8x128xf32>
    %192 = tpu.concatenate %113, %139 in 1 : vector<8x128xf32>, vector<8x128xf32> -> vector<8x256xf32>
    %193 = arith.truncf %192 : vector<8x256xf32> to vector<8x256xbf16>
    %cst_71 = arith.constant dense<0.000000e+00> : vector<8x512xf32>
    %194 = tpu.matmul %193, %8, %cst_71 {dimension_numbers = #tpu.dot_dimension_numbers<[1], [0], [0], [1], [0, 0, 1, 1], [], []>} : vector<8x256xbf16>, vector<256x512xbf16>, vector<8x512xf32> -> vector<8x512xf32>
    %195 = arith.addf %194, %10 : vector<8x512xf32>
    %196 = math.tanh %195 : vector<8x512xf32>
    %197 = vector.extract_strided_slice %196 {offsets = [0, 0], sizes = [8, 128], strides = [1, 1]} : vector<8x512xf32> to vector<8x128xf32>
    %cst_72 = arith.constant 5.000000e-01 : f32
    %198 = vector.broadcast %cst_72 : f32 to vector<8x128xf32>
    %199 = arith.mulf %198, %197 : vector<8x128xf32>
    %cst_73 = arith.constant 5.000000e-01 : f32
    %200 = vector.broadcast %cst_73 : f32 to vector<8x128xf32>
    %201 = arith.addf %199, %200 : vector<8x128xf32>
    %202 = vector.extract_strided_slice %196 {offsets = [0, 128], sizes = [8, 128], strides = [1, 1]} : vector<8x512xf32> to vector<8x128xf32>
    %cst_74 = arith.constant 5.000000e-01 : f32
    %203 = vector.broadcast %cst_74 : f32 to vector<8x128xf32>
    %204 = arith.mulf %203, %202 : vector<8x128xf32>
    %cst_75 = arith.constant 5.000000e-01 : f32
    %205 = vector.broadcast %cst_75 : f32 to vector<8x128xf32>
    %206 = arith.addf %204, %205 : vector<8x128xf32>
    %207 = vector.extract_strided_slice %196 {offsets = [0, 256], sizes = [8, 128], strides = [1, 1]} : vector<8x512xf32> to vector<8x128xf32>
    %cst_76 = arith.constant 5.000000e-01 : f32
    %208 = vector.broadcast %cst_76 : f32 to vector<8x128xf32>
    %209 = arith.mulf %208, %207 : vector<8x128xf32>
    %cst_77 = arith.constant 5.000000e-01 : f32
    %210 = vector.broadcast %cst_77 : f32 to vector<8x128xf32>
    %211 = arith.addf %209, %210 : vector<8x128xf32>
    %212 = vector.extract_strided_slice %196 {offsets = [0, 384], sizes = [8, 128], strides = [1, 1]} : vector<8x512xf32> to vector<8x128xf32>
    %213 = arith.mulf %206, %137 : vector<8x128xf32>
    %214 = arith.mulf %201, %212 : vector<8x128xf32>
    %215 = arith.addf %213, %214 : vector<8x128xf32>
    %216 = math.tanh %215 : vector<8x128xf32>
    %217 = arith.mulf %211, %216 : vector<8x128xf32>
    %218 = tpu.concatenate %139, %165 in 1 : vector<8x128xf32>, vector<8x128xf32> -> vector<8x256xf32>
    %219 = arith.truncf %218 : vector<8x256xf32> to vector<8x256xbf16>
    %cst_78 = arith.constant dense<0.000000e+00> : vector<8x512xf32>
    %220 = tpu.matmul %219, %9, %cst_78 {dimension_numbers = #tpu.dot_dimension_numbers<[1], [0], [0], [1], [0, 0, 1, 1], [], []>} : vector<8x256xbf16>, vector<256x512xbf16>, vector<8x512xf32> -> vector<8x512xf32>
    %221 = arith.addf %220, %11 : vector<8x512xf32>
    %222 = math.tanh %221 : vector<8x512xf32>
    %223 = vector.extract_strided_slice %222 {offsets = [0, 0], sizes = [8, 128], strides = [1, 1]} : vector<8x512xf32> to vector<8x128xf32>
    %cst_79 = arith.constant 5.000000e-01 : f32
    %224 = vector.broadcast %cst_79 : f32 to vector<8x128xf32>
    %225 = arith.mulf %224, %223 : vector<8x128xf32>
    %cst_80 = arith.constant 5.000000e-01 : f32
    %226 = vector.broadcast %cst_80 : f32 to vector<8x128xf32>
    %227 = arith.addf %225, %226 : vector<8x128xf32>
    %228 = vector.extract_strided_slice %222 {offsets = [0, 128], sizes = [8, 128], strides = [1, 1]} : vector<8x512xf32> to vector<8x128xf32>
    %cst_81 = arith.constant 5.000000e-01 : f32
    %229 = vector.broadcast %cst_81 : f32 to vector<8x128xf32>
    %230 = arith.mulf %229, %228 : vector<8x128xf32>
    %cst_82 = arith.constant 5.000000e-01 : f32
    %231 = vector.broadcast %cst_82 : f32 to vector<8x128xf32>
    %232 = arith.addf %230, %231 : vector<8x128xf32>
    %233 = vector.extract_strided_slice %222 {offsets = [0, 256], sizes = [8, 128], strides = [1, 1]} : vector<8x512xf32> to vector<8x128xf32>
    %cst_83 = arith.constant 5.000000e-01 : f32
    %234 = vector.broadcast %cst_83 : f32 to vector<8x128xf32>
    %235 = arith.mulf %234, %233 : vector<8x128xf32>
    %cst_84 = arith.constant 5.000000e-01 : f32
    %236 = vector.broadcast %cst_84 : f32 to vector<8x128xf32>
    %237 = arith.addf %235, %236 : vector<8x128xf32>
    %238 = vector.extract_strided_slice %222 {offsets = [0, 384], sizes = [8, 128], strides = [1, 1]} : vector<8x512xf32> to vector<8x128xf32>
    %239 = arith.mulf %232, %163 : vector<8x128xf32>
    %240 = arith.mulf %227, %238 : vector<8x128xf32>
    %241 = arith.addf %239, %240 : vector<8x128xf32>
    %242 = math.tanh %241 : vector<8x128xf32>
    %243 = arith.mulf %237, %242 : vector<8x128xf32>
    %c32 = arith.constant 32 : index
    %c0_85 = arith.constant 0 : index
    %244 = vector.load %arg11[%c32, %c0_85] : memref<64x512xf32, #tpu.memory_space<vmem>>, vector<8x512xf32>
    %245 = arith.truncf %191 : vector<8x128xf32> to vector<8x128xbf16>
    %cst_86 = arith.constant dense<0.000000e+00> : vector<8x512xf32>
    %246 = tpu.matmul %245, %7, %cst_86 {dimension_numbers = #tpu.dot_dimension_numbers<[1], [0], [0], [1], [0, 0, 1, 1], [], []>} : vector<8x128xbf16>, vector<128x512xbf16>, vector<8x512xf32> -> vector<8x512xf32>
    %247 = arith.addf %244, %246 : vector<8x512xf32>
    %248 = math.tanh %247 : vector<8x512xf32>
    %249 = vector.extract_strided_slice %248 {offsets = [0, 0], sizes = [8, 128], strides = [1, 1]} : vector<8x512xf32> to vector<8x128xf32>
    %cst_87 = arith.constant 5.000000e-01 : f32
    %250 = vector.broadcast %cst_87 : f32 to vector<8x128xf32>
    %251 = arith.mulf %250, %249 : vector<8x128xf32>
    %cst_88 = arith.constant 5.000000e-01 : f32
    %252 = vector.broadcast %cst_88 : f32 to vector<8x128xf32>
    %253 = arith.addf %251, %252 : vector<8x128xf32>
    %254 = vector.extract_strided_slice %248 {offsets = [0, 128], sizes = [8, 128], strides = [1, 1]} : vector<8x512xf32> to vector<8x128xf32>
    %cst_89 = arith.constant 5.000000e-01 : f32
    %255 = vector.broadcast %cst_89 : f32 to vector<8x128xf32>
    %256 = arith.mulf %255, %254 : vector<8x128xf32>
    %cst_90 = arith.constant 5.000000e-01 : f32
    %257 = vector.broadcast %cst_90 : f32 to vector<8x128xf32>
    %258 = arith.addf %256, %257 : vector<8x128xf32>
    %259 = vector.extract_strided_slice %248 {offsets = [0, 256], sizes = [8, 128], strides = [1, 1]} : vector<8x512xf32> to vector<8x128xf32>
    %cst_91 = arith.constant 5.000000e-01 : f32
    %260 = vector.broadcast %cst_91 : f32 to vector<8x128xf32>
    %261 = arith.mulf %260, %259 : vector<8x128xf32>
    %cst_92 = arith.constant 5.000000e-01 : f32
    %262 = vector.broadcast %cst_92 : f32 to vector<8x128xf32>
    %263 = arith.addf %261, %262 : vector<8x128xf32>
    %264 = vector.extract_strided_slice %248 {offsets = [0, 384], sizes = [8, 128], strides = [1, 1]} : vector<8x512xf32> to vector<8x128xf32>
    %265 = arith.mulf %258, %189 : vector<8x128xf32>
    %266 = arith.mulf %253, %264 : vector<8x128xf32>
    %267 = arith.addf %265, %266 : vector<8x128xf32>
    %268 = math.tanh %267 : vector<8x128xf32>
    %269 = arith.mulf %263, %268 : vector<8x128xf32>
    %270 = tpu.concatenate %191, %217 in 1 : vector<8x128xf32>, vector<8x128xf32> -> vector<8x256xf32>
    %271 = arith.truncf %270 : vector<8x256xf32> to vector<8x256xbf16>
    %cst_93 = arith.constant dense<0.000000e+00> : vector<8x512xf32>
    %272 = tpu.matmul %271, %8, %cst_93 {dimension_numbers = #tpu.dot_dimension_numbers<[1], [0], [0], [1], [0, 0, 1, 1], [], []>} : vector<8x256xbf16>, vector<256x512xbf16>, vector<8x512xf32> -> vector<8x512xf32>
    %273 = arith.addf %272, %10 : vector<8x512xf32>
    %274 = math.tanh %273 : vector<8x512xf32>
    %275 = vector.extract_strided_slice %274 {offsets = [0, 0], sizes = [8, 128], strides = [1, 1]} : vector<8x512xf32> to vector<8x128xf32>
    %cst_94 = arith.constant 5.000000e-01 : f32
    %276 = vector.broadcast %cst_94 : f32 to vector<8x128xf32>
    %277 = arith.mulf %276, %275 : vector<8x128xf32>
    %cst_95 = arith.constant 5.000000e-01 : f32
    %278 = vector.broadcast %cst_95 : f32 to vector<8x128xf32>
    %279 = arith.addf %277, %278 : vector<8x128xf32>
    %280 = vector.extract_strided_slice %274 {offsets = [0, 128], sizes = [8, 128], strides = [1, 1]} : vector<8x512xf32> to vector<8x128xf32>
    %cst_96 = arith.constant 5.000000e-01 : f32
    %281 = vector.broadcast %cst_96 : f32 to vector<8x128xf32>
    %282 = arith.mulf %281, %280 : vector<8x128xf32>
    %cst_97 = arith.constant 5.000000e-01 : f32
    %283 = vector.broadcast %cst_97 : f32 to vector<8x128xf32>
    %284 = arith.addf %282, %283 : vector<8x128xf32>
    %285 = vector.extract_strided_slice %274 {offsets = [0, 256], sizes = [8, 128], strides = [1, 1]} : vector<8x512xf32> to vector<8x128xf32>
    %cst_98 = arith.constant 5.000000e-01 : f32
    %286 = vector.broadcast %cst_98 : f32 to vector<8x128xf32>
    %287 = arith.mulf %286, %285 : vector<8x128xf32>
    %cst_99 = arith.constant 5.000000e-01 : f32
    %288 = vector.broadcast %cst_99 : f32 to vector<8x128xf32>
    %289 = arith.addf %287, %288 : vector<8x128xf32>
    %290 = vector.extract_strided_slice %274 {offsets = [0, 384], sizes = [8, 128], strides = [1, 1]} : vector<8x512xf32> to vector<8x128xf32>
    %291 = arith.mulf %284, %215 : vector<8x128xf32>
    %292 = arith.mulf %279, %290 : vector<8x128xf32>
    %293 = arith.addf %291, %292 : vector<8x128xf32>
    %294 = math.tanh %293 : vector<8x128xf32>
    %295 = arith.mulf %289, %294 : vector<8x128xf32>
    %296 = tpu.concatenate %217, %243 in 1 : vector<8x128xf32>, vector<8x128xf32> -> vector<8x256xf32>
    %297 = arith.truncf %296 : vector<8x256xf32> to vector<8x256xbf16>
    %cst_100 = arith.constant dense<0.000000e+00> : vector<8x512xf32>
    %298 = tpu.matmul %297, %9, %cst_100 {dimension_numbers = #tpu.dot_dimension_numbers<[1], [0], [0], [1], [0, 0, 1, 1], [], []>} : vector<8x256xbf16>, vector<256x512xbf16>, vector<8x512xf32> -> vector<8x512xf32>
    %299 = arith.addf %298, %11 : vector<8x512xf32>
    %300 = math.tanh %299 : vector<8x512xf32>
    %301 = vector.extract_strided_slice %300 {offsets = [0, 0], sizes = [8, 128], strides = [1, 1]} : vector<8x512xf32> to vector<8x128xf32>
    %cst_101 = arith.constant 5.000000e-01 : f32
    %302 = vector.broadcast %cst_101 : f32 to vector<8x128xf32>
    %303 = arith.mulf %302, %301 : vector<8x128xf32>
    %cst_102 = arith.constant 5.000000e-01 : f32
    %304 = vector.broadcast %cst_102 : f32 to vector<8x128xf32>
    %305 = arith.addf %303, %304 : vector<8x128xf32>
    %306 = vector.extract_strided_slice %300 {offsets = [0, 128], sizes = [8, 128], strides = [1, 1]} : vector<8x512xf32> to vector<8x128xf32>
    %cst_103 = arith.constant 5.000000e-01 : f32
    %307 = vector.broadcast %cst_103 : f32 to vector<8x128xf32>
    %308 = arith.mulf %307, %306 : vector<8x128xf32>
    %cst_104 = arith.constant 5.000000e-01 : f32
    %309 = vector.broadcast %cst_104 : f32 to vector<8x128xf32>
    %310 = arith.addf %308, %309 : vector<8x128xf32>
    %311 = vector.extract_strided_slice %300 {offsets = [0, 256], sizes = [8, 128], strides = [1, 1]} : vector<8x512xf32> to vector<8x128xf32>
    %cst_105 = arith.constant 5.000000e-01 : f32
    %312 = vector.broadcast %cst_105 : f32 to vector<8x128xf32>
    %313 = arith.mulf %312, %311 : vector<8x128xf32>
    %cst_106 = arith.constant 5.000000e-01 : f32
    %314 = vector.broadcast %cst_106 : f32 to vector<8x128xf32>
    %315 = arith.addf %313, %314 : vector<8x128xf32>
    %316 = vector.extract_strided_slice %300 {offsets = [0, 384], sizes = [8, 128], strides = [1, 1]} : vector<8x512xf32> to vector<8x128xf32>
    %317 = arith.mulf %310, %241 : vector<8x128xf32>
    %318 = arith.mulf %305, %316 : vector<8x128xf32>
    %319 = arith.addf %317, %318 : vector<8x128xf32>
    %320 = math.tanh %319 : vector<8x128xf32>
    %321 = arith.mulf %315, %320 : vector<8x128xf32>
    %c40 = arith.constant 40 : index
    %c0_107 = arith.constant 0 : index
    %322 = vector.load %arg11[%c40, %c0_107] : memref<64x512xf32, #tpu.memory_space<vmem>>, vector<8x512xf32>
    %323 = arith.truncf %269 : vector<8x128xf32> to vector<8x128xbf16>
    %cst_108 = arith.constant dense<0.000000e+00> : vector<8x512xf32>
    %324 = tpu.matmul %323, %7, %cst_108 {dimension_numbers = #tpu.dot_dimension_numbers<[1], [0], [0], [1], [0, 0, 1, 1], [], []>} : vector<8x128xbf16>, vector<128x512xbf16>, vector<8x512xf32> -> vector<8x512xf32>
    %325 = arith.addf %322, %324 : vector<8x512xf32>
    %326 = math.tanh %325 : vector<8x512xf32>
    %327 = vector.extract_strided_slice %326 {offsets = [0, 0], sizes = [8, 128], strides = [1, 1]} : vector<8x512xf32> to vector<8x128xf32>
    %cst_109 = arith.constant 5.000000e-01 : f32
    %328 = vector.broadcast %cst_109 : f32 to vector<8x128xf32>
    %329 = arith.mulf %328, %327 : vector<8x128xf32>
    %cst_110 = arith.constant 5.000000e-01 : f32
    %330 = vector.broadcast %cst_110 : f32 to vector<8x128xf32>
    %331 = arith.addf %329, %330 : vector<8x128xf32>
    %332 = vector.extract_strided_slice %326 {offsets = [0, 128], sizes = [8, 128], strides = [1, 1]} : vector<8x512xf32> to vector<8x128xf32>
    %cst_111 = arith.constant 5.000000e-01 : f32
    %333 = vector.broadcast %cst_111 : f32 to vector<8x128xf32>
    %334 = arith.mulf %333, %332 : vector<8x128xf32>
    %cst_112 = arith.constant 5.000000e-01 : f32
    %335 = vector.broadcast %cst_112 : f32 to vector<8x128xf32>
    %336 = arith.addf %334, %335 : vector<8x128xf32>
    %337 = vector.extract_strided_slice %326 {offsets = [0, 256], sizes = [8, 128], strides = [1, 1]} : vector<8x512xf32> to vector<8x128xf32>
    %cst_113 = arith.constant 5.000000e-01 : f32
    %338 = vector.broadcast %cst_113 : f32 to vector<8x128xf32>
    %339 = arith.mulf %338, %337 : vector<8x128xf32>
    %cst_114 = arith.constant 5.000000e-01 : f32
    %340 = vector.broadcast %cst_114 : f32 to vector<8x128xf32>
    %341 = arith.addf %339, %340 : vector<8x128xf32>
    %342 = vector.extract_strided_slice %326 {offsets = [0, 384], sizes = [8, 128], strides = [1, 1]} : vector<8x512xf32> to vector<8x128xf32>
    %343 = arith.mulf %336, %267 : vector<8x128xf32>
    %344 = arith.mulf %331, %342 : vector<8x128xf32>
    %345 = arith.addf %343, %344 : vector<8x128xf32>
    %346 = math.tanh %345 : vector<8x128xf32>
    %347 = arith.mulf %341, %346 : vector<8x128xf32>
    %348 = tpu.concatenate %269, %295 in 1 : vector<8x128xf32>, vector<8x128xf32> -> vector<8x256xf32>
    %349 = arith.truncf %348 : vector<8x256xf32> to vector<8x256xbf16>
    %cst_115 = arith.constant dense<0.000000e+00> : vector<8x512xf32>
    %350 = tpu.matmul %349, %8, %cst_115 {dimension_numbers = #tpu.dot_dimension_numbers<[1], [0], [0], [1], [0, 0, 1, 1], [], []>} : vector<8x256xbf16>, vector<256x512xbf16>, vector<8x512xf32> -> vector<8x512xf32>
    %351 = arith.addf %350, %10 : vector<8x512xf32>
    %352 = math.tanh %351 : vector<8x512xf32>
    %353 = vector.extract_strided_slice %352 {offsets = [0, 0], sizes = [8, 128], strides = [1, 1]} : vector<8x512xf32> to vector<8x128xf32>
    %cst_116 = arith.constant 5.000000e-01 : f32
    %354 = vector.broadcast %cst_116 : f32 to vector<8x128xf32>
    %355 = arith.mulf %354, %353 : vector<8x128xf32>
    %cst_117 = arith.constant 5.000000e-01 : f32
    %356 = vector.broadcast %cst_117 : f32 to vector<8x128xf32>
    %357 = arith.addf %355, %356 : vector<8x128xf32>
    %358 = vector.extract_strided_slice %352 {offsets = [0, 128], sizes = [8, 128], strides = [1, 1]} : vector<8x512xf32> to vector<8x128xf32>
    %cst_118 = arith.constant 5.000000e-01 : f32
    %359 = vector.broadcast %cst_118 : f32 to vector<8x128xf32>
    %360 = arith.mulf %359, %358 : vector<8x128xf32>
    %cst_119 = arith.constant 5.000000e-01 : f32
    %361 = vector.broadcast %cst_119 : f32 to vector<8x128xf32>
    %362 = arith.addf %360, %361 : vector<8x128xf32>
    %363 = vector.extract_strided_slice %352 {offsets = [0, 256], sizes = [8, 128], strides = [1, 1]} : vector<8x512xf32> to vector<8x128xf32>
    %cst_120 = arith.constant 5.000000e-01 : f32
    %364 = vector.broadcast %cst_120 : f32 to vector<8x128xf32>
    %365 = arith.mulf %364, %363 : vector<8x128xf32>
    %cst_121 = arith.constant 5.000000e-01 : f32
    %366 = vector.broadcast %cst_121 : f32 to vector<8x128xf32>
    %367 = arith.addf %365, %366 : vector<8x128xf32>
    %368 = vector.extract_strided_slice %352 {offsets = [0, 384], sizes = [8, 128], strides = [1, 1]} : vector<8x512xf32> to vector<8x128xf32>
    %369 = arith.mulf %362, %293 : vector<8x128xf32>
    %370 = arith.mulf %357, %368 : vector<8x128xf32>
    %371 = arith.addf %369, %370 : vector<8x128xf32>
    %372 = math.tanh %371 : vector<8x128xf32>
    %373 = arith.mulf %367, %372 : vector<8x128xf32>
    %374 = tpu.concatenate %295, %321 in 1 : vector<8x128xf32>, vector<8x128xf32> -> vector<8x256xf32>
    %375 = arith.truncf %374 : vector<8x256xf32> to vector<8x256xbf16>
    %cst_122 = arith.constant dense<0.000000e+00> : vector<8x512xf32>
    %376 = tpu.matmul %375, %9, %cst_122 {dimension_numbers = #tpu.dot_dimension_numbers<[1], [0], [0], [1], [0, 0, 1, 1], [], []>} : vector<8x256xbf16>, vector<256x512xbf16>, vector<8x512xf32> -> vector<8x512xf32>
    %377 = arith.addf %376, %11 : vector<8x512xf32>
    %378 = math.tanh %377 : vector<8x512xf32>
    %379 = vector.extract_strided_slice %378 {offsets = [0, 0], sizes = [8, 128], strides = [1, 1]} : vector<8x512xf32> to vector<8x128xf32>
    %cst_123 = arith.constant 5.000000e-01 : f32
    %380 = vector.broadcast %cst_123 : f32 to vector<8x128xf32>
    %381 = arith.mulf %380, %379 : vector<8x128xf32>
    %cst_124 = arith.constant 5.000000e-01 : f32
    %382 = vector.broadcast %cst_124 : f32 to vector<8x128xf32>
    %383 = arith.addf %381, %382 : vector<8x128xf32>
    %384 = vector.extract_strided_slice %378 {offsets = [0, 128], sizes = [8, 128], strides = [1, 1]} : vector<8x512xf32> to vector<8x128xf32>
    %cst_125 = arith.constant 5.000000e-01 : f32
    %385 = vector.broadcast %cst_125 : f32 to vector<8x128xf32>
    %386 = arith.mulf %385, %384 : vector<8x128xf32>
    %cst_126 = arith.constant 5.000000e-01 : f32
    %387 = vector.broadcast %cst_126 : f32 to vector<8x128xf32>
    %388 = arith.addf %386, %387 : vector<8x128xf32>
    %389 = vector.extract_strided_slice %378 {offsets = [0, 256], sizes = [8, 128], strides = [1, 1]} : vector<8x512xf32> to vector<8x128xf32>
    %cst_127 = arith.constant 5.000000e-01 : f32
    %390 = vector.broadcast %cst_127 : f32 to vector<8x128xf32>
    %391 = arith.mulf %390, %389 : vector<8x128xf32>
    %cst_128 = arith.constant 5.000000e-01 : f32
    %392 = vector.broadcast %cst_128 : f32 to vector<8x128xf32>
    %393 = arith.addf %391, %392 : vector<8x128xf32>
    %394 = vector.extract_strided_slice %378 {offsets = [0, 384], sizes = [8, 128], strides = [1, 1]} : vector<8x512xf32> to vector<8x128xf32>
    %395 = arith.mulf %388, %319 : vector<8x128xf32>
    %396 = arith.mulf %383, %394 : vector<8x128xf32>
    %397 = arith.addf %395, %396 : vector<8x128xf32>
    %398 = math.tanh %397 : vector<8x128xf32>
    %399 = arith.mulf %393, %398 : vector<8x128xf32>
    %c48 = arith.constant 48 : index
    %c0_129 = arith.constant 0 : index
    %400 = vector.load %arg11[%c48, %c0_129] : memref<64x512xf32, #tpu.memory_space<vmem>>, vector<8x512xf32>
    %401 = arith.truncf %347 : vector<8x128xf32> to vector<8x128xbf16>
    %cst_130 = arith.constant dense<0.000000e+00> : vector<8x512xf32>
    %402 = tpu.matmul %401, %7, %cst_130 {dimension_numbers = #tpu.dot_dimension_numbers<[1], [0], [0], [1], [0, 0, 1, 1], [], []>} : vector<8x128xbf16>, vector<128x512xbf16>, vector<8x512xf32> -> vector<8x512xf32>
    %403 = arith.addf %400, %402 : vector<8x512xf32>
    %404 = math.tanh %403 : vector<8x512xf32>
    %405 = vector.extract_strided_slice %404 {offsets = [0, 0], sizes = [8, 128], strides = [1, 1]} : vector<8x512xf32> to vector<8x128xf32>
    %cst_131 = arith.constant 5.000000e-01 : f32
    %406 = vector.broadcast %cst_131 : f32 to vector<8x128xf32>
    %407 = arith.mulf %406, %405 : vector<8x128xf32>
    %cst_132 = arith.constant 5.000000e-01 : f32
    %408 = vector.broadcast %cst_132 : f32 to vector<8x128xf32>
    %409 = arith.addf %407, %408 : vector<8x128xf32>
    %410 = vector.extract_strided_slice %404 {offsets = [0, 128], sizes = [8, 128], strides = [1, 1]} : vector<8x512xf32> to vector<8x128xf32>
    %cst_133 = arith.constant 5.000000e-01 : f32
    %411 = vector.broadcast %cst_133 : f32 to vector<8x128xf32>
    %412 = arith.mulf %411, %410 : vector<8x128xf32>
    %cst_134 = arith.constant 5.000000e-01 : f32
    %413 = vector.broadcast %cst_134 : f32 to vector<8x128xf32>
    %414 = arith.addf %412, %413 : vector<8x128xf32>
    %415 = vector.extract_strided_slice %404 {offsets = [0, 256], sizes = [8, 128], strides = [1, 1]} : vector<8x512xf32> to vector<8x128xf32>
    %cst_135 = arith.constant 5.000000e-01 : f32
    %416 = vector.broadcast %cst_135 : f32 to vector<8x128xf32>
    %417 = arith.mulf %416, %415 : vector<8x128xf32>
    %cst_136 = arith.constant 5.000000e-01 : f32
    %418 = vector.broadcast %cst_136 : f32 to vector<8x128xf32>
    %419 = arith.addf %417, %418 : vector<8x128xf32>
    %420 = vector.extract_strided_slice %404 {offsets = [0, 384], sizes = [8, 128], strides = [1, 1]} : vector<8x512xf32> to vector<8x128xf32>
    %421 = arith.mulf %414, %345 : vector<8x128xf32>
    %422 = arith.mulf %409, %420 : vector<8x128xf32>
    %423 = arith.addf %421, %422 : vector<8x128xf32>
    %424 = math.tanh %423 : vector<8x128xf32>
    %425 = arith.mulf %419, %424 : vector<8x128xf32>
    %426 = tpu.concatenate %347, %373 in 1 : vector<8x128xf32>, vector<8x128xf32> -> vector<8x256xf32>
    %427 = arith.truncf %426 : vector<8x256xf32> to vector<8x256xbf16>
    %cst_137 = arith.constant dense<0.000000e+00> : vector<8x512xf32>
    %428 = tpu.matmul %427, %8, %cst_137 {dimension_numbers = #tpu.dot_dimension_numbers<[1], [0], [0], [1], [0, 0, 1, 1], [], []>} : vector<8x256xbf16>, vector<256x512xbf16>, vector<8x512xf32> -> vector<8x512xf32>
    %429 = arith.addf %428, %10 : vector<8x512xf32>
    %430 = math.tanh %429 : vector<8x512xf32>
    %431 = vector.extract_strided_slice %430 {offsets = [0, 0], sizes = [8, 128], strides = [1, 1]} : vector<8x512xf32> to vector<8x128xf32>
    %cst_138 = arith.constant 5.000000e-01 : f32
    %432 = vector.broadcast %cst_138 : f32 to vector<8x128xf32>
    %433 = arith.mulf %432, %431 : vector<8x128xf32>
    %cst_139 = arith.constant 5.000000e-01 : f32
    %434 = vector.broadcast %cst_139 : f32 to vector<8x128xf32>
    %435 = arith.addf %433, %434 : vector<8x128xf32>
    %436 = vector.extract_strided_slice %430 {offsets = [0, 128], sizes = [8, 128], strides = [1, 1]} : vector<8x512xf32> to vector<8x128xf32>
    %cst_140 = arith.constant 5.000000e-01 : f32
    %437 = vector.broadcast %cst_140 : f32 to vector<8x128xf32>
    %438 = arith.mulf %437, %436 : vector<8x128xf32>
    %cst_141 = arith.constant 5.000000e-01 : f32
    %439 = vector.broadcast %cst_141 : f32 to vector<8x128xf32>
    %440 = arith.addf %438, %439 : vector<8x128xf32>
    %441 = vector.extract_strided_slice %430 {offsets = [0, 256], sizes = [8, 128], strides = [1, 1]} : vector<8x512xf32> to vector<8x128xf32>
    %cst_142 = arith.constant 5.000000e-01 : f32
    %442 = vector.broadcast %cst_142 : f32 to vector<8x128xf32>
    %443 = arith.mulf %442, %441 : vector<8x128xf32>
    %cst_143 = arith.constant 5.000000e-01 : f32
    %444 = vector.broadcast %cst_143 : f32 to vector<8x128xf32>
    %445 = arith.addf %443, %444 : vector<8x128xf32>
    %446 = vector.extract_strided_slice %430 {offsets = [0, 384], sizes = [8, 128], strides = [1, 1]} : vector<8x512xf32> to vector<8x128xf32>
    %447 = arith.mulf %440, %371 : vector<8x128xf32>
    %448 = arith.mulf %435, %446 : vector<8x128xf32>
    %449 = arith.addf %447, %448 : vector<8x128xf32>
    %450 = math.tanh %449 : vector<8x128xf32>
    %451 = arith.mulf %445, %450 : vector<8x128xf32>
    %452 = tpu.concatenate %373, %399 in 1 : vector<8x128xf32>, vector<8x128xf32> -> vector<8x256xf32>
    %453 = arith.truncf %452 : vector<8x256xf32> to vector<8x256xbf16>
    %cst_144 = arith.constant dense<0.000000e+00> : vector<8x512xf32>
    %454 = tpu.matmul %453, %9, %cst_144 {dimension_numbers = #tpu.dot_dimension_numbers<[1], [0], [0], [1], [0, 0, 1, 1], [], []>} : vector<8x256xbf16>, vector<256x512xbf16>, vector<8x512xf32> -> vector<8x512xf32>
    %455 = arith.addf %454, %11 : vector<8x512xf32>
    %456 = math.tanh %455 : vector<8x512xf32>
    %457 = vector.extract_strided_slice %456 {offsets = [0, 0], sizes = [8, 128], strides = [1, 1]} : vector<8x512xf32> to vector<8x128xf32>
    %cst_145 = arith.constant 5.000000e-01 : f32
    %458 = vector.broadcast %cst_145 : f32 to vector<8x128xf32>
    %459 = arith.mulf %458, %457 : vector<8x128xf32>
    %cst_146 = arith.constant 5.000000e-01 : f32
    %460 = vector.broadcast %cst_146 : f32 to vector<8x128xf32>
    %461 = arith.addf %459, %460 : vector<8x128xf32>
    %462 = vector.extract_strided_slice %456 {offsets = [0, 128], sizes = [8, 128], strides = [1, 1]} : vector<8x512xf32> to vector<8x128xf32>
    %cst_147 = arith.constant 5.000000e-01 : f32
    %463 = vector.broadcast %cst_147 : f32 to vector<8x128xf32>
    %464 = arith.mulf %463, %462 : vector<8x128xf32>
    %cst_148 = arith.constant 5.000000e-01 : f32
    %465 = vector.broadcast %cst_148 : f32 to vector<8x128xf32>
    %466 = arith.addf %464, %465 : vector<8x128xf32>
    %467 = vector.extract_strided_slice %456 {offsets = [0, 256], sizes = [8, 128], strides = [1, 1]} : vector<8x512xf32> to vector<8x128xf32>
    %cst_149 = arith.constant 5.000000e-01 : f32
    %468 = vector.broadcast %cst_149 : f32 to vector<8x128xf32>
    %469 = arith.mulf %468, %467 : vector<8x128xf32>
    %cst_150 = arith.constant 5.000000e-01 : f32
    %470 = vector.broadcast %cst_150 : f32 to vector<8x128xf32>
    %471 = arith.addf %469, %470 : vector<8x128xf32>
    %472 = vector.extract_strided_slice %456 {offsets = [0, 384], sizes = [8, 128], strides = [1, 1]} : vector<8x512xf32> to vector<8x128xf32>
    %473 = arith.mulf %466, %397 : vector<8x128xf32>
    %474 = arith.mulf %461, %472 : vector<8x128xf32>
    %475 = arith.addf %473, %474 : vector<8x128xf32>
    %476 = math.tanh %475 : vector<8x128xf32>
    %477 = arith.mulf %471, %476 : vector<8x128xf32>
    %c56 = arith.constant 56 : index
    %c0_151 = arith.constant 0 : index
    %478 = vector.load %arg11[%c56, %c0_151] : memref<64x512xf32, #tpu.memory_space<vmem>>, vector<8x512xf32>
    %479 = arith.truncf %425 : vector<8x128xf32> to vector<8x128xbf16>
    %cst_152 = arith.constant dense<0.000000e+00> : vector<8x512xf32>
    %480 = tpu.matmul %479, %7, %cst_152 {dimension_numbers = #tpu.dot_dimension_numbers<[1], [0], [0], [1], [0, 0, 1, 1], [], []>} : vector<8x128xbf16>, vector<128x512xbf16>, vector<8x512xf32> -> vector<8x512xf32>
    %481 = arith.addf %478, %480 : vector<8x512xf32>
    %482 = math.tanh %481 : vector<8x512xf32>
    %483 = vector.extract_strided_slice %482 {offsets = [0, 0], sizes = [8, 128], strides = [1, 1]} : vector<8x512xf32> to vector<8x128xf32>
    %cst_153 = arith.constant 5.000000e-01 : f32
    %484 = vector.broadcast %cst_153 : f32 to vector<8x128xf32>
    %485 = arith.mulf %484, %483 : vector<8x128xf32>
    %cst_154 = arith.constant 5.000000e-01 : f32
    %486 = vector.broadcast %cst_154 : f32 to vector<8x128xf32>
    %487 = arith.addf %485, %486 : vector<8x128xf32>
    %488 = vector.extract_strided_slice %482 {offsets = [0, 128], sizes = [8, 128], strides = [1, 1]} : vector<8x512xf32> to vector<8x128xf32>
    %cst_155 = arith.constant 5.000000e-01 : f32
    %489 = vector.broadcast %cst_155 : f32 to vector<8x128xf32>
    %490 = arith.mulf %489, %488 : vector<8x128xf32>
    %cst_156 = arith.constant 5.000000e-01 : f32
    %491 = vector.broadcast %cst_156 : f32 to vector<8x128xf32>
    %492 = arith.addf %490, %491 : vector<8x128xf32>
    %493 = vector.extract_strided_slice %482 {offsets = [0, 256], sizes = [8, 128], strides = [1, 1]} : vector<8x512xf32> to vector<8x128xf32>
    %cst_157 = arith.constant 5.000000e-01 : f32
    %494 = vector.broadcast %cst_157 : f32 to vector<8x128xf32>
    %495 = arith.mulf %494, %493 : vector<8x128xf32>
    %cst_158 = arith.constant 5.000000e-01 : f32
    %496 = vector.broadcast %cst_158 : f32 to vector<8x128xf32>
    %497 = arith.addf %495, %496 : vector<8x128xf32>
    %498 = vector.extract_strided_slice %482 {offsets = [0, 384], sizes = [8, 128], strides = [1, 1]} : vector<8x512xf32> to vector<8x128xf32>
    %499 = arith.mulf %492, %423 : vector<8x128xf32>
    %500 = arith.mulf %487, %498 : vector<8x128xf32>
    %501 = arith.addf %499, %500 : vector<8x128xf32>
    %502 = math.tanh %501 : vector<8x128xf32>
    %503 = arith.mulf %497, %502 : vector<8x128xf32>
    %504 = tpu.concatenate %425, %451 in 1 : vector<8x128xf32>, vector<8x128xf32> -> vector<8x256xf32>
    %505 = arith.truncf %504 : vector<8x256xf32> to vector<8x256xbf16>
    %cst_159 = arith.constant dense<0.000000e+00> : vector<8x512xf32>
    %506 = tpu.matmul %505, %8, %cst_159 {dimension_numbers = #tpu.dot_dimension_numbers<[1], [0], [0], [1], [0, 0, 1, 1], [], []>} : vector<8x256xbf16>, vector<256x512xbf16>, vector<8x512xf32> -> vector<8x512xf32>
    %507 = arith.addf %506, %10 : vector<8x512xf32>
    %508 = math.tanh %507 : vector<8x512xf32>
    %509 = vector.extract_strided_slice %508 {offsets = [0, 0], sizes = [8, 128], strides = [1, 1]} : vector<8x512xf32> to vector<8x128xf32>
    %cst_160 = arith.constant 5.000000e-01 : f32
    %510 = vector.broadcast %cst_160 : f32 to vector<8x128xf32>
    %511 = arith.mulf %510, %509 : vector<8x128xf32>
    %cst_161 = arith.constant 5.000000e-01 : f32
    %512 = vector.broadcast %cst_161 : f32 to vector<8x128xf32>
    %513 = arith.addf %511, %512 : vector<8x128xf32>
    %514 = vector.extract_strided_slice %508 {offsets = [0, 128], sizes = [8, 128], strides = [1, 1]} : vector<8x512xf32> to vector<8x128xf32>
    %cst_162 = arith.constant 5.000000e-01 : f32
    %515 = vector.broadcast %cst_162 : f32 to vector<8x128xf32>
    %516 = arith.mulf %515, %514 : vector<8x128xf32>
    %cst_163 = arith.constant 5.000000e-01 : f32
    %517 = vector.broadcast %cst_163 : f32 to vector<8x128xf32>
    %518 = arith.addf %516, %517 : vector<8x128xf32>
    %519 = vector.extract_strided_slice %508 {offsets = [0, 256], sizes = [8, 128], strides = [1, 1]} : vector<8x512xf32> to vector<8x128xf32>
    %cst_164 = arith.constant 5.000000e-01 : f32
    %520 = vector.broadcast %cst_164 : f32 to vector<8x128xf32>
    %521 = arith.mulf %520, %519 : vector<8x128xf32>
    %cst_165 = arith.constant 5.000000e-01 : f32
    %522 = vector.broadcast %cst_165 : f32 to vector<8x128xf32>
    %523 = arith.addf %521, %522 : vector<8x128xf32>
    %524 = vector.extract_strided_slice %508 {offsets = [0, 384], sizes = [8, 128], strides = [1, 1]} : vector<8x512xf32> to vector<8x128xf32>
    %525 = arith.mulf %518, %449 : vector<8x128xf32>
    %526 = arith.mulf %513, %524 : vector<8x128xf32>
    %527 = arith.addf %525, %526 : vector<8x128xf32>
    %528 = math.tanh %527 : vector<8x128xf32>
    %529 = arith.mulf %523, %528 : vector<8x128xf32>
    %530 = tpu.concatenate %451, %477 in 1 : vector<8x128xf32>, vector<8x128xf32> -> vector<8x256xf32>
    %531 = arith.truncf %530 : vector<8x256xf32> to vector<8x256xbf16>
    %cst_166 = arith.constant dense<0.000000e+00> : vector<8x512xf32>
    %532 = tpu.matmul %531, %9, %cst_166 {dimension_numbers = #tpu.dot_dimension_numbers<[1], [0], [0], [1], [0, 0, 1, 1], [], []>} : vector<8x256xbf16>, vector<256x512xbf16>, vector<8x512xf32> -> vector<8x512xf32>
    %533 = arith.addf %532, %11 : vector<8x512xf32>
    %534 = math.tanh %533 : vector<8x512xf32>
    %535 = vector.extract_strided_slice %534 {offsets = [0, 0], sizes = [8, 128], strides = [1, 1]} : vector<8x512xf32> to vector<8x128xf32>
    %cst_167 = arith.constant 5.000000e-01 : f32
    %536 = vector.broadcast %cst_167 : f32 to vector<8x128xf32>
    %537 = arith.mulf %536, %535 : vector<8x128xf32>
    %cst_168 = arith.constant 5.000000e-01 : f32
    %538 = vector.broadcast %cst_168 : f32 to vector<8x128xf32>
    %539 = arith.addf %537, %538 : vector<8x128xf32>
    %540 = vector.extract_strided_slice %534 {offsets = [0, 128], sizes = [8, 128], strides = [1, 1]} : vector<8x512xf32> to vector<8x128xf32>
    %cst_169 = arith.constant 5.000000e-01 : f32
    %541 = vector.broadcast %cst_169 : f32 to vector<8x128xf32>
    %542 = arith.mulf %541, %540 : vector<8x128xf32>
    %cst_170 = arith.constant 5.000000e-01 : f32
    %543 = vector.broadcast %cst_170 : f32 to vector<8x128xf32>
    %544 = arith.addf %542, %543 : vector<8x128xf32>
    %545 = vector.extract_strided_slice %534 {offsets = [0, 256], sizes = [8, 128], strides = [1, 1]} : vector<8x512xf32> to vector<8x128xf32>
    %cst_171 = arith.constant 5.000000e-01 : f32
    %546 = vector.broadcast %cst_171 : f32 to vector<8x128xf32>
    %547 = arith.mulf %546, %545 : vector<8x128xf32>
    %cst_172 = arith.constant 5.000000e-01 : f32
    %548 = vector.broadcast %cst_172 : f32 to vector<8x128xf32>
    %549 = arith.addf %547, %548 : vector<8x128xf32>
    %550 = vector.extract_strided_slice %534 {offsets = [0, 384], sizes = [8, 128], strides = [1, 1]} : vector<8x512xf32> to vector<8x128xf32>
    %551 = arith.mulf %544, %475 : vector<8x128xf32>
    %552 = arith.mulf %539, %550 : vector<8x128xf32>
    %553 = arith.addf %551, %552 : vector<8x128xf32>
    %554 = math.tanh %553 : vector<8x128xf32>
    %555 = arith.mulf %549, %554 : vector<8x128xf32>
    %556 = tpu.concatenate %503, %529 in 1 : vector<8x128xf32>, vector<8x128xf32> -> vector<8x256xf32>
    %557 = arith.truncf %556 : vector<8x256xf32> to vector<8x256xbf16>
    %cst_173 = arith.constant dense<0.000000e+00> : vector<8x512xf32>
    %558 = tpu.matmul %557, %8, %cst_173 {dimension_numbers = #tpu.dot_dimension_numbers<[1], [0], [0], [1], [0, 0, 1, 1], [], []>} : vector<8x256xbf16>, vector<256x512xbf16>, vector<8x512xf32> -> vector<8x512xf32>
    %559 = arith.addf %558, %10 : vector<8x512xf32>
    %560 = math.tanh %559 : vector<8x512xf32>
    %561 = vector.extract_strided_slice %560 {offsets = [0, 0], sizes = [8, 128], strides = [1, 1]} : vector<8x512xf32> to vector<8x128xf32>
    %cst_174 = arith.constant 5.000000e-01 : f32
    %562 = vector.broadcast %cst_174 : f32 to vector<8x128xf32>
    %563 = arith.mulf %562, %561 : vector<8x128xf32>
    %cst_175 = arith.constant 5.000000e-01 : f32
    %564 = vector.broadcast %cst_175 : f32 to vector<8x128xf32>
    %565 = arith.addf %563, %564 : vector<8x128xf32>
    %566 = vector.extract_strided_slice %560 {offsets = [0, 128], sizes = [8, 128], strides = [1, 1]} : vector<8x512xf32> to vector<8x128xf32>
    %cst_176 = arith.constant 5.000000e-01 : f32
    %567 = vector.broadcast %cst_176 : f32 to vector<8x128xf32>
    %568 = arith.mulf %567, %566 : vector<8x128xf32>
    %cst_177 = arith.constant 5.000000e-01 : f32
    %569 = vector.broadcast %cst_177 : f32 to vector<8x128xf32>
    %570 = arith.addf %568, %569 : vector<8x128xf32>
    %571 = vector.extract_strided_slice %560 {offsets = [0, 256], sizes = [8, 128], strides = [1, 1]} : vector<8x512xf32> to vector<8x128xf32>
    %cst_178 = arith.constant 5.000000e-01 : f32
    %572 = vector.broadcast %cst_178 : f32 to vector<8x128xf32>
    %573 = arith.mulf %572, %571 : vector<8x128xf32>
    %cst_179 = arith.constant 5.000000e-01 : f32
    %574 = vector.broadcast %cst_179 : f32 to vector<8x128xf32>
    %575 = arith.addf %573, %574 : vector<8x128xf32>
    %576 = vector.extract_strided_slice %560 {offsets = [0, 384], sizes = [8, 128], strides = [1, 1]} : vector<8x512xf32> to vector<8x128xf32>
    %577 = arith.mulf %570, %527 : vector<8x128xf32>
    %578 = arith.mulf %565, %576 : vector<8x128xf32>
    %579 = arith.addf %577, %578 : vector<8x128xf32>
    %580 = math.tanh %579 : vector<8x128xf32>
    %581 = arith.mulf %575, %580 : vector<8x128xf32>
    %582 = tpu.concatenate %529, %555 in 1 : vector<8x128xf32>, vector<8x128xf32> -> vector<8x256xf32>
    %583 = arith.truncf %582 : vector<8x256xf32> to vector<8x256xbf16>
    %cst_180 = arith.constant dense<0.000000e+00> : vector<8x512xf32>
    %584 = tpu.matmul %583, %9, %cst_180 {dimension_numbers = #tpu.dot_dimension_numbers<[1], [0], [0], [1], [0, 0, 1, 1], [], []>} : vector<8x256xbf16>, vector<256x512xbf16>, vector<8x512xf32> -> vector<8x512xf32>
    %585 = arith.addf %584, %11 : vector<8x512xf32>
    %586 = math.tanh %585 : vector<8x512xf32>
    %587 = vector.extract_strided_slice %586 {offsets = [0, 0], sizes = [8, 128], strides = [1, 1]} : vector<8x512xf32> to vector<8x128xf32>
    %cst_181 = arith.constant 5.000000e-01 : f32
    %588 = vector.broadcast %cst_181 : f32 to vector<8x128xf32>
    %589 = arith.mulf %588, %587 : vector<8x128xf32>
    %cst_182 = arith.constant 5.000000e-01 : f32
    %590 = vector.broadcast %cst_182 : f32 to vector<8x128xf32>
    %591 = arith.addf %589, %590 : vector<8x128xf32>
    %592 = vector.extract_strided_slice %586 {offsets = [0, 128], sizes = [8, 128], strides = [1, 1]} : vector<8x512xf32> to vector<8x128xf32>
    %cst_183 = arith.constant 5.000000e-01 : f32
    %593 = vector.broadcast %cst_183 : f32 to vector<8x128xf32>
    %594 = arith.mulf %593, %592 : vector<8x128xf32>
    %cst_184 = arith.constant 5.000000e-01 : f32
    %595 = vector.broadcast %cst_184 : f32 to vector<8x128xf32>
    %596 = arith.addf %594, %595 : vector<8x128xf32>
    %597 = vector.extract_strided_slice %586 {offsets = [0, 256], sizes = [8, 128], strides = [1, 1]} : vector<8x512xf32> to vector<8x128xf32>
    %cst_185 = arith.constant 5.000000e-01 : f32
    %598 = vector.broadcast %cst_185 : f32 to vector<8x128xf32>
    %599 = arith.mulf %598, %597 : vector<8x128xf32>
    %cst_186 = arith.constant 5.000000e-01 : f32
    %600 = vector.broadcast %cst_186 : f32 to vector<8x128xf32>
    %601 = arith.addf %599, %600 : vector<8x128xf32>
    %602 = vector.extract_strided_slice %586 {offsets = [0, 384], sizes = [8, 128], strides = [1, 1]} : vector<8x512xf32> to vector<8x128xf32>
    %603 = arith.mulf %596, %553 : vector<8x128xf32>
    %604 = arith.mulf %591, %602 : vector<8x128xf32>
    %605 = arith.addf %603, %604 : vector<8x128xf32>
    %606 = math.tanh %605 : vector<8x128xf32>
    %607 = arith.mulf %601, %606 : vector<8x128xf32>
    %608 = tpu.concatenate %581, %607 in 1 : vector<8x128xf32>, vector<8x128xf32> -> vector<8x256xf32>
    %609 = arith.truncf %608 : vector<8x256xf32> to vector<8x256xbf16>
    %cst_187 = arith.constant dense<0.000000e+00> : vector<8x512xf32>
    %610 = tpu.matmul %609, %9, %cst_187 {dimension_numbers = #tpu.dot_dimension_numbers<[1], [0], [0], [1], [0, 0, 1, 1], [], []>} : vector<8x256xbf16>, vector<256x512xbf16>, vector<8x512xf32> -> vector<8x512xf32>
    %611 = arith.addf %610, %11 : vector<8x512xf32>
    %612 = math.tanh %611 : vector<8x512xf32>
    %613 = vector.extract_strided_slice %612 {offsets = [0, 0], sizes = [8, 128], strides = [1, 1]} : vector<8x512xf32> to vector<8x128xf32>
    %cst_188 = arith.constant 5.000000e-01 : f32
    %614 = vector.broadcast %cst_188 : f32 to vector<8x128xf32>
    %615 = arith.mulf %614, %613 : vector<8x128xf32>
    %cst_189 = arith.constant 5.000000e-01 : f32
    %616 = vector.broadcast %cst_189 : f32 to vector<8x128xf32>
    %617 = arith.addf %615, %616 : vector<8x128xf32>
    %618 = vector.extract_strided_slice %612 {offsets = [0, 128], sizes = [8, 128], strides = [1, 1]} : vector<8x512xf32> to vector<8x128xf32>
    %cst_190 = arith.constant 5.000000e-01 : f32
    %619 = vector.broadcast %cst_190 : f32 to vector<8x128xf32>
    %620 = arith.mulf %619, %618 : vector<8x128xf32>
    %cst_191 = arith.constant 5.000000e-01 : f32
    %621 = vector.broadcast %cst_191 : f32 to vector<8x128xf32>
    %622 = arith.addf %620, %621 : vector<8x128xf32>
    %623 = vector.extract_strided_slice %612 {offsets = [0, 256], sizes = [8, 128], strides = [1, 1]} : vector<8x512xf32> to vector<8x128xf32>
    %cst_192 = arith.constant 5.000000e-01 : f32
    %624 = vector.broadcast %cst_192 : f32 to vector<8x128xf32>
    %625 = arith.mulf %624, %623 : vector<8x128xf32>
    %cst_193 = arith.constant 5.000000e-01 : f32
    %626 = vector.broadcast %cst_193 : f32 to vector<8x128xf32>
    %627 = arith.addf %625, %626 : vector<8x128xf32>
    %628 = vector.extract_strided_slice %612 {offsets = [0, 384], sizes = [8, 128], strides = [1, 1]} : vector<8x512xf32> to vector<8x128xf32>
    %629 = arith.mulf %622, %605 : vector<8x128xf32>
    %630 = arith.mulf %617, %628 : vector<8x128xf32>
    %631 = arith.addf %629, %630 : vector<8x128xf32>
    %632 = math.tanh %631 : vector<8x128xf32>
    %633 = arith.mulf %627, %632 : vector<8x128xf32>
    %c0_194 = arith.constant 0 : index
    %c0_195 = arith.constant 0 : index
    %634 = vector.load %arg8[%c0_194, %c0_195] : memref<128x128xf32, #tpu.memory_space<vmem>>, vector<128x128xf32>
    %cst_196 = arith.constant dense<0.000000e+00> : vector<8x128xf32>
    %635 = tpu.matmul %633, %634, %cst_196 {dimension_numbers = #tpu.dot_dimension_numbers<[1], [0], [0], [1], [0, 0, 1, 1], [], []>} : vector<8x128xf32>, vector<128x128xf32>, vector<8x128xf32> -> vector<8x128xf32>
    %c0_197 = arith.constant 0 : index
    %c0_198 = arith.constant 0 : index
    %636 = vector.load %arg9[%c0_197, %c0_198] : memref<1x128xf32, #tpu.memory_space<vmem>>, vector<1x128xf32>
    %637 = vector.broadcast %636 : vector<1x128xf32> to vector<8x128xf32>
    %638 = arith.addf %635, %637 : vector<8x128xf32>
    %c0_199 = arith.constant 0 : index
    %c0_200 = arith.constant 0 : index
    %639 = vector.load %arg10[%c0_199, %c0_200] : memref<8x128xf32, #tpu.memory_space<vmem>>, vector<8x128xf32>
    tpu.vector_store %arg10[%c0_199, %c0_200], %638 {strides = array<i32>} : memref<8x128xf32, #tpu.memory_space<vmem>>, vector<8x128xf32>,
    return
  }
}

</mosaic_0001>

<bundles_post_ra>
// kernel: stock_predictor_forward.1
= control target key start
LH: loop header
LB: loop body
LE: loop exit
PB: predicated region body
PF: predicated region fallthrough
CT: control target
= control target key end

     0   :  { %v10050_v2 = vmov 0.0   ;;  %vm70_vm0 = vcmask 64512   ;;  %v10053_v47 = vmov 0   ;;  %v50_v48 = vlaneseq  ;;  %s10039_s1 = inlined_call_operand.vmem [shape: f32[8,512], index: 1, kind: input, shape index: {}]   ;;  %s10040_s0 = inlined_call_operand.vmem [shape: f32[64,8], index: 0, kind: input, shape index: {}]   ;;  %s10041_s2 = inlined_call_operand.vmem [shape: bf16[128,512], index: 2, kind: input, shape index: {}]   ;;  %s10042_s4 = inlined_call_operand.vmem [shape: bf16[256,512], index: 4, kind: input, shape index: {}]   ;;  %s10043_s3 = inlined_call_operand.vmem [shape: f32[1,512], index: 3, kind: input, shape index: {}]   ;;  %s10044_s6 = inlined_call_operand.vmem [shape: bf16[256,512], index: 6, kind: input, shape index: {}]   ;;  %s10045_s5 = inlined_call_operand.vmem [shape: f32[8,512], index: 5, kind: input, shape index: {}]   ;;  %s10046_s7 = inlined_call_operand.vmem [shape: f32[8,512], index: 7, kind: input, shape index: {}]   ;;  %s10047_s8 = inlined_call_operand.vmem [shape: f32[128,128], index: 8, kind: input, shape index: {}]   ;;  %s10048_s9 = inlined_call_operand.vmem [shape: f32[1,128], index: 9, kind: input, shape index: {}]   ;;  %s10049_s10 = inlined_call_operand.vmem [shape: f32[8,128], index: 10, kind: output, shape index: {}]  }
   0x1   :  { %v45_v0 = vld [vmem:[%s10039_s1 + $0x8] sm:$0xff]  ;;  %v44_v1 = vld [vmem:[%s10039_s1] sm:$0xff]  ;;  %159 = vmatprep.mubr.f32.mxu0 %v10050_v2  ;;  %272 = vmatprep.mubr.f32.mxu1 %v10050_v2  ;;  %v47_v4 = vld [vmem:[%s10039_s1 + $0x18] sm:$0xff]  ;;  %vm4989_vm1 = vmmov 0  }
   0x2   :  { %v36_v3 = vld [vmem:[%s10040_s0] sm:$0xff]  ;;  %95 = vmatprep.subr.mxu0 %v45_v0  ;;  %v46_v5 = vld [vmem:[%s10039_s1 + $0x10] sm:$0xff]  ;;  %208 = vmatprep.subr.mxu1 %v47_v4  ;;  %v5074_v7 = vld [vmem:[%s10041_s2 + $0xc] ss:$16 sps:$4 sm:$0xff]   ;;  %v51_v49 = vshrl.u32 %v50_v48, 7 }
   0x3   :  { %96 = vmatpush1.msra.mxu0 %v44_v1  ;;  %209 = vmatpush1.msra.mxu1 %v46_v5  ;;  %v5069_v6 = vld [vmem:[%s10041_s2 + $0x4] ss:$16 sps:$4 sm:$0xff]   ;;  %v5080_v8 = vld [vmem:[%s10041_s2] ss:$16 sps:$4 sm:$0xff]   ;;  %v5085_v9 = vld [vmem:[%s10041_s2 + $0x8] ss:$16 sps:$4 sm:$0xff]  }
   0x4   :  { %3749 = vmatmul.mubr.msk.f32.vlgmr.msra.gmra.mrb[0].mxu0 %vm70_vm0, %v36_v3  ;;  %3757 = vmatmul.mubr.msk.f32.vlgmr.msra.gmra.mrb[0].mxu1 %vm70_vm0, %v36_v3  ;;  %v5093_v10 = vld [vmem:[%s10041_s2 + $0x24] ss:$16 sps:$4 sm:$0xff]   ;;  %v5098_v11 = vld [vmem:[%s10041_s2 + $0x2c] ss:$16 sps:$4 sm:$0xff]   ;;  %v5106_v13 = vld [vmem:[%s10041_s2 + $0x20] ss:$16 sps:$4 sm:$0xff]  }
   0x5   :  { %165 = vmatprep.mubr.f32.mxu0 %v10050_v2  ;;  %278 = vmatprep.mubr.f32.mxu1 %v10050_v2  ;;  %v37_v12 = vld [vmem:[%s10040_s0 + $0x8] sm:$0xff]  ;;  %v5122_v15 = vld [vmem:[%s10041_s2 + $0x44] ss:$16 sps:$4 sm:$0xff]   ;;  %v5137_v18 = vld [vmem:[%s10041_s2 + $0x40] ss:$16 sps:$4 sm:$0xff]   ;;  %v52_v50 = vsub.s32 0, %v51_v49 }
   0x6   :  { %705 = vmatprep.subr.bf16.mxu0 %v5069_v6  ;;  %746 = vmatprep.subr.bf16.mxu1 %v5074_v7  ;;  %v5111_v14 = vld [vmem:[%s10041_s2 + $0x28] ss:$16 sps:$4 sm:$0xff]   ;;  %v5127_v16 = vld [vmem:[%s10041_s2 + $0x4c] ss:$16 sps:$4 sm:$0xff]   ;;  %v38_v17 = vld [vmem:[%s10040_s0 + $0x10] sm:$0xff]  ;;  %v56_v52 = vsub.s32 1, %v51_v49 }
   0x7   :  { %706 = vmatpush1.bf16.msra.mxu0 %v5080_v8  ;;  %747 = vmatpush1.bf16.msra.mxu1 %v5085_v9  ;;  %v5142_v19 = vld [vmem:[%s10041_s2 + $0x48] ss:$16 sps:$4 sm:$0xff]   ;;  %v5153_v20 = vld [vmem:[%s10041_s2 + $0x64] ss:$16 sps:$4 sm:$0xff]   ;;  %v5158_v21 = vld [vmem:[%s10041_s2 + $0x6c] ss:$16 sps:$4 sm:$0xff]  }
   0x8   :  { %3750 = vmatmul.mubr.msk.f32.gmra.mrb[2].mxu0 %vm70_vm0, %v37_v12  ;;  %707 = vmatprep.subr.bf16.mxu0 %v5093_v10  ;;  %v39_v22 = vld [vmem:[%s10040_s0 + $0x18] sm:$0xff]  ;;  %v5168_v23 = vld [vmem:[%s10041_s2 + $0x60] ss:$16 sps:$4 sm:$0xff]   ;;  %v5184_v25 = vld [vmem:[%s10041_s2 + $0x84] ss:$16 sps:$4 sm:$0xff]   ;;  %v64_v53 = vsub.s32 3, %v51_v49 }
   0x9   :  { %748 = vmatprep.subr.bf16.mxu1 %v5098_v11  ;;  %3758 = vmatmul.mubr.msk.f32.gmra.mrb[2].mxu1 %vm70_vm0, %v37_v12  ;;  %v5173_v24 = vld [vmem:[%s10041_s2 + $0x68] ss:$16 sps:$4 sm:$0xff]   ;;  %v5189_v26 = vld [vmem:[%s10041_s2 + $0x8c] ss:$16 sps:$4 sm:$0xff]   ;;  %v40_v27 = vld [vmem:[%s10040_s0 + $0x20] sm:$0xff]  ;;  %v60_v63 = vsub.s32 2, %v51_v49 }
   0xa   :  { %171 = vmatprep.mubr.f32.mxu0 %v10050_v2  ;;  %284 = vmatprep.mubr.f32.mxu1 %v10050_v2  ;;  %v5199_v28 = vld [vmem:[%s10041_s2 + $0x80] ss:$16 sps:$4 sm:$0xff]   ;;  %v5204_v29 = vld [vmem:[%s10041_s2 + $0x88] ss:$16 sps:$4 sm:$0xff]   ;;  %v5218_v31 = vld [vmem:[%s10041_s2 + $0xa4] ss:$16 sps:$4 sm:$0xff]  }
   0xb   :  { %708 = vmatpush1.bf16.msra.mxu0 %v5106_v13  ;;  %749 = vmatpush1.bf16.msra.mxu1 %v5111_v14  ;;  %v41_v30 = vld [vmem:[%s10040_s0 + $0x28] sm:$0xff]  ;;  %v5230_v33 = vld [vmem:[%s10041_s2 + $0xa0] ss:$16 sps:$4 sm:$0xff]   ;;  %v5242_v35 = vld [vmem:[%s10041_s2 + $0xc4] ss:$16 sps:$4 sm:$0xff]  }
   0xc   :  { %3751 = vmatmul.mubr.msk.f32.gmra.mrb[4].mxu0 %vm70_vm0, %v38_v17  ;;  %709 = vmatprep.subr.bf16.mxu0 %v5122_v15  ;;  %v5223_v32 = vld [vmem:[%s10041_s2 + $0xac] ss:$16 sps:$4 sm:$0xff]   ;;  %v5235_v34 = vld [vmem:[%s10041_s2 + $0xa8] ss:$16 sps:$4 sm:$0xff]   ;;  %v42_v36 = vld [vmem:[%s10040_s0 + $0x30] sm:$0xff] }
   0xd   :  { %750 = vmatprep.subr.bf16.mxu1 %v5127_v16  ;;  %3759 = vmatmul.mubr.msk.f32.gmra.mrb[4].mxu1 %vm70_vm0, %v38_v17  ;;  %v5252_v37 = vld [vmem:[%s10041_s2 + $0xcc] ss:$16 sps:$4 sm:$0xff]   ;;  %v5259_v38 = vld [vmem:[%s10041_s2 + $0xc0] ss:$16 sps:$4 sm:$0xff]   ;;  %v5264_v39 = vld [vmem:[%s10041_s2 + $0xc8] ss:$16 sps:$4 sm:$0xff]  }
   0xe   :  { %177 = vmatprep.mubr.f32.mxu0 %v10050_v2  ;;  %290 = vmatprep.mubr.f32.mxu1 %v10050_v2  ;;  %v5269_v40 = vld [vmem:[%s10041_s2 + $0xe4] ss:$16 sps:$4 sm:$0xff]   ;;  %v43_v41 = vld [vmem:[%s10040_s0 + $0x38] sm:$0xff]  ;;  %v5286_v43 = vld [vmem:[%s10041_s2 + $0xe0] ss:$16 sps:$4 sm:$0xff]  }
   0xf   :  { %710 = vmatpush1.bf16.msra.mxu0 %v5137_v18  ;;  %751 = vmatpush1.bf16.msra.mxu1 %v5142_v19  ;;  %v5279_v42 = vld [vmem:[%s10041_s2 + $0xec] ss:$16 sps:$4 sm:$0xff]   ;;  %v5291_v44 = vld [vmem:[%s10041_s2 + $0xe8] ss:$16 sps:$4 sm:$0xff]   ;;  %v5300_v45 = vld [vmem:[%s10042_s4 + $0x4] ss:$16 sps:$4 sm:$0xff]  }
  0x10   :  { %3752 = vmatmul.mubr.msk.f32.gmra.mrb[6].mxu0 %vm70_vm0, %v39_v22  ;;  %711 = vmatprep.subr.bf16.mxu0 %v5153_v20  ;;  %v5305_v46 = vld [vmem:[%s10042_s4 + $0xc] ss:$16 sps:$4 sm:$0xff]   ;;  %v48_v51 = vld [vmem:[%s10043_s3] sm:$0xf] }
  0x11   :  { %752 = vmatprep.subr.bf16.mxu1 %v5158_v21  ;;  %3760 = vmatmul.mubr.msk.f32.gmra.mrb[6].mxu1 %vm70_vm0, %v39_v22  ;;  %v5322_v54 = vrot.slane %v48_v51, %v52_v50  ;;  %v5324_v55 = vrot.slane %v48_v51, %v56_v52  ;;  %v5326_v56 = vrot.slane %v48_v51, %v64_v53 }
  0x12   :  { %183 = vmatprep.mubr.f32.mxu0 %v10050_v2  ;;  %296 = vmatprep.mubr.f32.mxu1 %v10050_v2  ;;  %v5331_v1 = vrot.slane %v48_v51, %v60_v63  ;;  %v5371_v63 = vld [vmem:[%s10042_s4 + $0x28] ss:$16 sps:$4 sm:$0xff]  }
  0x13   :  { %712 = vmatpush1.bf16.msra.mxu0 %v5168_v23  ;;  %753 = vmatpush1.bf16.msra.mxu1 %v5173_v24  ;;  %10421 = vst [vmem:[#allocation3_spill] sm:$0xff] %v5322_v54  ;;  %10422 = vst [vmem:[#allocation4_spill] sm:$0xff] %v5324_v55 }
  0x14   :  { %3753 = vmatmul.mubr.msk.f32.gmra.mrb[8].mxu0 %vm70_vm0, %v40_v27  ;;  %713 = vmatprep.subr.bf16.mxu0 %v5184_v25  ;;  %10423 = vst [vmem:[#allocation5_spill] sm:$0xff] %v5326_v56  ;;  %10424 = vst [vmem:[#allocation6_spill] sm:$0xff] %v5331_v1 }
  0x15   :  { %754 = vmatprep.subr.bf16.mxu1 %v5189_v26  ;;  %3761 = vmatmul.mubr.msk.f32.gmra.mrb[8].mxu1 %vm70_vm0, %v40_v27 }
  0x16   :  { %189 = vmatprep.mubr.f32.mxu0 %v10050_v2  ;;  %302 = vmatprep.mubr.f32.mxu1 %v10050_v2 }
  0x17   :  { %714 = vmatpush1.bf16.msra.mxu0 %v5199_v28  ;;  %755 = vmatpush1.bf16.msra.mxu1 %v5204_v29 }
  0x18   :  { %3754 = vmatmul.mubr.msk.f32.gmra.mrb[10].mxu0 %vm70_vm0, %v41_v30  ;;  %715 = vmatprep.subr.bf16.mxu0 %v5218_v31 }
  0x19   :  { %756 = vmatprep.subr.bf16.mxu1 %v5223_v32  ;;  %3762 = vmatmul.mubr.msk.f32.gmra.mrb[10].mxu1 %vm70_vm0, %v41_v30 }
  0x1a   :  { %195 = vmatprep.mubr.f32.mxu0 %v10050_v2  ;;  %308 = vmatprep.mubr.f32.mxu1 %v10050_v2 }
  0x1b   :  { %716 = vmatpush1.bf16.msra.mxu0 %v5230_v33  ;;  %757 = vmatpush1.bf16.msra.mxu1 %v5235_v34 }
  0x1c   :  { %3755 = vmatmul.mubr.msk.f32.gmra.mrb[12].mxu0 %vm70_vm0, %v42_v36  ;;  %717 = vmatprep.subr.bf16.mxu0 %v5242_v35 }
  0x1d   :  { %758 = vmatprep.subr.bf16.mxu1 %v5252_v37  ;;  %3763 = vmatmul.mubr.msk.f32.gmra.mrb[12].mxu1 %vm70_vm0, %v42_v36 }
  0x1e   :  { %201 = vmatprep.mubr.f32.mxu0 %v10050_v2  ;;  %314 = vmatprep.mubr.f32.mxu1 %v10050_v2  ;;  %v5469_v2 = vld [vmem:[%s10042_s4 + $0xa8] ss:$16 sps:$4 sm:$0xff]  }
  0x1f   :  { %718 = vmatpush1.bf16.msra.mxu0 %v5259_v38  ;;  %759 = vmatpush1.bf16.msra.mxu1 %v5264_v39  ;;  %10435 = vst [vmem:[#allocation17_spill] sm:$0xff] %v5469_v2 }
  0x20   :  { %3756 = vmatmul.mubr.msk.f32.gmra.mrb[14].mxu0 %vm70_vm0, %v43_v41  ;;  %719 = vmatprep.subr.bf16.mxu0 %v5269_v40 }
  0x21   :  { %760 = vmatprep.subr.bf16.mxu1 %v5279_v42  ;;  %3764 = vmatmul.mubr.msk.f32.gmra.mrb[14].mxu1 %vm70_vm0, %v43_v41 }
  0x22   :  { %737 = vmatprep.mubr.bf16.mxu0 %v10053_v47  ;;  %778 = vmatprep.mubr.bf16.mxu1 %v10053_v47  ;;  %v5481_v47 = vld [vmem:[%s10042_s4 + $0xcc] ss:$16 sps:$4 sm:$0xff]  }
  0x23   :  { %720 = vmatpush1.bf16.msra.mxu0 %v5286_v43  ;;  %761 = vmatpush1.bf16.msra.mxu1 %v5291_v44  ;;  %10437 = vst [vmem:[#allocation19_spill] sm:$0xff] %v5481_v47 }
  0x24   :  { %1127 = vmatprep.subr.bf16.mxu0 %v5300_v45  ;;  %1168 = vmatprep.subr.bf16.mxu1 %v5305_v46 }
  0xd7   :  { %v161_v57 = vpop.f32.mrb[0].mxu0  ;;  %v274_v60 = vpop.f32.mrb[0].mxu1 }
  0xd8   :  { %v162_v58 = vadd.f32 %v161_v57, %v5322_v54  ;;  %v163_v59 = vpop.f32.mrb[1].mxu0  ;;  %v276_v62 = vpop.f32.mrb[1].mxu1  ;;  %v275_v3 = vadd.f32 %v274_v60, %v5331_v1  ;;  %v5340_v57 = vld [vmem:[%s10042_s4] ss:$16 sps:$4 sm:$0xff]   ;;  %v5352_v60 = vld [vmem:[%s10042_s4 + $0x24] ss:$16 sps:$4 sm:$0xff]  }
  0xd9   :  { %v164_v61 = vadd.f32 %v163_v59, %v5324_v55  ;;  %v277_v0 = vadd.f32 %v276_v62, %v5326_v56  ;;  %v5366_v62 = vld [vmem:[%s10042_s4 + $0x20] ss:$16 sps:$4 sm:$0xff]  }
  0xda   :  { %4246 = vtanh.f32 %v162_v58  ;;  %v5345_v58 = vld [vmem:[%s10042_s4 + $0x8] ss:$16 sps:$4 sm:$0xff]  }
  0xdb   :  { %4248 = vtanh.f32 %v164_v61  ;;  %v5357_v61 = vld [vmem:[%s10042_s4 + $0x2c] ss:$16 sps:$4 sm:$0xff]  }
  0xdc   :  { %4250 = vtanh.f32 %v277_v0  ;;  %v5378_v0 = vld [vmem:[%s10042_s4 + $0x44] ss:$16 sps:$4 sm:$0xff]  }
  0xdd   :  { %4252 = vtanh.f32 %v275_v3  ;;  %v5383_v3 = vld [vmem:[%s10042_s4 + $0x4c] ss:$16 sps:$4 sm:$0xff]  }
  0xe4   :  { %v4247_v4 = vpop.eup %4246 }
  0xe5   :  { %v4249_v5 = vpop.eup %4248  ;;  %v529_v12 = vmul.f32 0.5, %v4247_v4  ;;  %v10051_v4 = vmov 0.0|0.0  }
  0xe6   :  { %v531_v17 = vmul.f32 0.5, %v4249_v5  ;;  %v4251_v22 = vpop.eup %4250  ;;  %v5392_v5 = vld [vmem:[%s10042_s4 + $0x40] ss:$16 sps:$4 sm:$0xff]  }
  0xe7   :  { %v530_v27 = vadd.f32 0.5, %v529_v12  ;;  %v4253_v49 = vpop.eup %4252  ;;  %v5397_v12 = vld [vmem:[%s10042_s4 + $0x48] ss:$16 sps:$4 sm:$0xff]  }
  0xe8   :  { %v532_v30 = vadd.f32 0.5, %v531_v17  ;;  %v533_v50 = vmul.f32 0.5, %v4253_v49  ;;  %v5404_v17 = vld [vmem:[%s10042_s4 + $0x64] ss:$16 sps:$4 sm:$0xff]   ;;  %v5440_v49 = vld [vmem:[%s10042_s4 + $0x80] ss:$16 sps:$4 sm:$0xff]  }
  0xe9   :  { %v536_v36 = vmul.f32 %v4251_v22, %v530_v27  ;;  %v5409_v22 = vld [vmem:[%s10042_s4 + $0x6c] ss:$16 sps:$4 sm:$0xff]   ;;  %v5416_v27 = vld [vmem:[%s10042_s4 + $0x60] ss:$16 sps:$4 sm:$0xff]   ;;  %10430 = vst [vmem:[#allocation12_spill] sm:$0xff] %v5440_v49 }
  0xea   :  { %v535_v41 = vmul.f32 0.0, %v532_v30  ;;  %v534_v51 = vadd.f32 0.5, %v533_v50  ;;  %10425 = vst [vmem:[#allocation7_spill] sm:$0xff] %v5409_v22  ;;  %10426 = vst [vmem:[#allocation8_spill] sm:$0xff] %v5416_v27  ;;  %v5421_v30 = vld [vmem:[%s10042_s4 + $0x68] ss:$16 sps:$4 sm:$0xff]  }
  0xeb   :  { %10427 = vst [vmem:[#allocation9_spill] sm:$0xff] %v5421_v30  ;;  %v5445_v50 = vld [vmem:[%s10042_s4 + $0x88] ss:$16 sps:$4 sm:$0xff]  }
  0xec   :  { %v5334_v48 = vadd.f32 %v536_v36, %v535_v41  ;;  %v5428_v36 = vld [vmem:[%s10042_s4 + $0x84] ss:$16 sps:$4 sm:$0xff]   ;;  %v5433_v41 = vld [vmem:[%s10042_s4 + $0x8c] ss:$16 sps:$4 sm:$0xff]   ;;  %10431 = vst [vmem:[#allocation13_spill] sm:$0xff] %v5445_v50 }
  0xed   :  { %10428 = vst [vmem:[#allocation10_spill] sm:$0xff] %v5428_v36  ;;  %10429 = vst [vmem:[#allocation11_spill] sm:$0xff] %v5433_v41 }
  0xee   :  { %4254 = vtanh.f32 %v5334_v48 }
  0xf8   :  { %v4255_v52 = vpop.eup %4254 }
  0xf9   :  { %v539_v53 = vmul.f32 %v4255_v52, %v534_v51  ;;  %v5452_v51 = vld [vmem:[%s10042_s4 + $0xa4] ss:$16 sps:$4 sm:$0xff]   ;;  %v5457_v52 = vld [vmem:[%s10042_s4 + $0xac] ss:$16 sps:$4 sm:$0xff]  }
  0xfa   :  { %10432 = vst [vmem:[#allocation14_spill] sm:$0xff] %v5452_v51  ;;  %10433 = vst [vmem:[#allocation15_spill] sm:$0xff] %v5457_v52 }
  0xfb   :  { %v5347_v59 = vpack.c.bf16 %v539_v53, %v539_v53  ;;  %v5464_v53 = vld [vmem:[%s10042_s4 + $0xa0] ss:$16 sps:$4 sm:$0xff]  }
  0xfc   :  { %10434 = vst [vmem:[#allocation16_spill] sm:$0xff] %v5464_v53 }
  0xfd   :  { %738 = vmatmul.mubr.bf16.vlgmr.msra.gmra.mrb[16].mxu0 %v5347_v59  ;;  %779 = vmatmul.mubr.bf16.vlgmr.msra.gmra.mrb[16].mxu1 %v5347_v59 }
  0xfe   :  { %1128 = vmatpush1.bf16.msra.mxu0 %v5340_v57  ;;  %1169 = vmatpush1.bf16.msra.mxu1 %v5345_v58 }
  0xff   :  { %1129 = vmatprep.subr.bf16.mxu0 %v5352_v60  ;;  %1170 = vmatprep.subr.bf16.mxu1 %v5357_v61 }
 0x100   :  { %1159 = vmatprep.mubr.bf16.mxu0 %v10051_v4  ;;  %1200 = vmatprep.mubr.bf16.mxu1 %v10051_v4  ;;  %v5476_v4 = vld [vmem:[%s10042_s4 + $0xc4] ss:$16 sps:$4 sm:$0xff]  }
 0x101   :  { %10436 = vst [vmem:[#allocation18_spill] sm:$0xff] %v5476_v4 }
 0x102   :  { %1130 = vmatpush1.bf16.msra.mxu0 %v5366_v62  ;;  %1171 = vmatpush1.bf16.msra.mxu1 %v5371_v63 }
 0x103   :  { %1131 = vmatprep.subr.bf16.mxu0 %v5378_v0  ;;  %1172 = vmatprep.subr.bf16.mxu1 %v5383_v3 }
 0x106   :  { %1132 = vmatpush1.bf16.msra.mxu0 %v5392_v5  ;;  %1173 = vmatpush1.bf16.msra.mxu1 %v5397_v12 }
 0x107   :  { %1133 = vmatprep.subr.bf16.mxu0 %v5404_v17  ;;  %1174 = vmatprep.subr.bf16.mxu1 %v5409_v22 }
 0x10a   :  { %1134 = vmatpush1.bf16.msra.mxu0 %v5416_v27  ;;  %1175 = vmatpush1.bf16.msra.mxu1 %v5421_v30 }
 0x10b   :  { %1135 = vmatprep.subr.bf16.mxu0 %v5428_v36  ;;  %1176 = vmatprep.subr.bf16.mxu1 %v5433_v41  ;;  %v5703_v41 = vpop.f32.mrb[2].mxu1 }
 0x10c   :  { %v5705_v36 = vpop.f32.mrb[3].mxu1 }
 0x10e   :  { %1136 = vmatpush1.bf16.msra.mxu0 %v5440_v49  ;;  %1177 = vmatpush1.bf16.msra.mxu1 %v5445_v50  ;;  %v5699_v50 = vpop.f32.mrb[2].mxu0 }
 0x10f   :  { %1137 = vmatprep.subr.bf16.mxu0 %v5452_v51  ;;  %1178 = vmatprep.subr.bf16.mxu1 %v5457_v52  ;;  %v5488_v51 = vld [vmem:[%s10042_s4 + $0xc0] ss:$16 sps:$4 sm:$0xff]   ;;  %v5493_v52 = vld [vmem:[%s10042_s4 + $0xc8] ss:$16 sps:$4 sm:$0xff]   ;;  %v5701_v49 = vpop.f32.mrb[3].mxu0 }
 0x110   :  { %10438 = vst [vmem:[#allocation20_spill] sm:$0xff] %v5488_v51  ;;  %10439 = vst [vmem:[#allocation21_spill] sm:$0xff] %v5493_v52  ;;  %v5721_v30 = vpop.f32.mrb[4].mxu0 }
 0x111   :  { %v5723_v27 = vpop.f32.mrb[5].mxu0 }
 0x112   :  { %1138 = vmatpush1.bf16.msra.mxu0 %v5464_v53  ;;  %1179 = vmatpush1.bf16.msra.mxu1 %v5469_v2  ;;  %v5500_v53 = vld [vmem:[%s10042_s4 + $0xe4] ss:$16 sps:$4 sm:$0xff]   ;;  %v5505_v2 = vld [vmem:[%s10042_s4 + $0xec] ss:$16 sps:$4 sm:$0xff]   ;;  %10474 = vst [vmem:[#allocation56_spill] sm:$0xff] %v5723_v27  ;;  %v5731_v22 = vpop.f32.mrb[6].mxu0 }
 0x113   :  { %1139 = vmatprep.subr.bf16.mxu0 %v5476_v4  ;;  %1180 = vmatprep.subr.bf16.mxu1 %v5481_v47  ;;  %10440 = vst [vmem:[#allocation22_spill] sm:$0xff] %v5500_v53  ;;  %10441 = vst [vmem:[#allocation23_spill] sm:$0xff] %v5505_v2  ;;  %v5512_v4 = vld [vmem:[%s10042_s4 + $0xe0] ss:$16 sps:$4 sm:$0xff]   ;;  %v5517_v47 = vld [vmem:[%s10042_s4 + $0xe8] ss:$16 sps:$4 sm:$0xff]  }
 0x114   :  { %10442 = vst [vmem:[#allocation24_spill] sm:$0xff] %v5512_v4  ;;  %10443 = vst [vmem:[#allocation25_spill] sm:$0xff] %v5517_v47 }
 0x115   :  { %10476 = vst [vmem:[#allocation58_spill] sm:$0xff] %v5731_v22  ;;  %v6216_v22 = vld [vmem:[%s10044_s6 + $0x18c] ss:$16 sps:$4 sm:$0xff]  }
 0x116   :  { %1140 = vmatpush1.bf16.msra.mxu0 %v5488_v51  ;;  %1181 = vmatpush1.bf16.msra.mxu1 %v5493_v52  ;;  %v5524_v51 = vld [vmem:[%s10042_s4 + $0x104] ss:$16 sps:$4 sm:$0xff]   ;;  %v5529_v52 = vld [vmem:[%s10042_s4 + $0x10c] ss:$16 sps:$4 sm:$0xff]  }
 0x117   :  { %1141 = vmatprep.subr.bf16.mxu0 %v5500_v53  ;;  %1182 = vmatprep.subr.bf16.mxu1 %v5505_v2  ;;  %10444 = vst [vmem:[#allocation26_spill] sm:$0xff] %v5524_v51  ;;  %10445 = vst [vmem:[#allocation27_spill] sm:$0xff] %v5529_v52  ;;  %v5536_v53 = vld [vmem:[%s10042_s4 + $0x100] ss:$16 sps:$4 sm:$0xff]   ;;  %v5541_v2 = vld [vmem:[%s10042_s4 + $0x108] ss:$16 sps:$4 sm:$0xff]  }
 0x118   :  { %10446 = vst [vmem:[#allocation28_spill] sm:$0xff] %v5536_v53  ;;  %10447 = vst [vmem:[#allocation29_spill] sm:$0xff] %v5541_v2 }
 0x11a   :  { %1142 = vmatpush1.bf16.msra.mxu0 %v5512_v4  ;;  %1183 = vmatpush1.bf16.msra.mxu1 %v5517_v47  ;;  %v5548_v4 = vld [vmem:[%s10042_s4 + $0x124] ss:$16 sps:$4 sm:$0xff]   ;;  %v5553_v47 = vld [vmem:[%s10042_s4 + $0x12c] ss:$16 sps:$4 sm:$0xff]  }
 0x11b   :  { %1143 = vmatprep.subr.bf16.mxu0 %v5524_v51  ;;  %1184 = vmatprep.subr.bf16.mxu1 %v5529_v52  ;;  %10448 = vst [vmem:[#allocation30_spill] sm:$0xff] %v5548_v4  ;;  %10449 = vst [vmem:[#allocation31_spill] sm:$0xff] %v5553_v47  ;;  %v5560_v51 = vld [vmem:[%s10042_s4 + $0x120] ss:$16 sps:$4 sm:$0xff]   ;;  %v5565_v52 = vld [vmem:[%s10042_s4 + $0x128] ss:$16 sps:$4 sm:$0xff]  }
 0x11c   :  { %10450 = vst [vmem:[#allocation32_spill] sm:$0xff] %v5560_v51  ;;  %10451 = vst [vmem:[#allocation33_spill] sm:$0xff] %v5565_v52 }
 0x11e   :  { %1144 = vmatpush1.bf16.msra.mxu0 %v5536_v53  ;;  %1185 = vmatpush1.bf16.msra.mxu1 %v5541_v2  ;;  %v5572_v53 = vld [vmem:[%s10042_s4 + $0x144] ss:$16 sps:$4 sm:$0xff]   ;;  %v5577_v2 = vld [vmem:[%s10042_s4 + $0x14c] ss:$16 sps:$4 sm:$0xff]  }
 0x11f   :  { %1145 = vmatprep.subr.bf16.mxu0 %v5548_v4  ;;  %1186 = vmatprep.subr.bf16.mxu1 %v5553_v47  ;;  %10452 = vst [vmem:[#allocation34_spill] sm:$0xff] %v5572_v53  ;;  %10453 = vst [vmem:[#allocation35_spill] sm:$0xff] %v5577_v2  ;;  %v5584_v4 = vld [vmem:[%s10042_s4 + $0x140] ss:$16 sps:$4 sm:$0xff]   ;;  %v5589_v47 = vld [vmem:[%s10042_s4 + $0x148] ss:$16 sps:$4 sm:$0xff]  }
 0x120   :  { %10454 = vst [vmem:[#allocation36_spill] sm:$0xff] %v5584_v4  ;;  %10455 = vst [vmem:[#allocation37_spill] sm:$0xff] %v5589_v47 }
 0x122   :  { %1146 = vmatpush1.bf16.msra.mxu0 %v5560_v51  ;;  %1187 = vmatpush1.bf16.msra.mxu1 %v5565_v52  ;;  %v5596_v51 = vld [vmem:[%s10042_s4 + $0x164] ss:$16 sps:$4 sm:$0xff]   ;;  %v5601_v52 = vld [vmem:[%s10042_s4 + $0x16c] ss:$16 sps:$4 sm:$0xff]  }
 0x123   :  { %1147 = vmatprep.subr.bf16.mxu0 %v5572_v53  ;;  %1188 = vmatprep.subr.bf16.mxu1 %v5577_v2  ;;  %10456 = vst [vmem:[#allocation38_spill] sm:$0xff] %v5596_v51  ;;  %10457 = vst [vmem:[#allocation39_spill] sm:$0xff] %v5601_v52  ;;  %v5608_v53 = vld [vmem:[%s10042_s4 + $0x160] ss:$16 sps:$4 sm:$0xff]   ;;  %v5613_v2 = vld [vmem:[%s10042_s4 + $0x168] ss:$16 sps:$4 sm:$0xff]  }
 0x124   :  { %10458 = vst [vmem:[#allocation40_spill] sm:$0xff] %v5608_v53  ;;  %10459 = vst [vmem:[#allocation41_spill] sm:$0xff] %v5613_v2 }
 0x126   :  { %1148 = vmatpush1.bf16.msra.mxu0 %v5584_v4  ;;  %1189 = vmatpush1.bf16.msra.mxu1 %v5589_v47  ;;  %v5620_v4 = vld [vmem:[%s10042_s4 + $0x184] ss:$16 sps:$4 sm:$0xff]   ;;  %v5625_v47 = vld [vmem:[%s10042_s4 + $0x18c] ss:$16 sps:$4 sm:$0xff]  }
 0x127   :  { %1149 = vmatprep.subr.bf16.mxu0 %v5596_v51  ;;  %1190 = vmatprep.subr.bf16.mxu1 %v5601_v52  ;;  %10460 = vst [vmem:[#allocation42_spill] sm:$0xff] %v5620_v4  ;;  %10461 = vst [vmem:[#allocation43_spill] sm:$0xff] %v5625_v47  ;;  %v5632_v51 = vld [vmem:[%s10042_s4 + $0x180] ss:$16 sps:$4 sm:$0xff]   ;;  %v5637_v52 = vld [vmem:[%s10042_s4 + $0x188] ss:$16 sps:$4 sm:$0xff]  }
 0x128   :  { %10462 = vst [vmem:[#allocation44_spill] sm:$0xff] %v5632_v51  ;;  %10463 = vst [vmem:[#allocation45_spill] sm:$0xff] %v5637_v52 }
 0x12a   :  { %1150 = vmatpush1.bf16.msra.mxu0 %v5608_v53  ;;  %1191 = vmatpush1.bf16.msra.mxu1 %v5613_v2  ;;  %v5644_v53 = vld [vmem:[%s10042_s4 + $0x1a4] ss:$16 sps:$4 sm:$0xff]   ;;  %v5649_v2 = vld [vmem:[%s10042_s4 + $0x1ac] ss:$16 sps:$4 sm:$0xff]  }
 0x12b   :  { %1151 = vmatprep.subr.bf16.mxu0 %v5620_v4  ;;  %1192 = vmatprep.subr.bf16.mxu1 %v5625_v47  ;;  %10464 = vst [vmem:[#allocation46_spill] sm:$0xff] %v5644_v53  ;;  %10465 = vst [vmem:[#allocation47_spill] sm:$0xff] %v5649_v2  ;;  %v5656_v4 = vld [vmem:[%s10042_s4 + $0x1a0] ss:$16 sps:$4 sm:$0xff]   ;;  %v5661_v47 = vld [vmem:[%s10042_s4 + $0x1a8] ss:$16 sps:$4 sm:$0xff]  }
 0x12c   :  { %10466 = vst [vmem:[#allocation48_spill] sm:$0xff] %v5656_v4  ;;  %10467 = vst [vmem:[#allocation49_spill] sm:$0xff] %v5661_v47 }
 0x12e   :  { %1152 = vmatpush1.bf16.msra.mxu0 %v5632_v51  ;;  %1193 = vmatpush1.bf16.msra.mxu1 %v5637_v52  ;;  %v5668_v51 = vld [vmem:[%s10042_s4 + $0x1c4] ss:$16 sps:$4 sm:$0xff]   ;;  %v5673_v52 = vld [vmem:[%s10042_s4 + $0x1cc] ss:$16 sps:$4 sm:$0xff]  }
 0x12f   :  { %1153 = vmatprep.subr.bf16.mxu0 %v5644_v53  ;;  %1194 = vmatprep.subr.bf16.mxu1 %v5649_v2  ;;  %10468 = vst [vmem:[#allocation50_spill] sm:$0xff] %v5668_v51  ;;  %10469 = vst [vmem:[#allocation51_spill] sm:$0xff] %v5673_v52  ;;  %v5680_v53 = vld [vmem:[%s10042_s4 + $0x1c0] ss:$16 sps:$4 sm:$0xff]   ;;  %v5685_v2 = vld [vmem:[%s10042_s4 + $0x1c8] ss:$16 sps:$4 sm:$0xff]  }
 0x130   :  { %10470 = vst [vmem:[#allocation52_spill] sm:$0xff] %v5680_v53  ;;  %10471 = vst [vmem:[#allocation53_spill] sm:$0xff] %v5685_v2 }
 0x132   :  { %1154 = vmatpush1.bf16.msra.mxu0 %v5656_v4  ;;  %1195 = vmatpush1.bf16.msra.mxu1 %v5661_v47  ;;  %v5692_v4 = vld [vmem:[%s10042_s4 + $0x1e4] ss:$16 sps:$4 sm:$0xff]   ;;  %v5697_v47 = vld [vmem:[%s10042_s4 + $0x1ec] ss:$16 sps:$4 sm:$0xff]  }
 0x133   :  { %1155 = vmatprep.subr.bf16.mxu0 %v5668_v51  ;;  %1196 = vmatprep.subr.bf16.mxu1 %v5673_v52  ;;  %10472 = vst [vmem:[#allocation54_spill] sm:$0xff] %v5692_v4  ;;  %10473 = vst [vmem:[#allocation55_spill] sm:$0xff] %v5697_v47  ;;  %v5712_v52 = vld [vmem:[%s10042_s4 + $0x1e0] ss:$16 sps:$4 sm:$0xff]   ;;  %v5717_v51 = vld [vmem:[%s10042_s4 + $0x1e8] ss:$16 sps:$4 sm:$0xff]  }
 0x136   :  { %1156 = vmatpush1.bf16.msra.mxu0 %v5680_v53  ;;  %1197 = vmatpush1.bf16.msra.mxu1 %v5685_v2  ;;  %v5725_v53 = vpop.f32.mrb[4].mxu1 }
 0x137   :  { %1157 = vmatprep.subr.bf16.mxu0 %v5692_v4  ;;  %1198 = vmatprep.subr.bf16.mxu1 %v5697_v47  ;;  %v5727_v2 = vpop.f32.mrb[5].mxu1  ;;  %v5735_v4 = vpop.f32.mrb[7].mxu0 }
 0x138   :  { %10475 = vst [vmem:[#allocation57_spill] sm:$0xff] %v5727_v2  ;;  %10477 = vst [vmem:[#allocation59_spill] sm:$0xff] %v5735_v4  ;;  %v5737_v47 = vpop.f32.mrb[6].mxu1  ;;  %v5745_v2 = vpop.f32.mrb[8].mxu0  ;;  %v10483_v4 = vmov 0  }
 0x139   :  { %10478 = vst [vmem:[#allocation60_spill] sm:$0xff] %v5737_v47  ;;  %v5741_v27 = vpop.f32.mrb[7].mxu1  ;;  %10480 = vst [vmem:[#allocation62_spill] sm:$0xff] %v5745_v2  ;;  %v6199_v2 = vld [vmem:[%s10044_s6 + $0x160] ss:$16 sps:$4 sm:$0xff]  }
 0x13a   :  { %1158 = vmatpush1.bf16.msra.mxu0 %v5712_v52  ;;  %1199 = vmatpush1.bf16.msra.mxu1 %v5717_v51  ;;  %10479 = vst [vmem:[#allocation61_spill] sm:$0xff] %v5741_v27  ;;  %v6204_v27 = vld [vmem:[%s10044_s6 + $0x168] ss:$16 sps:$4 sm:$0xff]   ;;  %v6211_v47 = vld [vmem:[%s10044_s6 + $0x184] ss:$16 sps:$4 sm:$0xff]  }
 0x13b   :  { %1229 = vmatprep.subr.bf16.mxu0 %v5069_v6  ;;  %1270 = vmatprep.subr.bf16.mxu1 %v5074_v7  ;;  %v5749_v6 = vpop.f32.mrb[9].mxu0  ;;  %v5751_v7 = vpop.f32.mrb[8].mxu1 }
 0x13c   :  { %10481 = vst [vmem:[#allocation63_spill] sm:$0xff] %v5749_v6  ;;  %10482 = vst [vmem:[#allocation64_spill] sm:$0xff] %v5751_v7  ;;  %v6187_v6 = vld [vmem:[%s10044_s6 + $0x164] ss:$16 sps:$4 sm:$0xff]   ;;  %v6192_v7 = vld [vmem:[%s10044_s6 + $0x16c] ss:$16 sps:$4 sm:$0xff]  }
 0x13d   :  { %1160 = vmatmul.mubr.bf16.vlgmr.msra.gmra.mrb[20].mxu0 %v5347_v59  ;;  %1201 = vmatmul.mubr.bf16.vlgmr.msra.gmra.mrb[20].mxu1 %v5347_v59  ;;  %v5755_v59 = vpop.f32.mrb[9].mxu1 }
 0x13e   :  { %1230 = vmatpush1.bf16.msra.mxu0 %v5080_v8  ;;  %1271 = vmatpush1.bf16.msra.mxu1 %v5085_v9  ;;  %10484 = vst [vmem:[#allocation65_spill] sm:$0xff] %v5755_v59  ;;  %v5759_v8 = vpop.f32.mrb[10].mxu0 }
 0x13f   :  { %1231 = vmatprep.subr.bf16.mxu0 %v5093_v10  ;;  %1272 = vmatprep.subr.bf16.mxu1 %v5098_v11  ;;  %10485 = vst [vmem:[#allocation66_spill] sm:$0xff] %v5759_v8  ;;  %v5763_v9 = vpop.f32.mrb[11].mxu0  ;;  %v5765_v10 = vpop.f32.mrb[10].mxu1  ;;  %v6180_v8 = vld [vmem:[%s10044_s6 + $0x148] ss:$16 sps:$4 sm:$0xff]  }
 0x140   :  { %1261 = vmatprep.mubr.bf16.mxu0 %v10483_v4  ;;  %1302 = vmatprep.mubr.bf16.mxu1 %v10483_v4  ;;  %10486 = vst [vmem:[#allocation67_spill] sm:$0xff] %v5763_v9  ;;  %10487 = vst [vmem:[#allocation68_spill] sm:$0xff] %v5765_v10  ;;  %v5767_v11 = vpop.f32.mrb[11].mxu1  ;;  %v5771_v59 = vpop.f32.mrb[12].mxu0  ;;  %v6168_v9 = vld [vmem:[%s10044_s6 + $0x14c] ss:$16 sps:$4 sm:$0xff]  }
 0x141   :  { %10488 = vst [vmem:[#allocation69_spill] sm:$0xff] %v5767_v11  ;;  %10489 = vst [vmem:[#allocation70_spill] sm:$0xff] %v5771_v59  ;;  %v6156_v59 = vld [vmem:[%s10044_s6 + $0x128] ss:$16 sps:$4 sm:$0xff]   ;;  %v6163_v11 = vld [vmem:[%s10044_s6 + $0x144] ss:$16 sps:$4 sm:$0xff]  }
 0x142   :  { %1232 = vmatpush1.bf16.msra.mxu0 %v5106_v13  ;;  %1273 = vmatpush1.bf16.msra.mxu1 %v5111_v14  ;;  %v5775_v13 = vpop.f32.mrb[13].mxu0  ;;  %v5777_v14 = vpop.f32.mrb[12].mxu1  ;;  %v6175_v10 = vld [vmem:[%s10044_s6 + $0x140] ss:$16 sps:$4 sm:$0xff]  }
 0x143   :  { %1233 = vmatprep.subr.bf16.mxu0 %v5122_v15  ;;  %1274 = vmatprep.subr.bf16.mxu1 %v5127_v16  ;;  %10490 = vst [vmem:[#allocation71_spill] sm:$0xff] %v5775_v13  ;;  %10491 = vst [vmem:[#allocation72_spill] sm:$0xff] %v5777_v14  ;;  %v5779_v15 = vpop.f32.mrb[13].mxu1  ;;  %v5783_v16 = vpop.f32.mrb[14].mxu0  ;;  %v6144_v13 = vld [vmem:[%s10044_s6 + $0x12c] ss:$16 sps:$4 sm:$0xff]  }
 0x144   :  { %10492 = vst [vmem:[#allocation73_spill] sm:$0xff] %v5779_v15  ;;  %10493 = vst [vmem:[#allocation74_spill] sm:$0xff] %v5783_v16  ;;  %v6132_v16 = vld [vmem:[%s10044_s6 + $0x108] ss:$16 sps:$4 sm:$0xff]   ;;  %v6139_v15 = vld [vmem:[%s10044_s6 + $0x124] ss:$16 sps:$4 sm:$0xff]  }
 0x145   :  { %v6151_v14 = vld [vmem:[%s10044_s6 + $0x120] ss:$16 sps:$4 sm:$0xff]  }
 0x146   :  { %1234 = vmatpush1.bf16.msra.mxu0 %v5137_v18  ;;  %1275 = vmatpush1.bf16.msra.mxu1 %v5142_v19  ;;  %v5787_v18 = vpop.f32.mrb[15].mxu0  ;;  %v5789_v19 = vpop.f32.mrb[14].mxu1 }
 0x147   :  { %1235 = vmatprep.subr.bf16.mxu0 %v5153_v20  ;;  %1276 = vmatprep.subr.bf16.mxu1 %v5158_v21  ;;  %10494 = vst [vmem:[#allocation75_spill] sm:$0xff] %v5787_v18  ;;  %10495 = vst [vmem:[#allocation76_spill] sm:$0xff] %v5789_v19  ;;  %v5791_v20 = vpop.f32.mrb[15].mxu1  ;;  %v168_v21 = vadd.f32 %v5699_v50, %v5322_v54  ;;  %v6120_v18 = vld [vmem:[%s10044_s6 + $0x10c] ss:$16 sps:$4 sm:$0xff]  }
 0x148   :  { %10496 = vst [vmem:[#allocation77_spill] sm:$0xff] %v5791_v20  ;;  %v6115_v20 = vld [vmem:[%s10044_s6 + $0x104] ss:$16 sps:$4 sm:$0xff]   ;;  %v6127_v19 = vld [vmem:[%s10044_s6 + $0x100] ss:$16 sps:$4 sm:$0xff]  }
 0x14a   :  { %1236 = vmatpush1.bf16.msra.mxu0 %v5168_v23  ;;  %1277 = vmatpush1.bf16.msra.mxu1 %v5173_v24  ;;  %v281_v23 = vadd.f32 %v5703_v41, %v5331_v1  ;;  %v170_v24 = vadd.f32 %v5701_v49, %v5324_v55 }
 0x14b   :  { %1237 = vmatprep.subr.bf16.mxu0 %v5184_v25  ;;  %1278 = vmatprep.subr.bf16.mxu1 %v5189_v26  ;;  %v283_v25 = vadd.f32 %v5705_v36, %v5326_v56 }
 0x14e   :  { %1238 = vmatpush1.bf16.msra.mxu0 %v5199_v28  ;;  %1279 = vmatpush1.bf16.msra.mxu1 %v5204_v29 }
 0x14f   :  { %1239 = vmatprep.subr.bf16.mxu0 %v5218_v31  ;;  %1280 = vmatprep.subr.bf16.mxu1 %v5223_v32 }
 0x152   :  { %1240 = vmatpush1.bf16.msra.mxu0 %v5230_v33  ;;  %1281 = vmatpush1.bf16.msra.mxu1 %v5235_v34 }
 0x153   :  { %1241 = vmatprep.subr.bf16.mxu0 %v5242_v35  ;;  %1282 = vmatprep.subr.bf16.mxu1 %v5252_v37 }
 0x156   :  { %1242 = vmatpush1.bf16.msra.mxu0 %v5259_v38  ;;  %1283 = vmatpush1.bf16.msra.mxu1 %v5264_v39 }
 0x157   :  { %1243 = vmatprep.subr.bf16.mxu0 %v5269_v40  ;;  %1284 = vmatprep.subr.bf16.mxu1 %v5279_v42 }
 0x15a   :  { %1244 = vmatpush1.bf16.msra.mxu0 %v5286_v43  ;;  %1285 = vmatpush1.bf16.msra.mxu1 %v5291_v44 }
 0x15b   :  { %1331 = vmatprep.subr.bf16.mxu0 %v5300_v45  ;;  %1372 = vmatprep.subr.bf16.mxu1 %v5305_v46 }
 0x1d0   :  { %v739_v26 = vpop.f32.mrb[16].mxu0  ;;  %v780_v28 = vpop.f32.mrb[16].mxu1 }
 0x1d1   :  { %v787_v29 = vadd.f32 %v739_v26, %v168_v21  ;;  %v789_v31 = vadd.f32 %v780_v28, %v281_v23  ;;  %v741_v32 = vpop.f32.mrb[17].mxu0  ;;  %v782_v33 = vpop.f32.mrb[17].mxu1 }
 0x1d2   :  { %v788_v34 = vadd.f32 %v741_v32, %v170_v24  ;;  %v790_v35 = vadd.f32 %v782_v33, %v283_v25  ;;  %v743_v37 = vpop.f32.mrb[18].mxu0  ;;  %v784_v38 = vpop.f32.mrb[18].mxu1  ;;  %v5852_v32 = vld [vmem:[%s10045_s5] sm:$0xff]  ;;  %v5857_v33 = vld [vmem:[%s10045_s5 + $0x8] sm:$0xff] }
 0x1d3   :  { %4256 = vtanh.f32 %v787_v29  ;;  %v744_v39 = vpop.f32.mrb[19].mxu0  ;;  %v785_v40 = vpop.f32.mrb[19].mxu1 }
 0x1d4   :  { %4258 = vtanh.f32 %v788_v34  ;;  %v10510_v34 = vld [vmem:[#allocation20_spill] sm:$0xff]  ;;  %v5864_v39 = vld [vmem:[%s10045_s5 + $0x18] sm:$0xff] }
 0x1d5   :  { %4260 = vtanh.f32 %v790_v35  ;;  %v10511_v35 = vld [vmem:[#allocation21_spill] sm:$0xff]  ;;  %10560 = vst [vmem:[#allocation20_spill] sm:$0xff] %v6216_v22 }
 0x1d6   :  { %4262 = vtanh.f32 %v789_v31  ;;  %v10509_v31 = vld [vmem:[#allocation19_spill] sm:$0xff] }
 0x1d7   :  { %10559 = vst [vmem:[#allocation19_spill] sm:$0xff] %v6211_v47 }
 0x1dd   :  { %v4257_v42 = vpop.eup %4256 }
 0x1de   :  { %v795_v43 = vmul.f32 0.5, %v4257_v42  ;;  %v4259_v44 = vpop.eup %4258 }
 0x1df   :  { %v797_v46 = vmul.f32 0.5, %v4259_v44  ;;  %v4261_v36 = vpop.eup %4260  ;;  %v10512_v44 = vld [vmem:[#allocation22_spill] sm:$0xff] }
 0x1e0   :  { %v796_v45 = vadd.f32 0.5, %v795_v43  ;;  %v4263_v23 = vpop.eup %4262 }
 0x1e1   :  { %v798_v41 = vadd.f32 0.5, %v797_v46  ;;  %v799_v24 = vmul.f32 0.5, %v4263_v23 }
 0x1e2   :  { %v802_v49 = vmul.f32 %v4261_v36, %v796_v45  ;;  %v10513_v45 = vld [vmem:[#allocation23_spill] sm:$0xff] }
 0x1e3   :  { %v801_v50 = vmul.f32 %v798_v41, %v5334_v48  ;;  %v800_v25 = vadd.f32 0.5, %v799_v24  ;;  %v10497_v48 = vld [vmem:[#allocation7_spill] sm:$0xff]  ;;  %v10514_v24 = vld [vmem:[#allocation24_spill] sm:$0xff] }
 0x1e4   :  { %10547 = vst [vmem:[#allocation7_spill] sm:$0xff] %v6139_v15 }
 0x1e5   :  { %v5818_v21 = vadd.f32 %v802_v49, %v801_v50 }
 0x1e7   :  { %4264 = vtanh.f32 %v5818_v21 }
 0x1f1   :  { %v4265_v26 = vpop.eup %4264 }
 0x1f2   :  { %v805_v28 = vmul.f32 %v4265_v26, %v800_v25  ;;  %v10515_v25 = vld [vmem:[#allocation25_spill] sm:$0xff]  ;;  %v10516_v26 = vld [vmem:[#allocation26_spill] sm:$0xff] }
 0x1f4   :  { %v5821_v29 = vpack.c.bf16 %v805_v28, %v805_v28  ;;  %v10517_v28 = vld [vmem:[#allocation27_spill] sm:$0xff] }
 0x1f6   :  { %1262 = vmatmul.mubr.bf16.vlgmr.msra.gmra.mrb[24].mxu0 %v5821_v29  ;;  %1303 = vmatmul.mubr.bf16.vlgmr.msra.gmra.mrb[24].mxu1 %v5821_v29 }
 0x1f7   :  { %1332 = vmatpush1.bf16.msra.mxu0 %v5340_v57  ;;  %1373 = vmatpush1.bf16.msra.mxu1 %v5345_v58  ;;  %v10498_v57 = vld [vmem:[#allocation8_spill] sm:$0xff]  ;;  %v10499_v58 = vld [vmem:[#allocation9_spill] sm:$0xff] }
 0x1f8   :  { %1333 = vmatprep.subr.bf16.mxu0 %v5352_v60  ;;  %1374 = vmatprep.subr.bf16.mxu1 %v5357_v61  ;;  %v10500_v60 = vld [vmem:[#allocation10_spill] sm:$0xff]  ;;  %v10501_v61 = vld [vmem:[#allocation11_spill] sm:$0xff]  ;;  %10548 = vst [vmem:[#allocation8_spill] sm:$0xff] %v6144_v13  ;;  %10549 = vst [vmem:[#allocation9_spill] sm:$0xff] %v6151_v14 }
 0x1f9   :  { %10550 = vst [vmem:[#allocation10_spill] sm:$0xff] %v6156_v59  ;;  %10551 = vst [vmem:[#allocation11_spill] sm:$0xff] %v6163_v11 }
 0x1fb   :  { %1334 = vmatpush1.bf16.msra.mxu0 %v5366_v62  ;;  %1375 = vmatpush1.bf16.msra.mxu1 %v5371_v63  ;;  %v10502_v62 = vld [vmem:[#allocation12_spill] sm:$0xff]  ;;  %v10503_v63 = vld [vmem:[#allocation13_spill] sm:$0xff] }
 0x1fc   :  { %1335 = vmatprep.subr.bf16.mxu0 %v5378_v0  ;;  %1376 = vmatprep.subr.bf16.mxu1 %v5383_v3  ;;  %v10504_v0 = vld [vmem:[#allocation14_spill] sm:$0xff]  ;;  %v10505_v3 = vld [vmem:[#allocation15_spill] sm:$0xff]  ;;  %10552 = vst [vmem:[#allocation12_spill] sm:$0xff] %v6168_v9  ;;  %10553 = vst [vmem:[#allocation13_spill] sm:$0xff] %v6175_v10 }
 0x1fd   :  { %10554 = vst [vmem:[#allocation14_spill] sm:$0xff] %v6180_v8  ;;  %10555 = vst [vmem:[#allocation15_spill] sm:$0xff] %v6187_v6 }
 0x1ff   :  { %1336 = vmatpush1.bf16.msra.mxu0 %v5392_v5  ;;  %1377 = vmatpush1.bf16.msra.mxu1 %v5397_v12  ;;  %v10506_v5 = vld [vmem:[#allocation16_spill] sm:$0xff]  ;;  %v10507_v12 = vld [vmem:[#allocation17_spill] sm:$0xff] }
 0x200   :  { %1337 = vmatprep.subr.bf16.mxu0 %v5404_v17  ;;  %1378 = vmatprep.subr.bf16.mxu1 %v10497_v48  ;;  %v10508_v17 = vld [vmem:[#allocation18_spill] sm:$0xff]  ;;  %v10518_v48 = vld [vmem:[#allocation28_spill] sm:$0xff]  ;;  %10556 = vst [vmem:[#allocation16_spill] sm:$0xff] %v6192_v7  ;;  %10557 = vst [vmem:[#allocation17_spill] sm:$0xff] %v6199_v2 }
 0x201   :  { %10558 = vst [vmem:[#allocation18_spill] sm:$0xff] %v6204_v27 }
 0x203   :  { %1338 = vmatpush1.bf16.msra.mxu0 %v10498_v57  ;;  %1379 = vmatpush1.bf16.msra.mxu1 %v10499_v58  ;;  %v10519_v57 = vld [vmem:[#allocation29_spill] sm:$0xff] }
 0x204   :  { %1339 = vmatprep.subr.bf16.mxu0 %v10500_v60  ;;  %1380 = vmatprep.subr.bf16.mxu1 %v10501_v61  ;;  %v5880_v58 = vld [vmem:[%s10045_s5 + $0x10] sm:$0xff]  ;;  %v10520_v60 = vld [vmem:[#allocation30_spill] sm:$0xff]  ;;  %v10521_v61 = vld [vmem:[#allocation31_spill] sm:$0xff] }
 0x207   :  { %1340 = vmatpush1.bf16.msra.mxu0 %v10502_v62  ;;  %1381 = vmatpush1.bf16.msra.mxu1 %v10503_v63  ;;  %v10522_v63 = vld [vmem:[#allocation32_spill] sm:$0xff] }
 0x208   :  { %1341 = vmatprep.subr.bf16.mxu0 %v10504_v0  ;;  %1382 = vmatprep.subr.bf16.mxu1 %v10505_v3  ;;  %v10523_v0 = vld [vmem:[#allocation33_spill] sm:$0xff] }
 0x20b   :  { %1342 = vmatpush1.bf16.msra.mxu0 %v10506_v5  ;;  %1383 = vmatpush1.bf16.msra.mxu1 %v10507_v12  ;;  %v10524_v5 = vld [vmem:[#allocation34_spill] sm:$0xff]  ;;  %v10525_v12 = vld [vmem:[#allocation35_spill] sm:$0xff] }
 0x20c   :  { %1343 = vmatprep.subr.bf16.mxu0 %v10508_v17  ;;  %1384 = vmatprep.subr.bf16.mxu1 %v10509_v31 }
 0x20f   :  { %1344 = vmatpush1.bf16.msra.mxu0 %v10510_v34  ;;  %1385 = vmatpush1.bf16.msra.mxu1 %v10511_v35 }
 0x210   :  { %v1161_v37 = vpop.f32.mrb[20].mxu0  ;;  %v1202_v38 = vpop.f32.mrb[20].mxu1  ;;  %1345 = vmatprep.subr.bf16.mxu0 %v10512_v44  ;;  %1386 = vmatprep.subr.bf16.mxu1 %v10513_v45 }
 0x211   :  { %v1162_v40 = vadd.f32 %v1161_v37, %v5852_v32  ;;  %v1163_v42 = vpop.f32.mrb[21].mxu0  ;;  %v1204_v43 = vpop.f32.mrb[21].mxu1  ;;  %v1203_v62 = vadd.f32 %v1202_v38, %v5880_v58  ;;  %v10526_v37 = vld [vmem:[#allocation36_spill] sm:$0xff]  ;;  %v10528_v38 = vld [vmem:[#allocation38_spill] sm:$0xff] }
 0x212   :  { %v1164_v46 = vadd.f32 %v1163_v42, %v5857_v33  ;;  %v1165_v36 = vpop.f32.mrb[22].mxu0  ;;  %v1206_v41 = vpop.f32.mrb[22].mxu1  ;;  %v1205_v49 = vadd.f32 %v1204_v43, %v5864_v39  ;;  %v10529_v43 = vld [vmem:[#allocation39_spill] sm:$0xff] }
 0x213   :  { %4266 = vtanh.f32 %v1162_v40  ;;  %v1166_v50 = vpop.f32.mrb[23].mxu0  ;;  %v1207_v23 = vpop.f32.mrb[23].mxu1  ;;  %1346 = vmatpush1.bf16.msra.mxu0 %v10514_v24  ;;  %1387 = vmatpush1.bf16.msra.mxu1 %v10515_v25  ;;  %v10527_v40 = vld [vmem:[#allocation37_spill] sm:$0xff]  ;;  %v10530_v36 = vld [vmem:[#allocation40_spill] sm:$0xff] }
 0x214   :  { %4268 = vtanh.f32 %v1164_v46  ;;  %1347 = vmatprep.subr.bf16.mxu0 %v10516_v26  ;;  %1388 = vmatprep.subr.bf16.mxu1 %v10517_v28  ;;  %v10531_v41 = vld [vmem:[#allocation41_spill] sm:$0xff]  ;;  %v10533_v50 = vld [vmem:[#allocation43_spill] sm:$0xff]  ;;  %v10534_v24 = vld [vmem:[#allocation44_spill] sm:$0xff] }
 0x215   :  { %4270 = vtanh.f32 %v1205_v49  ;;  %v10532_v49 = vld [vmem:[#allocation42_spill] sm:$0xff]  ;;  %v10535_v25 = vld [vmem:[#allocation45_spill] sm:$0xff]  ;;  %v10537_v28 = vld [vmem:[#allocation47_spill] sm:$0xff] }
 0x216   :  { %4272 = vtanh.f32 %v1203_v62  ;;  %v10536_v26 = vld [vmem:[#allocation46_spill] sm:$0xff] }
 0x217   :  { %1348 = vmatpush1.bf16.msra.mxu0 %v10518_v48  ;;  %1389 = vmatpush1.bf16.msra.mxu1 %v10519_v57  ;;  %v10538_v57 = vld [vmem:[#allocation48_spill] sm:$0xff]  ;;  %v10540_v62 = vld [vmem:[#allocation50_spill] sm:$0xff] }
 0x218   :  { %1349 = vmatprep.subr.bf16.mxu0 %v10520_v60  ;;  %1390 = vmatprep.subr.bf16.mxu1 %v10521_v61  ;;  %v10539_v60 = vld [vmem:[#allocation49_spill] sm:$0xff] }
 0x21b   :  { %1350 = vmatpush1.bf16.msra.mxu0 %v10522_v63  ;;  %1391 = vmatpush1.bf16.msra.mxu1 %v10523_v0  ;;  %v10541_v63 = vld [vmem:[#allocation51_spill] sm:$0xff]  ;;  %v10542_v0 = vld [vmem:[#allocation52_spill] sm:$0xff] }
 0x21c   :  { %1351 = vmatprep.subr.bf16.mxu0 %v10524_v5  ;;  %1392 = vmatprep.subr.bf16.mxu1 %v10525_v12  ;;  %v10544_v12 = vld [vmem:[#allocation54_spill] sm:$0xff] }
 0x21d   :  { %v4267_v3 = vpop.eup %4266 }
 0x21e   :  { %v1213_v17 = vmul.f32 0.5, %v4267_v3  ;;  %v4269_v31 = vpop.eup %4268  ;;  %v10543_v3 = vld [vmem:[#allocation53_spill] sm:$0xff] }
 0x21f   :  { %v1215_v35 = vmul.f32 0.5, %v4269_v31  ;;  %1352 = vmatpush1.bf16.msra.mxu0 %v10526_v37  ;;  %1393 = vmatpush1.bf16.msra.mxu1 %v10527_v40  ;;  %v4271_v42 = vpop.eup %4270  ;;  %v5915_v31 = vld [vmem:[%s10044_s6 + $0x4] ss:$16 sps:$4 sm:$0xff]  }
 0x220   :  { %v1214_v34 = vadd.f32 0.5, %v1213_v17  ;;  %1353 = vmatprep.subr.bf16.mxu0 %v10528_v38  ;;  %1394 = vmatprep.subr.bf16.mxu1 %v10529_v43  ;;  %v4273_v48 = vpop.eup %4272  ;;  %v10545_v17 = vld [vmem:[#allocation55_spill] sm:$0xff]  ;;  %v5936_v38 = vld [vmem:[%s10044_s6 + $0x8] ss:$16 sps:$4 sm:$0xff]  }
 0x221   :  { %v1216_v44 = vadd.f32 0.5, %v1215_v35  ;;  %v1217_v61 = vmul.f32 0.5, %v4273_v48  ;;  %v5957_v43 = vld [vmem:[%s10044_s6 + $0x20] ss:$16 sps:$4 sm:$0xff]  }
 0x222   :  { %v1220_v45 = vmul.f32 %v4271_v42, %v1214_v34  ;;  %v5920_v34 = vld [vmem:[%s10044_s6 + $0xc] ss:$16 sps:$4 sm:$0xff]   ;;  %v5931_v42 = vld [vmem:[%s10044_s6] ss:$16 sps:$4 sm:$0xff]  }
 0x223   :  { %v1219_v46 = vmul.f32 0.0, %v1216_v44  ;;  %1354 = vmatpush1.bf16.msra.mxu0 %v10530_v36  ;;  %1395 = vmatpush1.bf16.msra.mxu1 %v10531_v41  ;;  %v1218_v5 = vadd.f32 0.5, %v1217_v61  ;;  %v5962_v44 = vld [vmem:[%s10044_s6 + $0x28] ss:$16 sps:$4 sm:$0xff]   ;;  %v5983_v36 = vld [vmem:[%s10044_s6 + $0x40] ss:$16 sps:$4 sm:$0xff]  }
 0x224   :  { %1355 = vmatprep.subr.bf16.mxu0 %v10532_v49  ;;  %1396 = vmatprep.subr.bf16.mxu1 %v10533_v50  ;;  %v5988_v41 = vld [vmem:[%s10044_s6 + $0x48] ss:$16 sps:$4 sm:$0xff]   ;;  %v5995_v49 = vld [vmem:[%s10044_s6 + $0x64] ss:$16 sps:$4 sm:$0xff]   ;;  %v6000_v50 = vld [vmem:[%s10044_s6 + $0x6c] ss:$16 sps:$4 sm:$0xff]  }
 0x225   :  { %v5897_v23 = vadd.f32 %v1220_v45, %v1219_v46  ;;  %v5974_v45 = vld [vmem:[%s10044_s6 + $0x4c] ss:$16 sps:$4 sm:$0xff]   ;;  %v10546_v46 = vmov 0.0|0.0   ;;  %v6031_v48 = vld [vmem:[%s10044_s6 + $0x80] ss:$16 sps:$4 sm:$0xff]  }
 0x226   :  { %v6048_v61 = vld [vmem:[%s10044_s6 + $0xac] ss:$16 sps:$4 sm:$0xff]  }
 0x227   :  { %4274 = vtanh.f32 %v5897_v23  ;;  %1356 = vmatpush1.bf16.msra.mxu0 %v10534_v24  ;;  %1397 = vmatpush1.bf16.msra.mxu1 %v10535_v25  ;;  %v6007_v24 = vld [vmem:[%s10044_s6 + $0x60] ss:$16 sps:$4 sm:$0xff]   ;;  %v6012_v25 = vld [vmem:[%s10044_s6 + $0x68] ss:$16 sps:$4 sm:$0xff]  }
 0x228   :  { %1357 = vmatprep.subr.bf16.mxu0 %v10536_v26  ;;  %1398 = vmatprep.subr.bf16.mxu1 %v10537_v28  ;;  %v6019_v26 = vld [vmem:[%s10044_s6 + $0x84] ss:$16 sps:$4 sm:$0xff]   ;;  %v6024_v28 = vld [vmem:[%s10044_s6 + $0x8c] ss:$16 sps:$4 sm:$0xff]  }
 0x22b   :  { %1358 = vmatpush1.bf16.msra.mxu0 %v10538_v57  ;;  %1399 = vmatpush1.bf16.msra.mxu1 %v10539_v60  ;;  %v6036_v57 = vld [vmem:[%s10044_s6 + $0x88] ss:$16 sps:$4 sm:$0xff]   ;;  %v6043_v60 = vld [vmem:[%s10044_s6 + $0xa4] ss:$16 sps:$4 sm:$0xff]  }
 0x22c   :  { %1359 = vmatprep.subr.bf16.mxu0 %v10540_v62  ;;  %1400 = vmatprep.subr.bf16.mxu1 %v10541_v63  ;;  %v6055_v62 = vld [vmem:[%s10044_s6 + $0xa0] ss:$16 sps:$4 sm:$0xff]   ;;  %v6060_v63 = vld [vmem:[%s10044_s6 + $0xa8] ss:$16 sps:$4 sm:$0xff]  }
 0x22f   :  { %1360 = vmatpush1.bf16.msra.mxu0 %v10542_v0  ;;  %1401 = vmatpush1.bf16.msra.mxu1 %v10543_v3  ;;  %v6067_v0 = vld [vmem:[%s10044_s6 + $0xc4] ss:$16 sps:$4 sm:$0xff]   ;;  %v6072_v3 = vld [vmem:[%s10044_s6 + $0xcc] ss:$16 sps:$4 sm:$0xff]  }
 0x230   :  { %1361 = vmatprep.subr.bf16.mxu0 %v10544_v12  ;;  %1402 = vmatprep.subr.bf16.mxu1 %v10545_v17  ;;  %v6084_v12 = vld [vmem:[%s10044_s6 + $0xc8] ss:$16 sps:$4 sm:$0xff]   ;;  %v6091_v17 = vld [vmem:[%s10044_s6 + $0xe4] ss:$16 sps:$4 sm:$0xff]  }
 0x231   :  { %v4275_v35 = vpop.eup %4274 }
 0x232   :  { %v1223_v37 = vmul.f32 %v4275_v35, %v1218_v5  ;;  %v6079_v5 = vld [vmem:[%s10044_s6 + $0xc0] ss:$16 sps:$4 sm:$0xff]   ;;  %v6096_v35 = vld [vmem:[%s10044_s6 + $0xec] ss:$16 sps:$4 sm:$0xff]  }
 0x233   :  { %1362 = vmatpush1.bf16.msra.mxu0 %v5712_v52  ;;  %1403 = vmatpush1.bf16.msra.mxu1 %v5717_v51  ;;  %v5941_v51 = vld [vmem:[%s10044_s6 + $0x24] ss:$16 sps:$4 sm:$0xff]   ;;  %v5946_v52 = vld [vmem:[%s10044_s6 + $0x2c] ss:$16 sps:$4 sm:$0xff]  }
 0x234   :  { %v5924_v40 = vpack.c.bf16 %v1223_v37, %v1223_v37  ;;  %1748 = vmatprep.subr.bf16.mxu0 %v5915_v31  ;;  %1789 = vmatprep.subr.bf16.mxu1 %v5920_v34  ;;  %v6103_v37 = vld [vmem:[%s10044_s6 + $0xe0] ss:$16 sps:$4 sm:$0xff]  }
 0x236   :  { %1363 = vmatprep.mubr.bf16.mxu0 %v5924_v40  ;;  %1404 = vmatprep.mubr.bf16.mxu1 %v5924_v40 }
 0x237   :  { %1364 = vmatmul.mubr.bf16.vlgmr.msra.gmra.mrb[28].mxu0 %v5821_v29  ;;  %1405 = vmatmul.mubr.bf16.vlgmr.msra.gmra.mrb[28].mxu1 %v5821_v29  ;;  %v5969_v29 = vld [vmem:[%s10044_s6 + $0x44] ss:$16 sps:$4 sm:$0xff]  }
 0x238   :  { %1749 = vmatpush1.bf16.msra.mxu0 %v5931_v42  ;;  %1790 = vmatpush1.bf16.msra.mxu1 %v5936_v38 }
 0x239   :  { %1750 = vmatprep.subr.bf16.mxu0 %v5941_v51  ;;  %1791 = vmatprep.subr.bf16.mxu1 %v5946_v52 }
 0x23a   :  { %1780 = vmatprep.mubr.bf16.mxu0 %v10546_v46  ;;  %1821 = vmatprep.mubr.bf16.mxu1 %v10546_v46  ;;  %v6108_v46 = vld [vmem:[%s10044_s6 + $0xe8] ss:$16 sps:$4 sm:$0xff]  }
 0x23c   :  { %1751 = vmatpush1.bf16.msra.mxu0 %v5957_v43  ;;  %1792 = vmatpush1.bf16.msra.mxu1 %v5962_v44 }
 0x23d   :  { %1752 = vmatprep.subr.bf16.mxu0 %v5969_v29  ;;  %1793 = vmatprep.subr.bf16.mxu1 %v5974_v45 }
 0x240   :  { %1753 = vmatpush1.bf16.msra.mxu0 %v5983_v36  ;;  %1794 = vmatpush1.bf16.msra.mxu1 %v5988_v41 }
 0x241   :  { %1754 = vmatprep.subr.bf16.mxu0 %v5995_v49  ;;  %1795 = vmatprep.subr.bf16.mxu1 %v6000_v50 }
 0x244   :  { %1755 = vmatpush1.bf16.msra.mxu0 %v6007_v24  ;;  %1796 = vmatpush1.bf16.msra.mxu1 %v6012_v25 }
 0x245   :  { %1756 = vmatprep.subr.bf16.mxu0 %v6019_v26  ;;  %1797 = vmatprep.subr.bf16.mxu1 %v6024_v28 }
 0x248   :  { %1757 = vmatpush1.bf16.msra.mxu0 %v6031_v48  ;;  %1798 = vmatpush1.bf16.msra.mxu1 %v6036_v57 }
 0x249   :  { %1758 = vmatprep.subr.bf16.mxu0 %v6043_v60  ;;  %1799 = vmatprep.subr.bf16.mxu1 %v6048_v61 }
 0x24c   :  { %1759 = vmatpush1.bf16.msra.mxu0 %v6055_v62  ;;  %1800 = vmatpush1.bf16.msra.mxu1 %v6060_v63 }
 0x24d   :  { %1760 = vmatprep.subr.bf16.mxu0 %v6067_v0  ;;  %1801 = vmatprep.subr.bf16.mxu1 %v6072_v3 }
 0x250   :  { %1761 = vmatpush1.bf16.msra.mxu0 %v6079_v5  ;;  %1802 = vmatpush1.bf16.msra.mxu1 %v6084_v12 }
 0x251   :  { %1762 = vmatprep.subr.bf16.mxu0 %v6091_v17  ;;  %1803 = vmatprep.subr.bf16.mxu1 %v6096_v35 }
 0x254   :  { %1763 = vmatpush1.bf16.msra.mxu0 %v6103_v37  ;;  %1804 = vmatpush1.bf16.msra.mxu1 %v6108_v46 }
 0x255   :  { %1764 = vmatprep.subr.bf16.mxu0 %v6115_v20  ;;  %1805 = vmatprep.subr.bf16.mxu1 %v6120_v18 }
 0x258   :  { %1765 = vmatpush1.bf16.msra.mxu0 %v6127_v19  ;;  %1806 = vmatpush1.bf16.msra.mxu1 %v6132_v16 }
 0x259   :  { %1766 = vmatprep.subr.bf16.mxu0 %v6139_v15  ;;  %1807 = vmatprep.subr.bf16.mxu1 %v6144_v13 }
 0x25c   :  { %1767 = vmatpush1.bf16.msra.mxu0 %v6151_v14  ;;  %1808 = vmatpush1.bf16.msra.mxu1 %v6156_v59 }
 0x25d   :  { %1768 = vmatprep.subr.bf16.mxu0 %v6163_v11  ;;  %1809 = vmatprep.subr.bf16.mxu1 %v6168_v9 }
 0x260   :  { %1769 = vmatpush1.bf16.msra.mxu0 %v6175_v10  ;;  %1810 = vmatpush1.bf16.msra.mxu1 %v6180_v8 }
 0x261   :  { %1770 = vmatprep.subr.bf16.mxu0 %v6187_v6  ;;  %1811 = vmatprep.subr.bf16.mxu1 %v6192_v7  ;;  %v6223_v6 = vld [vmem:[%s10044_s6 + $0x180] ss:$16 sps:$4 sm:$0xff]   ;;  %v6228_v7 = vld [vmem:[%s10044_s6 + $0x188] ss:$16 sps:$4 sm:$0xff]  }
 0x262   :  { %10561 = vst [vmem:[#allocation21_spill] sm:$0xff] %v6223_v6  ;;  %10562 = vst [vmem:[#allocation22_spill] sm:$0xff] %v6228_v7 }
 0x264   :  { %1771 = vmatpush1.bf16.msra.mxu0 %v6199_v2  ;;  %1812 = vmatpush1.bf16.msra.mxu1 %v6204_v27  ;;  %v6235_v2 = vld [vmem:[%s10044_s6 + $0x1a4] ss:$16 sps:$4 sm:$0xff]   ;;  %v6240_v27 = vld [vmem:[%s10044_s6 + $0x1ac] ss:$16 sps:$4 sm:$0xff]  }
 0x265   :  { %1772 = vmatprep.subr.bf16.mxu0 %v6211_v47  ;;  %1813 = vmatprep.subr.bf16.mxu1 %v6216_v22  ;;  %10563 = vst [vmem:[#allocation23_spill] sm:$0xff] %v6235_v2  ;;  %10564 = vst [vmem:[#allocation24_spill] sm:$0xff] %v6240_v27  ;;  %v6247_v47 = vld [vmem:[%s10044_s6 + $0x1a0] ss:$16 sps:$4 sm:$0xff]   ;;  %v6252_v22 = vld [vmem:[%s10044_s6 + $0x1a8] ss:$16 sps:$4 sm:$0xff]  }
 0x266   :  { %10565 = vst [vmem:[#allocation25_spill] sm:$0xff] %v6247_v47  ;;  %10566 = vst [vmem:[#allocation26_spill] sm:$0xff] %v6252_v22 }
 0x268   :  { %1773 = vmatpush1.bf16.msra.mxu0 %v6223_v6  ;;  %1814 = vmatpush1.bf16.msra.mxu1 %v6228_v7  ;;  %v6259_v6 = vld [vmem:[%s10044_s6 + $0x1c4] ss:$16 sps:$4 sm:$0xff]   ;;  %v6264_v7 = vld [vmem:[%s10044_s6 + $0x1cc] ss:$16 sps:$4 sm:$0xff]  }
 0x269   :  { %1774 = vmatprep.subr.bf16.mxu0 %v6235_v2  ;;  %1815 = vmatprep.subr.bf16.mxu1 %v6240_v27  ;;  %10567 = vst [vmem:[#allocation27_spill] sm:$0xff] %v6259_v6  ;;  %10568 = vst [vmem:[#allocation28_spill] sm:$0xff] %v6264_v7  ;;  %v6271_v2 = vld [vmem:[%s10044_s6 + $0x1c0] ss:$16 sps:$4 sm:$0xff]   ;;  %v6276_v27 = vld [vmem:[%s10044_s6 + $0x1c8] ss:$16 sps:$4 sm:$0xff]  }
 0x26a   :  { %10569 = vst [vmem:[#allocation29_spill] sm:$0xff] %v6271_v2  ;;  %10570 = vst [vmem:[#allocation30_spill] sm:$0xff] %v6276_v27 }
 0x26c   :  { %1775 = vmatpush1.bf16.msra.mxu0 %v6247_v47  ;;  %1816 = vmatpush1.bf16.msra.mxu1 %v6252_v22  ;;  %v6283_v47 = vld [vmem:[%s10044_s6 + $0x1e4] ss:$16 sps:$4 sm:$0xff]   ;;  %v6288_v22 = vld [vmem:[%s10044_s6 + $0x1ec] ss:$16 sps:$4 sm:$0xff]  }
 0x26d   :  { %1776 = vmatprep.subr.bf16.mxu0 %v6259_v6  ;;  %1817 = vmatprep.subr.bf16.mxu1 %v6264_v7  ;;  %10571 = vst [vmem:[#allocation31_spill] sm:$0xff] %v6283_v47  ;;  %10572 = vst [vmem:[#allocation32_spill] sm:$0xff] %v6288_v22  ;;  %v6295_v6 = vld [vmem:[%s10044_s6 + $0x1e0] ss:$16 sps:$4 sm:$0xff]   ;;  %v6300_v7 = vld [vmem:[%s10044_s6 + $0x1e8] ss:$16 sps:$4 sm:$0xff]  }
 0x26e   :  { %10573 = vst [vmem:[#allocation33_spill] sm:$0xff] %v6295_v6  ;;  %10574 = vst [vmem:[#allocation34_spill] sm:$0xff] %v6300_v7 }
 0x270   :  { %1777 = vmatpush1.bf16.msra.mxu0 %v6271_v2  ;;  %1818 = vmatpush1.bf16.msra.mxu1 %v6276_v27  ;;  %v6309_v27 = vld [vmem:[%s10041_s2 + $0x4] ss:$16 sps:$4 sm:$0xff]   ;;  %v6315_v2 = vld [vmem:[%s10041_s2 + $0xc] ss:$16 sps:$4 sm:$0xff]  }
 0x271   :  { %1778 = vmatprep.subr.bf16.mxu0 %v6283_v47  ;;  %1819 = vmatprep.subr.bf16.mxu1 %v6288_v22  ;;  %10575 = vst [vmem:[#allocation35_spill] sm:$0xff] %v6309_v27  ;;  %10576 = vst [vmem:[#allocation36_spill] sm:$0xff] %v6315_v2  ;;  %v10610_v22 = vld [vmem:[#allocation57_spill] sm:$0xff] }
 0x272   :  { %v289_v47 = vadd.f32 %v10610_v22, %v5326_v56 }
 0x274   :  { %1779 = vmatpush1.bf16.msra.mxu0 %v6295_v6  ;;  %1820 = vmatpush1.bf16.msra.mxu1 %v6300_v7  ;;  %v6323_v7 = vld [vmem:[%s10041_s2] ss:$16 sps:$4 sm:$0xff]  }
 0x275   :  { %1850 = vmatprep.subr.bf16.mxu0 %v6309_v27  ;;  %1891 = vmatprep.subr.bf16.mxu1 %v6315_v2  ;;  %10577 = vst [vmem:[#allocation37_spill] sm:$0xff] %v6323_v7  ;;  %v6329_v27 = vld [vmem:[%s10041_s2 + $0x8] ss:$16 sps:$4 sm:$0xff]   ;;  %v6335_v2 = vld [vmem:[%s10041_s2 + $0x24] ss:$16 sps:$4 sm:$0xff]  }
 0x276   :  { %10578 = vst [vmem:[#allocation38_spill] sm:$0xff] %v6329_v27  ;;  %10579 = vst [vmem:[#allocation39_spill] sm:$0xff] %v6335_v2 }
 0x277   :  { %1781 = vmatmul.mubr.bf16.vlgmr.msra.gmra.mrb[32].mxu0 %v5924_v40  ;;  %1822 = vmatmul.mubr.bf16.vlgmr.msra.gmra.mrb[32].mxu1 %v5924_v40  ;;  %v6341_v40 = vld [vmem:[%s10041_s2 + $0x2c] ss:$16 sps:$4 sm:$0xff]  }
 0x278   :  { %1851 = vmatpush1.bf16.msra.mxu0 %v6323_v7  ;;  %1892 = vmatpush1.bf16.msra.mxu1 %v6329_v27  ;;  %10580 = vst [vmem:[#allocation40_spill] sm:$0xff] %v6341_v40  ;;  %v6349_v27 = vld [vmem:[%s10041_s2 + $0x20] ss:$16 sps:$4 sm:$0xff]   ;;  %v10609_v7 = vld [vmem:[#allocation56_spill] sm:$0xff] }
 0x279   :  { %1852 = vmatprep.subr.bf16.mxu0 %v6335_v2  ;;  %1893 = vmatprep.subr.bf16.mxu1 %v6341_v40  ;;  %10581 = vst [vmem:[#allocation41_spill] sm:$0xff] %v6349_v27  ;;  %v6355_v2 = vld [vmem:[%s10041_s2 + $0x28] ss:$16 sps:$4 sm:$0xff]   ;;  %v6361_v40 = vld [vmem:[%s10041_s2 + $0x44] ss:$16 sps:$4 sm:$0xff]   ;;  %v176_v6 = vadd.f32 %v10609_v7, %v5324_v55 }
 0x27a   :  { %1882 = vmatprep.mubr.bf16.mxu0 %v10483_v4  ;;  %1923 = vmatprep.mubr.bf16.mxu1 %v10483_v4  ;;  %10582 = vst [vmem:[#allocation42_spill] sm:$0xff] %v6355_v2  ;;  %10583 = vst [vmem:[#allocation43_spill] sm:$0xff] %v6361_v40  ;;  %v6367_v4 = vld [vmem:[%s10041_s2 + $0x4c] ss:$16 sps:$4 sm:$0xff]  }
 0x27b   :  { %10584 = vst [vmem:[#allocation44_spill] sm:$0xff] %v6367_v4 }
 0x27c   :  { %1853 = vmatpush1.bf16.msra.mxu0 %v6349_v27  ;;  %1894 = vmatpush1.bf16.msra.mxu1 %v6355_v2  ;;  %v6373_v27 = vld [vmem:[%s10041_s2 + $0x40] ss:$16 sps:$4 sm:$0xff]   ;;  %v6379_v2 = vld [vmem:[%s10041_s2 + $0x48] ss:$16 sps:$4 sm:$0xff]  }
 0x27d   :  { %1854 = vmatprep.subr.bf16.mxu0 %v6361_v40  ;;  %1895 = vmatprep.subr.bf16.mxu1 %v6367_v4  ;;  %10585 = vst [vmem:[#allocation45_spill] sm:$0xff] %v6373_v27  ;;  %10586 = vst [vmem:[#allocation46_spill] sm:$0xff] %v6379_v2  ;;  %v6385_v40 = vld [vmem:[%s10041_s2 + $0x64] ss:$16 sps:$4 sm:$0xff]   ;;  %v6391_v4 = vld [vmem:[%s10041_s2 + $0x6c] ss:$16 sps:$4 sm:$0xff]  }
 0x27e   :  { %10587 = vst [vmem:[#allocation47_spill] sm:$0xff] %v6385_v40  ;;  %10588 = vst [vmem:[#allocation48_spill] sm:$0xff] %v6391_v4 }
 0x280   :  { %1855 = vmatpush1.bf16.msra.mxu0 %v6373_v27  ;;  %1896 = vmatpush1.bf16.msra.mxu1 %v6379_v2  ;;  %v6397_v27 = vld [vmem:[%s10041_s2 + $0x60] ss:$16 sps:$4 sm:$0xff]   ;;  %v6403_v2 = vld [vmem:[%s10041_s2 + $0x68] ss:$16 sps:$4 sm:$0xff]  }
 0x281   :  { %1856 = vmatprep.subr.bf16.mxu0 %v6385_v40  ;;  %1897 = vmatprep.subr.bf16.mxu1 %v6391_v4  ;;  %10589 = vst [vmem:[#allocation49_spill] sm:$0xff] %v6397_v27  ;;  %10590 = vst [vmem:[#allocation50_spill] sm:$0xff] %v6403_v2  ;;  %v6409_v40 = vld [vmem:[%s10041_s2 + $0x84] ss:$16 sps:$4 sm:$0xff]   ;;  %v6415_v4 = vld [vmem:[%s10041_s2 + $0x8c] ss:$16 sps:$4 sm:$0xff]  }
 0x282   :  { %10591 = vst [vmem:[#allocation51_spill] sm:$0xff] %v6409_v40  ;;  %10592 = vst [vmem:[#allocation52_spill] sm:$0xff] %v6415_v4 }
 0x284   :  { %1857 = vmatpush1.bf16.msra.mxu0 %v6397_v27  ;;  %1898 = vmatpush1.bf16.msra.mxu1 %v6403_v2  ;;  %v6421_v27 = vld [vmem:[%s10041_s2 + $0x80] ss:$16 sps:$4 sm:$0xff]   ;;  %v6427_v2 = vld [vmem:[%s10041_s2 + $0x88] ss:$16 sps:$4 sm:$0xff]  }
 0x285   :  { %1858 = vmatprep.subr.bf16.mxu0 %v6409_v40  ;;  %1899 = vmatprep.subr.bf16.mxu1 %v6415_v4  ;;  %10593 = vst [vmem:[#allocation53_spill] sm:$0xff] %v6421_v27  ;;  %10594 = vst [vmem:[#allocation54_spill] sm:$0xff] %v6427_v2  ;;  %v6433_v40 = vld [vmem:[%s10041_s2 + $0xa4] ss:$16 sps:$4 sm:$0xff]   ;;  %v6439_v4 = vld [vmem:[%s10041_s2 + $0xac] ss:$16 sps:$4 sm:$0xff]  }
 0x286   :  { %10595 = vst [vmem:[#allocation55_spill] sm:$0xff] %v6433_v40  ;;  %10596 = vst [vmem:[#allocation78_spill] sm:$0xff] %v6439_v4 }
 0x288   :  { %1859 = vmatpush1.bf16.msra.mxu0 %v6421_v27  ;;  %1900 = vmatpush1.bf16.msra.mxu1 %v6427_v2  ;;  %v6445_v27 = vld [vmem:[%s10041_s2 + $0xa0] ss:$16 sps:$4 sm:$0xff]   ;;  %v6451_v2 = vld [vmem:[%s10041_s2 + $0xa8] ss:$16 sps:$4 sm:$0xff]  }
 0x289   :  { %1860 = vmatprep.subr.bf16.mxu0 %v6433_v40  ;;  %1901 = vmatprep.subr.bf16.mxu1 %v6439_v4  ;;  %10597 = vst [vmem:[#allocation79_spill] sm:$0xff] %v6445_v27  ;;  %10598 = vst [vmem:[#allocation80_spill] sm:$0xff] %v6451_v2  ;;  %v6457_v40 = vld [vmem:[%s10041_s2 + $0xc4] ss:$16 sps:$4 sm:$0xff]   ;;  %v6463_v4 = vld [vmem:[%s10041_s2 + $0xcc] ss:$16 sps:$4 sm:$0xff]  }
 0x28a   :  { %10599 = vst [vmem:[#allocation81_spill] sm:$0xff] %v6457_v40  ;;  %10600 = vst [vmem:[#allocation82_spill] sm:$0xff] %v6463_v4 }
 0x28c   :  { %1861 = vmatpush1.bf16.msra.mxu0 %v6445_v27  ;;  %1902 = vmatpush1.bf16.msra.mxu1 %v6451_v2  ;;  %v6469_v27 = vld [vmem:[%s10041_s2 + $0xc0] ss:$16 sps:$4 sm:$0xff]   ;;  %v6475_v2 = vld [vmem:[%s10041_s2 + $0xc8] ss:$16 sps:$4 sm:$0xff]  }
 0x28d   :  { %1862 = vmatprep.subr.bf16.mxu0 %v6457_v40  ;;  %1903 = vmatprep.subr.bf16.mxu1 %v6463_v4  ;;  %10601 = vst [vmem:[#allocation83_spill] sm:$0xff] %v6469_v27  ;;  %10602 = vst [vmem:[#allocation84_spill] sm:$0xff] %v6475_v2  ;;  %v6481_v40 = vld [vmem:[%s10041_s2 + $0xe4] ss:$16 sps:$4 sm:$0xff]   ;;  %v6487_v4 = vld [vmem:[%s10041_s2 + $0xec] ss:$16 sps:$4 sm:$0xff]  }
 0x28e   :  { %10603 = vst [vmem:[#allocation85_spill] sm:$0xff] %v6481_v40  ;;  %10604 = vst [vmem:[#allocation86_spill] sm:$0xff] %v6487_v4 }
 0x290   :  { %1863 = vmatpush1.bf16.msra.mxu0 %v6469_v27  ;;  %1904 = vmatpush1.bf16.msra.mxu1 %v6475_v2  ;;  %v6493_v27 = vld [vmem:[%s10041_s2 + $0xe0] ss:$16 sps:$4 sm:$0xff]   ;;  %v6499_v2 = vld [vmem:[%s10041_s2 + $0xe8] ss:$16 sps:$4 sm:$0xff]  }
 0x291   :  { %1864 = vmatprep.subr.bf16.mxu0 %v6481_v40  ;;  %1905 = vmatprep.subr.bf16.mxu1 %v6487_v4  ;;  %10605 = vst [vmem:[#allocation87_spill] sm:$0xff] %v6493_v27  ;;  %10606 = vst [vmem:[#allocation88_spill] sm:$0xff] %v6499_v2  ;;  %v6505_v40 = vld [vmem:[%s10042_s4 + $0x4] ss:$16 sps:$4 sm:$0xff]   ;;  %v6511_v4 = vld [vmem:[%s10042_s4 + $0xc] ss:$16 sps:$4 sm:$0xff]  }
 0x292   :  { %10607 = vst [vmem:[#allocation89_spill] sm:$0xff] %v6505_v40  ;;  %10608 = vst [vmem:[#allocation90_spill] sm:$0xff] %v6511_v4 }
 0x294   :  { %1865 = vmatpush1.bf16.msra.mxu0 %v6493_v27  ;;  %1906 = vmatpush1.bf16.msra.mxu1 %v6499_v2  ;;  %v174_v27 = vadd.f32 %v5721_v30, %v5322_v54  ;;  %v287_v2 = vadd.f32 %v5725_v53, %v5331_v1 }
 0x295   :  { %1952 = vmatprep.subr.bf16.mxu0 %v6505_v40  ;;  %1993 = vmatprep.subr.bf16.mxu1 %v6511_v4 }
 0x2c9   :  { %v1263_v40 = vpop.f32.mrb[24].mxu0  ;;  %v1304_v8 = vpop.f32.mrb[24].mxu1 }
 0x2ca   :  { %v1311_v10 = vadd.f32 %v1263_v40, %v174_v27  ;;  %v1313_v9 = vadd.f32 %v1304_v8, %v287_v2  ;;  %v1265_v11 = vpop.f32.mrb[25].mxu0  ;;  %v1306_v59 = vpop.f32.mrb[25].mxu1  ;;  %v6581_v40 = vld [vmem:[%s10042_s4 + $0x40] ss:$16 sps:$4 sm:$0xff]  }
 0x2cb   :  { %v1312_v14 = vadd.f32 %v1265_v11, %v176_v6  ;;  %v1314_v4 = vadd.f32 %v1306_v59, %v289_v47  ;;  %v1267_v13 = vpop.f32.mrb[26].mxu0  ;;  %v1308_v15 = vpop.f32.mrb[26].mxu1  ;;  %10611 = vst [vmem:[#allocation56_spill] sm:$0xff] %v6581_v40 }
 0x2cc   :  { %4276 = vtanh.f32 %v1311_v10  ;;  %v1268_v30 = vpop.f32.mrb[27].mxu0  ;;  %v1309_v54 = vpop.f32.mrb[27].mxu1  ;;  %v6557_v13 = vld [vmem:[%s10042_s4 + $0x20] ss:$16 sps:$4 sm:$0xff]   ;;  %v6569_v15 = vld [vmem:[%s10042_s4 + $0x44] ss:$16 sps:$4 sm:$0xff]  }
 0x2cd   :  { %4278 = vtanh.f32 %v1312_v14  ;;  %v6563_v14 = vld [vmem:[%s10042_s4 + $0x28] ss:$16 sps:$4 sm:$0xff]  }
 0x2ce   :  { %4280 = vtanh.f32 %v1314_v4  ;;  %v6587_v30 = vld [vmem:[%s10042_s4 + $0x48] ss:$16 sps:$4 sm:$0xff]  }
 0x2cf   :  { %4282 = vtanh.f32 %v1313_v9  ;;  %v6551_v9 = vld [vmem:[%s10042_s4 + $0x2c] ss:$16 sps:$4 sm:$0xff]   ;;  %10612 = vst [vmem:[#allocation57_spill] sm:$0xff] %v6587_v30 }
 0x2d6   :  { %v4277_v53 = vpop.eup %4276 }
 0x2d7   :  { %v1319_v7 = vmul.f32 0.5, %v4277_v53  ;;  %v4279_v55 = vpop.eup %4278  ;;  %v6593_v53 = vld [vmem:[%s10042_s4 + $0x64] ss:$16 sps:$4 sm:$0xff]  }
 0x2d8   :  { %v1321_v22 = vmul.f32 0.5, %v4279_v55  ;;  %v4281_v56 = vpop.eup %4280  ;;  %v6533_v55 = vld [vmem:[%s10042_s4] ss:$16 sps:$4 sm:$0xff]   ;;  %10613 = vst [vmem:[#allocation91_spill] sm:$0xff] %v6593_v53 }
 0x2d9   :  { %v1320_v1 = vadd.f32 0.5, %v1319_v7  ;;  %v4283_v47 = vpop.eup %4282  ;;  %v6599_v7 = vld [vmem:[%s10042_s4 + $0x6c] ss:$16 sps:$4 sm:$0xff]  }
 0x2da   :  { %v1322_v27 = vadd.f32 0.5, %v1321_v22  ;;  %v1323_v59 = vmul.f32 0.5, %v4283_v47  ;;  %10614 = vst [vmem:[#allocation92_spill] sm:$0xff] %v6599_v7  ;;  %v6605_v22 = vld [vmem:[%s10042_s4 + $0x60] ss:$16 sps:$4 sm:$0xff]  }
 0x2db   :  { %v1326_v2 = vmul.f32 %v4281_v56, %v1320_v1  ;;  %v6539_v56 = vld [vmem:[%s10042_s4 + $0x8] ss:$16 sps:$4 sm:$0xff]   ;;  %v6545_v1 = vld [vmem:[%s10042_s4 + $0x24] ss:$16 sps:$4 sm:$0xff]   ;;  %10615 = vst [vmem:[#allocation93_spill] sm:$0xff] %v6605_v22 }
 0x2dc   :  { %v1325_v8 = vmul.f32 %v1322_v27, %v5818_v21  ;;  %v1324_v54 = vadd.f32 0.5, %v1323_v59  ;;  %v6575_v21 = vld [vmem:[%s10042_s4 + $0x4c] ss:$16 sps:$4 sm:$0xff]   ;;  %v6611_v27 = vld [vmem:[%s10042_s4 + $0x68] ss:$16 sps:$4 sm:$0xff]  }
 0x2dd   :  { %10616 = vst [vmem:[#allocation94_spill] sm:$0xff] %v6611_v27  ;;  %v6629_v47 = vld [vmem:[%s10042_s4 + $0x80] ss:$16 sps:$4 sm:$0xff]   ;;  %v6635_v59 = vld [vmem:[%s10042_s4 + $0x88] ss:$16 sps:$4 sm:$0xff]  }
 0x2de   :  { %v6523_v6 = vadd.f32 %v1326_v2, %v1325_v8  ;;  %v6617_v2 = vld [vmem:[%s10042_s4 + $0x84] ss:$16 sps:$4 sm:$0xff]   ;;  %v6623_v8 = vld [vmem:[%s10042_s4 + $0x8c] ss:$16 sps:$4 sm:$0xff]   ;;  %10619 = vst [vmem:[#allocation97_spill] sm:$0xff] %v6629_v47  ;;  %10620 = vst [vmem:[#allocation98_spill] sm:$0xff] %v6635_v59 }
 0x2df   :  { %10617 = vst [vmem:[#allocation95_spill] sm:$0xff] %v6617_v2  ;;  %10618 = vst [vmem:[#allocation96_spill] sm:$0xff] %v6623_v8 }
 0x2e0   :  { %4284 = vtanh.f32 %v6523_v6 }
 0x2ea   :  { %v4285_v10 = vpop.eup %4284 }
 0x2eb   :  { %v1329_v4 = vmul.f32 %v4285_v10, %v1324_v54  ;;  %v6641_v54 = vld [vmem:[%s10042_s4 + $0xa4] ss:$16 sps:$4 sm:$0xff]   ;;  %v6647_v10 = vld [vmem:[%s10042_s4 + $0xac] ss:$16 sps:$4 sm:$0xff]  }
 0x2ec   :  { %10621 = vst [vmem:[#allocation99_spill] sm:$0xff] %v6641_v54  ;;  %10622 = vst [vmem:[#allocation100_spill] sm:$0xff] %v6647_v10 }
 0x2ed   :  { %v6526_v11 = vpack.c.bf16 %v1329_v4, %v1329_v4  ;;  %v6653_v4 = vld [vmem:[%s10042_s4 + $0xa0] ss:$16 sps:$4 sm:$0xff]  }
 0x2ee   :  { %10623 = vst [vmem:[#allocation101_spill] sm:$0xff] %v6653_v4 }
 0x2ef   :  { %1883 = vmatmul.mubr.bf16.vlgmr.msra.gmra.mrb[36].mxu0 %v6526_v11  ;;  %1924 = vmatmul.mubr.bf16.vlgmr.msra.gmra.mrb[36].mxu1 %v6526_v11 }
 0x2f0   :  { %1953 = vmatpush1.bf16.msra.mxu0 %v6533_v55  ;;  %1994 = vmatpush1.bf16.msra.mxu1 %v6539_v56 }
 0x2f1   :  { %1954 = vmatprep.subr.bf16.mxu0 %v6545_v1  ;;  %1995 = vmatprep.subr.bf16.mxu1 %v6551_v9 }
 0x2f4   :  { %1955 = vmatpush1.bf16.msra.mxu0 %v6557_v13  ;;  %1996 = vmatpush1.bf16.msra.mxu1 %v6563_v14 }
 0x2f5   :  { %1956 = vmatprep.subr.bf16.mxu0 %v6569_v15  ;;  %1997 = vmatprep.subr.bf16.mxu1 %v6575_v21 }
 0x2f8   :  { %1957 = vmatpush1.bf16.msra.mxu0 %v6581_v40  ;;  %1998 = vmatpush1.bf16.msra.mxu1 %v6587_v30  ;;  %v6704_v40 = vld [vmem:[%s10042_s4 + $0xe0] ss:$16 sps:$4 sm:$0xff]  }
 0x2f9   :  { %1958 = vmatprep.subr.bf16.mxu0 %v6593_v53  ;;  %1999 = vmatprep.subr.bf16.mxu1 %v6599_v7 }
 0x2fc   :  { %1959 = vmatpush1.bf16.msra.mxu0 %v6605_v22  ;;  %2000 = vmatpush1.bf16.msra.mxu1 %v6611_v27 }
 0x2fd   :  { %1960 = vmatprep.subr.bf16.mxu0 %v6617_v2  ;;  %2001 = vmatprep.subr.bf16.mxu1 %v6623_v8 }
 0x300   :  { %1961 = vmatpush1.bf16.msra.mxu0 %v6629_v47  ;;  %2002 = vmatpush1.bf16.msra.mxu1 %v6635_v59  ;;  %v6659_v59 = vld [vmem:[%s10042_s4 + $0xa8] ss:$16 sps:$4 sm:$0xff]  }
 0x301   :  { %1962 = vmatprep.subr.bf16.mxu0 %v6641_v54  ;;  %2003 = vmatprep.subr.bf16.mxu1 %v6647_v10  ;;  %10624 = vst [vmem:[#allocation102_spill] sm:$0xff] %v6659_v59  ;;  %v6665_v54 = vld [vmem:[%s10042_s4 + $0xc4] ss:$16 sps:$4 sm:$0xff]   ;;  %v6671_v10 = vld [vmem:[%s10042_s4 + $0xcc] ss:$16 sps:$4 sm:$0xff]  }
 0x302   :  { %10625 = vst [vmem:[#allocation103_spill] sm:$0xff] %v6665_v54  ;;  %10626 = vst [vmem:[#allocation104_spill] sm:$0xff] %v6671_v10 }
 0x304   :  { %1963 = vmatpush1.bf16.msra.mxu0 %v6653_v4  ;;  %2004 = vmatpush1.bf16.msra.mxu1 %v6659_v59  ;;  %v6677_v4 = vld [vmem:[%s10042_s4 + $0xc0] ss:$16 sps:$4 sm:$0xff]   ;;  %v6683_v59 = vld [vmem:[%s10042_s4 + $0xc8] ss:$16 sps:$4 sm:$0xff]  }
 0x305   :  { %1964 = vmatprep.subr.bf16.mxu0 %v6665_v54  ;;  %2005 = vmatprep.subr.bf16.mxu1 %v6671_v10  ;;  %10627 = vst [vmem:[#allocation105_spill] sm:$0xff] %v6677_v4  ;;  %10628 = vst [vmem:[#allocation106_spill] sm:$0xff] %v6683_v59  ;;  %v6689_v10 = vld [vmem:[%s10042_s4 + $0xe4] ss:$16 sps:$4 sm:$0xff]  }
 0x306   :  { %10629 = vst [vmem:[#allocation107_spill] sm:$0xff] %v6689_v10 }
 0x308   :  { %1965 = vmatpush1.bf16.msra.mxu0 %v6677_v4  ;;  %2006 = vmatpush1.bf16.msra.mxu1 %v6683_v59  ;;  %v6695_v4 = vld [vmem:[%s10042_s4 + $0xec] ss:$16 sps:$4 sm:$0xff]  }
 0x309   :  { %1966 = vmatprep.subr.bf16.mxu0 %v6689_v10  ;;  %2007 = vmatprep.subr.bf16.mxu1 %v6695_v4 }
 0x30a   :  { %v1365_v54 = vpop.f32.mrb[28].mxu0  ;;  %v1406_v47 = vpop.f32.mrb[28].mxu1 }
 0x30b   :  { %v1366_v8 = vadd.f32 %v1365_v54, %v5852_v32  ;;  %v1367_v2 = vpop.f32.mrb[29].mxu0  ;;  %v1408_v59 = vpop.f32.mrb[29].mxu1  ;;  %v6710_v32 = vld [vmem:[%s10042_s4 + $0xe8] ss:$16 sps:$4 sm:$0xff]   ;;  %v6771_v54 = vld [vmem:[%s10042_s4 + $0x14c] ss:$16 sps:$4 sm:$0xff]  }
 0x30c   :  { %v1368_v27 = vadd.f32 %v1367_v2, %v5857_v33  ;;  %v1369_v22 = vpop.f32.mrb[30].mxu0  ;;  %v1410_v7 = vpop.f32.mrb[30].mxu1  ;;  %v1409_v53 = vadd.f32 %v1408_v59, %v5864_v39  ;;  %1967 = vmatpush1.bf16.msra.mxu0 %v6704_v40  ;;  %2008 = vmatpush1.bf16.msra.mxu1 %v6710_v32  ;;  %v6716_v33 = vld [vmem:[%s10042_s4 + $0x104] ss:$16 sps:$4 sm:$0xff]   ;;  %v6722_v39 = vld [vmem:[%s10042_s4 + $0x10c] ss:$16 sps:$4 sm:$0xff]  }
 0x30d   :  { %4286 = vtanh.f32 %v1366_v8  ;;  %v1370_v30 = vpop.f32.mrb[31].mxu0  ;;  %v1411_v10 = vpop.f32.mrb[31].mxu1  ;;  %1968 = vmatprep.subr.bf16.mxu0 %v6716_v33  ;;  %2009 = vmatprep.subr.bf16.mxu1 %v6722_v39  ;;  %v6734_v7 = vld [vmem:[%s10042_s4 + $0x108] ss:$16 sps:$4 sm:$0xff]   ;;  %v6740_v22 = vld [vmem:[%s10042_s4 + $0x124] ss:$16 sps:$4 sm:$0xff]   ;;  %v1407_v8 = vadd.f32 %v1406_v47, %v5880_v58 }
 0x30e   :  { %4288 = vtanh.f32 %v1368_v27  ;;  %v6728_v30 = vld [vmem:[%s10042_s4 + $0x100] ss:$16 sps:$4 sm:$0xff]   ;;  %10630 = vst [vmem:[#allocation108_spill] sm:$0xff] %v6740_v22  ;;  %v6758_v2 = vld [vmem:[%s10042_s4 + $0x128] ss:$16 sps:$4 sm:$0xff]   ;;  %10635 = vst [vmem:[#allocation113_spill] sm:$0xff] %v6771_v54 }
 0x30f   :  { %4290 = vtanh.f32 %v1409_v53  ;;  %v6746_v53 = vld [vmem:[%s10042_s4 + $0x12c] ss:$16 sps:$4 sm:$0xff]   ;;  %v6752_v27 = vld [vmem:[%s10042_s4 + $0x120] ss:$16 sps:$4 sm:$0xff]   ;;  %10633 = vst [vmem:[#allocation111_spill] sm:$0xff] %v6758_v2 }
 0x310   :  { %1969 = vmatpush1.bf16.msra.mxu0 %v6728_v30  ;;  %2010 = vmatpush1.bf16.msra.mxu1 %v6734_v7  ;;  %10631 = vst [vmem:[#allocation109_spill] sm:$0xff] %v6746_v53  ;;  %10632 = vst [vmem:[#allocation110_spill] sm:$0xff] %v6752_v27  ;;  %v6765_v59 = vld [vmem:[%s10042_s4 + $0x144] ss:$16 sps:$4 sm:$0xff]   ;;  %v6777_v58 = vld [vmem:[%s10042_s4 + $0x140] ss:$16 sps:$4 sm:$0xff]   ;;  %4292 = vtanh.f32 %v1407_v8 }
 0x311   :  { %1970 = vmatprep.subr.bf16.mxu0 %v6740_v22  ;;  %2011 = vmatprep.subr.bf16.mxu1 %v6746_v53  ;;  %10634 = vst [vmem:[#allocation112_spill] sm:$0xff] %v6765_v59  ;;  %10636 = vst [vmem:[#allocation114_spill] sm:$0xff] %v6777_v58  ;;  %v6783_v47 = vld [vmem:[%s10042_s4 + $0x148] ss:$16 sps:$4 sm:$0xff]  }
 0x312   :  { %10637 = vst [vmem:[#allocation115_spill] sm:$0xff] %v6783_v47 }
 0x314   :  { %1971 = vmatpush1.bf16.msra.mxu0 %v6752_v27  ;;  %2012 = vmatpush1.bf16.msra.mxu1 %v6758_v2 }
 0x315   :  { %1972 = vmatprep.subr.bf16.mxu0 %v6765_v59  ;;  %2013 = vmatprep.subr.bf16.mxu1 %v6771_v54 }
 0x317   :  { %v4287_v10 = vpop.eup %4286 }
 0x318   :  { %v1417_v27 = vmul.f32 0.5, %v4287_v10  ;;  %v4289_v53 = vpop.eup %4288  ;;  %1973 = vmatpush1.bf16.msra.mxu0 %v6777_v58  ;;  %2014 = vmatpush1.bf16.msra.mxu1 %v6783_v47  ;;  %v6789_v10 = vld [vmem:[%s10042_s4 + $0x164] ss:$16 sps:$4 sm:$0xff]   ;;  %v6795_v58 = vld [vmem:[%s10042_s4 + $0x16c] ss:$16 sps:$4 sm:$0xff]  }
 0x319   :  { %v1419_v54 = vmul.f32 0.5, %v4289_v53  ;;  %1974 = vmatprep.subr.bf16.mxu0 %v6789_v10  ;;  %2015 = vmatprep.subr.bf16.mxu1 %v6795_v58  ;;  %v4291_v2 = vpop.eup %4290  ;;  %v6801_v53 = vld [vmem:[%s10042_s4 + $0x160] ss:$16 sps:$4 sm:$0xff]  }
 0x31a   :  { %v1418_v59 = vadd.f32 0.5, %v1417_v27  ;;  %v6807_v27 = vld [vmem:[%s10042_s4 + $0x168] ss:$16 sps:$4 sm:$0xff]  }
 0x31b   :  { %v1420_v22 = vadd.f32 0.5, %v1419_v54 }
 0x31c   :  { %v1424_v47 = vmul.f32 %v4291_v2, %v1418_v59  ;;  %1975 = vmatpush1.bf16.msra.mxu0 %v6801_v53  ;;  %2016 = vmatpush1.bf16.msra.mxu1 %v6807_v27  ;;  %v6814_v2 = vld [vmem:[%s10042_s4 + $0x184] ss:$16 sps:$4 sm:$0xff]   ;;  %v6820_v59 = vld [vmem:[%s10042_s4 + $0x18c] ss:$16 sps:$4 sm:$0xff]  }
 0x31d   :  { %v1423_v8 = vmul.f32 %v1420_v22, %v5897_v23  ;;  %10638 = vst [vmem:[#allocation116_spill] sm:$0xff] %v6814_v2  ;;  %1976 = vmatprep.subr.bf16.mxu0 %v6814_v2  ;;  %10639 = vst [vmem:[#allocation117_spill] sm:$0xff] %v6820_v59  ;;  %2017 = vmatprep.subr.bf16.mxu1 %v6820_v59  ;;  %v6828_v23 = vld [vmem:[%s10042_s4 + $0x180] ss:$16 sps:$4 sm:$0xff]   ;;  %v6834_v22 = vld [vmem:[%s10042_s4 + $0x188] ss:$16 sps:$4 sm:$0xff]  }
 0x31e   :  { %10641 = vst [vmem:[#allocation119_spill] sm:$0xff] %v6828_v23  ;;  %10642 = vst [vmem:[#allocation120_spill] sm:$0xff] %v6834_v22  ;;  %v6877_v59 = vld [vmem:[%s10042_s4 + $0x1c0] ss:$16 sps:$4 sm:$0xff]  }
 0x31f   :  { %v6823_v54 = vadd.f32 %v1424_v47, %v1423_v8  ;;  %v6841_v47 = vld [vmem:[%s10042_s4 + $0x1a4] ss:$16 sps:$4 sm:$0xff]   ;;  %v6847_v8 = vld [vmem:[%s10042_s4 + $0x1ac] ss:$16 sps:$4 sm:$0xff]   ;;  %10649 = vst [vmem:[#allocation127_spill] sm:$0xff] %v6877_v59 }
 0x320   :  { %1977 = vmatpush1.bf16.msra.mxu0 %v6828_v23  ;;  %2018 = vmatpush1.bf16.msra.mxu1 %v6834_v22  ;;  %10643 = vst [vmem:[#allocation121_spill] sm:$0xff] %v6841_v47  ;;  %10644 = vst [vmem:[#allocation122_spill] sm:$0xff] %v6847_v8  ;;  %v4293_v23 = vpop.eup %4292  ;;  %v6853_v22 = vld [vmem:[%s10042_s4 + $0x1a0] ss:$16 sps:$4 sm:$0xff]  }
 0x321   :  { %10640 = vst [vmem:[#allocation118_spill] sm:$0xff] %v6823_v54  ;;  %4294 = vtanh.f32 %v6823_v54  ;;  %1978 = vmatprep.subr.bf16.mxu0 %v6841_v47  ;;  %2019 = vmatprep.subr.bf16.mxu1 %v6847_v8  ;;  %10645 = vst [vmem:[#allocation123_spill] sm:$0xff] %v6853_v22  ;;  %v6859_v54 = vld [vmem:[%s10042_s4 + $0x1a8] ss:$16 sps:$4 sm:$0xff]   ;;  %v6865_v47 = vld [vmem:[%s10042_s4 + $0x1c4] ss:$16 sps:$4 sm:$0xff]  }
 0x322   :  { %10646 = vst [vmem:[#allocation124_spill] sm:$0xff] %v6859_v54  ;;  %10647 = vst [vmem:[#allocation125_spill] sm:$0xff] %v6865_v47  ;;  %v6871_v8 = vld [vmem:[%s10042_s4 + $0x1cc] ss:$16 sps:$4 sm:$0xff]  }
 0x323   :  { %10648 = vst [vmem:[#allocation126_spill] sm:$0xff] %v6871_v8 }
 0x324   :  { %1979 = vmatpush1.bf16.msra.mxu0 %v6853_v22  ;;  %2020 = vmatpush1.bf16.msra.mxu1 %v6859_v54  ;;  %v1421_v22 = vmul.f32 0.5, %v4293_v23  ;;  %v6883_v54 = vld [vmem:[%s10042_s4 + $0x1c8] ss:$16 sps:$4 sm:$0xff]   ;;  %v6895_v23 = vld [vmem:[%s10042_s4 + $0x1ec] ss:$16 sps:$4 sm:$0xff]  }
 0x325   :  { %1980 = vmatprep.subr.bf16.mxu0 %v6865_v47  ;;  %2021 = vmatprep.subr.bf16.mxu1 %v6871_v8  ;;  %10650 = vst [vmem:[#allocation128_spill] sm:$0xff] %v6883_v54  ;;  %v6889_v47 = vld [vmem:[%s10042_s4 + $0x1e4] ss:$16 sps:$4 sm:$0xff]  }
 0x326   :  { %10651 = vst [vmem:[#allocation129_spill] sm:$0xff] %v6889_v47 }
 0x328   :  { %1981 = vmatpush1.bf16.msra.mxu0 %v6877_v59  ;;  %2022 = vmatpush1.bf16.msra.mxu1 %v6883_v54  ;;  %v1422_v59 = vadd.f32 0.5, %v1421_v22  ;;  %v6901_v54 = vld [vmem:[%s10042_s4 + $0x1e0] ss:$16 sps:$4 sm:$0xff]  }
 0x329   :  { %1982 = vmatprep.subr.bf16.mxu0 %v6889_v47  ;;  %2023 = vmatprep.subr.bf16.mxu1 %v6895_v23  ;;  %v6907_v47 = vld [vmem:[%s10042_s4 + $0x1e8] ss:$16 sps:$4 sm:$0xff]  }
 0x32b   :  { %v4295_v8 = vpop.eup %4294 }
 0x32c   :  { %1983 = vmatpush1.bf16.msra.mxu0 %v6901_v54  ;;  %2024 = vmatpush1.bf16.msra.mxu1 %v6907_v47  ;;  %v1427_v2 = vmul.f32 %v4295_v8, %v1422_v59  ;;  %v10664_v59 = vld [vmem:[#allocation19_spill] sm:$0xff]  ;;  %v10665_v8 = vld [vmem:[#allocation20_spill] sm:$0xff] }
 0x32d   :  { %2050 = vmatprep.subr.bf16.mxu0 %v5915_v31  ;;  %2091 = vmatprep.subr.bf16.mxu1 %v5920_v34  ;;  %v6945_v31 = vld [vmem:[%s10046_s7] sm:$0xff]  ;;  %v6950_v34 = vld [vmem:[%s10046_s7 + $0x8] sm:$0xff] }
 0x32e   :  { %v6912_v22 = vpack.c.bf16 %v1427_v2, %v1427_v2 }
 0x330   :  { %1984 = vmatprep.mubr.bf16.mxu0 %v6912_v22  ;;  %2025 = vmatprep.mubr.bf16.mxu1 %v6912_v22 }
 0x331   :  { %1985 = vmatmul.mubr.bf16.vlgmr.msra.gmra.mrb[40].mxu0 %v6526_v11  ;;  %2026 = vmatmul.mubr.bf16.vlgmr.msra.gmra.mrb[40].mxu1 %v6526_v11  ;;  %v10663_v11 = vld [vmem:[#allocation18_spill] sm:$0xff] }
 0x332   :  { %2051 = vmatpush1.bf16.msra.mxu0 %v5931_v42  ;;  %2092 = vmatpush1.bf16.msra.mxu1 %v5936_v38 }
 0x333   :  { %2052 = vmatprep.subr.bf16.mxu0 %v5941_v51  ;;  %2093 = vmatprep.subr.bf16.mxu1 %v5946_v52  ;;  %v6955_v51 = vld [vmem:[%s10046_s7 + $0x18] sm:$0xff] }
 0x336   :  { %2053 = vmatpush1.bf16.msra.mxu0 %v5957_v43  ;;  %2094 = vmatpush1.bf16.msra.mxu1 %v5962_v44 }
 0x337   :  { %2054 = vmatprep.subr.bf16.mxu0 %v5969_v29  ;;  %2095 = vmatprep.subr.bf16.mxu1 %v5974_v45 }
 0x33a   :  { %2055 = vmatpush1.bf16.msra.mxu0 %v5983_v36  ;;  %2096 = vmatpush1.bf16.msra.mxu1 %v5988_v41 }
 0x33b   :  { %2056 = vmatprep.subr.bf16.mxu0 %v5995_v49  ;;  %2097 = vmatprep.subr.bf16.mxu1 %v6000_v50 }
 0x33e   :  { %2057 = vmatpush1.bf16.msra.mxu0 %v6007_v24  ;;  %2098 = vmatpush1.bf16.msra.mxu1 %v6012_v25  ;;  %v6971_v24 = vld [vmem:[%s10046_s7 + $0x10] sm:$0xff]  ;;  %v10652_v25 = vld [vmem:[#allocation7_spill] sm:$0xff] }
 0x33f   :  { %2058 = vmatprep.subr.bf16.mxu0 %v6019_v26  ;;  %2099 = vmatprep.subr.bf16.mxu1 %v6024_v28  ;;  %v10653_v26 = vld [vmem:[#allocation8_spill] sm:$0xff] }
 0x342   :  { %2059 = vmatpush1.bf16.msra.mxu0 %v6031_v48  ;;  %2100 = vmatpush1.bf16.msra.mxu1 %v6036_v57  ;;  %v10656_v57 = vld [vmem:[#allocation11_spill] sm:$0xff] }
 0x343   :  { %2060 = vmatprep.subr.bf16.mxu0 %v6043_v60  ;;  %2101 = vmatprep.subr.bf16.mxu1 %v6048_v61  ;;  %v10657_v60 = vld [vmem:[#allocation12_spill] sm:$0xff] }
 0x346   :  { %2061 = vmatpush1.bf16.msra.mxu0 %v6055_v62  ;;  %2102 = vmatpush1.bf16.msra.mxu1 %v6060_v63  ;;  %v10658_v63 = vld [vmem:[#allocation13_spill] sm:$0xff] }
 0x347   :  { %2062 = vmatprep.subr.bf16.mxu0 %v6067_v0  ;;  %2103 = vmatprep.subr.bf16.mxu1 %v6072_v3  ;;  %v10659_v0 = vld [vmem:[#allocation14_spill] sm:$0xff] }
 0x34a   :  { %v1782_v42 = vpop.f32.mrb[32].mxu0  ;;  %v1823_v38 = vpop.f32.mrb[32].mxu1  ;;  %2063 = vmatpush1.bf16.msra.mxu0 %v6079_v5  ;;  %2104 = vmatpush1.bf16.msra.mxu1 %v6084_v12  ;;  %v10660_v12 = vld [vmem:[#allocation15_spill] sm:$0xff] }
 0x34b   :  { %v1783_v52 = vadd.f32 %v1782_v42, %v6945_v31  ;;  %v1784_v43 = vpop.f32.mrb[33].mxu0  ;;  %v1825_v44 = vpop.f32.mrb[33].mxu1  ;;  %2064 = vmatprep.subr.bf16.mxu0 %v6091_v17  ;;  %2105 = vmatprep.subr.bf16.mxu1 %v6096_v35  ;;  %v10661_v17 = vld [vmem:[#allocation16_spill] sm:$0xff]  ;;  %v10666_v42 = vld [vmem:[#allocation21_spill] sm:$0xff] }
 0x34c   :  { %v1785_v29 = vadd.f32 %v1784_v43, %v6950_v34  ;;  %v1786_v45 = vpop.f32.mrb[34].mxu0  ;;  %v1827_v36 = vpop.f32.mrb[34].mxu1  ;;  %v1826_v41 = vadd.f32 %v1825_v44, %v6955_v51  ;;  %v10668_v43 = vld [vmem:[#allocation23_spill] sm:$0xff]  ;;  %v10669_v44 = vld [vmem:[#allocation24_spill] sm:$0xff] }
 0x34d   :  { %4296 = vtanh.f32 %v1783_v52  ;;  %v1787_v49 = vpop.f32.mrb[35].mxu0  ;;  %v1828_v50 = vpop.f32.mrb[35].mxu1  ;;  %v10670_v45 = vld [vmem:[#allocation25_spill] sm:$0xff]  ;;  %v10671_v36 = vld [vmem:[#allocation26_spill] sm:$0xff] }
 0x34e   :  { %4298 = vtanh.f32 %v1785_v29  ;;  %2065 = vmatpush1.bf16.msra.mxu0 %v6103_v37  ;;  %2106 = vmatpush1.bf16.msra.mxu1 %v6108_v46  ;;  %v1824_v46 = vadd.f32 %v1823_v38, %v6971_v24  ;;  %v10662_v37 = vld [vmem:[#allocation17_spill] sm:$0xff]  ;;  %v10667_v38 = vld [vmem:[#allocation22_spill] sm:$0xff]  ;;  %v10673_v49 = vld [vmem:[#allocation28_spill] sm:$0xff] }
 0x34f   :  { %2066 = vmatprep.subr.bf16.mxu0 %v6115_v20  ;;  %2107 = vmatprep.subr.bf16.mxu1 %v6120_v18  ;;  %4300 = vtanh.f32 %v1826_v41  ;;  %v10654_v20 = vld [vmem:[#allocation9_spill] sm:$0xff]  ;;  %v10655_v18 = vld [vmem:[#allocation10_spill] sm:$0xff]  ;;  %v10672_v41 = vld [vmem:[#allocation27_spill] sm:$0xff] }
 0x350   :  { %4302 = vtanh.f32 %v1824_v46 }
 0x352   :  { %2067 = vmatpush1.bf16.msra.mxu0 %v6127_v19  ;;  %2108 = vmatpush1.bf16.msra.mxu1 %v6132_v16 }
 0x353   :  { %2068 = vmatprep.subr.bf16.mxu0 %v10652_v25  ;;  %2109 = vmatprep.subr.bf16.mxu1 %v10653_v26  ;;  %v10674_v25 = vld [vmem:[#allocation29_spill] sm:$0xff]  ;;  %v10675_v26 = vld [vmem:[#allocation30_spill] sm:$0xff] }
 0x356   :  { %2069 = vmatpush1.bf16.msra.mxu0 %v10654_v20  ;;  %2110 = vmatpush1.bf16.msra.mxu1 %v10655_v18  ;;  %v10677_v20 = vld [vmem:[#allocation32_spill] sm:$0xff] }
 0x357   :  { %v4297_v28 = vpop.eup %4296  ;;  %2070 = vmatprep.subr.bf16.mxu0 %v10656_v57  ;;  %2111 = vmatprep.subr.bf16.mxu1 %v10657_v60  ;;  %v10679_v57 = vld [vmem:[#allocation34_spill] sm:$0xff] }
 0x358   :  { %v1834_v48 = vmul.f32 0.5, %v4297_v28  ;;  %v4299_v61 = vpop.eup %4298  ;;  %v10676_v28 = vld [vmem:[#allocation31_spill] sm:$0xff] }
 0x359   :  { %v1836_v16 = vmul.f32 0.5, %v4299_v61  ;;  %v4301_v62 = vpop.eup %4300  ;;  %v10680_v61 = vld [vmem:[#allocation35_spill] sm:$0xff] }
 0x35a   :  { %v1835_v19 = vadd.f32 0.5, %v1834_v48  ;;  %2071 = vmatpush1.bf16.msra.mxu0 %v10658_v63  ;;  %2112 = vmatpush1.bf16.msra.mxu1 %v10659_v0  ;;  %v4303_v52 = vpop.eup %4302  ;;  %v10678_v48 = vld [vmem:[#allocation33_spill] sm:$0xff]  ;;  %v10684_v63 = vld [vmem:[#allocation39_spill] sm:$0xff]  ;;  %v10685_v0 = vld [vmem:[#allocation40_spill] sm:$0xff] }
 0x35b   :  { %v1837_v3 = vadd.f32 0.5, %v1836_v16  ;;  %2072 = vmatprep.subr.bf16.mxu0 %v10660_v12  ;;  %2113 = vmatprep.subr.bf16.mxu1 %v10661_v17  ;;  %v1838_v29 = vmul.f32 0.5, %v4303_v52  ;;  %v10682_v16 = vld [vmem:[#allocation37_spill] sm:$0xff]  ;;  %v10688_v12 = vld [vmem:[#allocation42_spill] sm:$0xff]  ;;  %v10689_v17 = vld [vmem:[#allocation43_spill] sm:$0xff] }
 0x35c   :  { %v1841_v5 = vmul.f32 %v4301_v62, %v1835_v19  ;;  %v10681_v19 = vld [vmem:[#allocation36_spill] sm:$0xff]  ;;  %v10683_v62 = vld [vmem:[#allocation38_spill] sm:$0xff] }
 0x35d   :  { %v1840_v35 = vmul.f32 0.0, %v1837_v3  ;;  %v1839_v50 = vadd.f32 0.5, %v1838_v29  ;;  %v10686_v3 = vmov 0   ;;  %v10698_v52 = vld [vmem:[#allocation52_spill] sm:$0xff]  ;;  %v10701_v29 = vld [vmem:[#allocation55_spill] sm:$0xff] }
 0x35e   :  { %2073 = vmatpush1.bf16.msra.mxu0 %v10662_v37  ;;  %2114 = vmatpush1.bf16.msra.mxu1 %v10663_v11  ;;  %v10692_v37 = vld [vmem:[#allocation46_spill] sm:$0xff]  ;;  %v10693_v11 = vld [vmem:[#allocation47_spill] sm:$0xff] }
 0x35f   :  { %v6988_v2 = vadd.f32 %v1841_v5, %v1840_v35  ;;  %2074 = vmatprep.subr.bf16.mxu0 %v10664_v59  ;;  %2115 = vmatprep.subr.bf16.mxu1 %v10665_v8  ;;  %v10687_v5 = vld [vmem:[#allocation41_spill] sm:$0xff]  ;;  %v10690_v35 = vld [vmem:[#allocation44_spill] sm:$0xff] }
 0x360   :  { %v10694_v59 = vld [vmem:[#allocation48_spill] sm:$0xff]  ;;  %v10695_v8 = vld [vmem:[#allocation49_spill] sm:$0xff] }
 0x361   :  { %4304 = vtanh.f32 %v6988_v2 }
 0x362   :  { %2075 = vmatpush1.bf16.msra.mxu0 %v10666_v42  ;;  %2116 = vmatpush1.bf16.msra.mxu1 %v10667_v38  ;;  %v10696_v42 = vld [vmem:[#allocation50_spill] sm:$0xff]  ;;  %v10697_v38 = vld [vmem:[#allocation51_spill] sm:$0xff] }
 0x363   :  { %2076 = vmatprep.subr.bf16.mxu0 %v10668_v43  ;;  %2117 = vmatprep.subr.bf16.mxu1 %v10669_v44  ;;  %v10699_v43 = vld [vmem:[#allocation53_spill] sm:$0xff]  ;;  %v10700_v44 = vld [vmem:[#allocation54_spill] sm:$0xff] }
 0x366   :  { %2077 = vmatpush1.bf16.msra.mxu0 %v10670_v45  ;;  %2118 = vmatpush1.bf16.msra.mxu1 %v10671_v36  ;;  %v10702_v45 = vld [vmem:[#allocation78_spill] sm:$0xff]  ;;  %v10703_v36 = vld [vmem:[#allocation79_spill] sm:$0xff] }
 0x367   :  { %2078 = vmatprep.subr.bf16.mxu0 %v10672_v41  ;;  %2119 = vmatprep.subr.bf16.mxu1 %v10673_v49  ;;  %v10704_v41 = vld [vmem:[#allocation80_spill] sm:$0xff]  ;;  %v10705_v49 = vld [vmem:[#allocation81_spill] sm:$0xff] }
 0x36a   :  { %2079 = vmatpush1.bf16.msra.mxu0 %v10674_v25  ;;  %2120 = vmatpush1.bf16.msra.mxu1 %v10675_v26  ;;  %v10707_v25 = vld [vmem:[#allocation83_spill] sm:$0xff]  ;;  %v10708_v26 = vld [vmem:[#allocation84_spill] sm:$0xff] }
 0x36b   :  { %v4305_v46 = vpop.eup %4304  ;;  %2080 = vmatprep.subr.bf16.mxu0 %v10676_v28  ;;  %2121 = vmatprep.subr.bf16.mxu1 %v10677_v20  ;;  %v10710_v28 = vld [vmem:[#allocation86_spill] sm:$0xff]  ;;  %v10711_v20 = vld [vmem:[#allocation87_spill] sm:$0xff] }
 0x36c   :  { %v1844_v18 = vmul.f32 %v4305_v46, %v1839_v50  ;;  %v10706_v50 = vld [vmem:[#allocation82_spill] sm:$0xff]  ;;  %v10709_v46 = vld [vmem:[#allocation85_spill] sm:$0xff] }
 0x36e   :  { %2081 = vmatpush1.bf16.msra.mxu0 %v10678_v48  ;;  %2122 = vmatpush1.bf16.msra.mxu1 %v10679_v57  ;;  %v2049_v60 = vpack.c.bf16 %v1844_v18, %v1844_v18  ;;  %v10712_v18 = vld [vmem:[#allocation88_spill] sm:$0xff]  ;;  %v10713_v48 = vld [vmem:[#allocation89_spill] sm:$0xff]  ;;  %v10714_v57 = vld [vmem:[#allocation90_spill] sm:$0xff] }
 0x36f   :  { %2152 = vmatprep.subr.bf16.mxu0 %v10680_v61  ;;  %2193 = vmatprep.subr.bf16.mxu1 %v10681_v19  ;;  %v10716_v61 = vld [vmem:[#allocation58_spill] sm:$0xff] }
 0x370   :  { %2082 = vmatprep.mubr.bf16.mxu0 %v2049_v60  ;;  %2123 = vmatprep.mubr.bf16.mxu1 %v2049_v60  ;;  %v10715_v60 = vld [vmem:[#allocation3_spill] sm:$0xff] }
 0x371   :  { %2083 = vmatmul.mubr.bf16.vlgmr.msra.gmra.mrb[44].mxu0 %v6912_v22  ;;  %2124 = vmatmul.mubr.bf16.vlgmr.msra.gmra.mrb[44].mxu1 %v6912_v22  ;;  %v10691_v22 = vld [vmem:[#allocation45_spill] sm:$0xff]  ;;  %v180_v19 = vadd.f32 %v10716_v61, %v10715_v60 }
 0x372   :  { %2153 = vmatpush1.bf16.msra.mxu0 %v10682_v16  ;;  %2194 = vmatpush1.bf16.msra.mxu1 %v10683_v62  ;;  %v10717_v16 = vld [vmem:[#allocation6_spill] sm:$0xff]  ;;  %v10718_v62 = vld [vmem:[#allocation60_spill] sm:$0xff] }
 0x373   :  { %2154 = vmatprep.subr.bf16.mxu0 %v10684_v63  ;;  %2195 = vmatprep.subr.bf16.mxu1 %v10685_v0  ;;  %v293_v63 = vadd.f32 %v10718_v62, %v10717_v16  ;;  %v10719_v0 = vld [vmem:[#allocation4_spill] sm:$0xff] }
 0x374   :  { %2184 = vmatprep.mubr.bf16.mxu0 %v10686_v3  ;;  %2225 = vmatprep.mubr.bf16.mxu1 %v10686_v3 }
 0x376   :  { %2155 = vmatpush1.bf16.msra.mxu0 %v10687_v5  ;;  %2196 = vmatpush1.bf16.msra.mxu1 %v10688_v12  ;;  %v10720_v5 = vld [vmem:[#allocation59_spill] sm:$0xff] }
 0x377   :  { %2156 = vmatprep.subr.bf16.mxu0 %v10689_v17  ;;  %2197 = vmatprep.subr.bf16.mxu1 %v10690_v35  ;;  %v182_v12 = vadd.f32 %v10720_v5, %v10719_v0  ;;  %v10721_v17 = vld [vmem:[#allocation5_spill] sm:$0xff] }
 0x378   :  { %v10722_v35 = vld [vmem:[#allocation61_spill] sm:$0xff] }
 0x37a   :  { %2157 = vmatpush1.bf16.msra.mxu0 %v10691_v22  ;;  %2198 = vmatpush1.bf16.msra.mxu1 %v10692_v37  ;;  %v295_v22 = vadd.f32 %v10722_v35, %v10721_v17  ;;  %v10725_v35 = vld [vmem:[#allocation91_spill] sm:$0xff] }
 0x37b   :  { %2158 = vmatprep.subr.bf16.mxu0 %v10693_v11  ;;  %2199 = vmatprep.subr.bf16.mxu1 %v10694_v59 }
 0x37e   :  { %2159 = vmatpush1.bf16.msra.mxu0 %v10695_v8  ;;  %2200 = vmatpush1.bf16.msra.mxu1 %v10696_v42 }
 0x37f   :  { %2160 = vmatprep.subr.bf16.mxu0 %v10697_v38  ;;  %2201 = vmatprep.subr.bf16.mxu1 %v10698_v52 }
 0x382   :  { %2161 = vmatpush1.bf16.msra.mxu0 %v10699_v43  ;;  %2202 = vmatpush1.bf16.msra.mxu1 %v10700_v44 }
 0x383   :  { %2162 = vmatprep.subr.bf16.mxu0 %v10701_v29  ;;  %2203 = vmatprep.subr.bf16.mxu1 %v10702_v45 }
 0x386   :  { %2163 = vmatpush1.bf16.msra.mxu0 %v10703_v36  ;;  %2204 = vmatpush1.bf16.msra.mxu1 %v10704_v41 }
 0x387   :  { %2164 = vmatprep.subr.bf16.mxu0 %v10705_v49  ;;  %2205 = vmatprep.subr.bf16.mxu1 %v10706_v50 }
 0x38a   :  { %2165 = vmatpush1.bf16.msra.mxu0 %v10707_v25  ;;  %2206 = vmatpush1.bf16.msra.mxu1 %v10708_v26 }
 0x38b   :  { %2166 = vmatprep.subr.bf16.mxu0 %v10709_v46  ;;  %2207 = vmatprep.subr.bf16.mxu1 %v10710_v28 }
 0x38e   :  { %2167 = vmatpush1.bf16.msra.mxu0 %v10711_v20  ;;  %2208 = vmatpush1.bf16.msra.mxu1 %v10712_v18 }
 0x38f   :  { %2254 = vmatprep.subr.bf16.mxu0 %v10713_v48  ;;  %2295 = vmatprep.subr.bf16.mxu1 %v10714_v57 }
 0x3c2   :  { %v1884_v37 = vpop.f32.mrb[36].mxu0  ;;  %v1925_v11 = vpop.f32.mrb[36].mxu1 }
 0x3c3   :  { %v1932_v59 = vadd.f32 %v1884_v37, %v180_v19  ;;  %v1934_v8 = vadd.f32 %v1925_v11, %v293_v63  ;;  %v1886_v42 = vpop.f32.mrb[37].mxu0  ;;  %v1927_v38 = vpop.f32.mrb[37].mxu1  ;;  %v10735_v37 = vld [vmem:[#allocation101_spill] sm:$0xff]  ;;  %v10736_v11 = vld [vmem:[#allocation102_spill] sm:$0xff] }
 0x3c4   :  { %v1933_v52 = vadd.f32 %v1886_v42, %v182_v12  ;;  %v1935_v43 = vadd.f32 %v1927_v38, %v295_v22  ;;  %v1888_v44 = vpop.f32.mrb[38].mxu0  ;;  %v1929_v29 = vpop.f32.mrb[38].mxu1  ;;  %v10724_v12 = vld [vmem:[#allocation57_spill] sm:$0xff]  ;;  %v10734_v22 = vld [vmem:[#allocation100_spill] sm:$0xff]  ;;  %v10740_v38 = vld [vmem:[#allocation106_spill] sm:$0xff] }
 0x3c5   :  { %4306 = vtanh.f32 %v1932_v59  ;;  %v1889_v45 = vpop.f32.mrb[39].mxu0  ;;  %v1930_v36 = vpop.f32.mrb[39].mxu1  ;;  %v10737_v59 = vld [vmem:[#allocation103_spill] sm:$0xff]  ;;  %v10739_v42 = vld [vmem:[#allocation105_spill] sm:$0xff] }
 0x3c6   :  { %4308 = vtanh.f32 %v1933_v52  ;;  %v10741_v52 = vld [vmem:[#allocation107_spill] sm:$0xff] }
 0x3c7   :  { %4310 = vtanh.f32 %v1935_v43  ;;  %v7092_v29 = vld [vmem:[%s10045_s5] sm:$0xff] }
 0x3c8   :  { %4312 = vtanh.f32 %v1934_v8  ;;  %v10738_v8 = vld [vmem:[#allocation104_spill] sm:$0xff] }
 0x3cf   :  { %v4307_v41 = vpop.eup %4306 }
 0x3d0   :  { %v1940_v49 = vmul.f32 0.5, %v4307_v41  ;;  %v4309_v50 = vpop.eup %4308 }
 0x3d1   :  { %v1942_v26 = vmul.f32 0.5, %v4309_v50  ;;  %v4311_v46 = vpop.eup %4310 }
 0x3d2   :  { %v1941_v25 = vadd.f32 0.5, %v1940_v49  ;;  %v4313_v57 = vpop.eup %4312  ;;  %v7098_v49 = vld [vmem:[%s10045_s5 + $0x8] sm:$0xff] }
 0x3d3   :  { %v1943_v28 = vadd.f32 0.5, %v1942_v26  ;;  %v1944_v61 = vmul.f32 0.5, %v4313_v57  ;;  %v7106_v26 = vld [vmem:[%s10045_s5 + $0x18] sm:$0xff]  ;;  %v10745_v57 = vld [vmem:[#allocation111_spill] sm:$0xff] }
 0x3d4   :  { %v1947_v20 = vmul.f32 %v4311_v46, %v1941_v25 }
 0x3d5   :  { %v1946_v18 = vmul.f32 %v1943_v28, %v6523_v6  ;;  %v1945_v19 = vadd.f32 0.5, %v1944_v61  ;;  %v10723_v6 = vld [vmem:[#allocation56_spill] sm:$0xff] }
 0x3d6   :  { %v10746_v61 = vld [vmem:[#allocation112_spill] sm:$0xff] }
 0x3d7   :  { %v7054_v48 = vadd.f32 %v1947_v20, %v1946_v18  ;;  %v10744_v18 = vld [vmem:[#allocation110_spill] sm:$0xff] }
 0x3d9   :  { %4314 = vtanh.f32 %v7054_v48 }
 0x3e3   :  { %v4315_v62 = vpop.eup %4314 }
 0x3e4   :  { %v1950_v63 = vmul.f32 %v4315_v62, %v1945_v19  ;;  %v10747_v19 = vld [vmem:[#allocation113_spill] sm:$0xff]  ;;  %v10748_v62 = vld [vmem:[#allocation114_spill] sm:$0xff] }
 0x3e6   :  { %v7057_v5 = vpack.c.bf16 %v1950_v63, %v1950_v63  ;;  %v10749_v63 = vld [vmem:[#allocation115_spill] sm:$0xff] }
 0x3e8   :  { %2185 = vmatmul.mubr.bf16.vlgmr.msra.gmra.mrb[48].mxu0 %v7057_v5  ;;  %2226 = vmatmul.mubr.bf16.vlgmr.msra.gmra.mrb[48].mxu1 %v7057_v5 }
 0x3e9   :  { %2255 = vmatpush1.bf16.msra.mxu0 %v6533_v55  ;;  %2296 = vmatpush1.bf16.msra.mxu1 %v6539_v56  ;;  %v10726_v55 = vld [vmem:[#allocation92_spill] sm:$0xff]  ;;  %v10727_v56 = vld [vmem:[#allocation93_spill] sm:$0xff] }
 0x3ea   :  { %2256 = vmatprep.subr.bf16.mxu0 %v6545_v1  ;;  %2297 = vmatprep.subr.bf16.mxu1 %v6551_v9  ;;  %v10728_v1 = vld [vmem:[#allocation94_spill] sm:$0xff]  ;;  %v10729_v9 = vld [vmem:[#allocation95_spill] sm:$0xff] }
 0x3ed   :  { %2257 = vmatpush1.bf16.msra.mxu0 %v6557_v13  ;;  %2298 = vmatpush1.bf16.msra.mxu1 %v6563_v14  ;;  %v10730_v13 = vld [vmem:[#allocation96_spill] sm:$0xff]  ;;  %v10731_v14 = vld [vmem:[#allocation97_spill] sm:$0xff] }
 0x3ee   :  { %2258 = vmatprep.subr.bf16.mxu0 %v6569_v15  ;;  %2299 = vmatprep.subr.bf16.mxu1 %v6575_v21  ;;  %v10732_v15 = vld [vmem:[#allocation98_spill] sm:$0xff]  ;;  %v10733_v21 = vld [vmem:[#allocation99_spill] sm:$0xff] }
 0x3f1   :  { %2259 = vmatpush1.bf16.msra.mxu0 %v10723_v6  ;;  %2300 = vmatpush1.bf16.msra.mxu1 %v10724_v12 }
 0x3f2   :  { %2260 = vmatprep.subr.bf16.mxu0 %v10725_v35  ;;  %2301 = vmatprep.subr.bf16.mxu1 %v10726_v55 }
 0x3f5   :  { %2261 = vmatpush1.bf16.msra.mxu0 %v10727_v56  ;;  %2302 = vmatpush1.bf16.msra.mxu1 %v10728_v1 }
 0x3f6   :  { %2262 = vmatprep.subr.bf16.mxu0 %v10729_v9  ;;  %2303 = vmatprep.subr.bf16.mxu1 %v10730_v13  ;;  %v10750_v9 = vld [vmem:[#allocation116_spill] sm:$0xff]  ;;  %v10751_v13 = vld [vmem:[#allocation117_spill] sm:$0xff] }
 0x3f9   :  { %2263 = vmatpush1.bf16.msra.mxu0 %v10731_v14  ;;  %2304 = vmatpush1.bf16.msra.mxu1 %v10732_v15  ;;  %v10752_v14 = vld [vmem:[#allocation118_spill] sm:$0xff] }
 0x3fa   :  { %2264 = vmatprep.subr.bf16.mxu0 %v10733_v21  ;;  %2305 = vmatprep.subr.bf16.mxu1 %v10734_v22  ;;  %v10755_v22 = vld [vmem:[#allocation121_spill] sm:$0xff] }
 0x3fd   :  { %2265 = vmatpush1.bf16.msra.mxu0 %v10735_v37  ;;  %2306 = vmatpush1.bf16.msra.mxu1 %v10736_v11  ;;  %v10756_v37 = vld [vmem:[#allocation122_spill] sm:$0xff]  ;;  %v10758_v11 = vld [vmem:[#allocation124_spill] sm:$0xff] }
 0x3fe   :  { %2266 = vmatprep.subr.bf16.mxu0 %v10737_v59  ;;  %2307 = vmatprep.subr.bf16.mxu1 %v10738_v8  ;;  %v10759_v59 = vld [vmem:[#allocation125_spill] sm:$0xff]  ;;  %v10760_v8 = vld [vmem:[#allocation126_spill] sm:$0xff] }
 0x401   :  { %2267 = vmatpush1.bf16.msra.mxu0 %v10739_v42  ;;  %2308 = vmatpush1.bf16.msra.mxu1 %v10740_v38  ;;  %v10761_v38 = vld [vmem:[#allocation127_spill] sm:$0xff] }
 0x402   :  { %2268 = vmatprep.subr.bf16.mxu0 %v10741_v52  ;;  %2309 = vmatprep.subr.bf16.mxu1 %v6695_v4  ;;  %v10762_v52 = vld [vmem:[#allocation128_spill] sm:$0xff] }
 0x404   :  { %v1986_v43 = vpop.f32.mrb[40].mxu0  ;;  %v2027_v44 = vpop.f32.mrb[40].mxu1 }
 0x405   :  { %v1987_v45 = vadd.f32 %v7092_v29, %v1986_v43  ;;  %v1988_v36 = vpop.f32.mrb[41].mxu0  ;;  %v2029_v41 = vpop.f32.mrb[41].mxu1  ;;  %2269 = vmatpush1.bf16.msra.mxu0 %v6704_v40  ;;  %2310 = vmatpush1.bf16.msra.mxu1 %v6710_v32  ;;  %v10742_v40 = vld [vmem:[#allocation108_spill] sm:$0xff]  ;;  %v10743_v32 = vld [vmem:[#allocation109_spill] sm:$0xff] }
 0x406   :  { %v1989_v50 = vadd.f32 %v7098_v49, %v1988_v36  ;;  %v1990_v25 = vpop.f32.mrb[42].mxu0  ;;  %v2031_v4 = vpop.f32.mrb[42].mxu1  ;;  %v2030_v46 = vadd.f32 %v7106_v26, %v2029_v41  ;;  %2270 = vmatprep.subr.bf16.mxu0 %v6716_v33  ;;  %2311 = vmatprep.subr.bf16.mxu1 %v6722_v39  ;;  %v7122_v33 = vld [vmem:[%s10045_s5 + $0x10] sm:$0xff] }
 0x407   :  { %4316 = vtanh.f32 %v1987_v45  ;;  %v1991_v28 = vpop.f32.mrb[43].mxu0  ;;  %v2032_v20 = vpop.f32.mrb[43].mxu1  ;;  %v2028_v39 = vadd.f32 %v7122_v33, %v2027_v44  ;;  %v10763_v43 = vld [vmem:[#allocation129_spill] sm:$0xff] }
 0x408   :  { %4318 = vtanh.f32 %v1989_v50  ;;  %v7154_v41 = vld [vmem:[%s10044_s6 + $0x4] ss:$16 sps:$4 sm:$0xff]   ;;  %v7160_v50 = vld [vmem:[%s10044_s6 + $0xc] ss:$16 sps:$4 sm:$0xff]   ;;  %v7196_v4 = vld [vmem:[%s10044_s6 + $0x20] ss:$16 sps:$4 sm:$0xff]  }
 0x409   :  { %2271 = vmatpush1.bf16.msra.mxu0 %v6728_v30  ;;  %2312 = vmatpush1.bf16.msra.mxu1 %v6734_v7  ;;  %4320 = vtanh.f32 %v2030_v46  ;;  %v7184_v25 = vld [vmem:[%s10044_s6 + $0x24] ss:$16 sps:$4 sm:$0xff]   ;;  %v7202_v46 = vld [vmem:[%s10044_s6 + $0x28] ss:$16 sps:$4 sm:$0xff]   ;;  %v7214_v20 = vld [vmem:[%s10044_s6 + $0x4c] ss:$16 sps:$4 sm:$0xff]  }
 0x40a   :  { %2272 = vmatprep.subr.bf16.mxu0 %v10742_v40  ;;  %2313 = vmatprep.subr.bf16.mxu1 %v10743_v32  ;;  %4322 = vtanh.f32 %v2028_v39  ;;  %v7208_v28 = vld [vmem:[%s10044_s6 + $0x44] ss:$16 sps:$4 sm:$0xff]   ;;  %v7220_v40 = vld [vmem:[%s10044_s6 + $0x40] ss:$16 sps:$4 sm:$0xff]   ;;  %v7226_v32 = vld [vmem:[%s10044_s6 + $0x48] ss:$16 sps:$4 sm:$0xff]  }
 0x40b   :  { %v7256_v39 = vld [vmem:[%s10044_s6 + $0x84] ss:$16 sps:$4 sm:$0xff]  }
 0x40d   :  { %2273 = vmatpush1.bf16.msra.mxu0 %v10744_v18  ;;  %2314 = vmatpush1.bf16.msra.mxu1 %v10745_v57  ;;  %v7232_v18 = vld [vmem:[%s10044_s6 + $0x64] ss:$16 sps:$4 sm:$0xff]   ;;  %v7238_v57 = vld [vmem:[%s10044_s6 + $0x6c] ss:$16 sps:$4 sm:$0xff]  }
 0x40e   :  { %2274 = vmatprep.subr.bf16.mxu0 %v10746_v61  ;;  %2315 = vmatprep.subr.bf16.mxu1 %v10747_v19  ;;  %v7244_v61 = vld [vmem:[%s10044_s6 + $0x60] ss:$16 sps:$4 sm:$0xff]   ;;  %v7250_v19 = vld [vmem:[%s10044_s6 + $0x68] ss:$16 sps:$4 sm:$0xff]  }
 0x411   :  { %v4317_v30 = vpop.eup %4316  ;;  %2275 = vmatpush1.bf16.msra.mxu0 %v10748_v62  ;;  %2316 = vmatpush1.bf16.msra.mxu1 %v10749_v63  ;;  %v7274_v62 = vld [vmem:[%s10044_s6 + $0x88] ss:$16 sps:$4 sm:$0xff]   ;;  %v7280_v63 = vld [vmem:[%s10044_s6 + $0xa4] ss:$16 sps:$4 sm:$0xff]  }
 0x412   :  { %v2038_v7 = vmul.f32 0.5, %v4317_v30  ;;  %v4319_v6 = vpop.eup %4318  ;;  %2276 = vmatprep.subr.bf16.mxu0 %v6789_v10  ;;  %2317 = vmatprep.subr.bf16.mxu1 %v6795_v58  ;;  %v10753_v10 = vld [vmem:[#allocation119_spill] sm:$0xff]  ;;  %v10754_v58 = vld [vmem:[#allocation120_spill] sm:$0xff] }
 0x413   :  { %v2040_v35 = vmul.f32 0.5, %v4319_v6  ;;  %v4321_v55 = vpop.eup %4320  ;;  %v7262_v30 = vld [vmem:[%s10044_s6 + $0x8c] ss:$16 sps:$4 sm:$0xff]  }
 0x414   :  { %v2039_v12 = vadd.f32 0.5, %v2038_v7  ;;  %v7268_v7 = vld [vmem:[%s10044_s6 + $0x80] ss:$16 sps:$4 sm:$0xff]   ;;  %v7286_v6 = vld [vmem:[%s10044_s6 + $0xac] ss:$16 sps:$4 sm:$0xff]  }
 0x415   :  { %v2041_v56 = vadd.f32 0.5, %v2040_v35  ;;  %2277 = vmatpush1.bf16.msra.mxu0 %v6801_v53  ;;  %2318 = vmatpush1.bf16.msra.mxu1 %v6807_v27  ;;  %v4323_v53 = vpop.eup %4322  ;;  %v10757_v27 = vld [vmem:[#allocation123_spill] sm:$0xff]  ;;  %v7298_v35 = vld [vmem:[%s10044_s6 + $0xa8] ss:$16 sps:$4 sm:$0xff]  }
 0x416   :  { %v2045_v1 = vmul.f32 %v4321_v55, %v2039_v12  ;;  %2278 = vmatprep.subr.bf16.mxu0 %v10750_v9  ;;  %2319 = vmatprep.subr.bf16.mxu1 %v10751_v13  ;;  %v2042_v42 = vmul.f32 0.5, %v4323_v53  ;;  %v7292_v12 = vld [vmem:[%s10044_s6 + $0xa0] ss:$16 sps:$4 sm:$0xff]   ;;  %v7304_v55 = vld [vmem:[%s10044_s6 + $0xc4] ss:$16 sps:$4 sm:$0xff]  }
 0x417   :  { %v2044_v15 = vmul.f32 %v2041_v56, %v10752_v14  ;;  %v7310_v56 = vld [vmem:[%s10044_s6 + $0xcc] ss:$16 sps:$4 sm:$0xff]   ;;  %v7317_v14 = vld [vmem:[%s10044_s6 + $0xc0] ss:$16 sps:$4 sm:$0xff]   ;;  %v7330_v53 = vld [vmem:[%s10044_s6 + $0xe4] ss:$16 sps:$4 sm:$0xff]  }
 0x418   :  { %v2043_v44 = vadd.f32 0.5, %v2042_v42  ;;  %v7349_v42 = vld [vmem:[%s10044_s6 + $0xe8] ss:$16 sps:$4 sm:$0xff]  }
 0x419   :  { %v7134_v21 = vadd.f32 %v2045_v1, %v2044_v15  ;;  %2279 = vmatpush1.bf16.msra.mxu0 %v10753_v10  ;;  %2320 = vmatpush1.bf16.msra.mxu1 %v10754_v58  ;;  %v7323_v15 = vld [vmem:[%s10044_s6 + $0xc8] ss:$16 sps:$4 sm:$0xff]  }
 0x41a   :  { %2280 = vmatprep.subr.bf16.mxu0 %v10755_v22  ;;  %2321 = vmatprep.subr.bf16.mxu1 %v10756_v37 }
 0x41b   :  { %4324 = vtanh.f32 %v7134_v21 }
 0x41d   :  { %2281 = vmatpush1.bf16.msra.mxu0 %v10757_v27  ;;  %2322 = vmatpush1.bf16.msra.mxu1 %v10758_v11  ;;  %v7336_v27 = vld [vmem:[%s10044_s6 + $0xec] ss:$16 sps:$4 sm:$0xff]  }
 0x41e   :  { %2282 = vmatprep.subr.bf16.mxu0 %v10759_v59  ;;  %2323 = vmatprep.subr.bf16.mxu1 %v10760_v8  ;;  %v7343_v8 = vld [vmem:[%s10044_s6 + $0xe0] ss:$16 sps:$4 sm:$0xff]  }
 0x421   :  { %2283 = vmatpush1.bf16.msra.mxu0 %v10761_v38  ;;  %2324 = vmatpush1.bf16.msra.mxu1 %v10762_v52  ;;  %v7361_v38 = vld [vmem:[%s10044_s6 + $0x10c] ss:$16 sps:$4 sm:$0xff]   ;;  %v7367_v52 = vld [vmem:[%s10044_s6 + $0x100] ss:$16 sps:$4 sm:$0xff]  }
 0x422   :  { %2284 = vmatprep.subr.bf16.mxu0 %v10763_v43  ;;  %2325 = vmatprep.subr.bf16.mxu1 %v6895_v23  ;;  %v7373_v43 = vld [vmem:[%s10044_s6 + $0x108] ss:$16 sps:$4 sm:$0xff]  }
 0x425   :  { %v4325_v45 = vpop.eup %4324  ;;  %2285 = vmatpush1.bf16.msra.mxu0 %v6901_v54  ;;  %2326 = vmatpush1.bf16.msra.mxu1 %v6907_v47  ;;  %v7172_v54 = vld [vmem:[%s10044_s6] ss:$16 sps:$4 sm:$0xff]   ;;  %v7178_v47 = vld [vmem:[%s10044_s6 + $0x8] ss:$16 sps:$4 sm:$0xff]  }
 0x426   :  { %v2048_v36 = vmul.f32 %v4325_v45, %v2043_v44  ;;  %2352 = vmatprep.subr.bf16.mxu0 %v7154_v41  ;;  %2393 = vmatprep.subr.bf16.mxu1 %v7160_v50  ;;  %v7379_v44 = vld [vmem:[%s10044_s6 + $0x124] ss:$16 sps:$4 sm:$0xff]   ;;  %v7385_v45 = vld [vmem:[%s10044_s6 + $0x12c] ss:$16 sps:$4 sm:$0xff]  }
 0x427   :  { %10764 = vst [vmem:[#allocation7_spill] sm:$0xff] %v7379_v44  ;;  %10765 = vst [vmem:[#allocation8_spill] sm:$0xff] %v7385_v45 }
 0x428   :  { %v7163_v23 = vpack.c.bf16 %v2048_v36, %v2048_v36 }
 0x42a   :  { %2286 = vmatprep.mubr.bf16.mxu0 %v7163_v23  ;;  %2327 = vmatprep.mubr.bf16.mxu1 %v7163_v23 }
 0x42b   :  { %2287 = vmatmul.mubr.bf16.vlgmr.msra.gmra.mrb[52].mxu0 %v7057_v5  ;;  %2328 = vmatmul.mubr.bf16.vlgmr.msra.gmra.mrb[52].mxu1 %v7057_v5  ;;  %v7190_v5 = vld [vmem:[%s10044_s6 + $0x2c] ss:$16 sps:$4 sm:$0xff]  }
 0x42c   :  { %2353 = vmatpush1.bf16.msra.mxu0 %v7172_v54  ;;  %2394 = vmatpush1.bf16.msra.mxu1 %v7178_v47 }
 0x42d   :  { %2354 = vmatprep.subr.bf16.mxu0 %v7184_v25  ;;  %2395 = vmatprep.subr.bf16.mxu1 %v7190_v5 }
 0x430   :  { %2355 = vmatpush1.bf16.msra.mxu0 %v7196_v4  ;;  %2396 = vmatpush1.bf16.msra.mxu1 %v7202_v46 }
 0x431   :  { %2356 = vmatprep.subr.bf16.mxu0 %v7208_v28  ;;  %2397 = vmatprep.subr.bf16.mxu1 %v7214_v20 }
 0x434   :  { %2357 = vmatpush1.bf16.msra.mxu0 %v7220_v40  ;;  %2398 = vmatpush1.bf16.msra.mxu1 %v7226_v32 }
 0x435   :  { %2358 = vmatprep.subr.bf16.mxu0 %v7232_v18  ;;  %2399 = vmatprep.subr.bf16.mxu1 %v7238_v57 }
 0x438   :  { %2359 = vmatpush1.bf16.msra.mxu0 %v7244_v61  ;;  %2400 = vmatpush1.bf16.msra.mxu1 %v7250_v19 }
 0x439   :  { %2360 = vmatprep.subr.bf16.mxu0 %v7256_v39  ;;  %2401 = vmatprep.subr.bf16.mxu1 %v7262_v30 }
 0x43c   :  { %2361 = vmatpush1.bf16.msra.mxu0 %v7268_v7  ;;  %2402 = vmatpush1.bf16.msra.mxu1 %v7274_v62 }
 0x43d   :  { %2362 = vmatprep.subr.bf16.mxu0 %v7280_v63  ;;  %2403 = vmatprep.subr.bf16.mxu1 %v7286_v6 }
 0x440   :  { %2363 = vmatpush1.bf16.msra.mxu0 %v7292_v12  ;;  %2404 = vmatpush1.bf16.msra.mxu1 %v7298_v35 }
 0x441   :  { %2364 = vmatprep.subr.bf16.mxu0 %v7304_v55  ;;  %2405 = vmatprep.subr.bf16.mxu1 %v7310_v56 }
 0x444   :  { %v2084_v1 = vpop.f32.mrb[44].mxu0  ;;  %v2125_v9 = vpop.f32.mrb[44].mxu1  ;;  %2365 = vmatpush1.bf16.msra.mxu0 %v7317_v14  ;;  %2406 = vmatpush1.bf16.msra.mxu1 %v7323_v15 }
 0x445   :  { %v2085_v13 = vadd.f32 %v2084_v1, %v6945_v31  ;;  %v2086_v10 = vpop.f32.mrb[45].mxu0  ;;  %v2127_v58 = vpop.f32.mrb[45].mxu1  ;;  %2366 = vmatprep.subr.bf16.mxu0 %v7330_v53  ;;  %2407 = vmatprep.subr.bf16.mxu1 %v7336_v27  ;;  %v2126_v36 = vadd.f32 %v2125_v9, %v6971_v24  ;;  %v7404_v24 = vld [vmem:[%s10044_s6 + $0x144] ss:$16 sps:$4 sm:$0xff]   ;;  %v7410_v9 = vld [vmem:[%s10044_s6 + $0x14c] ss:$16 sps:$4 sm:$0xff]  }
 0x446   :  { %v2087_v22 = vadd.f32 %v2086_v10, %v6950_v34  ;;  %v2088_v37 = vpop.f32.mrb[46].mxu0  ;;  %v2129_v31 = vpop.f32.mrb[46].mxu1  ;;  %v2128_v11 = vadd.f32 %v2127_v58, %v6955_v51  ;;  %v7355_v51 = vld [vmem:[%s10044_s6 + $0x104] ss:$16 sps:$4 sm:$0xff]   ;;  %v7398_v10 = vld [vmem:[%s10044_s6 + $0x128] ss:$16 sps:$4 sm:$0xff]  }
 0x447   :  { %4326 = vtanh.f32 %v2085_v13  ;;  %v2089_v34 = vpop.f32.mrb[47].mxu0  ;;  %v2130_v59 = vpop.f32.mrb[47].mxu1  ;;  %v7392_v13 = vld [vmem:[%s10044_s6 + $0x120] ss:$16 sps:$4 sm:$0xff]   ;;  %10767 = vst [vmem:[#allocation10_spill] sm:$0xff] %v7398_v10  ;;  %10768 = vst [vmem:[#allocation11_spill] sm:$0xff] %v7404_v24 }
 0x448   :  { %4328 = vtanh.f32 %v2087_v22  ;;  %2367 = vmatpush1.bf16.msra.mxu0 %v7343_v8  ;;  %2408 = vmatpush1.bf16.msra.mxu1 %v7349_v42  ;;  %10766 = vst [vmem:[#allocation9_spill] sm:$0xff] %v7392_v13  ;;  %10769 = vst [vmem:[#allocation12_spill] sm:$0xff] %v7410_v9  ;;  %v7416_v34 = vld [vmem:[%s10044_s6 + $0x140] ss:$16 sps:$4 sm:$0xff]   ;;  %v7422_v59 = vld [vmem:[%s10044_s6 + $0x148] ss:$16 sps:$4 sm:$0xff]  }
 0x449   :  { %2368 = vmatprep.subr.bf16.mxu0 %v7355_v51  ;;  %2409 = vmatprep.subr.bf16.mxu1 %v7361_v38  ;;  %4330 = vtanh.f32 %v2128_v11  ;;  %10770 = vst [vmem:[#allocation13_spill] sm:$0xff] %v7416_v34  ;;  %10771 = vst [vmem:[#allocation14_spill] sm:$0xff] %v7422_v59 }
 0x44a   :  { %4332 = vtanh.f32 %v2126_v36  ;;  %v7428_v36 = vld [vmem:[%s10044_s6 + $0x164] ss:$16 sps:$4 sm:$0xff]  }
 0x44b   :  { %10772 = vst [vmem:[#allocation15_spill] sm:$0xff] %v7428_v36 }
 0x44c   :  { %2369 = vmatpush1.bf16.msra.mxu0 %v7367_v52  ;;  %2410 = vmatpush1.bf16.msra.mxu1 %v7373_v43 }
 0x44d   :  { %2370 = vmatprep.subr.bf16.mxu0 %v7379_v44  ;;  %2411 = vmatprep.subr.bf16.mxu1 %v7385_v45 }
 0x450   :  { %2371 = vmatpush1.bf16.msra.mxu0 %v7392_v13  ;;  %2412 = vmatpush1.bf16.msra.mxu1 %v7398_v10 }
 0x451   :  { %v4327_v1 = vpop.eup %4326  ;;  %2372 = vmatprep.subr.bf16.mxu0 %v7404_v24  ;;  %2413 = vmatprep.subr.bf16.mxu1 %v7410_v9 }
 0x452   :  { %v2136_v58 = vmul.f32 0.5, %v4327_v1  ;;  %v4329_v22 = vpop.eup %4328 }
 0x453   :  { %v2138_v31 = vmul.f32 0.5, %v4329_v22  ;;  %v4331_v11 = vpop.eup %4330 }
 0x454   :  { %v2137_v37 = vadd.f32 0.5, %v2136_v58  ;;  %2373 = vmatpush1.bf16.msra.mxu0 %v7416_v34  ;;  %2414 = vmatpush1.bf16.msra.mxu1 %v7422_v59  ;;  %v7434_v58 = vld [vmem:[%s10044_s6 + $0x16c] ss:$16 sps:$4 sm:$0xff]  }
 0x455   :  { %v2139_v1 = vadd.f32 0.5, %v2138_v31  ;;  %2374 = vmatprep.subr.bf16.mxu0 %v7428_v36  ;;  %10773 = vst [vmem:[#allocation16_spill] sm:$0xff] %v7434_v58  ;;  %2415 = vmatprep.subr.bf16.mxu1 %v7434_v58  ;;  %v7447_v31 = vld [vmem:[%s10044_s6 + $0x168] ss:$16 sps:$4 sm:$0xff]  }
 0x456   :  { %v2143_v9 = vmul.f32 %v4331_v11, %v2137_v37  ;;  %v7441_v37 = vld [vmem:[%s10044_s6 + $0x160] ss:$16 sps:$4 sm:$0xff]   ;;  %10775 = vst [vmem:[#allocation18_spill] sm:$0xff] %v7447_v31 }
 0x457   :  { %v2142_v22 = vmul.f32 %v2139_v1, %v6988_v2  ;;  %10774 = vst [vmem:[#allocation17_spill] sm:$0xff] %v7441_v37  ;;  %v7455_v2 = vld [vmem:[%s10044_s6 + $0x184] ss:$16 sps:$4 sm:$0xff]   ;;  %v7461_v1 = vld [vmem:[%s10044_s6 + $0x18c] ss:$16 sps:$4 sm:$0xff]  }
 0x458   :  { %2375 = vmatpush1.bf16.msra.mxu0 %v7441_v37  ;;  %2416 = vmatpush1.bf16.msra.mxu1 %v7447_v31  ;;  %10777 = vst [vmem:[#allocation20_spill] sm:$0xff] %v7455_v2  ;;  %10778 = vst [vmem:[#allocation21_spill] sm:$0xff] %v7461_v1  ;;  %v7486_v31 = vld [vmem:[%s10044_s6 + $0x1ac] ss:$16 sps:$4 sm:$0xff]   ;;  %v7498_v37 = vld [vmem:[%s10044_s6 + $0x1a8] ss:$16 sps:$4 sm:$0xff]  }
 0x459   :  { %v7450_v11 = vadd.f32 %v2143_v9, %v2142_v22  ;;  %2376 = vmatprep.subr.bf16.mxu0 %v7455_v2  ;;  %2417 = vmatprep.subr.bf16.mxu1 %v7461_v1  ;;  %v7468_v9 = vld [vmem:[%s10044_s6 + $0x180] ss:$16 sps:$4 sm:$0xff]   ;;  %v7474_v22 = vld [vmem:[%s10044_s6 + $0x188] ss:$16 sps:$4 sm:$0xff]   ;;  %v4333_v2 = vpop.eup %4332  ;;  %v7480_v1 = vld [vmem:[%s10044_s6 + $0x1a4] ss:$16 sps:$4 sm:$0xff]  }
 0x45a   :  { %10779 = vst [vmem:[#allocation22_spill] sm:$0xff] %v7468_v9  ;;  %10780 = vst [vmem:[#allocation23_spill] sm:$0xff] %v7474_v22 }
 0x45b   :  { %10776 = vst [vmem:[#allocation19_spill] sm:$0xff] %v7450_v11  ;;  %4334 = vtanh.f32 %v7450_v11  ;;  %10781 = vst [vmem:[#allocation24_spill] sm:$0xff] %v7480_v1  ;;  %v7546_v11 = vld [vmem:[%s10044_s6 + $0x1e8] ss:$16 sps:$4 sm:$0xff]  }
 0x45c   :  { %2377 = vmatpush1.bf16.msra.mxu0 %v7468_v9  ;;  %2418 = vmatpush1.bf16.msra.mxu1 %v7474_v22  ;;  %10782 = vst [vmem:[#allocation25_spill] sm:$0xff] %v7486_v31  ;;  %v2140_v9 = vmul.f32 0.5, %v4333_v2  ;;  %v7492_v22 = vld [vmem:[%s10044_s6 + $0x1a0] ss:$16 sps:$4 sm:$0xff]   ;;  %10784 = vst [vmem:[#allocation27_spill] sm:$0xff] %v7498_v37 }
 0x45d   :  { %2378 = vmatprep.subr.bf16.mxu0 %v7480_v1  ;;  %2419 = vmatprep.subr.bf16.mxu1 %v7486_v31  ;;  %10783 = vst [vmem:[#allocation26_spill] sm:$0xff] %v7492_v22  ;;  %v7504_v1 = vld [vmem:[%s10044_s6 + $0x1c4] ss:$16 sps:$4 sm:$0xff]   ;;  %v7510_v2 = vld [vmem:[%s10044_s6 + $0x1cc] ss:$16 sps:$4 sm:$0xff]   ;;  %10792 = vst [vmem:[#allocation35_spill] sm:$0xff] %v7546_v11 }
 0x45e   :  { %10785 = vst [vmem:[#allocation28_spill] sm:$0xff] %v7504_v1  ;;  %10786 = vst [vmem:[#allocation29_spill] sm:$0xff] %v7510_v2  ;;  %v7516_v31 = vld [vmem:[%s10044_s6 + $0x1c0] ss:$16 sps:$4 sm:$0xff]  }
 0x45f   :  { %10787 = vst [vmem:[#allocation30_spill] sm:$0xff] %v7516_v31 }
 0x460   :  { %2379 = vmatpush1.bf16.msra.mxu0 %v7492_v22  ;;  %2420 = vmatpush1.bf16.msra.mxu1 %v7498_v37  ;;  %v2141_v22 = vadd.f32 0.5, %v2140_v9  ;;  %v7522_v37 = vld [vmem:[%s10044_s6 + $0x1c8] ss:$16 sps:$4 sm:$0xff]   ;;  %v7534_v9 = vld [vmem:[%s10044_s6 + $0x1ec] ss:$16 sps:$4 sm:$0xff]  }
 0x461   :  { %2380 = vmatprep.subr.bf16.mxu0 %v7504_v1  ;;  %2421 = vmatprep.subr.bf16.mxu1 %v7510_v2  ;;  %10788 = vst [vmem:[#allocation31_spill] sm:$0xff] %v7522_v37  ;;  %v7528_v2 = vld [vmem:[%s10044_s6 + $0x1e4] ss:$16 sps:$4 sm:$0xff]   ;;  %10790 = vst [vmem:[#allocation33_spill] sm:$0xff] %v7534_v9 }
 0x462   :  { %10789 = vst [vmem:[#allocation32_spill] sm:$0xff] %v7528_v2 }
 0x464   :  { %2381 = vmatpush1.bf16.msra.mxu0 %v7516_v31  ;;  %2422 = vmatpush1.bf16.msra.mxu1 %v7522_v37  ;;  %v7540_v37 = vld [vmem:[%s10044_s6 + $0x1e0] ss:$16 sps:$4 sm:$0xff]  }
 0x465   :  { %v4335_v1 = vpop.eup %4334  ;;  %2382 = vmatprep.subr.bf16.mxu0 %v7528_v2  ;;  %2423 = vmatprep.subr.bf16.mxu1 %v7534_v9  ;;  %10791 = vst [vmem:[#allocation34_spill] sm:$0xff] %v7540_v37  ;;  %v7552_v9 = vld [vmem:[%s10041_s2 + $0x4] ss:$16 sps:$4 sm:$0xff]  }
 0x466   :  { %v2146_v31 = vmul.f32 %v4335_v1, %v2141_v22  ;;  %10793 = vst [vmem:[#allocation36_spill] sm:$0xff] %v7552_v9  ;;  %v7558_v1 = vld [vmem:[%s10041_s2 + $0xc] ss:$16 sps:$4 sm:$0xff]   ;;  %v7572_v22 = vld [vmem:[%s10041_s2 + $0x8] ss:$16 sps:$4 sm:$0xff]  }
 0x467   :  { %10794 = vst [vmem:[#allocation37_spill] sm:$0xff] %v7558_v1  ;;  %10796 = vst [vmem:[#allocation39_spill] sm:$0xff] %v7572_v22 }
 0x468   :  { %2383 = vmatpush1.bf16.msra.mxu0 %v7540_v37  ;;  %2424 = vmatpush1.bf16.msra.mxu1 %v7546_v11  ;;  %v2351_v2 = vpack.c.bf16 %v2146_v31, %v2146_v31  ;;  %v7566_v31 = vld [vmem:[%s10041_s2] ss:$16 sps:$4 sm:$0xff]  }
 0x469   :  { %2454 = vmatprep.subr.bf16.mxu0 %v7552_v9  ;;  %2495 = vmatprep.subr.bf16.mxu1 %v7558_v1  ;;  %10795 = vst [vmem:[#allocation38_spill] sm:$0xff] %v7566_v31  ;;  %v10828_v1 = vld [vmem:[#allocation64_spill] sm:$0xff]  ;;  %v10829_v9 = vld [vmem:[#allocation63_spill] sm:$0xff]  ;;  %v10830_v37 = vld [vmem:[#allocation65_spill] sm:$0xff] }
 0x46a   :  { %2384 = vmatprep.mubr.bf16.mxu0 %v2351_v2  ;;  %2425 = vmatprep.mubr.bf16.mxu1 %v2351_v2  ;;  %v7578_v2 = vld [vmem:[%s10041_s2 + $0x24] ss:$16 sps:$4 sm:$0xff]   ;;  %v188_v11 = vadd.f32 %v10829_v9, %v10719_v0  ;;  %v301_v58 = vadd.f32 %v10830_v37, %v10721_v17 }
 0x46b   :  { %2385 = vmatmul.mubr.bf16.vlgmr.msra.gmra.mrb[56].mxu0 %v7163_v23  ;;  %2426 = vmatmul.mubr.bf16.vlgmr.msra.gmra.mrb[56].mxu1 %v7163_v23  ;;  %10797 = vst [vmem:[#allocation40_spill] sm:$0xff] %v7578_v2  ;;  %v7584_v23 = vld [vmem:[%s10041_s2 + $0x2c] ss:$16 sps:$4 sm:$0xff]  }
 0x46c   :  { %2455 = vmatpush1.bf16.msra.mxu0 %v7566_v31  ;;  %2496 = vmatpush1.bf16.msra.mxu1 %v7572_v22  ;;  %10798 = vst [vmem:[#allocation41_spill] sm:$0xff] %v7584_v23  ;;  %v7592_v22 = vld [vmem:[%s10041_s2 + $0x20] ss:$16 sps:$4 sm:$0xff]  }
 0x46d   :  { %2456 = vmatprep.subr.bf16.mxu0 %v7578_v2  ;;  %2497 = vmatprep.subr.bf16.mxu1 %v7584_v23  ;;  %10799 = vst [vmem:[#allocation42_spill] sm:$0xff] %v7592_v22  ;;  %v7598_v2 = vld [vmem:[%s10041_s2 + $0x28] ss:$16 sps:$4 sm:$0xff]   ;;  %v7604_v23 = vld [vmem:[%s10041_s2 + $0x44] ss:$16 sps:$4 sm:$0xff]  }
 0x46e   :  { %2486 = vmatprep.mubr.bf16.mxu0 %v10686_v3  ;;  %2527 = vmatprep.mubr.bf16.mxu1 %v10686_v3  ;;  %10800 = vst [vmem:[#allocation43_spill] sm:$0xff] %v7598_v2  ;;  %10801 = vst [vmem:[#allocation44_spill] sm:$0xff] %v7604_v23  ;;  %v7610_v3 = vld [vmem:[%s10041_s2 + $0x4c] ss:$16 sps:$4 sm:$0xff]  }
 0x46f   :  { %10802 = vst [vmem:[#allocation45_spill] sm:$0xff] %v7610_v3 }
 0x470   :  { %2457 = vmatpush1.bf16.msra.mxu0 %v7592_v22  ;;  %2498 = vmatpush1.bf16.msra.mxu1 %v7598_v2  ;;  %v7616_v22 = vld [vmem:[%s10041_s2 + $0x40] ss:$16 sps:$4 sm:$0xff]   ;;  %v7622_v2 = vld [vmem:[%s10041_s2 + $0x48] ss:$16 sps:$4 sm:$0xff]  }
 0x471   :  { %2458 = vmatprep.subr.bf16.mxu0 %v7604_v23  ;;  %2499 = vmatprep.subr.bf16.mxu1 %v7610_v3  ;;  %10803 = vst [vmem:[#allocation46_spill] sm:$0xff] %v7616_v22  ;;  %10804 = vst [vmem:[#allocation47_spill] sm:$0xff] %v7622_v2  ;;  %v7628_v23 = vld [vmem:[%s10041_s2 + $0x64] ss:$16 sps:$4 sm:$0xff]   ;;  %v7634_v3 = vld [vmem:[%s10041_s2 + $0x6c] ss:$16 sps:$4 sm:$0xff]  }
 0x472   :  { %10805 = vst [vmem:[#allocation48_spill] sm:$0xff] %v7628_v23  ;;  %10806 = vst [vmem:[#allocation49_spill] sm:$0xff] %v7634_v3 }
 0x474   :  { %2459 = vmatpush1.bf16.msra.mxu0 %v7616_v22  ;;  %2500 = vmatpush1.bf16.msra.mxu1 %v7622_v2  ;;  %v7640_v22 = vld [vmem:[%s10041_s2 + $0x60] ss:$16 sps:$4 sm:$0xff]   ;;  %v7646_v2 = vld [vmem:[%s10041_s2 + $0x68] ss:$16 sps:$4 sm:$0xff]  }
 0x475   :  { %2460 = vmatprep.subr.bf16.mxu0 %v7628_v23  ;;  %2501 = vmatprep.subr.bf16.mxu1 %v7634_v3  ;;  %10807 = vst [vmem:[#allocation50_spill] sm:$0xff] %v7640_v22  ;;  %10808 = vst [vmem:[#allocation51_spill] sm:$0xff] %v7646_v2  ;;  %v7652_v23 = vld [vmem:[%s10041_s2 + $0x84] ss:$16 sps:$4 sm:$0xff]   ;;  %v7658_v3 = vld [vmem:[%s10041_s2 + $0x8c] ss:$16 sps:$4 sm:$0xff]  }
 0x476   :  { %10809 = vst [vmem:[#allocation52_spill] sm:$0xff] %v7652_v23  ;;  %10810 = vst [vmem:[#allocation53_spill] sm:$0xff] %v7658_v3 }
 0x478   :  { %2461 = vmatpush1.bf16.msra.mxu0 %v7640_v22  ;;  %2502 = vmatpush1.bf16.msra.mxu1 %v7646_v2  ;;  %v7664_v22 = vld [vmem:[%s10041_s2 + $0x80] ss:$16 sps:$4 sm:$0xff]   ;;  %v7670_v2 = vld [vmem:[%s10041_s2 + $0x88] ss:$16 sps:$4 sm:$0xff]  }
 0x479   :  { %2462 = vmatprep.subr.bf16.mxu0 %v7652_v23  ;;  %2503 = vmatprep.subr.bf16.mxu1 %v7658_v3  ;;  %10811 = vst [vmem:[#allocation54_spill] sm:$0xff] %v7664_v22  ;;  %10812 = vst [vmem:[#allocation55_spill] sm:$0xff] %v7670_v2  ;;  %v7676_v23 = vld [vmem:[%s10041_s2 + $0xa4] ss:$16 sps:$4 sm:$0xff]   ;;  %v7682_v3 = vld [vmem:[%s10041_s2 + $0xac] ss:$16 sps:$4 sm:$0xff]  }
 0x47a   :  { %10813 = vst [vmem:[#allocation78_spill] sm:$0xff] %v7676_v23  ;;  %10814 = vst [vmem:[#allocation79_spill] sm:$0xff] %v7682_v3 }
 0x47c   :  { %2463 = vmatpush1.bf16.msra.mxu0 %v7664_v22  ;;  %2504 = vmatpush1.bf16.msra.mxu1 %v7670_v2  ;;  %v7688_v22 = vld [vmem:[%s10041_s2 + $0xa0] ss:$16 sps:$4 sm:$0xff]   ;;  %v7694_v2 = vld [vmem:[%s10041_s2 + $0xa8] ss:$16 sps:$4 sm:$0xff]  }
 0x47d   :  { %2464 = vmatprep.subr.bf16.mxu0 %v7676_v23  ;;  %2505 = vmatprep.subr.bf16.mxu1 %v7682_v3  ;;  %10815 = vst [vmem:[#allocation80_spill] sm:$0xff] %v7688_v22  ;;  %10816 = vst [vmem:[#allocation81_spill] sm:$0xff] %v7694_v2  ;;  %v7700_v23 = vld [vmem:[%s10041_s2 + $0xc4] ss:$16 sps:$4 sm:$0xff]   ;;  %v7706_v3 = vld [vmem:[%s10041_s2 + $0xcc] ss:$16 sps:$4 sm:$0xff]  }
 0x47e   :  { %10817 = vst [vmem:[#allocation82_spill] sm:$0xff] %v7700_v23  ;;  %10818 = vst [vmem:[#allocation83_spill] sm:$0xff] %v7706_v3 }
 0x480   :  { %2465 = vmatpush1.bf16.msra.mxu0 %v7688_v22  ;;  %2506 = vmatpush1.bf16.msra.mxu1 %v7694_v2  ;;  %v7712_v22 = vld [vmem:[%s10041_s2 + $0xc0] ss:$16 sps:$4 sm:$0xff]   ;;  %v7718_v2 = vld [vmem:[%s10041_s2 + $0xc8] ss:$16 sps:$4 sm:$0xff]  }
 0x481   :  { %2466 = vmatprep.subr.bf16.mxu0 %v7700_v23  ;;  %2507 = vmatprep.subr.bf16.mxu1 %v7706_v3  ;;  %10819 = vst [vmem:[#allocation84_spill] sm:$0xff] %v7712_v22  ;;  %10820 = vst [vmem:[#allocation85_spill] sm:$0xff] %v7718_v2  ;;  %v7724_v23 = vld [vmem:[%s10041_s2 + $0xe4] ss:$16 sps:$4 sm:$0xff]   ;;  %v7730_v3 = vld [vmem:[%s10041_s2 + $0xec] ss:$16 sps:$4 sm:$0xff]  }
 0x482   :  { %10821 = vst [vmem:[#allocation86_spill] sm:$0xff] %v7724_v23  ;;  %10822 = vst [vmem:[#allocation87_spill] sm:$0xff] %v7730_v3 }
 0x484   :  { %2467 = vmatpush1.bf16.msra.mxu0 %v7712_v22  ;;  %2508 = vmatpush1.bf16.msra.mxu1 %v7718_v2  ;;  %v7736_v22 = vld [vmem:[%s10041_s2 + $0xe0] ss:$16 sps:$4 sm:$0xff]   ;;  %v7742_v2 = vld [vmem:[%s10041_s2 + $0xe8] ss:$16 sps:$4 sm:$0xff]  }
 0x485   :  { %2468 = vmatprep.subr.bf16.mxu0 %v7724_v23  ;;  %2509 = vmatprep.subr.bf16.mxu1 %v7730_v3  ;;  %10823 = vst [vmem:[#allocation88_spill] sm:$0xff] %v7736_v22  ;;  %10824 = vst [vmem:[#allocation89_spill] sm:$0xff] %v7742_v2  ;;  %v7748_v23 = vld [vmem:[%s10042_s4 + $0x4] ss:$16 sps:$4 sm:$0xff]   ;;  %v7754_v3 = vld [vmem:[%s10042_s4 + $0xc] ss:$16 sps:$4 sm:$0xff]  }
 0x486   :  { %10825 = vst [vmem:[#allocation90_spill] sm:$0xff] %v7748_v23  ;;  %10826 = vst [vmem:[#allocation58_spill] sm:$0xff] %v7754_v3 }
 0x488   :  { %2469 = vmatpush1.bf16.msra.mxu0 %v7736_v22  ;;  %2510 = vmatpush1.bf16.msra.mxu1 %v7742_v2  ;;  %v10827_v22 = vld [vmem:[#allocation62_spill] sm:$0xff]  ;;  %v299_v2 = vadd.f32 %v10828_v1, %v10717_v16 }
 0x489   :  { %2556 = vmatprep.subr.bf16.mxu0 %v7748_v23  ;;  %2597 = vmatprep.subr.bf16.mxu1 %v7754_v3  ;;  %v186_v31 = vadd.f32 %v10827_v22, %v10715_v60 }
 0x4bb   :  { %v2186_v23 = vpop.f32.mrb[48].mxu0  ;;  %v2227_v36 = vpop.f32.mrb[48].mxu1 }
 0x4bc   :  { %v2234_v59 = vadd.f32 %v2186_v23, %v186_v31  ;;  %v2236_v34 = vadd.f32 %v2227_v36, %v299_v2  ;;  %v2188_v24 = vpop.f32.mrb[49].mxu0  ;;  %v2229_v10 = vpop.f32.mrb[49].mxu1  ;;  %v7824_v23 = vld [vmem:[%s10042_s4 + $0x40] ss:$16 sps:$4 sm:$0xff]  }
 0x4bd   :  { %v2235_v13 = vadd.f32 %v2188_v24, %v188_v11  ;;  %v2237_v3 = vadd.f32 %v2229_v10, %v301_v58  ;;  %v2190_v45 = vpop.f32.mrb[50].mxu0  ;;  %v2231_v44 = vpop.f32.mrb[50].mxu1  ;;  %v7812_v58 = vld [vmem:[%s10042_s4 + $0x44] ss:$16 sps:$4 sm:$0xff]   ;;  %v7818_v11 = vld [vmem:[%s10042_s4 + $0x4c] ss:$16 sps:$4 sm:$0xff]  }
 0x4be   :  { %4336 = vtanh.f32 %v2234_v59  ;;  %v2191_v22 = vpop.f32.mrb[51].mxu0  ;;  %v2232_v60 = vpop.f32.mrb[51].mxu1  ;;  %v7806_v59 = vld [vmem:[%s10042_s4 + $0x28] ss:$16 sps:$4 sm:$0xff]  }
 0x4bf   :  { %4338 = vtanh.f32 %v2235_v13  ;;  %v7830_v22 = vld [vmem:[%s10042_s4 + $0x48] ss:$16 sps:$4 sm:$0xff]  }
 0x4c0   :  { %4340 = vtanh.f32 %v2237_v3 }
 0x4c1   :  { %4342 = vtanh.f32 %v2236_v34  ;;  %v7800_v34 = vld [vmem:[%s10042_s4 + $0x20] ss:$16 sps:$4 sm:$0xff]  }
 0x4c8   :  { %v4337_v1 = vpop.eup %4336 }
 0x4c9   :  { %v2242_v9 = vmul.f32 0.5, %v4337_v1  ;;  %v4339_v0 = vpop.eup %4338  ;;  %v7836_v1 = vld [vmem:[%s10042_s4 + $0x64] ss:$16 sps:$4 sm:$0xff]  }
 0x4ca   :  { %v2244_v37 = vmul.f32 0.5, %v4339_v0  ;;  %v4341_v17 = vpop.eup %4340  ;;  %v7782_v0 = vld [vmem:[%s10042_s4 + $0x8] ss:$16 sps:$4 sm:$0xff]  }
 0x4cb   :  { %v2243_v16 = vadd.f32 0.5, %v2242_v9  ;;  %v4343_v44 = vpop.eup %4342  ;;  %v7842_v9 = vld [vmem:[%s10042_s4 + $0x6c] ss:$16 sps:$4 sm:$0xff]  }
 0x4cc   :  { %v2245_v31 = vadd.f32 0.5, %v2244_v37  ;;  %v2246_v45 = vmul.f32 0.5, %v4343_v44  ;;  %v7848_v37 = vld [vmem:[%s10042_s4 + $0x60] ss:$16 sps:$4 sm:$0xff]  }
 0x4cd   :  { %v2249_v36 = vmul.f32 %v4341_v17, %v2243_v16  ;;  %v7776_v16 = vld [vmem:[%s10042_s4] ss:$16 sps:$4 sm:$0xff]   ;;  %v7788_v17 = vld [vmem:[%s10042_s4 + $0x24] ss:$16 sps:$4 sm:$0xff]   ;;  %10831 = vst [vmem:[#allocation60_spill] sm:$0xff] %v7848_v37 }
 0x4ce   :  { %v2248_v2 = vmul.f32 %v2245_v31, %v7054_v48  ;;  %v2247_v60 = vadd.f32 0.5, %v2246_v45  ;;  %v7794_v48 = vld [vmem:[%s10042_s4 + $0x2c] ss:$16 sps:$4 sm:$0xff]   ;;  %v7854_v31 = vld [vmem:[%s10042_s4 + $0x68] ss:$16 sps:$4 sm:$0xff]  }
 0x4cf   :  { %10832 = vst [vmem:[#allocation59_spill] sm:$0xff] %v7854_v31  ;;  %v7872_v44 = vld [vmem:[%s10042_s4 + $0x80] ss:$16 sps:$4 sm:$0xff]   ;;  %v7878_v45 = vld [vmem:[%s10042_s4 + $0x88] ss:$16 sps:$4 sm:$0xff]  }
 0x4d0   :  { %v7766_v24 = vadd.f32 %v2249_v36, %v2248_v2  ;;  %v7860_v36 = vld [vmem:[%s10042_s4 + $0x84] ss:$16 sps:$4 sm:$0xff]   ;;  %v7866_v2 = vld [vmem:[%s10042_s4 + $0x8c] ss:$16 sps:$4 sm:$0xff]   ;;  %10835 = vst [vmem:[#allocation57_spill] sm:$0xff] %v7872_v44  ;;  %10836 = vst [vmem:[#allocation91_spill] sm:$0xff] %v7878_v45 }
 0x4d1   :  { %10833 = vst [vmem:[#allocation61_spill] sm:$0xff] %v7860_v36  ;;  %10834 = vst [vmem:[#allocation56_spill] sm:$0xff] %v7866_v2 }
 0x4d2   :  { %4344 = vtanh.f32 %v7766_v24 }
 0x4dc   :  { %v4345_v13 = vpop.eup %4344 }
 0x4dd   :  { %v2252_v3 = vmul.f32 %v4345_v13, %v2247_v60  ;;  %v7884_v60 = vld [vmem:[%s10042_s4 + $0xa4] ss:$16 sps:$4 sm:$0xff]   ;;  %v7890_v13 = vld [vmem:[%s10042_s4 + $0xac] ss:$16 sps:$4 sm:$0xff]  }
 0x4de   :  { %10837 = vst [vmem:[#allocation92_spill] sm:$0xff] %v7884_v60  ;;  %10838 = vst [vmem:[#allocation93_spill] sm:$0xff] %v7890_v13 }
 0x4df   :  { %v7769_v10 = vpack.c.bf16 %v2252_v3, %v2252_v3  ;;  %v7896_v3 = vld [vmem:[%s10042_s4 + $0xa0] ss:$16 sps:$4 sm:$0xff]  }
 0x4e0   :  { %10839 = vst [vmem:[#allocation94_spill] sm:$0xff] %v7896_v3 }
 0x4e1   :  { %2487 = vmatmul.mubr.bf16.vlgmr.msra.gmra.mrb[60].mxu0 %v7769_v10  ;;  %2528 = vmatmul.mubr.bf16.vlgmr.msra.gmra.mrb[60].mxu1 %v7769_v10 }
 0x4e2   :  { %2557 = vmatpush1.bf16.msra.mxu0 %v7776_v16  ;;  %2598 = vmatpush1.bf16.msra.mxu1 %v7782_v0 }
 0x4e3   :  { %2558 = vmatprep.subr.bf16.mxu0 %v7788_v17  ;;  %2599 = vmatprep.subr.bf16.mxu1 %v7794_v48 }
 0x4e6   :  { %2559 = vmatpush1.bf16.msra.mxu0 %v7800_v34  ;;  %2600 = vmatpush1.bf16.msra.mxu1 %v7806_v59 }
 0x4e7   :  { %2560 = vmatprep.subr.bf16.mxu0 %v7812_v58  ;;  %2601 = vmatprep.subr.bf16.mxu1 %v7818_v11 }
 0x4ea   :  { %2561 = vmatpush1.bf16.msra.mxu0 %v7824_v23  ;;  %2602 = vmatpush1.bf16.msra.mxu1 %v7830_v22 }
 0x4eb   :  { %2562 = vmatprep.subr.bf16.mxu0 %v7836_v1  ;;  %2603 = vmatprep.subr.bf16.mxu1 %v7842_v9 }
 0x4ee   :  { %2563 = vmatpush1.bf16.msra.mxu0 %v7848_v37  ;;  %2604 = vmatpush1.bf16.msra.mxu1 %v7854_v31  ;;  %v7945_v31 = vld [vmem:[%s10042_s4 + $0xe0] ss:$16 sps:$4 sm:$0xff]  }
 0x4ef   :  { %2564 = vmatprep.subr.bf16.mxu0 %v7860_v36  ;;  %2605 = vmatprep.subr.bf16.mxu1 %v7866_v2  ;;  %10847 = vst [vmem:[#allocation102_spill] sm:$0xff] %v7945_v31 }
 0x4f2   :  { %2565 = vmatpush1.bf16.msra.mxu0 %v7872_v44  ;;  %2606 = vmatpush1.bf16.msra.mxu1 %v7878_v45  ;;  %v7902_v45 = vld [vmem:[%s10042_s4 + $0xa8] ss:$16 sps:$4 sm:$0xff]  }
 0x4f3   :  { %2566 = vmatprep.subr.bf16.mxu0 %v7884_v60  ;;  %2607 = vmatprep.subr.bf16.mxu1 %v7890_v13  ;;  %10840 = vst [vmem:[#allocation95_spill] sm:$0xff] %v7902_v45  ;;  %v7908_v60 = vld [vmem:[%s10042_s4 + $0xc4] ss:$16 sps:$4 sm:$0xff]   ;;  %v7914_v13 = vld [vmem:[%s10042_s4 + $0xcc] ss:$16 sps:$4 sm:$0xff]  }
 0x4f4   :  { %10841 = vst [vmem:[#allocation96_spill] sm:$0xff] %v7908_v60  ;;  %10842 = vst [vmem:[#allocation97_spill] sm:$0xff] %v7914_v13 }
 0x4f6   :  { %2567 = vmatpush1.bf16.msra.mxu0 %v7896_v3  ;;  %2608 = vmatpush1.bf16.msra.mxu1 %v7902_v45  ;;  %v7920_v3 = vld [vmem:[%s10042_s4 + $0xc0] ss:$16 sps:$4 sm:$0xff]   ;;  %v7926_v45 = vld [vmem:[%s10042_s4 + $0xc8] ss:$16 sps:$4 sm:$0xff]  }
 0x4f7   :  { %2568 = vmatprep.subr.bf16.mxu0 %v7908_v60  ;;  %2609 = vmatprep.subr.bf16.mxu1 %v7914_v13  ;;  %10843 = vst [vmem:[#allocation98_spill] sm:$0xff] %v7920_v3  ;;  %10844 = vst [vmem:[#allocation99_spill] sm:$0xff] %v7926_v45  ;;  %v7932_v60 = vld [vmem:[%s10042_s4 + $0xe4] ss:$16 sps:$4 sm:$0xff]   ;;  %v7938_v13 = vld [vmem:[%s10042_s4 + $0xec] ss:$16 sps:$4 sm:$0xff]  }
 0x4f8   :  { %10845 = vst [vmem:[#allocation100_spill] sm:$0xff] %v7932_v60  ;;  %10846 = vst [vmem:[#allocation101_spill] sm:$0xff] %v7938_v13 }
 0x4fa   :  { %2569 = vmatpush1.bf16.msra.mxu0 %v7920_v3  ;;  %2610 = vmatpush1.bf16.msra.mxu1 %v7926_v45 }
 0x4fb   :  { %2570 = vmatprep.subr.bf16.mxu0 %v7932_v60  ;;  %2611 = vmatprep.subr.bf16.mxu1 %v7938_v13  ;;  %v7951_v60 = vld [vmem:[%s10042_s4 + $0xe8] ss:$16 sps:$4 sm:$0xff]  }
 0x4fc   :  { %10848 = vst [vmem:[#allocation103_spill] sm:$0xff] %v7951_v60 }
 0x4fe   :  { %v2288_v3 = vpop.f32.mrb[52].mxu0  ;;  %v2329_v44 = vpop.f32.mrb[52].mxu1  ;;  %2571 = vmatpush1.bf16.msra.mxu0 %v7945_v31  ;;  %2612 = vmatpush1.bf16.msra.mxu1 %v7951_v60  ;;  %v7964_v31 = vld [vmem:[%s10042_s4 + $0x10c] ss:$16 sps:$4 sm:$0xff]  }
 0x4ff   :  { %v2289_v2 = vadd.f32 %v7092_v29, %v2288_v3  ;;  %v2290_v36 = vpop.f32.mrb[53].mxu0  ;;  %v2331_v45 = vpop.f32.mrb[53].mxu1  ;;  %v7958_v3 = vld [vmem:[%s10042_s4 + $0x104] ss:$16 sps:$4 sm:$0xff]   ;;  %2613 = vmatprep.subr.bf16.mxu1 %v7964_v31 }
 0x500   :  { %v2291_v13 = vadd.f32 %v7098_v49, %v2290_v36  ;;  %v2292_v37 = vpop.f32.mrb[54].mxu0  ;;  %v2333_v29 = vpop.f32.mrb[54].mxu1  ;;  %2572 = vmatprep.subr.bf16.mxu0 %v7958_v3  ;;  %v2332_v60 = vadd.f32 %v7106_v26, %v2331_v45  ;;  %v7971_v36 = vld [vmem:[%s10042_s4 + $0x100] ss:$16 sps:$4 sm:$0xff]   ;;  %v7983_v26 = vld [vmem:[%s10042_s4 + $0x124] ss:$16 sps:$4 sm:$0xff]  }
 0x501   :  { %4346 = vtanh.f32 %v2289_v2  ;;  %v2293_v49 = vpop.f32.mrb[55].mxu0  ;;  %v2334_v37 = vpop.f32.mrb[55].mxu1  ;;  %v7977_v29 = vld [vmem:[%s10042_s4 + $0x108] ss:$16 sps:$4 sm:$0xff]   ;;  %10850 = vst [vmem:[#allocation105_spill] sm:$0xff] %v7983_v26 }
 0x502   :  { %4348 = vtanh.f32 %v2291_v13  ;;  %2573 = vmatpush1.bf16.msra.mxu0 %v7971_v36  ;;  %10849 = vst [vmem:[#allocation104_spill] sm:$0xff] %v7977_v29  ;;  %2614 = vmatpush1.bf16.msra.mxu1 %v7977_v29  ;;  %v7989_v2 = vld [vmem:[%s10042_s4 + $0x12c] ss:$16 sps:$4 sm:$0xff]   ;;  %v7995_v45 = vld [vmem:[%s10042_s4 + $0x120] ss:$16 sps:$4 sm:$0xff]   ;;  %v2330_v37 = vadd.f32 %v7122_v33, %v2329_v44 }
 0x503   :  { %2574 = vmatprep.subr.bf16.mxu0 %v7983_v26  ;;  %10851 = vst [vmem:[#allocation106_spill] sm:$0xff] %v7989_v2  ;;  %2615 = vmatprep.subr.bf16.mxu1 %v7989_v2  ;;  %4350 = vtanh.f32 %v2332_v60  ;;  %10852 = vst [vmem:[#allocation107_spill] sm:$0xff] %v7995_v45  ;;  %v8001_v13 = vld [vmem:[%s10042_s4 + $0x128] ss:$16 sps:$4 sm:$0xff]   ;;  %v8007_v49 = vld [vmem:[%s10042_s4 + $0x144] ss:$16 sps:$4 sm:$0xff]  }
 0x504   :  { %10853 = vst [vmem:[#allocation108_spill] sm:$0xff] %v8001_v13  ;;  %10854 = vst [vmem:[#allocation109_spill] sm:$0xff] %v8007_v49  ;;  %v8013_v60 = vld [vmem:[%s10042_s4 + $0x14c] ss:$16 sps:$4 sm:$0xff]   ;;  %v8032_v33 = vld [vmem:[%s10042_s4 + $0x164] ss:$16 sps:$4 sm:$0xff]   ;;  %4352 = vtanh.f32 %v2330_v37 }
 0x505   :  { %10855 = vst [vmem:[#allocation110_spill] sm:$0xff] %v8013_v60  ;;  %10858 = vst [vmem:[#allocation113_spill] sm:$0xff] %v8032_v33  ;;  %v8038_v44 = vld [vmem:[%s10042_s4 + $0x16c] ss:$16 sps:$4 sm:$0xff]  }
 0x506   :  { %2575 = vmatpush1.bf16.msra.mxu0 %v7995_v45  ;;  %2616 = vmatpush1.bf16.msra.mxu1 %v8001_v13  ;;  %v8020_v13 = vld [vmem:[%s10042_s4 + $0x140] ss:$16 sps:$4 sm:$0xff]   ;;  %10859 = vst [vmem:[#allocation114_spill] sm:$0xff] %v8038_v44 }
 0x507   :  { %2576 = vmatprep.subr.bf16.mxu0 %v8007_v49  ;;  %2617 = vmatprep.subr.bf16.mxu1 %v8013_v60  ;;  %10856 = vst [vmem:[#allocation111_spill] sm:$0xff] %v8020_v13  ;;  %v8026_v49 = vld [vmem:[%s10042_s4 + $0x148] ss:$16 sps:$4 sm:$0xff]  }
 0x508   :  { %10857 = vst [vmem:[#allocation112_spill] sm:$0xff] %v8026_v49 }
 0x50a   :  { %2577 = vmatpush1.bf16.msra.mxu0 %v8020_v13  ;;  %2618 = vmatpush1.bf16.msra.mxu1 %v8026_v49 }
 0x50b   :  { %v4347_v45 = vpop.eup %4346  ;;  %2578 = vmatprep.subr.bf16.mxu0 %v8032_v33  ;;  %2619 = vmatprep.subr.bf16.mxu1 %v8038_v44  ;;  %v8050_v33 = vld [vmem:[%s10042_s4 + $0x168] ss:$16 sps:$4 sm:$0xff]  }
 0x50c   :  { %v2340_v2 = vmul.f32 0.5, %v4347_v45  ;;  %v4349_v13 = vpop.eup %4348  ;;  %v8044_v45 = vld [vmem:[%s10042_s4 + $0x160] ss:$16 sps:$4 sm:$0xff]  }
 0x50d   :  { %v2342_v26 = vmul.f32 0.5, %v4349_v13  ;;  %v4351_v49 = vpop.eup %4350  ;;  %v8062_v13 = vld [vmem:[%s10042_s4 + $0x18c] ss:$16 sps:$4 sm:$0xff]  }
 0x50e   :  { %v2341_v60 = vadd.f32 0.5, %v2340_v2  ;;  %2579 = vmatpush1.bf16.msra.mxu0 %v8044_v45  ;;  %2620 = vmatpush1.bf16.msra.mxu1 %v8050_v33  ;;  %v8056_v2 = vld [vmem:[%s10042_s4 + $0x184] ss:$16 sps:$4 sm:$0xff]  }
 0x50f   :  { %v2343_v44 = vadd.f32 0.5, %v2342_v26  ;;  %2580 = vmatprep.subr.bf16.mxu0 %v8056_v2  ;;  %2621 = vmatprep.subr.bf16.mxu1 %v8062_v13  ;;  %v8069_v26 = vld [vmem:[%s10042_s4 + $0x180] ss:$16 sps:$4 sm:$0xff]  }
 0x510   :  { %v2347_v29 = vmul.f32 %v4351_v49, %v2341_v60  ;;  %10860 = vst [vmem:[#allocation115_spill] sm:$0xff] %v8069_v26  ;;  %v8075_v49 = vld [vmem:[%s10042_s4 + $0x188] ss:$16 sps:$4 sm:$0xff]  }
 0x511   :  { %v2346_v37 = vmul.f32 %v2343_v44, %v7134_v21  ;;  %10861 = vst [vmem:[#allocation116_spill] sm:$0xff] %v8075_v49  ;;  %v8083_v21 = vld [vmem:[%s10042_s4 + $0x1a4] ss:$16 sps:$4 sm:$0xff]   ;;  %v8089_v44 = vld [vmem:[%s10042_s4 + $0x1ac] ss:$16 sps:$4 sm:$0xff]  }
 0x512   :  { %2581 = vmatpush1.bf16.msra.mxu0 %v8069_v26  ;;  %2622 = vmatpush1.bf16.msra.mxu1 %v8075_v49  ;;  %10862 = vst [vmem:[#allocation117_spill] sm:$0xff] %v8083_v21  ;;  %10863 = vst [vmem:[#allocation118_spill] sm:$0xff] %v8089_v44  ;;  %v8114_v49 = vld [vmem:[%s10042_s4 + $0x1cc] ss:$16 sps:$4 sm:$0xff]   ;;  %v8126_v26 = vld [vmem:[%s10042_s4 + $0x1c8] ss:$16 sps:$4 sm:$0xff]  }
 0x513   :  { %v8078_v60 = vadd.f32 %v2347_v29, %v2346_v37  ;;  %2582 = vmatprep.subr.bf16.mxu0 %v8083_v21  ;;  %2623 = vmatprep.subr.bf16.mxu1 %v8089_v44  ;;  %v8096_v29 = vld [vmem:[%s10042_s4 + $0x1a0] ss:$16 sps:$4 sm:$0xff]   ;;  %v8102_v37 = vld [vmem:[%s10042_s4 + $0x1a8] ss:$16 sps:$4 sm:$0xff]   ;;  %v4353_v21 = vpop.eup %4352  ;;  %v8108_v44 = vld [vmem:[%s10042_s4 + $0x1c4] ss:$16 sps:$4 sm:$0xff]  }
 0x514   :  { %10864 = vst [vmem:[#allocation119_spill] sm:$0xff] %v8096_v29  ;;  %10865 = vst [vmem:[#allocation120_spill] sm:$0xff] %v8102_v37 }
 0x515   :  { %4354 = vtanh.f32 %v8078_v60  ;;  %10866 = vst [vmem:[#allocation121_spill] sm:$0xff] %v8108_v44  ;;  %10867 = vst [vmem:[#allocation122_spill] sm:$0xff] %v8114_v49 }
 0x516   :  { %2583 = vmatpush1.bf16.msra.mxu0 %v8096_v29  ;;  %2624 = vmatpush1.bf16.msra.mxu1 %v8102_v37  ;;  %v2344_v29 = vmul.f32 0.5, %v4353_v21  ;;  %v8120_v37 = vld [vmem:[%s10042_s4 + $0x1c0] ss:$16 sps:$4 sm:$0xff]   ;;  %10869 = vst [vmem:[#allocation124_spill] sm:$0xff] %v8126_v26  ;;  %v8138_v21 = vld [vmem:[%s10042_s4 + $0x1ec] ss:$16 sps:$4 sm:$0xff]  }
 0x517   :  { %2584 = vmatprep.subr.bf16.mxu0 %v8108_v44  ;;  %2625 = vmatprep.subr.bf16.mxu1 %v8114_v49  ;;  %10868 = vst [vmem:[#allocation123_spill] sm:$0xff] %v8120_v37  ;;  %v8132_v44 = vld [vmem:[%s10042_s4 + $0x1e4] ss:$16 sps:$4 sm:$0xff]   ;;  %10871 = vst [vmem:[#allocation126_spill] sm:$0xff] %v8138_v21  ;;  %v8144_v49 = vld [vmem:[%s10042_s4 + $0x1e0] ss:$16 sps:$4 sm:$0xff]  }
 0x518   :  { %10870 = vst [vmem:[#allocation125_spill] sm:$0xff] %v8132_v44 }
 0x51a   :  { %2585 = vmatpush1.bf16.msra.mxu0 %v8120_v37  ;;  %2626 = vmatpush1.bf16.msra.mxu1 %v8126_v26  ;;  %v2345_v37 = vadd.f32 0.5, %v2344_v29  ;;  %v8150_v26 = vld [vmem:[%s10042_s4 + $0x1e8] ss:$16 sps:$4 sm:$0xff]  }
 0x51b   :  { %2586 = vmatprep.subr.bf16.mxu0 %v8132_v44  ;;  %2627 = vmatprep.subr.bf16.mxu1 %v8138_v21 }
 0x51e   :  { %2587 = vmatpush1.bf16.msra.mxu0 %v8144_v49  ;;  %2628 = vmatpush1.bf16.msra.mxu1 %v8150_v26 }
 0x51f   :  { %v4355_v44 = vpop.eup %4354  ;;  %2654 = vmatprep.subr.bf16.mxu0 %v7154_v41  ;;  %2695 = vmatprep.subr.bf16.mxu1 %v7160_v50 }
 0x520   :  { %v2350_v29 = vmul.f32 %v4355_v44, %v2345_v37  ;;  %v10884_v44 = vld [vmem:[#allocation18_spill] sm:$0xff] }
 0x522   :  { %v8155_v21 = vpack.c.bf16 %v2350_v29, %v2350_v29  ;;  %v10885_v29 = vld [vmem:[#allocation20_spill] sm:$0xff] }
 0x524   :  { %2588 = vmatprep.mubr.bf16.mxu0 %v8155_v21  ;;  %2629 = vmatprep.mubr.bf16.mxu1 %v8155_v21 }
 0x525   :  { %2589 = vmatmul.mubr.bf16.vlgmr.msra.gmra.mrb[64].mxu0 %v7769_v10  ;;  %2630 = vmatmul.mubr.bf16.vlgmr.msra.gmra.mrb[64].mxu1 %v7769_v10  ;;  %v10883_v10 = vld [vmem:[#allocation17_spill] sm:$0xff] }
 0x526   :  { %2655 = vmatpush1.bf16.msra.mxu0 %v7172_v54  ;;  %2696 = vmatpush1.bf16.msra.mxu1 %v7178_v47  ;;  %v8188_v54 = vld [vmem:[%s10046_s7] sm:$0xff] }
 0x527   :  { %2656 = vmatprep.subr.bf16.mxu0 %v7184_v25  ;;  %2697 = vmatprep.subr.bf16.mxu1 %v7190_v5 }
 0x52a   :  { %2657 = vmatpush1.bf16.msra.mxu0 %v7196_v4  ;;  %2698 = vmatpush1.bf16.msra.mxu1 %v7202_v46  ;;  %v8196_v4 = vld [vmem:[%s10046_s7 + $0x8] sm:$0xff] }
 0x52b   :  { %2658 = vmatprep.subr.bf16.mxu0 %v7208_v28  ;;  %2699 = vmatprep.subr.bf16.mxu1 %v7214_v20 }
 0x52e   :  { %2659 = vmatpush1.bf16.msra.mxu0 %v7220_v40  ;;  %2700 = vmatpush1.bf16.msra.mxu1 %v7226_v32  ;;  %v8204_v40 = vld [vmem:[%s10046_s7 + $0x18] sm:$0xff] }
 0x52f   :  { %2660 = vmatprep.subr.bf16.mxu0 %v7232_v18  ;;  %2701 = vmatprep.subr.bf16.mxu1 %v7238_v57 }
 0x532   :  { %2661 = vmatpush1.bf16.msra.mxu0 %v7244_v61  ;;  %2702 = vmatpush1.bf16.msra.mxu1 %v7250_v19  ;;  %v10872_v61 = vld [vmem:[#allocation7_spill] sm:$0xff]  ;;  %v10873_v19 = vld [vmem:[#allocation8_spill] sm:$0xff] }
 0x533   :  { %2662 = vmatprep.subr.bf16.mxu0 %v7256_v39  ;;  %2703 = vmatprep.subr.bf16.mxu1 %v7262_v30  ;;  %v8218_v39 = vld [vmem:[%s10046_s7 + $0x10] sm:$0xff] }
 0x536   :  { %2663 = vmatpush1.bf16.msra.mxu0 %v7268_v7  ;;  %2704 = vmatpush1.bf16.msra.mxu1 %v7274_v62  ;;  %v10874_v62 = vld [vmem:[#allocation9_spill] sm:$0xff] }
 0x537   :  { %2664 = vmatprep.subr.bf16.mxu0 %v7280_v63  ;;  %2705 = vmatprep.subr.bf16.mxu1 %v7286_v6  ;;  %v10875_v63 = vld [vmem:[#allocation10_spill] sm:$0xff] }
 0x53a   :  { %2665 = vmatpush1.bf16.msra.mxu0 %v7292_v12  ;;  %2706 = vmatpush1.bf16.msra.mxu1 %v7298_v35  ;;  %v10876_v12 = vld [vmem:[#allocation11_spill] sm:$0xff]  ;;  %v10877_v35 = vld [vmem:[#allocation12_spill] sm:$0xff] }
 0x53b   :  { %2666 = vmatprep.subr.bf16.mxu0 %v7304_v55  ;;  %2707 = vmatprep.subr.bf16.mxu1 %v7310_v56 }
 0x53e   :  { %v2386_v41 = vpop.f32.mrb[56].mxu0  ;;  %v2427_v50 = vpop.f32.mrb[56].mxu1  ;;  %2667 = vmatpush1.bf16.msra.mxu0 %v7317_v14  ;;  %2708 = vmatpush1.bf16.msra.mxu1 %v7323_v15 }
 0x53f   :  { %v2387_v47 = vadd.f32 %v8188_v54, %v2386_v41  ;;  %v2388_v25 = vpop.f32.mrb[57].mxu0  ;;  %v2429_v5 = vpop.f32.mrb[57].mxu1  ;;  %2668 = vmatprep.subr.bf16.mxu0 %v7330_v53  ;;  %2709 = vmatprep.subr.bf16.mxu1 %v7336_v27  ;;  %v2428_v30 = vadd.f32 %v8218_v39, %v2427_v50  ;;  %v10878_v53 = vld [vmem:[#allocation13_spill] sm:$0xff]  ;;  %v10879_v27 = vld [vmem:[#allocation14_spill] sm:$0xff] }
 0x540   :  { %v2389_v46 = vadd.f32 %v8196_v4, %v2388_v25  ;;  %v2390_v28 = vpop.f32.mrb[58].mxu0  ;;  %v2431_v20 = vpop.f32.mrb[58].mxu1  ;;  %v2430_v32 = vadd.f32 %v8204_v40, %v2429_v5  ;;  %v10886_v41 = vld [vmem:[#allocation21_spill] sm:$0xff]  ;;  %v10887_v50 = vld [vmem:[#allocation22_spill] sm:$0xff]  ;;  %v10889_v5 = vld [vmem:[#allocation24_spill] sm:$0xff] }
 0x541   :  { %4356 = vtanh.f32 %v2387_v47  ;;  %v2391_v18 = vpop.f32.mrb[59].mxu0  ;;  %v2432_v57 = vpop.f32.mrb[59].mxu1  ;;  %v10888_v47 = vld [vmem:[#allocation23_spill] sm:$0xff]  ;;  %v10891_v20 = vld [vmem:[#allocation26_spill] sm:$0xff] }
 0x542   :  { %4358 = vtanh.f32 %v2389_v46  ;;  %2669 = vmatpush1.bf16.msra.mxu0 %v7343_v8  ;;  %2710 = vmatpush1.bf16.msra.mxu1 %v7349_v42  ;;  %v10890_v46 = vld [vmem:[#allocation25_spill] sm:$0xff]  ;;  %v10893_v18 = vld [vmem:[#allocation28_spill] sm:$0xff] }
 0x543   :  { %2670 = vmatprep.subr.bf16.mxu0 %v7355_v51  ;;  %2711 = vmatprep.subr.bf16.mxu1 %v7361_v38  ;;  %4360 = vtanh.f32 %v2430_v32  ;;  %v10880_v51 = vld [vmem:[#allocation15_spill] sm:$0xff]  ;;  %v10881_v38 = vld [vmem:[#allocation16_spill] sm:$0xff]  ;;  %v10894_v57 = vld [vmem:[#allocation29_spill] sm:$0xff] }
 0x544   :  { %4362 = vtanh.f32 %v2428_v30  ;;  %v10892_v32 = vld [vmem:[#allocation27_spill] sm:$0xff] }
 0x545   :  { %v10896_v30 = vld [vmem:[#allocation31_spill] sm:$0xff] }
 0x546   :  { %2671 = vmatpush1.bf16.msra.mxu0 %v7367_v52  ;;  %2712 = vmatpush1.bf16.msra.mxu1 %v7373_v43  ;;  %v10882_v52 = vld [vmem:[#allocation19_spill] sm:$0xff] }
 0x547   :  { %2672 = vmatprep.subr.bf16.mxu0 %v10872_v61  ;;  %2713 = vmatprep.subr.bf16.mxu1 %v10873_v19  ;;  %v10895_v19 = vld [vmem:[#allocation30_spill] sm:$0xff] }
 0x54a   :  { %2673 = vmatpush1.bf16.msra.mxu0 %v10874_v62  ;;  %2714 = vmatpush1.bf16.msra.mxu1 %v10875_v63  ;;  %v10897_v62 = vld [vmem:[#allocation32_spill] sm:$0xff]  ;;  %v10898_v63 = vld [vmem:[#allocation33_spill] sm:$0xff] }
 0x54b   :  { %v4357_v7 = vpop.eup %4356  ;;  %2674 = vmatprep.subr.bf16.mxu0 %v10876_v12  ;;  %2715 = vmatprep.subr.bf16.mxu1 %v10877_v35  ;;  %v10899_v12 = vld [vmem:[#allocation34_spill] sm:$0xff]  ;;  %v10900_v35 = vld [vmem:[#allocation35_spill] sm:$0xff] }
 0x54c   :  { %v2438_v6 = vmul.f32 0.5, %v4357_v7  ;;  %v4359_v55 = vpop.eup %4358 }
 0x54d   :  { %v2440_v14 = vmul.f32 0.5, %v4359_v55  ;;  %v4361_v15 = vpop.eup %4360 }
 0x54e   :  { %v2439_v56 = vadd.f32 0.5, %v2438_v6  ;;  %2675 = vmatpush1.bf16.msra.mxu0 %v10878_v53  ;;  %2716 = vmatpush1.bf16.msra.mxu1 %v10879_v27  ;;  %v4363_v25 = vpop.eup %4362  ;;  %v10904_v53 = vld [vmem:[#allocation39_spill] sm:$0xff]  ;;  %v10905_v27 = vld [vmem:[#allocation40_spill] sm:$0xff] }
 0x54f   :  { %v2441_v8 = vadd.f32 0.5, %v2440_v14  ;;  %2676 = vmatprep.subr.bf16.mxu0 %v10880_v51  ;;  %2717 = vmatprep.subr.bf16.mxu1 %v10881_v38  ;;  %v2442_v28 = vmul.f32 0.5, %v4363_v25  ;;  %v10902_v14 = vld [vmem:[#allocation37_spill] sm:$0xff]  ;;  %v10908_v51 = vld [vmem:[#allocation42_spill] sm:$0xff]  ;;  %v10909_v38 = vld [vmem:[#allocation43_spill] sm:$0xff] }
 0x550   :  { %v2445_v42 = vmul.f32 %v4361_v15, %v2439_v56  ;;  %v10901_v56 = vld [vmem:[#allocation36_spill] sm:$0xff]  ;;  %v10903_v15 = vld [vmem:[#allocation38_spill] sm:$0xff]  ;;  %v10919_v25 = vld [vmem:[#allocation53_spill] sm:$0xff] }
 0x551   :  { %v2444_v43 = vmul.f32 %v2441_v8, %v10882_v52  ;;  %v2443_v61 = vadd.f32 0.5, %v2442_v28  ;;  %v10906_v8 = vld [vmem:[#allocation41_spill] sm:$0xff]  ;;  %v10910_v52 = vld [vmem:[#allocation44_spill] sm:$0xff]  ;;  %v10922_v28 = vld [vmem:[#allocation78_spill] sm:$0xff] }
 0x552   :  { %2677 = vmatpush1.bf16.msra.mxu0 %v10883_v10  ;;  %2718 = vmatpush1.bf16.msra.mxu1 %v10884_v44  ;;  %v10913_v10 = vld [vmem:[#allocation47_spill] sm:$0xff]  ;;  %v10914_v44 = vld [vmem:[#allocation48_spill] sm:$0xff] }
 0x553   :  { %v8232_v37 = vadd.f32 %v2445_v42, %v2444_v43  ;;  %2678 = vmatprep.subr.bf16.mxu0 %v10885_v29  ;;  %2719 = vmatprep.subr.bf16.mxu1 %v10886_v41  ;;  %v10907_v42 = vmov 0   ;;  %v10911_v43 = vld [vmem:[#allocation45_spill] sm:$0xff]  ;;  %v10916_v41 = vld [vmem:[#allocation50_spill] sm:$0xff] }
 0x554   :  { %v10915_v29 = vld [vmem:[#allocation49_spill] sm:$0xff] }
 0x555   :  { %4364 = vtanh.f32 %v8232_v37 }
 0x556   :  { %2679 = vmatpush1.bf16.msra.mxu0 %v10887_v50  ;;  %2720 = vmatpush1.bf16.msra.mxu1 %v10888_v47  ;;  %v10917_v50 = vld [vmem:[#allocation51_spill] sm:$0xff]  ;;  %v10918_v47 = vld [vmem:[#allocation52_spill] sm:$0xff] }
 0x557   :  { %2680 = vmatprep.subr.bf16.mxu0 %v10889_v5  ;;  %2721 = vmatprep.subr.bf16.mxu1 %v10890_v46  ;;  %v10920_v5 = vld [vmem:[#allocation54_spill] sm:$0xff]  ;;  %v10921_v46 = vld [vmem:[#allocation55_spill] sm:$0xff] }
 0x55a   :  { %2681 = vmatpush1.bf16.msra.mxu0 %v10891_v20  ;;  %2722 = vmatpush1.bf16.msra.mxu1 %v10892_v32  ;;  %v10923_v20 = vld [vmem:[#allocation79_spill] sm:$0xff]  ;;  %v10924_v32 = vld [vmem:[#allocation80_spill] sm:$0xff] }
 0x55b   :  { %2682 = vmatprep.subr.bf16.mxu0 %v10893_v18  ;;  %2723 = vmatprep.subr.bf16.mxu1 %v10894_v57  ;;  %v10925_v18 = vld [vmem:[#allocation81_spill] sm:$0xff]  ;;  %v10926_v57 = vld [vmem:[#allocation82_spill] sm:$0xff] }
 0x55e   :  { %2683 = vmatpush1.bf16.msra.mxu0 %v10895_v19  ;;  %2724 = vmatpush1.bf16.msra.mxu1 %v10896_v30  ;;  %v10928_v19 = vld [vmem:[#allocation84_spill] sm:$0xff]  ;;  %v10929_v30 = vld [vmem:[#allocation85_spill] sm:$0xff] }
 0x55f   :  { %v4365_v7 = vpop.eup %4364  ;;  %2684 = vmatprep.subr.bf16.mxu0 %v10897_v62  ;;  %2725 = vmatprep.subr.bf16.mxu1 %v10898_v63  ;;  %v10931_v62 = vld [vmem:[#allocation87_spill] sm:$0xff]  ;;  %v10932_v63 = vld [vmem:[#allocation88_spill] sm:$0xff] }
 0x560   :  { %v2448_v6 = vmul.f32 %v4365_v7, %v2443_v61  ;;  %v10927_v61 = vld [vmem:[#allocation83_spill] sm:$0xff]  ;;  %v10930_v7 = vld [vmem:[#allocation86_spill] sm:$0xff] }
 0x562   :  { %2685 = vmatpush1.bf16.msra.mxu0 %v10899_v12  ;;  %2726 = vmatpush1.bf16.msra.mxu1 %v10900_v35  ;;  %v2653_v55 = vpack.c.bf16 %v2448_v6, %v2448_v6  ;;  %v10933_v6 = vld [vmem:[#allocation89_spill] sm:$0xff]  ;;  %v10934_v12 = vld [vmem:[#allocation90_spill] sm:$0xff] }
 0x563   :  { %2756 = vmatprep.subr.bf16.mxu0 %v10901_v56  ;;  %2797 = vmatprep.subr.bf16.mxu1 %v10902_v14  ;;  %v10935_v35 = vld [vmem:[#allocation58_spill] sm:$0xff] }
 0x564   :  { %2686 = vmatprep.mubr.bf16.mxu0 %v2653_v55  ;;  %2727 = vmatprep.mubr.bf16.mxu1 %v2653_v55  ;;  %v10936_v55 = vld [vmem:[#allocation3_spill] sm:$0xff]  ;;  %v10937_v56 = vld [vmem:[#allocation66_spill] sm:$0xff] }
 0x565   :  { %2687 = vmatmul.mubr.bf16.vlgmr.msra.gmra.mrb[68].mxu0 %v8155_v21  ;;  %2728 = vmatmul.mubr.bf16.vlgmr.msra.gmra.mrb[68].mxu1 %v8155_v21  ;;  %v10912_v21 = vld [vmem:[#allocation46_spill] sm:$0xff]  ;;  %v192_v14 = vadd.f32 %v10937_v56, %v10936_v55 }
 0x566   :  { %2757 = vmatpush1.bf16.msra.mxu0 %v10903_v15  ;;  %2798 = vmatpush1.bf16.msra.mxu1 %v10904_v53  ;;  %v10938_v15 = vld [vmem:[#allocation6_spill] sm:$0xff]  ;;  %v10939_v53 = vld [vmem:[#allocation68_spill] sm:$0xff] }
 0x567   :  { %2758 = vmatprep.subr.bf16.mxu0 %v10905_v27  ;;  %2799 = vmatprep.subr.bf16.mxu1 %v10906_v8  ;;  %v305_v27 = vadd.f32 %v10939_v53, %v10938_v15  ;;  %v10940_v8 = vld [vmem:[#allocation4_spill] sm:$0xff] }
 0x568   :  { %2788 = vmatprep.mubr.bf16.mxu0 %v10907_v42  ;;  %2829 = vmatprep.mubr.bf16.mxu1 %v10907_v42 }
 0x56a   :  { %2759 = vmatpush1.bf16.msra.mxu0 %v10908_v51  ;;  %2800 = vmatpush1.bf16.msra.mxu1 %v10909_v38  ;;  %v10941_v51 = vld [vmem:[#allocation67_spill] sm:$0xff] }
 0x56b   :  { %2760 = vmatprep.subr.bf16.mxu0 %v10910_v52  ;;  %2801 = vmatprep.subr.bf16.mxu1 %v10911_v43  ;;  %v194_v38 = vadd.f32 %v10941_v51, %v10940_v8  ;;  %v10942_v52 = vld [vmem:[#allocation5_spill] sm:$0xff] }
 0x56c   :  { %v10943_v43 = vld [vmem:[#allocation69_spill] sm:$0xff] }
 0x56e   :  { %2761 = vmatpush1.bf16.msra.mxu0 %v10912_v21  ;;  %2802 = vmatpush1.bf16.msra.mxu1 %v10913_v10  ;;  %v307_v21 = vadd.f32 %v10943_v43, %v10942_v52  ;;  %v10958_v43 = vld [vmem:[#allocation100_spill] sm:$0xff] }
 0x56f   :  { %2762 = vmatprep.subr.bf16.mxu0 %v10914_v44  ;;  %2803 = vmatprep.subr.bf16.mxu1 %v10915_v29 }
 0x572   :  { %2763 = vmatpush1.bf16.msra.mxu0 %v10916_v41  ;;  %2804 = vmatpush1.bf16.msra.mxu1 %v10917_v50 }
 0x573   :  { %2764 = vmatprep.subr.bf16.mxu0 %v10918_v47  ;;  %2805 = vmatprep.subr.bf16.mxu1 %v10919_v25 }
 0x576   :  { %2765 = vmatpush1.bf16.msra.mxu0 %v10920_v5  ;;  %2806 = vmatpush1.bf16.msra.mxu1 %v10921_v46 }
 0x577   :  { %2766 = vmatprep.subr.bf16.mxu0 %v10922_v28  ;;  %2807 = vmatprep.subr.bf16.mxu1 %v10923_v20 }
 0x57a   :  { %2767 = vmatpush1.bf16.msra.mxu0 %v10924_v32  ;;  %2808 = vmatpush1.bf16.msra.mxu1 %v10925_v18 }
 0x57b   :  { %2768 = vmatprep.subr.bf16.mxu0 %v10926_v57  ;;  %2809 = vmatprep.subr.bf16.mxu1 %v10927_v61 }
 0x57e   :  { %2769 = vmatpush1.bf16.msra.mxu0 %v10928_v19  ;;  %2810 = vmatpush1.bf16.msra.mxu1 %v10929_v30 }
 0x57f   :  { %2770 = vmatprep.subr.bf16.mxu0 %v10930_v7  ;;  %2811 = vmatprep.subr.bf16.mxu1 %v10931_v62 }
 0x582   :  { %2771 = vmatpush1.bf16.msra.mxu0 %v10932_v63  ;;  %2812 = vmatpush1.bf16.msra.mxu1 %v10933_v6 }
 0x583   :  { %2858 = vmatprep.subr.bf16.mxu0 %v10934_v12  ;;  %2899 = vmatprep.subr.bf16.mxu1 %v10935_v35 }
 0x5b4   :  { %v2488_v10 = vpop.f32.mrb[60].mxu0  ;;  %v2529_v44 = vpop.f32.mrb[60].mxu1 }
 0x5b5   :  { %v2536_v29 = vadd.f32 %v2488_v10, %v192_v14  ;;  %v2538_v41 = vadd.f32 %v2529_v44, %v305_v27  ;;  %v2490_v50 = vpop.f32.mrb[61].mxu0  ;;  %v2531_v47 = vpop.f32.mrb[61].mxu1 }
 0x5b6   :  { %v2537_v25 = vadd.f32 %v2490_v50, %v194_v38  ;;  %v2539_v5 = vadd.f32 %v2531_v47, %v307_v21  ;;  %v2492_v46 = vpop.f32.mrb[62].mxu0  ;;  %v2533_v28 = vpop.f32.mrb[62].mxu1  ;;  %v10957_v38 = vld [vmem:[#allocation99_spill] sm:$0xff]  ;;  %v10959_v21 = vld [vmem:[#allocation101_spill] sm:$0xff] }
 0x5b7   :  { %4366 = vtanh.f32 %v2536_v29  ;;  %v2493_v20 = vpop.f32.mrb[63].mxu0  ;;  %v2534_v32 = vpop.f32.mrb[63].mxu1  ;;  %v10960_v29 = vld [vmem:[#allocation102_spill] sm:$0xff]  ;;  %v8338_v50 = vld [vmem:[%s10045_s5] sm:$0xff]  ;;  %v8346_v46 = vld [vmem:[%s10045_s5 + $0x8] sm:$0xff] }
 0x5b8   :  { %4368 = vtanh.f32 %v2537_v25 }
 0x5b9   :  { %4370 = vtanh.f32 %v2539_v5 }
 0x5ba   :  { %4372 = vtanh.f32 %v2538_v41  ;;  %v10961_v41 = vld [vmem:[#allocation103_spill] sm:$0xff] }
 0x5c1   :  { %v4367_v18 = vpop.eup %4366 }
 0x5c2   :  { %v2544_v57 = vmul.f32 0.5, %v4367_v18  ;;  %v4369_v61 = vpop.eup %4368  ;;  %v8352_v18 = vld [vmem:[%s10045_s5 + $0x18] sm:$0xff] }
 0x5c3   :  { %v2546_v30 = vmul.f32 0.5, %v4369_v61  ;;  %v4371_v7 = vpop.eup %4370 }
 0x5c4   :  { %v2545_v19 = vadd.f32 0.5, %v2544_v57  ;;  %v4373_v35 = vpop.eup %4372 }
 0x5c5   :  { %v2547_v62 = vadd.f32 0.5, %v2546_v30  ;;  %v2548_v56 = vmul.f32 0.5, %v4373_v35  ;;  %v10964_v30 = vld [vmem:[#allocation106_spill] sm:$0xff] }
 0x5c6   :  { %v2551_v63 = vmul.f32 %v4371_v7, %v2545_v19  ;;  %v10963_v19 = vld [vmem:[#allocation105_spill] sm:$0xff]  ;;  %v10965_v7 = vld [vmem:[#allocation107_spill] sm:$0xff] }
 0x5c7   :  { %v2550_v6 = vmul.f32 %v2547_v62, %v7766_v24  ;;  %v2549_v14 = vadd.f32 0.5, %v2548_v56  ;;  %v10944_v24 = vld [vmem:[#allocation60_spill] sm:$0xff]  ;;  %v10969_v56 = vld [vmem:[#allocation111_spill] sm:$0xff] }
 0x5c8   :  { %v10966_v62 = vld [vmem:[#allocation108_spill] sm:$0xff] }
 0x5c9   :  { %v8298_v12 = vadd.f32 %v2551_v63, %v2550_v6  ;;  %v10967_v63 = vld [vmem:[#allocation109_spill] sm:$0xff]  ;;  %v10968_v6 = vld [vmem:[#allocation110_spill] sm:$0xff] }
 0x5cb   :  { %4374 = vtanh.f32 %v8298_v12 }
 0x5d5   :  { %v4375_v53 = vpop.eup %4374 }
 0x5d6   :  { %v2554_v27 = vmul.f32 %v4375_v53, %v2549_v14  ;;  %v10970_v14 = vld [vmem:[#allocation112_spill] sm:$0xff] }
 0x5d8   :  { %v8301_v51 = vpack.c.bf16 %v2554_v27, %v2554_v27  ;;  %v10971_v27 = vld [vmem:[#allocation113_spill] sm:$0xff] }
 0x5da   :  { %2789 = vmatmul.mubr.bf16.vlgmr.msra.gmra.mrb[72].mxu0 %v8301_v51  ;;  %2830 = vmatmul.mubr.bf16.vlgmr.msra.gmra.mrb[72].mxu1 %v8301_v51 }
 0x5db   :  { %2859 = vmatpush1.bf16.msra.mxu0 %v7776_v16  ;;  %2900 = vmatpush1.bf16.msra.mxu1 %v7782_v0  ;;  %v10945_v16 = vld [vmem:[#allocation59_spill] sm:$0xff]  ;;  %v10946_v0 = vld [vmem:[#allocation61_spill] sm:$0xff] }
 0x5dc   :  { %2860 = vmatprep.subr.bf16.mxu0 %v7788_v17  ;;  %2901 = vmatprep.subr.bf16.mxu1 %v7794_v48  ;;  %v10947_v17 = vld [vmem:[#allocation56_spill] sm:$0xff]  ;;  %v10948_v48 = vld [vmem:[#allocation57_spill] sm:$0xff] }
 0x5df   :  { %2861 = vmatpush1.bf16.msra.mxu0 %v7800_v34  ;;  %2902 = vmatpush1.bf16.msra.mxu1 %v7806_v59  ;;  %v10949_v34 = vld [vmem:[#allocation91_spill] sm:$0xff]  ;;  %v10950_v59 = vld [vmem:[#allocation92_spill] sm:$0xff] }
 0x5e0   :  { %2862 = vmatprep.subr.bf16.mxu0 %v7812_v58  ;;  %2903 = vmatprep.subr.bf16.mxu1 %v7818_v11  ;;  %v10951_v58 = vld [vmem:[#allocation93_spill] sm:$0xff]  ;;  %v10952_v11 = vld [vmem:[#allocation94_spill] sm:$0xff] }
 0x5e3   :  { %2863 = vmatpush1.bf16.msra.mxu0 %v7824_v23  ;;  %2904 = vmatpush1.bf16.msra.mxu1 %v7830_v22  ;;  %v10953_v23 = vld [vmem:[#allocation95_spill] sm:$0xff]  ;;  %v10954_v22 = vld [vmem:[#allocation96_spill] sm:$0xff] }
 0x5e4   :  { %2864 = vmatprep.subr.bf16.mxu0 %v7836_v1  ;;  %2905 = vmatprep.subr.bf16.mxu1 %v7842_v9  ;;  %v10955_v1 = vld [vmem:[#allocation97_spill] sm:$0xff]  ;;  %v10956_v9 = vld [vmem:[#allocation98_spill] sm:$0xff] }
 0x5e7   :  { %2865 = vmatpush1.bf16.msra.mxu0 %v10944_v24  ;;  %2906 = vmatpush1.bf16.msra.mxu1 %v10945_v16  ;;  %v10972_v24 = vld [vmem:[#allocation114_spill] sm:$0xff] }
 0x5e8   :  { %2866 = vmatprep.subr.bf16.mxu0 %v10946_v0  ;;  %2907 = vmatprep.subr.bf16.mxu1 %v10947_v17 }
 0x5eb   :  { %2867 = vmatpush1.bf16.msra.mxu0 %v10948_v48  ;;  %2908 = vmatpush1.bf16.msra.mxu1 %v10949_v34 }
 0x5ec   :  { %2868 = vmatprep.subr.bf16.mxu0 %v10950_v59  ;;  %2909 = vmatprep.subr.bf16.mxu1 %v10951_v58 }
 0x5ef   :  { %2869 = vmatpush1.bf16.msra.mxu0 %v10952_v11  ;;  %2910 = vmatpush1.bf16.msra.mxu1 %v10953_v23  ;;  %v10973_v23 = vld [vmem:[#allocation115_spill] sm:$0xff] }
 0x5f0   :  { %2870 = vmatprep.subr.bf16.mxu0 %v10954_v22  ;;  %2911 = vmatprep.subr.bf16.mxu1 %v10955_v1  ;;  %v10974_v22 = vld [vmem:[#allocation116_spill] sm:$0xff]  ;;  %v10975_v1 = vld [vmem:[#allocation117_spill] sm:$0xff] }
 0x5f3   :  { %2871 = vmatpush1.bf16.msra.mxu0 %v10956_v9  ;;  %2912 = vmatpush1.bf16.msra.mxu1 %v10957_v38  ;;  %v10976_v9 = vld [vmem:[#allocation118_spill] sm:$0xff] }
 0x5f4   :  { %2872 = vmatprep.subr.bf16.mxu0 %v10958_v43  ;;  %2913 = vmatprep.subr.bf16.mxu1 %v10959_v21  ;;  %v10980_v38 = vld [vmem:[#allocation122_spill] sm:$0xff]  ;;  %v10981_v43 = vld [vmem:[#allocation123_spill] sm:$0xff]  ;;  %v10982_v21 = vld [vmem:[#allocation124_spill] sm:$0xff] }
 0x5f7   :  { %2873 = vmatpush1.bf16.msra.mxu0 %v10960_v29  ;;  %2914 = vmatpush1.bf16.msra.mxu1 %v10961_v41  ;;  %v10984_v29 = vld [vmem:[#allocation126_spill] sm:$0xff] }
 0x5f8   :  { %v2590_v10 = vpop.f32.mrb[64].mxu0  ;;  %v2631_v44 = vpop.f32.mrb[64].mxu1  ;;  %2874 = vmatprep.subr.bf16.mxu0 %v7958_v3  ;;  %2915 = vmatprep.subr.bf16.mxu1 %v7964_v31  ;;  %v10962_v31 = vld [vmem:[#allocation104_spill] sm:$0xff] }
 0x5f9   :  { %v2591_v47 = vadd.f32 %v8338_v50, %v2590_v10  ;;  %v2592_v25 = vpop.f32.mrb[65].mxu0  ;;  %v2633_v5 = vpop.f32.mrb[65].mxu1 }
 0x5fa   :  { %v2593_v28 = vadd.f32 %v8346_v46, %v2592_v25  ;;  %v2594_v20 = vpop.f32.mrb[66].mxu0  ;;  %v2635_v32 = vpop.f32.mrb[66].mxu1  ;;  %v2634_v57 = vadd.f32 %v8352_v18, %v2633_v5  ;;  %v8404_v25 = vld [vmem:[%s10044_s6 + $0xc] ss:$16 sps:$4 sm:$0xff]  }
 0x5fb   :  { %4376 = vtanh.f32 %v2591_v47  ;;  %v2595_v3 = vpop.f32.mrb[67].mxu0  ;;  %v2636_v61 = vpop.f32.mrb[67].mxu1  ;;  %2875 = vmatpush1.bf16.msra.mxu0 %v7971_v36  ;;  %2916 = vmatpush1.bf16.msra.mxu1 %v10962_v31  ;;  %v8366_v36 = vld [vmem:[%s10045_s5 + $0x10] sm:$0xff]  ;;  %v8422_v20 = vld [vmem:[%s10044_s6 + $0x8] ss:$16 sps:$4 sm:$0xff]  }
 0x5fc   :  { %4378 = vtanh.f32 %v2593_v28  ;;  %2876 = vmatprep.subr.bf16.mxu0 %v10963_v19  ;;  %2917 = vmatprep.subr.bf16.mxu1 %v10964_v30  ;;  %v2632_v35 = vadd.f32 %v8366_v36, %v2631_v44  ;;  %v10983_v44 = vld [vmem:[#allocation125_spill] sm:$0xff]  ;;  %v8446_v3 = vld [vmem:[%s10044_s6 + $0x28] ss:$16 sps:$4 sm:$0xff]   ;;  %v8458_v31 = vld [vmem:[%s10044_s6 + $0x4c] ss:$16 sps:$4 sm:$0xff]  }
 0x5fd   :  { %4380 = vtanh.f32 %v2634_v57  ;;  %v8398_v47 = vld [vmem:[%s10044_s6 + $0x4] ss:$16 sps:$4 sm:$0xff]   ;;  %v8440_v57 = vld [vmem:[%s10044_s6 + $0x20] ss:$16 sps:$4 sm:$0xff]   ;;  %v8470_v30 = vld [vmem:[%s10044_s6 + $0x48] ss:$16 sps:$4 sm:$0xff]  }
 0x5fe   :  { %4382 = vtanh.f32 %v2632_v35  ;;  %v8428_v32 = vld [vmem:[%s10044_s6 + $0x24] ss:$16 sps:$4 sm:$0xff]   ;;  %v8464_v19 = vld [vmem:[%s10044_s6 + $0x40] ss:$16 sps:$4 sm:$0xff]  }
 0x5ff   :  { %2877 = vmatpush1.bf16.msra.mxu0 %v10965_v7  ;;  %2918 = vmatpush1.bf16.msra.mxu1 %v10966_v62  ;;  %v8452_v61 = vld [vmem:[%s10044_s6 + $0x44] ss:$16 sps:$4 sm:$0xff]   ;;  %v8482_v62 = vld [vmem:[%s10044_s6 + $0x6c] ss:$16 sps:$4 sm:$0xff]  }
 0x600   :  { %2878 = vmatprep.subr.bf16.mxu0 %v10967_v63  ;;  %2919 = vmatprep.subr.bf16.mxu1 %v10968_v6  ;;  %v8476_v7 = vld [vmem:[%s10044_s6 + $0x64] ss:$16 sps:$4 sm:$0xff]   ;;  %v8488_v63 = vld [vmem:[%s10044_s6 + $0x60] ss:$16 sps:$4 sm:$0xff]   ;;  %v8494_v6 = vld [vmem:[%s10044_s6 + $0x68] ss:$16 sps:$4 sm:$0xff]  }
 0x601   :  { %v8500_v35 = vld [vmem:[%s10044_s6 + $0x84] ss:$16 sps:$4 sm:$0xff]  }
 0x603   :  { %2879 = vmatpush1.bf16.msra.mxu0 %v10969_v56  ;;  %2920 = vmatpush1.bf16.msra.mxu1 %v10970_v14  ;;  %v8506_v56 = vld [vmem:[%s10044_s6 + $0x8c] ss:$16 sps:$4 sm:$0xff]   ;;  %v8512_v14 = vld [vmem:[%s10044_s6 + $0x80] ss:$16 sps:$4 sm:$0xff]  }
 0x604   :  { %2880 = vmatprep.subr.bf16.mxu0 %v10971_v27  ;;  %2921 = vmatprep.subr.bf16.mxu1 %v10972_v24  ;;  %v8524_v27 = vld [vmem:[%s10044_s6 + $0xa4] ss:$16 sps:$4 sm:$0xff]   ;;  %v8530_v24 = vld [vmem:[%s10044_s6 + $0xac] ss:$16 sps:$4 sm:$0xff]  }
 0x605   :  { %v4377_v53 = vpop.eup %4376 }
 0x606   :  { %v2642_v16 = vmul.f32 0.5, %v4377_v53  ;;  %v4379_v0 = vpop.eup %4378  ;;  %v8518_v53 = vld [vmem:[%s10044_s6 + $0x88] ss:$16 sps:$4 sm:$0xff]  }
 0x607   :  { %v2644_v48 = vmul.f32 0.5, %v4379_v0  ;;  %2881 = vmatpush1.bf16.msra.mxu0 %v8044_v45  ;;  %2922 = vmatpush1.bf16.msra.mxu1 %v8050_v33  ;;  %v4381_v34 = vpop.eup %4380  ;;  %v10977_v33 = vld [vmem:[#allocation119_spill] sm:$0xff]  ;;  %v8542_v0 = vld [vmem:[%s10044_s6 + $0xa8] ss:$16 sps:$4 sm:$0xff]  }
 0x608   :  { %v2643_v17 = vadd.f32 0.5, %v2642_v16  ;;  %2882 = vmatprep.subr.bf16.mxu0 %v8056_v2  ;;  %2923 = vmatprep.subr.bf16.mxu1 %v8062_v13  ;;  %v10978_v2 = vld [vmem:[#allocation120_spill] sm:$0xff]  ;;  %v10979_v13 = vld [vmem:[#allocation121_spill] sm:$0xff] }
 0x609   :  { %v2645_v59 = vadd.f32 0.5, %v2644_v48  ;;  %v8536_v16 = vld [vmem:[%s10044_s6 + $0xa0] ss:$16 sps:$4 sm:$0xff]   ;;  %v8554_v48 = vld [vmem:[%s10044_s6 + $0xcc] ss:$16 sps:$4 sm:$0xff]  }
 0x60a   :  { %v2649_v58 = vmul.f32 %v4381_v34, %v2643_v17  ;;  %v8548_v17 = vld [vmem:[%s10044_s6 + $0xc4] ss:$16 sps:$4 sm:$0xff]  }
 0x60b   :  { %v2648_v11 = vmul.f32 %v2645_v59, %v8078_v60  ;;  %2883 = vmatpush1.bf16.msra.mxu0 %v10973_v23  ;;  %2924 = vmatpush1.bf16.msra.mxu1 %v10974_v22  ;;  %v4383_v60 = vpop.eup %4382  ;;  %v8567_v23 = vld [vmem:[%s10044_s6 + $0xc8] ss:$16 sps:$4 sm:$0xff]  }
 0x60c   :  { %2884 = vmatprep.subr.bf16.mxu0 %v10975_v1  ;;  %2925 = vmatprep.subr.bf16.mxu1 %v10976_v9  ;;  %v2646_v10 = vmul.f32 0.5, %v4383_v60 }
 0x60d   :  { %v8382_v45 = vadd.f32 %v2649_v58, %v2648_v11  ;;  %v8561_v11 = vld [vmem:[%s10044_s6 + $0xc0] ss:$16 sps:$4 sm:$0xff]  }
 0x60e   :  { %v2647_v41 = vadd.f32 0.5, %v2646_v10  ;;  %v8605_v10 = vld [vmem:[%s10044_s6 + $0x10c] ss:$16 sps:$4 sm:$0xff]  }
 0x60f   :  { %4384 = vtanh.f32 %v8382_v45  ;;  %2885 = vmatpush1.bf16.msra.mxu0 %v10977_v33  ;;  %2926 = vmatpush1.bf16.msra.mxu1 %v10978_v2  ;;  %v8574_v2 = vld [vmem:[%s10044_s6 + $0xe4] ss:$16 sps:$4 sm:$0xff]  }
 0x610   :  { %2886 = vmatprep.subr.bf16.mxu0 %v10979_v13  ;;  %2927 = vmatprep.subr.bf16.mxu1 %v10980_v38  ;;  %v8580_v13 = vld [vmem:[%s10044_s6 + $0xec] ss:$16 sps:$4 sm:$0xff]  }
 0x613   :  { %2887 = vmatpush1.bf16.msra.mxu0 %v10981_v43  ;;  %2928 = vmatpush1.bf16.msra.mxu1 %v10982_v21  ;;  %v8587_v43 = vld [vmem:[%s10044_s6 + $0xe0] ss:$16 sps:$4 sm:$0xff]   ;;  %v8593_v21 = vld [vmem:[%s10044_s6 + $0xe8] ss:$16 sps:$4 sm:$0xff]  }
 0x614   :  { %2888 = vmatprep.subr.bf16.mxu0 %v10983_v44  ;;  %2929 = vmatprep.subr.bf16.mxu1 %v10984_v29  ;;  %v8611_v44 = vld [vmem:[%s10044_s6 + $0x100] ss:$16 sps:$4 sm:$0xff]   ;;  %v8617_v29 = vld [vmem:[%s10044_s6 + $0x108] ss:$16 sps:$4 sm:$0xff]  }
 0x617   :  { %2889 = vmatpush1.bf16.msra.mxu0 %v8144_v49  ;;  %2930 = vmatpush1.bf16.msra.mxu1 %v8150_v26  ;;  %v8416_v26 = vld [vmem:[%s10044_s6] ss:$16 sps:$4 sm:$0xff]  }
 0x618   :  { %2956 = vmatprep.subr.bf16.mxu0 %v8398_v47  ;;  %2997 = vmatprep.subr.bf16.mxu1 %v8404_v25 }
 0x619   :  { %v4385_v5 = vpop.eup %4384 }
 0x61a   :  { %v2652_v28 = vmul.f32 %v4385_v5, %v2647_v41  ;;  %v8623_v41 = vld [vmem:[%s10044_s6 + $0x124] ss:$16 sps:$4 sm:$0xff]   ;;  %v8629_v5 = vld [vmem:[%s10044_s6 + $0x12c] ss:$16 sps:$4 sm:$0xff]  }
 0x61b   :  { %10985 = vst [vmem:[#allocation127_spill] sm:$0xff] %v8623_v41  ;;  %10986 = vst [vmem:[#allocation128_spill] sm:$0xff] %v8629_v5 }
 0x61c   :  { %v8407_v49 = vpack.c.bf16 %v2652_v28, %v2652_v28 }
 0x61e   :  { %2890 = vmatprep.mubr.bf16.mxu0 %v8407_v49  ;;  %2931 = vmatprep.mubr.bf16.mxu1 %v8407_v49 }
 0x61f   :  { %2891 = vmatmul.mubr.bf16.vlgmr.msra.gmra.mrb[76].mxu0 %v8301_v51  ;;  %2932 = vmatmul.mubr.bf16.vlgmr.msra.gmra.mrb[76].mxu1 %v8301_v51  ;;  %v8434_v51 = vld [vmem:[%s10044_s6 + $0x2c] ss:$16 sps:$4 sm:$0xff]  }
 0x620   :  { %2957 = vmatpush1.bf16.msra.mxu0 %v8416_v26  ;;  %2998 = vmatpush1.bf16.msra.mxu1 %v8422_v20 }
 0x621   :  { %2958 = vmatprep.subr.bf16.mxu0 %v8428_v32  ;;  %2999 = vmatprep.subr.bf16.mxu1 %v8434_v51 }
 0x624   :  { %2959 = vmatpush1.bf16.msra.mxu0 %v8440_v57  ;;  %3000 = vmatpush1.bf16.msra.mxu1 %v8446_v3 }
 0x625   :  { %2960 = vmatprep.subr.bf16.mxu0 %v8452_v61  ;;  %3001 = vmatprep.subr.bf16.mxu1 %v8458_v31 }
 0x628   :  { %2961 = vmatpush1.bf16.msra.mxu0 %v8464_v19  ;;  %3002 = vmatpush1.bf16.msra.mxu1 %v8470_v30 }
 0x629   :  { %2962 = vmatprep.subr.bf16.mxu0 %v8476_v7  ;;  %3003 = vmatprep.subr.bf16.mxu1 %v8482_v62 }
 0x62c   :  { %2963 = vmatpush1.bf16.msra.mxu0 %v8488_v63  ;;  %3004 = vmatpush1.bf16.msra.mxu1 %v8494_v6 }
 0x62d   :  { %2964 = vmatprep.subr.bf16.mxu0 %v8500_v35  ;;  %3005 = vmatprep.subr.bf16.mxu1 %v8506_v56 }
 0x630   :  { %2965 = vmatpush1.bf16.msra.mxu0 %v8512_v14  ;;  %3006 = vmatpush1.bf16.msra.mxu1 %v8518_v53 }
 0x631   :  { %2966 = vmatprep.subr.bf16.mxu0 %v8524_v27  ;;  %3007 = vmatprep.subr.bf16.mxu1 %v8530_v24 }
 0x634   :  { %2967 = vmatpush1.bf16.msra.mxu0 %v8536_v16  ;;  %3008 = vmatpush1.bf16.msra.mxu1 %v8542_v0 }
 0x635   :  { %2968 = vmatprep.subr.bf16.mxu0 %v8548_v17  ;;  %3009 = vmatprep.subr.bf16.mxu1 %v8554_v48 }
 0x638   :  { %v2688_v34 = vpop.f32.mrb[68].mxu0  ;;  %v2729_v59 = vpop.f32.mrb[68].mxu1  ;;  %2969 = vmatpush1.bf16.msra.mxu0 %v8561_v11  ;;  %3010 = vmatpush1.bf16.msra.mxu1 %v8567_v23 }
 0x639   :  { %v2689_v58 = vadd.f32 %v8188_v54, %v2688_v34  ;;  %v2690_v22 = vpop.f32.mrb[69].mxu0  ;;  %v2731_v1 = vpop.f32.mrb[69].mxu1  ;;  %2970 = vmatprep.subr.bf16.mxu0 %v8574_v2  ;;  %3011 = vmatprep.subr.bf16.mxu1 %v8580_v13  ;;  %v2730_v28 = vadd.f32 %v8218_v39, %v2729_v59  ;;  %v8648_v39 = vld [vmem:[%s10044_s6 + $0x144] ss:$16 sps:$4 sm:$0xff]   ;;  %v8654_v59 = vld [vmem:[%s10044_s6 + $0x14c] ss:$16 sps:$4 sm:$0xff]  }
 0x63a   :  { %v2691_v9 = vadd.f32 %v8196_v4, %v2690_v22  ;;  %v2692_v33 = vpop.f32.mrb[70].mxu0  ;;  %v2733_v54 = vpop.f32.mrb[70].mxu1  ;;  %v2732_v38 = vadd.f32 %v8204_v40, %v2731_v1  ;;  %v8599_v40 = vld [vmem:[%s10044_s6 + $0x104] ss:$16 sps:$4 sm:$0xff]   ;;  %v8642_v22 = vld [vmem:[%s10044_s6 + $0x128] ss:$16 sps:$4 sm:$0xff]  }
 0x63b   :  { %4386 = vtanh.f32 %v2689_v58  ;;  %v2693_v4 = vpop.f32.mrb[71].mxu0  ;;  %v2734_v60 = vpop.f32.mrb[71].mxu1  ;;  %v8636_v58 = vld [vmem:[%s10044_s6 + $0x120] ss:$16 sps:$4 sm:$0xff]   ;;  %10988 = vst [vmem:[#allocation62_spill] sm:$0xff] %v8642_v22  ;;  %10989 = vst [vmem:[#allocation64_spill] sm:$0xff] %v8648_v39 }
 0x63c   :  { %4388 = vtanh.f32 %v2691_v9  ;;  %2971 = vmatpush1.bf16.msra.mxu0 %v8587_v43  ;;  %3012 = vmatpush1.bf16.msra.mxu1 %v8593_v21  ;;  %10987 = vst [vmem:[#allocation129_spill] sm:$0xff] %v8636_v58  ;;  %10990 = vst [vmem:[#allocation63_spill] sm:$0xff] %v8654_v59  ;;  %v8660_v4 = vld [vmem:[%s10044_s6 + $0x140] ss:$16 sps:$4 sm:$0xff]   ;;  %v8666_v60 = vld [vmem:[%s10044_s6 + $0x148] ss:$16 sps:$4 sm:$0xff]  }
 0x63d   :  { %2972 = vmatprep.subr.bf16.mxu0 %v8599_v40  ;;  %3013 = vmatprep.subr.bf16.mxu1 %v8605_v10  ;;  %4390 = vtanh.f32 %v2732_v38  ;;  %10991 = vst [vmem:[#allocation65_spill] sm:$0xff] %v8660_v4  ;;  %10992 = vst [vmem:[#allocation7_spill] sm:$0xff] %v8666_v60 }
 0x63e   :  { %4392 = vtanh.f32 %v2730_v28  ;;  %v8672_v28 = vld [vmem:[%s10044_s6 + $0x164] ss:$16 sps:$4 sm:$0xff]  }
 0x63f   :  { %10993 = vst [vmem:[#allocation8_spill] sm:$0xff] %v8672_v28 }
 0x640   :  { %2973 = vmatpush1.bf16.msra.mxu0 %v8611_v44  ;;  %3014 = vmatpush1.bf16.msra.mxu1 %v8617_v29 }
 0x641   :  { %2974 = vmatprep.subr.bf16.mxu0 %v8623_v41  ;;  %3015 = vmatprep.subr.bf16.mxu1 %v8629_v5 }
 0x644   :  { %2975 = vmatpush1.bf16.msra.mxu0 %v8636_v58  ;;  %3016 = vmatpush1.bf16.msra.mxu1 %v8642_v22 }
 0x645   :  { %v4387_v34 = vpop.eup %4386  ;;  %2976 = vmatprep.subr.bf16.mxu0 %v8648_v39  ;;  %3017 = vmatprep.subr.bf16.mxu1 %v8654_v59 }
 0x646   :  { %v2740_v1 = vmul.f32 0.5, %v4387_v34  ;;  %v4389_v9 = vpop.eup %4388 }
 0x647   :  { %v2742_v54 = vmul.f32 0.5, %v4389_v9  ;;  %v4391_v38 = vpop.eup %4390 }
 0x648   :  { %v2741_v33 = vadd.f32 0.5, %v2740_v1  ;;  %2977 = vmatpush1.bf16.msra.mxu0 %v8660_v4  ;;  %3018 = vmatpush1.bf16.msra.mxu1 %v8666_v60  ;;  %v8678_v1 = vld [vmem:[%s10044_s6 + $0x16c] ss:$16 sps:$4 sm:$0xff]  }
 0x649   :  { %v2743_v34 = vadd.f32 0.5, %v2742_v54  ;;  %2978 = vmatprep.subr.bf16.mxu0 %v8672_v28  ;;  %10994 = vst [vmem:[#allocation9_spill] sm:$0xff] %v8678_v1  ;;  %3019 = vmatprep.subr.bf16.mxu1 %v8678_v1  ;;  %v8691_v54 = vld [vmem:[%s10044_s6 + $0x168] ss:$16 sps:$4 sm:$0xff]  }
 0x64a   :  { %v2747_v59 = vmul.f32 %v4391_v38, %v2741_v33  ;;  %v8685_v33 = vld [vmem:[%s10044_s6 + $0x160] ss:$16 sps:$4 sm:$0xff]   ;;  %10996 = vst [vmem:[#allocation11_spill] sm:$0xff] %v8691_v54 }
 0x64b   :  { %v2746_v9 = vmul.f32 %v2743_v34, %v8232_v37  ;;  %10995 = vst [vmem:[#allocation10_spill] sm:$0xff] %v8685_v33  ;;  %v8699_v37 = vld [vmem:[%s10044_s6 + $0x184] ss:$16 sps:$4 sm:$0xff]   ;;  %v8705_v34 = vld [vmem:[%s10044_s6 + $0x18c] ss:$16 sps:$4 sm:$0xff]  }
 0x64c   :  { %2979 = vmatpush1.bf16.msra.mxu0 %v8685_v33  ;;  %3020 = vmatpush1.bf16.msra.mxu1 %v8691_v54  ;;  %10998 = vst [vmem:[#allocation13_spill] sm:$0xff] %v8699_v37  ;;  %10999 = vst [vmem:[#allocation14_spill] sm:$0xff] %v8705_v34  ;;  %v8730_v54 = vld [vmem:[%s10044_s6 + $0x1ac] ss:$16 sps:$4 sm:$0xff]   ;;  %v8742_v33 = vld [vmem:[%s10044_s6 + $0x1a8] ss:$16 sps:$4 sm:$0xff]  }
 0x64d   :  { %v8694_v38 = vadd.f32 %v2747_v59, %v2746_v9  ;;  %2980 = vmatprep.subr.bf16.mxu0 %v8699_v37  ;;  %3021 = vmatprep.subr.bf16.mxu1 %v8705_v34  ;;  %v8712_v59 = vld [vmem:[%s10044_s6 + $0x180] ss:$16 sps:$4 sm:$0xff]   ;;  %v8718_v9 = vld [vmem:[%s10044_s6 + $0x188] ss:$16 sps:$4 sm:$0xff]   ;;  %v4393_v37 = vpop.eup %4392  ;;  %v8724_v34 = vld [vmem:[%s10044_s6 + $0x1a4] ss:$16 sps:$4 sm:$0xff]  }
 0x64e   :  { %11000 = vst [vmem:[#allocation15_spill] sm:$0xff] %v8712_v59  ;;  %11001 = vst [vmem:[#allocation16_spill] sm:$0xff] %v8718_v9 }
 0x64f   :  { %10997 = vst [vmem:[#allocation12_spill] sm:$0xff] %v8694_v38  ;;  %4394 = vtanh.f32 %v8694_v38  ;;  %11002 = vst [vmem:[#allocation19_spill] sm:$0xff] %v8724_v34  ;;  %v8790_v38 = vld [vmem:[%s10044_s6 + $0x1e8] ss:$16 sps:$4 sm:$0xff]  }
 0x650   :  { %2981 = vmatpush1.bf16.msra.mxu0 %v8712_v59  ;;  %3022 = vmatpush1.bf16.msra.mxu1 %v8718_v9  ;;  %11003 = vst [vmem:[#allocation17_spill] sm:$0xff] %v8730_v54  ;;  %v2744_v59 = vmul.f32 0.5, %v4393_v37  ;;  %v8736_v9 = vld [vmem:[%s10044_s6 + $0x1a0] ss:$16 sps:$4 sm:$0xff]   ;;  %11005 = vst [vmem:[#allocation20_spill] sm:$0xff] %v8742_v33 }
 0x651   :  { %2982 = vmatprep.subr.bf16.mxu0 %v8724_v34  ;;  %3023 = vmatprep.subr.bf16.mxu1 %v8730_v54  ;;  %11004 = vst [vmem:[#allocation18_spill] sm:$0xff] %v8736_v9  ;;  %v8748_v34 = vld [vmem:[%s10044_s6 + $0x1c4] ss:$16 sps:$4 sm:$0xff]   ;;  %v8754_v37 = vld [vmem:[%s10044_s6 + $0x1cc] ss:$16 sps:$4 sm:$0xff]   ;;  %11013 = vst [vmem:[#allocation28_spill] sm:$0xff] %v8790_v38 }
 0x652   :  { %11006 = vst [vmem:[#allocation21_spill] sm:$0xff] %v8748_v34  ;;  %11007 = vst [vmem:[#allocation22_spill] sm:$0xff] %v8754_v37  ;;  %v8760_v54 = vld [vmem:[%s10044_s6 + $0x1c0] ss:$16 sps:$4 sm:$0xff]  }
 0x653   :  { %11008 = vst [vmem:[#allocation23_spill] sm:$0xff] %v8760_v54 }
 0x654   :  { %2983 = vmatpush1.bf16.msra.mxu0 %v8736_v9  ;;  %3024 = vmatpush1.bf16.msra.mxu1 %v8742_v33  ;;  %v2745_v9 = vadd.f32 0.5, %v2744_v59  ;;  %v8766_v33 = vld [vmem:[%s10044_s6 + $0x1c8] ss:$16 sps:$4 sm:$0xff]   ;;  %v8778_v59 = vld [vmem:[%s10044_s6 + $0x1ec] ss:$16 sps:$4 sm:$0xff]  }
 0x655   :  { %2984 = vmatprep.subr.bf16.mxu0 %v8748_v34  ;;  %3025 = vmatprep.subr.bf16.mxu1 %v8754_v37  ;;  %11009 = vst [vmem:[#allocation24_spill] sm:$0xff] %v8766_v33  ;;  %v8772_v37 = vld [vmem:[%s10044_s6 + $0x1e4] ss:$16 sps:$4 sm:$0xff]   ;;  %11011 = vst [vmem:[#allocation26_spill] sm:$0xff] %v8778_v59 }
 0x656   :  { %11010 = vst [vmem:[#allocation25_spill] sm:$0xff] %v8772_v37 }
 0x658   :  { %2985 = vmatpush1.bf16.msra.mxu0 %v8760_v54  ;;  %3026 = vmatpush1.bf16.msra.mxu1 %v8766_v33  ;;  %v8784_v33 = vld [vmem:[%s10044_s6 + $0x1e0] ss:$16 sps:$4 sm:$0xff]  }
 0x659   :  { %v4395_v34 = vpop.eup %4394  ;;  %2986 = vmatprep.subr.bf16.mxu0 %v8772_v37  ;;  %3027 = vmatprep.subr.bf16.mxu1 %v8778_v59  ;;  %11012 = vst [vmem:[#allocation27_spill] sm:$0xff] %v8784_v33  ;;  %v4818_v59 = vld [vmem:[%s10041_s2 + $0x4] ss:$16 sps:$4 sm:$0xff]  }
 0x65a   :  { %v2750_v54 = vmul.f32 %v4395_v34, %v2745_v9  ;;  %v4819_v34 = vld [vmem:[%s10041_s2 + $0xc] ss:$16 sps:$4 sm:$0xff]   ;;  %v4821_v9 = vld [vmem:[%s10041_s2 + $0x8] ss:$16 sps:$4 sm:$0xff]  }
 0x65c   :  { %2987 = vmatpush1.bf16.msra.mxu0 %v8784_v33  ;;  %3028 = vmatpush1.bf16.msra.mxu1 %v8790_v38  ;;  %v2955_v37 = vpack.c.bf16 %v2750_v54, %v2750_v54  ;;  %v4820_v54 = vld [vmem:[%s10041_s2] ss:$16 sps:$4 sm:$0xff]  }
 0x65d   :  { %3058 = vmatprep.subr.bf16.mxu0 %v4818_v59  ;;  %3099 = vmatprep.subr.bf16.mxu1 %v4819_v34  ;;  %v4822_v59 = vld [vmem:[%s10041_s2 + $0x24] ss:$16 sps:$4 sm:$0xff]   ;;  %v4825_v34 = vld [vmem:[%s10041_s2 + $0x28] ss:$16 sps:$4 sm:$0xff]  }
 0x65e   :  { %2988 = vmatprep.mubr.bf16.mxu0 %v2955_v37  ;;  %3029 = vmatprep.mubr.bf16.mxu1 %v2955_v37  ;;  %v4823_v37 = vld [vmem:[%s10041_s2 + $0x2c] ss:$16 sps:$4 sm:$0xff]   ;;  %v11019_v33 = vld [vmem:[#allocation73_spill] sm:$0xff] }
 0x65f   :  { %2989 = vmatmul.mubr.bf16.vlgmr.msra.gmra.mrb[80].mxu0 %v8407_v49  ;;  %3030 = vmatmul.mubr.bf16.vlgmr.msra.gmra.mrb[80].mxu1 %v8407_v49  ;;  %v4824_v49 = vld [vmem:[%s10041_s2 + $0x20] ss:$16 sps:$4 sm:$0xff]   ;;  %v313_v1 = vadd.f32 %v11019_v33, %v10942_v52 }
 0x660   :  { %3059 = vmatpush1.bf16.msra.mxu0 %v4820_v54  ;;  %3100 = vmatpush1.bf16.msra.mxu1 %v4821_v9  ;;  %v4826_v54 = vld [vmem:[%s10041_s2 + $0x44] ss:$16 sps:$4 sm:$0xff]   ;;  %v4827_v9 = vld [vmem:[%s10041_s2 + $0x4c] ss:$16 sps:$4 sm:$0xff]  }
 0x661   :  { %3060 = vmatprep.subr.bf16.mxu0 %v4822_v59  ;;  %3101 = vmatprep.subr.bf16.mxu1 %v4823_v37  ;;  %v4829_v59 = vld [vmem:[%s10041_s2 + $0x48] ss:$16 sps:$4 sm:$0xff]   ;;  %v4830_v37 = vld [vmem:[%s10041_s2 + $0x64] ss:$16 sps:$4 sm:$0xff]  }
 0x662   :  { %3090 = vmatprep.mubr.bf16.mxu0 %v10907_v42  ;;  %3131 = vmatprep.mubr.bf16.mxu1 %v10907_v42  ;;  %v4828_v42 = vld [vmem:[%s10041_s2 + $0x40] ss:$16 sps:$4 sm:$0xff]  }
 0x664   :  { %3061 = vmatpush1.bf16.msra.mxu0 %v4824_v49  ;;  %3102 = vmatpush1.bf16.msra.mxu1 %v4825_v34  ;;  %v4831_v49 = vld [vmem:[%s10041_s2 + $0x6c] ss:$16 sps:$4 sm:$0xff]   ;;  %v4832_v34 = vld [vmem:[%s10041_s2 + $0x60] ss:$16 sps:$4 sm:$0xff]  }
 0x665   :  { %3062 = vmatprep.subr.bf16.mxu0 %v4826_v54  ;;  %3103 = vmatprep.subr.bf16.mxu1 %v4827_v9  ;;  %v4833_v54 = vld [vmem:[%s10041_s2 + $0x68] ss:$16 sps:$4 sm:$0xff]   ;;  %v4834_v9 = vld [vmem:[%s10041_s2 + $0x84] ss:$16 sps:$4 sm:$0xff]  }
 0x668   :  { %3063 = vmatpush1.bf16.msra.mxu0 %v4828_v42  ;;  %3104 = vmatpush1.bf16.msra.mxu1 %v4829_v59  ;;  %v4835_v42 = vld [vmem:[%s10041_s2 + $0x8c] ss:$16 sps:$4 sm:$0xff]   ;;  %v4836_v59 = vld [vmem:[%s10041_s2 + $0x80] ss:$16 sps:$4 sm:$0xff]  }
 0x669   :  { %3064 = vmatprep.subr.bf16.mxu0 %v4830_v37  ;;  %3105 = vmatprep.subr.bf16.mxu1 %v4831_v49  ;;  %v4837_v37 = vld [vmem:[%s10041_s2 + $0x88] ss:$16 sps:$4 sm:$0xff]   ;;  %v4838_v49 = vld [vmem:[%s10041_s2 + $0xa4] ss:$16 sps:$4 sm:$0xff]  }
 0x66c   :  { %3065 = vmatpush1.bf16.msra.mxu0 %v4832_v34  ;;  %3106 = vmatpush1.bf16.msra.mxu1 %v4833_v54  ;;  %v4839_v34 = vld [vmem:[%s10041_s2 + $0xac] ss:$16 sps:$4 sm:$0xff]   ;;  %v4840_v54 = vld [vmem:[%s10041_s2 + $0xa0] ss:$16 sps:$4 sm:$0xff]  }
 0x66d   :  { %3066 = vmatprep.subr.bf16.mxu0 %v4834_v9  ;;  %3107 = vmatprep.subr.bf16.mxu1 %v4835_v42  ;;  %v4841_v9 = vld [vmem:[%s10041_s2 + $0xa8] ss:$16 sps:$4 sm:$0xff]   ;;  %v4842_v42 = vld [vmem:[%s10041_s2 + $0xc4] ss:$16 sps:$4 sm:$0xff]  }
 0x670   :  { %3067 = vmatpush1.bf16.msra.mxu0 %v4836_v59  ;;  %3108 = vmatpush1.bf16.msra.mxu1 %v4837_v37  ;;  %v4843_v59 = vld [vmem:[%s10041_s2 + $0xcc] ss:$16 sps:$4 sm:$0xff]   ;;  %v4844_v37 = vld [vmem:[%s10041_s2 + $0xc0] ss:$16 sps:$4 sm:$0xff]  }
 0x671   :  { %3068 = vmatprep.subr.bf16.mxu0 %v4838_v49  ;;  %3109 = vmatprep.subr.bf16.mxu1 %v4839_v34  ;;  %v4845_v49 = vld [vmem:[%s10041_s2 + $0xc8] ss:$16 sps:$4 sm:$0xff]   ;;  %v4846_v34 = vld [vmem:[%s10041_s2 + $0xe4] ss:$16 sps:$4 sm:$0xff]  }
 0x674   :  { %3069 = vmatpush1.bf16.msra.mxu0 %v4840_v54  ;;  %3110 = vmatpush1.bf16.msra.mxu1 %v4841_v9  ;;  %v4847_v54 = vld [vmem:[%s10041_s2 + $0xec] ss:$16 sps:$4 sm:$0xff]   ;;  %v4848_v9 = vld [vmem:[%s10041_s2 + $0xe0] ss:$16 sps:$4 sm:$0xff]  }
 0x675   :  { %3070 = vmatprep.subr.bf16.mxu0 %v4842_v42  ;;  %3111 = vmatprep.subr.bf16.mxu1 %v4843_v59  ;;  %v4849_v42 = vld [vmem:[%s10041_s2 + $0xe8] ss:$16 sps:$4 sm:$0xff]   ;;  %v8896_v59 = vld [vmem:[%s10042_s4 + $0x4] ss:$16 sps:$4 sm:$0xff]  }
 0x676   :  { %11014 = vst [vmem:[#allocation29_spill] sm:$0xff] %v8896_v59 }
 0x678   :  { %3071 = vmatpush1.bf16.msra.mxu0 %v4844_v37  ;;  %3112 = vmatpush1.bf16.msra.mxu1 %v4845_v49  ;;  %v8902_v37 = vld [vmem:[%s10042_s4 + $0xc] ss:$16 sps:$4 sm:$0xff]  }
 0x679   :  { %3072 = vmatprep.subr.bf16.mxu0 %v4846_v34  ;;  %3113 = vmatprep.subr.bf16.mxu1 %v4847_v54  ;;  %11015 = vst [vmem:[#allocation30_spill] sm:$0xff] %v8902_v37  ;;  %v11016_v49 = vld [vmem:[#allocation70_spill] sm:$0xff]  ;;  %v11017_v54 = vld [vmem:[#allocation72_spill] sm:$0xff] }
 0x67a   :  { %v198_v34 = vadd.f32 %v11016_v49, %v10936_v55 }
 0x67c   :  { %3073 = vmatpush1.bf16.msra.mxu0 %v4848_v9  ;;  %3114 = vmatpush1.bf16.msra.mxu1 %v4849_v42  ;;  %v311_v9 = vadd.f32 %v11017_v54, %v10938_v15  ;;  %v11018_v42 = vld [vmem:[#allocation71_spill] sm:$0xff] }
 0x67d   :  { %3160 = vmatprep.subr.bf16.mxu0 %v8896_v59  ;;  %3201 = vmatprep.subr.bf16.mxu1 %v8902_v37  ;;  %v200_v38 = vadd.f32 %v11018_v42, %v10940_v8 }
 0x6ad   :  { %v2790_v59 = vpop.f32.mrb[72].mxu0  ;;  %v2831_v28 = vpop.f32.mrb[72].mxu1 }
 0x6ae   :  { %v2838_v60 = vadd.f32 %v2790_v59, %v198_v34  ;;  %v2840_v4 = vadd.f32 %v2831_v28, %v311_v9  ;;  %v2792_v39 = vpop.f32.mrb[73].mxu0  ;;  %v2833_v22 = vpop.f32.mrb[73].mxu1  ;;  %v8972_v9 = vld [vmem:[%s10042_s4 + $0x40] ss:$16 sps:$4 sm:$0xff]  }
 0x6af   :  { %v2839_v58 = vadd.f32 %v2792_v39, %v200_v38  ;;  %v2841_v37 = vadd.f32 %v2833_v22, %v313_v1  ;;  %v2794_v5 = vpop.f32.mrb[74].mxu0  ;;  %v2835_v41 = vpop.f32.mrb[74].mxu1  ;;  %v8954_v1 = vld [vmem:[%s10042_s4 + $0x28] ss:$16 sps:$4 sm:$0xff]   ;;  %v8960_v38 = vld [vmem:[%s10042_s4 + $0x44] ss:$16 sps:$4 sm:$0xff]  }
 0x6b0   :  { %4396 = vtanh.f32 %v2838_v60  ;;  %v2795_v49 = vpop.f32.mrb[75].mxu0  ;;  %v2836_v55 = vpop.f32.mrb[75].mxu1 }
 0x6b1   :  { %4398 = vtanh.f32 %v2839_v58  ;;  %v8978_v49 = vld [vmem:[%s10042_s4 + $0x48] ss:$16 sps:$4 sm:$0xff]  }
 0x6b2   :  { %4400 = vtanh.f32 %v2841_v37  ;;  %v8966_v37 = vld [vmem:[%s10042_s4 + $0x4c] ss:$16 sps:$4 sm:$0xff]   ;;  %11021 = vst [vmem:[#allocation32_spill] sm:$0xff] %v8978_v49 }
 0x6b3   :  { %4402 = vtanh.f32 %v2840_v4  ;;  %v8948_v4 = vld [vmem:[%s10042_s4 + $0x20] ss:$16 sps:$4 sm:$0xff]  }
 0x6ba   :  { %v4397_v54 = vpop.eup %4396 }
 0x6bb   :  { %v2846_v42 = vmul.f32 0.5, %v4397_v54  ;;  %v4399_v8 = vpop.eup %4398  ;;  %v8984_v54 = vld [vmem:[%s10042_s4 + $0x64] ss:$16 sps:$4 sm:$0xff]  }
 0x6bc   :  { %v2848_v33 = vmul.f32 0.5, %v4399_v8  ;;  %v4401_v52 = vpop.eup %4400  ;;  %v8930_v8 = vld [vmem:[%s10042_s4 + $0x8] ss:$16 sps:$4 sm:$0xff]   ;;  %11022 = vst [vmem:[#allocation33_spill] sm:$0xff] %v8984_v54 }
 0x6bd   :  { %v2847_v15 = vadd.f32 0.5, %v2846_v42  ;;  %v4403_v41 = vpop.eup %4402  ;;  %v8990_v42 = vld [vmem:[%s10042_s4 + $0x6c] ss:$16 sps:$4 sm:$0xff]  }
 0x6be   :  { %v2849_v59 = vadd.f32 0.5, %v2848_v33  ;;  %v2850_v5 = vmul.f32 0.5, %v4403_v41  ;;  %11023 = vst [vmem:[#allocation34_spill] sm:$0xff] %v8990_v42  ;;  %v8996_v33 = vld [vmem:[%s10042_s4 + $0x60] ss:$16 sps:$4 sm:$0xff]  }
 0x6bf   :  { %v2853_v28 = vmul.f32 %v4401_v52, %v2847_v15  ;;  %v8924_v15 = vld [vmem:[%s10042_s4] ss:$16 sps:$4 sm:$0xff]   ;;  %v8936_v52 = vld [vmem:[%s10042_s4 + $0x24] ss:$16 sps:$4 sm:$0xff]   ;;  %11024 = vst [vmem:[#allocation35_spill] sm:$0xff] %v8996_v33 }
 0x6c0   :  { %v2852_v34 = vmul.f32 %v2849_v59, %v8298_v12  ;;  %v2851_v55 = vadd.f32 0.5, %v2850_v5  ;;  %v8942_v12 = vld [vmem:[%s10042_s4 + $0x2c] ss:$16 sps:$4 sm:$0xff]   ;;  %v9002_v59 = vld [vmem:[%s10042_s4 + $0x68] ss:$16 sps:$4 sm:$0xff]  }
 0x6c1   :  { %11025 = vst [vmem:[#allocation36_spill] sm:$0xff] %v9002_v59  ;;  %v9020_v41 = vld [vmem:[%s10042_s4 + $0x80] ss:$16 sps:$4 sm:$0xff]   ;;  %v9026_v5 = vld [vmem:[%s10042_s4 + $0x88] ss:$16 sps:$4 sm:$0xff]  }
 0x6c2   :  { %v8914_v39 = vadd.f32 %v2853_v28, %v2852_v34  ;;  %v9008_v28 = vld [vmem:[%s10042_s4 + $0x84] ss:$16 sps:$4 sm:$0xff]   ;;  %v9014_v34 = vld [vmem:[%s10042_s4 + $0x8c] ss:$16 sps:$4 sm:$0xff]   ;;  %11028 = vst [vmem:[#allocation39_spill] sm:$0xff] %v9020_v41  ;;  %11029 = vst [vmem:[#allocation40_spill] sm:$0xff] %v9026_v5 }
 0x6c3   :  { %11026 = vst [vmem:[#allocation37_spill] sm:$0xff] %v9008_v28  ;;  %11027 = vst [vmem:[#allocation38_spill] sm:$0xff] %v9014_v34 }
 0x6c4   :  { %11020 = vst [vmem:[#allocation31_spill] sm:$0xff] %v8914_v39  ;;  %4404 = vtanh.f32 %v8914_v39  ;;  %v9050_v39 = vld [vmem:[%s10042_s4 + $0xa8] ss:$16 sps:$4 sm:$0xff]  }
 0x6c5   :  { %11033 = vst [vmem:[#allocation44_spill] sm:$0xff] %v9050_v39 }
 0x6ce   :  { %v4405_v58 = vpop.eup %4404 }
 0x6cf   :  { %v2856_v22 = vmul.f32 %v4405_v58, %v2851_v55  ;;  %v9032_v55 = vld [vmem:[%s10042_s4 + $0xa4] ss:$16 sps:$4 sm:$0xff]   ;;  %v9038_v58 = vld [vmem:[%s10042_s4 + $0xac] ss:$16 sps:$4 sm:$0xff]  }
 0x6d0   :  { %11030 = vst [vmem:[#allocation41_spill] sm:$0xff] %v9032_v55  ;;  %11031 = vst [vmem:[#allocation42_spill] sm:$0xff] %v9038_v58 }
 0x6d1   :  { %v8917_v60 = vpack.c.bf16 %v2856_v22, %v2856_v22  ;;  %v9044_v22 = vld [vmem:[%s10042_s4 + $0xa0] ss:$16 sps:$4 sm:$0xff]  }
 0x6d2   :  { %11032 = vst [vmem:[#allocation43_spill] sm:$0xff] %v9044_v22 }
 0x6d3   :  { %3091 = vmatmul.mubr.bf16.vlgmr.msra.gmra.mrb[84].mxu0 %v8917_v60  ;;  %3132 = vmatmul.mubr.bf16.vlgmr.msra.gmra.mrb[84].mxu1 %v8917_v60 }
 0x6d4   :  { %3161 = vmatpush1.bf16.msra.mxu0 %v8924_v15  ;;  %3202 = vmatpush1.bf16.msra.mxu1 %v8930_v8 }
 0x6d5   :  { %3162 = vmatprep.subr.bf16.mxu0 %v8936_v52  ;;  %3203 = vmatprep.subr.bf16.mxu1 %v8942_v12 }
 0x6d8   :  { %3163 = vmatpush1.bf16.msra.mxu0 %v8948_v4  ;;  %3204 = vmatpush1.bf16.msra.mxu1 %v8954_v1 }
 0x6d9   :  { %3164 = vmatprep.subr.bf16.mxu0 %v8960_v38  ;;  %3205 = vmatprep.subr.bf16.mxu1 %v8966_v37 }
 0x6dc   :  { %3165 = vmatpush1.bf16.msra.mxu0 %v8972_v9  ;;  %3206 = vmatpush1.bf16.msra.mxu1 %v8978_v49  ;;  %v9119_v49 = vld [vmem:[%s10042_s4 + $0x100] ss:$16 sps:$4 sm:$0xff]  }
 0x6dd   :  { %3166 = vmatprep.subr.bf16.mxu0 %v8984_v54  ;;  %3207 = vmatprep.subr.bf16.mxu1 %v8990_v42 }
 0x6e0   :  { %3167 = vmatpush1.bf16.msra.mxu0 %v8996_v33  ;;  %3208 = vmatpush1.bf16.msra.mxu1 %v9002_v59 }
 0x6e1   :  { %3168 = vmatprep.subr.bf16.mxu0 %v9008_v28  ;;  %3209 = vmatprep.subr.bf16.mxu1 %v9014_v34 }
 0x6e4   :  { %3169 = vmatpush1.bf16.msra.mxu0 %v9020_v41  ;;  %3210 = vmatpush1.bf16.msra.mxu1 %v9026_v5 }
 0x6e5   :  { %3170 = vmatprep.subr.bf16.mxu0 %v9032_v55  ;;  %3211 = vmatprep.subr.bf16.mxu1 %v9038_v58  ;;  %v9056_v55 = vld [vmem:[%s10042_s4 + $0xc4] ss:$16 sps:$4 sm:$0xff]   ;;  %v9062_v58 = vld [vmem:[%s10042_s4 + $0xcc] ss:$16 sps:$4 sm:$0xff]  }
 0x6e6   :  { %11034 = vst [vmem:[#allocation45_spill] sm:$0xff] %v9056_v55  ;;  %11035 = vst [vmem:[#allocation46_spill] sm:$0xff] %v9062_v58 }
 0x6e8   :  { %3171 = vmatpush1.bf16.msra.mxu0 %v9044_v22  ;;  %3212 = vmatpush1.bf16.msra.mxu1 %v9050_v39  ;;  %v9068_v22 = vld [vmem:[%s10042_s4 + $0xc0] ss:$16 sps:$4 sm:$0xff]   ;;  %v9074_v39 = vld [vmem:[%s10042_s4 + $0xc8] ss:$16 sps:$4 sm:$0xff]  }
 0x6e9   :  { %3172 = vmatprep.subr.bf16.mxu0 %v9056_v55  ;;  %3213 = vmatprep.subr.bf16.mxu1 %v9062_v58  ;;  %11036 = vst [vmem:[#allocation47_spill] sm:$0xff] %v9068_v22  ;;  %11037 = vst [vmem:[#allocation48_spill] sm:$0xff] %v9074_v39  ;;  %v9080_v55 = vld [vmem:[%s10042_s4 + $0xe4] ss:$16 sps:$4 sm:$0xff]   ;;  %v9086_v58 = vld [vmem:[%s10042_s4 + $0xec] ss:$16 sps:$4 sm:$0xff]  }
 0x6ea   :  { %11038 = vst [vmem:[#allocation49_spill] sm:$0xff] %v9080_v55  ;;  %11039 = vst [vmem:[#allocation50_spill] sm:$0xff] %v9086_v58 }
 0x6ec   :  { %3173 = vmatpush1.bf16.msra.mxu0 %v9068_v22  ;;  %3214 = vmatpush1.bf16.msra.mxu1 %v9074_v39  ;;  %v9092_v22 = vld [vmem:[%s10042_s4 + $0xe0] ss:$16 sps:$4 sm:$0xff]   ;;  %v9098_v39 = vld [vmem:[%s10042_s4 + $0xe8] ss:$16 sps:$4 sm:$0xff]  }
 0x6ed   :  { %3174 = vmatprep.subr.bf16.mxu0 %v9080_v55  ;;  %3215 = vmatprep.subr.bf16.mxu1 %v9086_v58  ;;  %11040 = vst [vmem:[#allocation51_spill] sm:$0xff] %v9092_v22  ;;  %11041 = vst [vmem:[#allocation52_spill] sm:$0xff] %v9098_v39  ;;  %v9104_v58 = vld [vmem:[%s10042_s4 + $0x104] ss:$16 sps:$4 sm:$0xff]  }
 0x6ee   :  { %11042 = vst [vmem:[#allocation53_spill] sm:$0xff] %v9104_v58 }
 0x6f0   :  { %3175 = vmatpush1.bf16.msra.mxu0 %v9092_v22  ;;  %3216 = vmatpush1.bf16.msra.mxu1 %v9098_v39  ;;  %v9110_v22 = vld [vmem:[%s10042_s4 + $0x10c] ss:$16 sps:$4 sm:$0xff]  }
 0x6f1   :  { %3176 = vmatprep.subr.bf16.mxu0 %v9104_v58  ;;  %3217 = vmatprep.subr.bf16.mxu1 %v9110_v22 }
 0x6f2   :  { %v2892_v55 = vpop.f32.mrb[76].mxu0  ;;  %v2933_v5 = vpop.f32.mrb[76].mxu1 }
 0x6f3   :  { %v2893_v41 = vadd.f32 %v8338_v50, %v2892_v55  ;;  %v2894_v34 = vpop.f32.mrb[77].mxu0  ;;  %v2935_v39 = vpop.f32.mrb[77].mxu1  ;;  %v9125_v50 = vld [vmem:[%s10042_s4 + $0x108] ss:$16 sps:$4 sm:$0xff]   ;;  %v9186_v55 = vld [vmem:[%s10042_s4 + $0x16c] ss:$16 sps:$4 sm:$0xff]  }
 0x6f4   :  { %v2895_v28 = vadd.f32 %v8346_v46, %v2894_v34  ;;  %v2896_v59 = vpop.f32.mrb[78].mxu0  ;;  %v2937_v33 = vpop.f32.mrb[78].mxu1  ;;  %v2936_v42 = vadd.f32 %v8352_v18, %v2935_v39  ;;  %3177 = vmatpush1.bf16.msra.mxu0 %v9119_v49  ;;  %3218 = vmatpush1.bf16.msra.mxu1 %v9125_v50  ;;  %v9131_v46 = vld [vmem:[%s10042_s4 + $0x124] ss:$16 sps:$4 sm:$0xff]   ;;  %v9137_v18 = vld [vmem:[%s10042_s4 + $0x12c] ss:$16 sps:$4 sm:$0xff]   ;;  %v2934_v34 = vadd.f32 %v8366_v36, %v2933_v5 }
 0x6f5   :  { %4406 = vtanh.f32 %v2893_v41  ;;  %v2897_v54 = vpop.f32.mrb[79].mxu0  ;;  %v2938_v58 = vpop.f32.mrb[79].mxu1  ;;  %3178 = vmatprep.subr.bf16.mxu0 %v9131_v46  ;;  %3219 = vmatprep.subr.bf16.mxu1 %v9137_v18  ;;  %v9143_v39 = vld [vmem:[%s10042_s4 + $0x120] ss:$16 sps:$4 sm:$0xff]   ;;  %v9155_v33 = vld [vmem:[%s10042_s4 + $0x144] ss:$16 sps:$4 sm:$0xff]  }
 0x6f6   :  { %4408 = vtanh.f32 %v2895_v28  ;;  %v9149_v54 = vld [vmem:[%s10042_s4 + $0x128] ss:$16 sps:$4 sm:$0xff]   ;;  %11043 = vst [vmem:[#allocation54_spill] sm:$0xff] %v9155_v33  ;;  %v9167_v59 = vld [vmem:[%s10042_s4 + $0x140] ss:$16 sps:$4 sm:$0xff]   ;;  %11048 = vst [vmem:[#allocation81_spill] sm:$0xff] %v9186_v55 }
 0x6f7   :  { %4410 = vtanh.f32 %v2936_v42  ;;  %v9161_v42 = vld [vmem:[%s10042_s4 + $0x14c] ss:$16 sps:$4 sm:$0xff]   ;;  %11045 = vst [vmem:[#allocation78_spill] sm:$0xff] %v9167_v59  ;;  %v9173_v28 = vld [vmem:[%s10042_s4 + $0x148] ss:$16 sps:$4 sm:$0xff]  }
 0x6f8   :  { %3179 = vmatpush1.bf16.msra.mxu0 %v9143_v39  ;;  %3220 = vmatpush1.bf16.msra.mxu1 %v9149_v54  ;;  %11044 = vst [vmem:[#allocation55_spill] sm:$0xff] %v9161_v42  ;;  %11046 = vst [vmem:[#allocation79_spill] sm:$0xff] %v9173_v28  ;;  %v9180_v41 = vld [vmem:[%s10042_s4 + $0x164] ss:$16 sps:$4 sm:$0xff]   ;;  %v9192_v36 = vld [vmem:[%s10042_s4 + $0x160] ss:$16 sps:$4 sm:$0xff]   ;;  %4412 = vtanh.f32 %v2934_v34 }
 0x6f9   :  { %3180 = vmatprep.subr.bf16.mxu0 %v9155_v33  ;;  %3221 = vmatprep.subr.bf16.mxu1 %v9161_v42  ;;  %11047 = vst [vmem:[#allocation80_spill] sm:$0xff] %v9180_v41  ;;  %11049 = vst [vmem:[#allocation82_spill] sm:$0xff] %v9192_v36  ;;  %v9198_v5 = vld [vmem:[%s10042_s4 + $0x168] ss:$16 sps:$4 sm:$0xff]  }
 0x6fa   :  { %11050 = vst [vmem:[#allocation83_spill] sm:$0xff] %v9198_v5 }
 0x6fc   :  { %3181 = vmatpush1.bf16.msra.mxu0 %v9167_v59  ;;  %3222 = vmatpush1.bf16.msra.mxu1 %v9173_v28 }
 0x6fd   :  { %3182 = vmatprep.subr.bf16.mxu0 %v9180_v41  ;;  %3223 = vmatprep.subr.bf16.mxu1 %v9186_v55 }
 0x6ff   :  { %v4407_v58 = vpop.eup %4406 }
 0x700   :  { %v2944_v59 = vmul.f32 0.5, %v4407_v58  ;;  %v4409_v42 = vpop.eup %4408  ;;  %3183 = vmatpush1.bf16.msra.mxu0 %v9192_v36  ;;  %3224 = vmatpush1.bf16.msra.mxu1 %v9198_v5  ;;  %v9204_v58 = vld [vmem:[%s10042_s4 + $0x184] ss:$16 sps:$4 sm:$0xff]   ;;  %v9210_v36 = vld [vmem:[%s10042_s4 + $0x18c] ss:$16 sps:$4 sm:$0xff]  }
 0x701   :  { %v2946_v55 = vmul.f32 0.5, %v4409_v42  ;;  %3184 = vmatprep.subr.bf16.mxu0 %v9204_v58  ;;  %3225 = vmatprep.subr.bf16.mxu1 %v9210_v36  ;;  %v4411_v28 = vpop.eup %4410  ;;  %v9216_v42 = vld [vmem:[%s10042_s4 + $0x180] ss:$16 sps:$4 sm:$0xff]  }
 0x702   :  { %v2945_v41 = vadd.f32 0.5, %v2944_v59  ;;  %v9222_v59 = vld [vmem:[%s10042_s4 + $0x188] ss:$16 sps:$4 sm:$0xff]  }
 0x703   :  { %v2947_v33 = vadd.f32 0.5, %v2946_v55 }
 0x704   :  { %v2951_v5 = vmul.f32 %v4411_v28, %v2945_v41  ;;  %3185 = vmatpush1.bf16.msra.mxu0 %v9216_v42  ;;  %3226 = vmatpush1.bf16.msra.mxu1 %v9222_v59  ;;  %v9229_v28 = vld [vmem:[%s10042_s4 + $0x1a4] ss:$16 sps:$4 sm:$0xff]   ;;  %v9235_v41 = vld [vmem:[%s10042_s4 + $0x1ac] ss:$16 sps:$4 sm:$0xff]  }
 0x705   :  { %v2950_v34 = vmul.f32 %v2947_v33, %v8382_v45  ;;  %11051 = vst [vmem:[#allocation84_spill] sm:$0xff] %v9229_v28  ;;  %3186 = vmatprep.subr.bf16.mxu0 %v9229_v28  ;;  %11052 = vst [vmem:[#allocation85_spill] sm:$0xff] %v9235_v41  ;;  %3227 = vmatprep.subr.bf16.mxu1 %v9235_v41  ;;  %v9243_v45 = vld [vmem:[%s10042_s4 + $0x1a0] ss:$16 sps:$4 sm:$0xff]   ;;  %v9249_v33 = vld [vmem:[%s10042_s4 + $0x1a8] ss:$16 sps:$4 sm:$0xff]  }
 0x706   :  { %11054 = vst [vmem:[#allocation87_spill] sm:$0xff] %v9243_v45  ;;  %11055 = vst [vmem:[#allocation88_spill] sm:$0xff] %v9249_v33  ;;  %v9292_v41 = vld [vmem:[%s10042_s4 + $0x1e0] ss:$16 sps:$4 sm:$0xff]  }
 0x707   :  { %v9238_v55 = vadd.f32 %v2951_v5, %v2950_v34  ;;  %v9256_v5 = vld [vmem:[%s10042_s4 + $0x1c4] ss:$16 sps:$4 sm:$0xff]   ;;  %v9262_v34 = vld [vmem:[%s10042_s4 + $0x1cc] ss:$16 sps:$4 sm:$0xff]  }
 0x708   :  { %3187 = vmatpush1.bf16.msra.mxu0 %v9243_v45  ;;  %3228 = vmatpush1.bf16.msra.mxu1 %v9249_v33  ;;  %11056 = vst [vmem:[#allocation89_spill] sm:$0xff] %v9256_v5  ;;  %11057 = vst [vmem:[#allocation90_spill] sm:$0xff] %v9262_v34  ;;  %v4413_v45 = vpop.eup %4412  ;;  %v9268_v33 = vld [vmem:[%s10042_s4 + $0x1c0] ss:$16 sps:$4 sm:$0xff]  }
 0x709   :  { %11053 = vst [vmem:[#allocation86_spill] sm:$0xff] %v9238_v55  ;;  %4414 = vtanh.f32 %v9238_v55  ;;  %3188 = vmatprep.subr.bf16.mxu0 %v9256_v5  ;;  %3229 = vmatprep.subr.bf16.mxu1 %v9262_v34  ;;  %11058 = vst [vmem:[#allocation58_spill] sm:$0xff] %v9268_v33  ;;  %v9274_v55 = vld [vmem:[%s10042_s4 + $0x1c8] ss:$16 sps:$4 sm:$0xff]   ;;  %v9280_v5 = vld [vmem:[%s10042_s4 + $0x1e4] ss:$16 sps:$4 sm:$0xff]  }
 0x70a   :  { %11059 = vst [vmem:[#allocation66_spill] sm:$0xff] %v9274_v55  ;;  %11060 = vst [vmem:[#allocation68_spill] sm:$0xff] %v9280_v5  ;;  %v9286_v34 = vld [vmem:[%s10042_s4 + $0x1ec] ss:$16 sps:$4 sm:$0xff]  }
 0x70b   :  { %11061 = vst [vmem:[#allocation67_spill] sm:$0xff] %v9286_v34 }
 0x70c   :  { %3189 = vmatpush1.bf16.msra.mxu0 %v9268_v33  ;;  %3230 = vmatpush1.bf16.msra.mxu1 %v9274_v55  ;;  %v2948_v33 = vmul.f32 0.5, %v4413_v45  ;;  %v9298_v55 = vld [vmem:[%s10042_s4 + $0x1e8] ss:$16 sps:$4 sm:$0xff]  }
 0x70d   :  { %3190 = vmatprep.subr.bf16.mxu0 %v9280_v5  ;;  %3231 = vmatprep.subr.bf16.mxu1 %v9286_v34 }
 0x70e   :  { %v2949_v34 = vadd.f32 0.5, %v2948_v33 }
 0x710   :  { %3191 = vmatpush1.bf16.msra.mxu0 %v9292_v41  ;;  %3232 = vmatpush1.bf16.msra.mxu1 %v9298_v55 }
 0x711   :  { %3258 = vmatprep.subr.bf16.mxu0 %v8398_v47  ;;  %3299 = vmatprep.subr.bf16.mxu1 %v8404_v25 }
 0x713   :  { %v4415_v45 = vpop.eup %4414 }
 0x714   :  { %v2954_v5 = vmul.f32 %v4415_v45, %v2949_v34  ;;  %v11078_v34 = vld [vmem:[#allocation11_spill] sm:$0xff] }
 0x716   :  { %v9303_v28 = vpack.c.bf16 %v2954_v5, %v2954_v5  ;;  %v11077_v5 = vld [vmem:[#allocation10_spill] sm:$0xff] }
 0x718   :  { %3192 = vmatprep.mubr.bf16.mxu0 %v9303_v28  ;;  %3233 = vmatprep.mubr.bf16.mxu1 %v9303_v28 }
 0x719   :  { %3193 = vmatmul.mubr.bf16.vlgmr.msra.gmra.mrb[88].mxu0 %v8917_v60  ;;  %3234 = vmatmul.mubr.bf16.vlgmr.msra.gmra.mrb[88].mxu1 %v8917_v60  ;;  %v11076_v60 = vld [vmem:[#allocation12_spill] sm:$0xff] }
 0x71a   :  { %3259 = vmatpush1.bf16.msra.mxu0 %v8416_v26  ;;  %3300 = vmatpush1.bf16.msra.mxu1 %v8422_v20 }
 0x71b   :  { %3260 = vmatprep.subr.bf16.mxu0 %v8428_v32  ;;  %3301 = vmatprep.subr.bf16.mxu1 %v8434_v51  ;;  %v9336_v32 = vld [vmem:[%s10046_s7] sm:$0xff] }
 0x71c   :  { %11062 = vst [vmem:[#allocation69_spill] sm:$0xff] %v9336_v32 }
 0x71e   :  { %3261 = vmatpush1.bf16.msra.mxu0 %v8440_v57  ;;  %3302 = vmatpush1.bf16.msra.mxu1 %v8446_v3 }
 0x71f   :  { %3262 = vmatprep.subr.bf16.mxu0 %v8452_v61  ;;  %3303 = vmatprep.subr.bf16.mxu1 %v8458_v31  ;;  %v9344_v61 = vld [vmem:[%s10046_s7 + $0x8] sm:$0xff] }
 0x720   :  { %11063 = vst [vmem:[#allocation60_spill] sm:$0xff] %v9344_v61 }
 0x722   :  { %3263 = vmatpush1.bf16.msra.mxu0 %v8464_v19  ;;  %3304 = vmatpush1.bf16.msra.mxu1 %v8470_v30 }
 0x723   :  { %3264 = vmatprep.subr.bf16.mxu0 %v8476_v7  ;;  %3305 = vmatprep.subr.bf16.mxu1 %v8482_v62  ;;  %v9352_v7 = vld [vmem:[%s10046_s7 + $0x18] sm:$0xff] }
 0x724   :  { %11064 = vst [vmem:[#allocation59_spill] sm:$0xff] %v9352_v7 }
 0x726   :  { %3265 = vmatpush1.bf16.msra.mxu0 %v8488_v63  ;;  %3306 = vmatpush1.bf16.msra.mxu1 %v8494_v6 }
 0x727   :  { %3266 = vmatprep.subr.bf16.mxu0 %v8500_v35  ;;  %3307 = vmatprep.subr.bf16.mxu1 %v8506_v56  ;;  %v11065_v35 = vld [vmem:[#allocation127_spill] sm:$0xff]  ;;  %v11066_v56 = vld [vmem:[#allocation128_spill] sm:$0xff] }
 0x72a   :  { %3267 = vmatpush1.bf16.msra.mxu0 %v8512_v14  ;;  %3308 = vmatpush1.bf16.msra.mxu1 %v8518_v53  ;;  %v9366_v14 = vld [vmem:[%s10046_s7 + $0x10] sm:$0xff] }
 0x72b   :  { %3268 = vmatprep.subr.bf16.mxu0 %v8524_v27  ;;  %3309 = vmatprep.subr.bf16.mxu1 %v8530_v24  ;;  %11067 = vst [vmem:[#allocation61_spill] sm:$0xff] %v9366_v14  ;;  %v11068_v24 = vld [vmem:[#allocation129_spill] sm:$0xff] }
 0x72e   :  { %3269 = vmatpush1.bf16.msra.mxu0 %v8536_v16  ;;  %3310 = vmatpush1.bf16.msra.mxu1 %v8542_v0  ;;  %v11069_v16 = vld [vmem:[#allocation62_spill] sm:$0xff] }
 0x72f   :  { %3270 = vmatprep.subr.bf16.mxu0 %v8548_v17  ;;  %3311 = vmatprep.subr.bf16.mxu1 %v8554_v48  ;;  %v11070_v17 = vld [vmem:[#allocation64_spill] sm:$0xff]  ;;  %v11071_v48 = vld [vmem:[#allocation63_spill] sm:$0xff] }
 0x732   :  { %v2990_v26 = vpop.f32.mrb[80].mxu0  ;;  %v3031_v20 = vpop.f32.mrb[80].mxu1  ;;  %3271 = vmatpush1.bf16.msra.mxu0 %v8561_v11  ;;  %3312 = vmatpush1.bf16.msra.mxu1 %v8567_v23 }
 0x733   :  { %v2991_v51 = vadd.f32 %v9336_v32, %v2990_v26  ;;  %v2992_v57 = vpop.f32.mrb[81].mxu0  ;;  %v3033_v3 = vpop.f32.mrb[81].mxu1  ;;  %3272 = vmatprep.subr.bf16.mxu0 %v8574_v2  ;;  %3313 = vmatprep.subr.bf16.mxu1 %v8580_v13  ;;  %v3032_v53 = vadd.f32 %v9366_v14, %v3031_v20  ;;  %v11079_v26 = vld [vmem:[#allocation13_spill] sm:$0xff]  ;;  %v11080_v20 = vld [vmem:[#allocation14_spill] sm:$0xff] }
 0x734   :  { %v2993_v31 = vadd.f32 %v9344_v61, %v2992_v57  ;;  %v2994_v19 = vpop.f32.mrb[82].mxu0  ;;  %v3035_v30 = vpop.f32.mrb[82].mxu1  ;;  %v3034_v62 = vadd.f32 %v9352_v7, %v3033_v3  ;;  %v11082_v57 = vld [vmem:[#allocation16_spill] sm:$0xff] }
 0x735   :  { %4416 = vtanh.f32 %v2991_v51  ;;  %v2995_v63 = vpop.f32.mrb[83].mxu0  ;;  %v3036_v6 = vpop.f32.mrb[83].mxu1  ;;  %v11081_v51 = vld [vmem:[#allocation15_spill] sm:$0xff]  ;;  %v11084_v19 = vld [vmem:[#allocation17_spill] sm:$0xff] }
 0x736   :  { %4418 = vtanh.f32 %v2993_v31  ;;  %3273 = vmatpush1.bf16.msra.mxu0 %v8587_v43  ;;  %3314 = vmatpush1.bf16.msra.mxu1 %v8593_v21  ;;  %v11072_v43 = vld [vmem:[#allocation65_spill] sm:$0xff]  ;;  %v11073_v21 = vld [vmem:[#allocation7_spill] sm:$0xff]  ;;  %v11086_v63 = vld [vmem:[#allocation20_spill] sm:$0xff] }
 0x737   :  { %3274 = vmatprep.subr.bf16.mxu0 %v8599_v40  ;;  %3315 = vmatprep.subr.bf16.mxu1 %v8605_v10  ;;  %4420 = vtanh.f32 %v3034_v62  ;;  %v11083_v31 = vld [vmem:[#allocation19_spill] sm:$0xff]  ;;  %v11085_v62 = vld [vmem:[#allocation18_spill] sm:$0xff]  ;;  %v11087_v6 = vld [vmem:[#allocation21_spill] sm:$0xff] }
 0x738   :  { %4422 = vtanh.f32 %v3032_v53  ;;  %v11089_v53 = vld [vmem:[#allocation23_spill] sm:$0xff] }
 0x73a   :  { %3275 = vmatpush1.bf16.msra.mxu0 %v8611_v44  ;;  %3316 = vmatpush1.bf16.msra.mxu1 %v8617_v29  ;;  %v11074_v44 = vld [vmem:[#allocation8_spill] sm:$0xff]  ;;  %v11075_v29 = vld [vmem:[#allocation9_spill] sm:$0xff] }
 0x73b   :  { %3276 = vmatprep.subr.bf16.mxu0 %v11065_v35  ;;  %3317 = vmatprep.subr.bf16.mxu1 %v11066_v56  ;;  %v11088_v35 = vld [vmem:[#allocation22_spill] sm:$0xff] }
 0x73e   :  { %3277 = vmatpush1.bf16.msra.mxu0 %v11068_v24  ;;  %3318 = vmatpush1.bf16.msra.mxu1 %v11069_v16  ;;  %v11091_v16 = vld [vmem:[#allocation25_spill] sm:$0xff] }
 0x73f   :  { %v4417_v27 = vpop.eup %4416  ;;  %3278 = vmatprep.subr.bf16.mxu0 %v11070_v17  ;;  %3319 = vmatprep.subr.bf16.mxu1 %v11071_v48  ;;  %v11093_v48 = vld [vmem:[#allocation27_spill] sm:$0xff] }
 0x740   :  { %v3042_v0 = vmul.f32 0.5, %v4417_v27  ;;  %v4419_v11 = vpop.eup %4418  ;;  %v11090_v27 = vld [vmem:[#allocation24_spill] sm:$0xff] }
 0x741   :  { %v3044_v2 = vmul.f32 0.5, %v4419_v11  ;;  %v4421_v13 = vpop.eup %4420  ;;  %v11094_v11 = vld [vmem:[#allocation28_spill] sm:$0xff] }
 0x742   :  { %v3043_v23 = vadd.f32 0.5, %v3042_v0  ;;  %3279 = vmatpush1.bf16.msra.mxu0 %v11072_v43  ;;  %3320 = vmatpush1.bf16.msra.mxu1 %v11073_v21  ;;  %v4423_v3 = vpop.eup %4422  ;;  %v11092_v0 = vld [vmem:[#allocation26_spill] sm:$0xff]  ;;  %v11097_v43 = vld [vmem:[#allocation32_spill] sm:$0xff]  ;;  %v11108_v21 = vld [vmem:[#allocation43_spill] sm:$0xff] }
 0x743   :  { %v3045_v40 = vadd.f32 0.5, %v3044_v2  ;;  %3280 = vmatprep.subr.bf16.mxu0 %v11074_v44  ;;  %3321 = vmatprep.subr.bf16.mxu1 %v11075_v29  ;;  %v3046_v30 = vmul.f32 0.5, %v4423_v3  ;;  %v11095_v2 = vld [vmem:[#allocation29_spill] sm:$0xff]  ;;  %v11111_v44 = vld [vmem:[#allocation46_spill] sm:$0xff]  ;;  %v11112_v29 = vld [vmem:[#allocation47_spill] sm:$0xff] }
 0x744   :  { %v3049_v10 = vmul.f32 %v4421_v13, %v3043_v23  ;;  %v11096_v13 = vld [vmem:[#allocation30_spill] sm:$0xff] }
 0x745   :  { %v3048_v33 = vmul.f32 %v3045_v40, %v11076_v60  ;;  %v3047_v56 = vadd.f32 0.5, %v3046_v30  ;;  %v11109_v40 = vld [vmem:[#allocation44_spill] sm:$0xff]  ;;  %v11121_v3 = vld [vmem:[#allocation78_spill] sm:$0xff]  ;;  %v11131_v30 = vld [vmem:[#allocation89_spill] sm:$0xff] }
 0x746   :  { %3281 = vmatpush1.bf16.msra.mxu0 %v11077_v5  ;;  %3322 = vmatpush1.bf16.msra.mxu1 %v11078_v34  ;;  %v11113_v60 = vld [vmem:[#allocation48_spill] sm:$0xff]  ;;  %v11115_v5 = vld [vmem:[#allocation50_spill] sm:$0xff]  ;;  %v11116_v34 = vld [vmem:[#allocation51_spill] sm:$0xff] }
 0x747   :  { %v9380_v45 = vadd.f32 %v3049_v10, %v3048_v33  ;;  %3282 = vmatprep.subr.bf16.mxu0 %v11079_v26  ;;  %3323 = vmatprep.subr.bf16.mxu1 %v11080_v20  ;;  %v11110_v10 = vld [vmem:[#allocation45_spill] sm:$0xff]  ;;  %v11117_v26 = vld [vmem:[#allocation52_spill] sm:$0xff] }
 0x748   :  { %v11114_v33 = vld [vmem:[#allocation49_spill] sm:$0xff] }
 0x749   :  { %4424 = vtanh.f32 %v9380_v45  ;;  %v11118_v20 = vld [vmem:[#allocation53_spill] sm:$0xff] }
 0x74a   :  { %3283 = vmatpush1.bf16.msra.mxu0 %v11081_v51  ;;  %3324 = vmatpush1.bf16.msra.mxu1 %v11082_v57  ;;  %v11119_v51 = vld [vmem:[#allocation54_spill] sm:$0xff]  ;;  %v11120_v57 = vld [vmem:[#allocation55_spill] sm:$0xff] }
 0x74b   :  { %3284 = vmatprep.subr.bf16.mxu0 %v11083_v31  ;;  %3325 = vmatprep.subr.bf16.mxu1 %v11084_v19  ;;  %v11122_v31 = vld [vmem:[#allocation79_spill] sm:$0xff]  ;;  %v11130_v19 = vld [vmem:[#allocation88_spill] sm:$0xff] }
 0x74e   :  { %3285 = vmatpush1.bf16.msra.mxu0 %v11085_v62  ;;  %3326 = vmatpush1.bf16.msra.mxu1 %v11086_v63  ;;  %v11132_v62 = vld [vmem:[#allocation90_spill] sm:$0xff] }
 0x74f   :  { %3286 = vmatprep.subr.bf16.mxu0 %v11087_v6  ;;  %3327 = vmatprep.subr.bf16.mxu1 %v11088_v35  ;;  %v11133_v63 = vld [vmem:[#allocation58_spill] sm:$0xff] }
 0x750   :  { %v11138_v6 = vld [vmem:[#allocation74_spill] sm:$0xff] }
 0x752   :  { %3287 = vmatpush1.bf16.msra.mxu0 %v11089_v53  ;;  %3328 = vmatpush1.bf16.msra.mxu1 %v11090_v27  ;;  %v11140_v53 = vld [vmem:[#allocation76_spill] sm:$0xff] }
 0x753   :  { %v4425_v24 = vpop.eup %4424  ;;  %3288 = vmatprep.subr.bf16.mxu0 %v11091_v16  ;;  %3329 = vmatprep.subr.bf16.mxu1 %v11092_v0  ;;  %v11142_v16 = vld [vmem:[#allocation75_spill] sm:$0xff] }
 0x754   :  { %v3052_v17 = vmul.f32 %v4425_v24, %v3047_v56  ;;  %v11139_v56 = vld [vmem:[#allocation6_spill] sm:$0xff]  ;;  %v11141_v24 = vld [vmem:[#allocation4_spill] sm:$0xff] }
 0x755   :  { %v317_v27 = vadd.f32 %v11140_v53, %v11139_v56  ;;  %v206_v0 = vadd.f32 %v11142_v16, %v11141_v24 }
 0x756   :  { %3289 = vmatpush1.bf16.msra.mxu0 %v11093_v48  ;;  %3330 = vmatpush1.bf16.msra.mxu1 %v11094_v11  ;;  %v3257_v23 = vpack.c.bf16 %v3052_v17, %v3052_v17  ;;  %v11143_v17 = vld [vmem:[#allocation5_spill] sm:$0xff] }
 0x757   :  { %3357 = vmatprep.subr.bf16.mxu0 %v11095_v2  ;;  %3398 = vmatprep.subr.bf16.mxu1 %v11096_v13  ;;  %v11144_v48 = vld [vmem:[#allocation77_spill] sm:$0xff] }
 0x758   :  { %3290 = vmatprep.mubr.bf16.mxu0 %v3257_v23  ;;  %3331 = vmatprep.mubr.bf16.mxu1 %v3257_v23  ;;  %v319_v11 = vadd.f32 %v11144_v48, %v11143_v17 }
 0x759   :  { %3291 = vmatmul.mubr.bf16.vlgmr.msra.gmra.mrb[92].mxu0 %v9303_v28  ;;  %3332 = vmatmul.mubr.bf16.vlgmr.msra.gmra.mrb[92].mxu1 %v9303_v28  ;;  %v11098_v28 = vld [vmem:[#allocation33_spill] sm:$0xff] }
 0x75a   :  { %3358 = vmatpush1.bf16.msra.mxu0 %v8924_v15  ;;  %3399 = vmatpush1.bf16.msra.mxu1 %v8930_v8  ;;  %v11099_v15 = vld [vmem:[#allocation34_spill] sm:$0xff]  ;;  %v11100_v8 = vld [vmem:[#allocation35_spill] sm:$0xff] }
 0x75b   :  { %3359 = vmatprep.subr.bf16.mxu0 %v8936_v52  ;;  %3400 = vmatprep.subr.bf16.mxu1 %v8942_v12  ;;  %v11101_v52 = vld [vmem:[#allocation36_spill] sm:$0xff]  ;;  %v11102_v12 = vld [vmem:[#allocation37_spill] sm:$0xff] }
 0x75e   :  { %3360 = vmatpush1.bf16.msra.mxu0 %v8948_v4  ;;  %3401 = vmatpush1.bf16.msra.mxu1 %v8954_v1  ;;  %v11103_v4 = vld [vmem:[#allocation38_spill] sm:$0xff]  ;;  %v11104_v1 = vld [vmem:[#allocation39_spill] sm:$0xff] }
 0x75f   :  { %3361 = vmatprep.subr.bf16.mxu0 %v8960_v38  ;;  %3402 = vmatprep.subr.bf16.mxu1 %v8966_v37  ;;  %v11105_v38 = vld [vmem:[#allocation40_spill] sm:$0xff]  ;;  %v11106_v37 = vld [vmem:[#allocation41_spill] sm:$0xff] }
 0x762   :  { %3362 = vmatpush1.bf16.msra.mxu0 %v8972_v9  ;;  %3403 = vmatpush1.bf16.msra.mxu1 %v11097_v43  ;;  %v11107_v9 = vld [vmem:[#allocation42_spill] sm:$0xff] }
 0x763   :  { %3363 = vmatprep.subr.bf16.mxu0 %v11098_v28  ;;  %3404 = vmatprep.subr.bf16.mxu1 %v11099_v15 }
 0x766   :  { %3364 = vmatpush1.bf16.msra.mxu0 %v11100_v8  ;;  %3405 = vmatpush1.bf16.msra.mxu1 %v11101_v52 }
 0x767   :  { %3365 = vmatprep.subr.bf16.mxu0 %v11102_v12  ;;  %3406 = vmatprep.subr.bf16.mxu1 %v11103_v4 }
 0x76a   :  { %3366 = vmatpush1.bf16.msra.mxu0 %v11104_v1  ;;  %3407 = vmatpush1.bf16.msra.mxu1 %v11105_v38 }
 0x76b   :  { %3367 = vmatprep.subr.bf16.mxu0 %v11106_v37  ;;  %3408 = vmatprep.subr.bf16.mxu1 %v11107_v9 }
 0x76e   :  { %3368 = vmatpush1.bf16.msra.mxu0 %v11108_v21  ;;  %3409 = vmatpush1.bf16.msra.mxu1 %v11109_v40 }
 0x76f   :  { %3369 = vmatprep.subr.bf16.mxu0 %v11110_v10  ;;  %3410 = vmatprep.subr.bf16.mxu1 %v11111_v44  ;;  %v11145_v10 = vld [vmem:[#allocation31_spill] sm:$0xff] }
 0x772   :  { %3370 = vmatpush1.bf16.msra.mxu0 %v11112_v29  ;;  %3411 = vmatpush1.bf16.msra.mxu1 %v11113_v60 }
 0x773   :  { %3371 = vmatprep.subr.bf16.mxu0 %v11114_v33  ;;  %3412 = vmatprep.subr.bf16.mxu1 %v11115_v5 }
 0x776   :  { %3372 = vmatpush1.bf16.msra.mxu0 %v11116_v34  ;;  %3413 = vmatpush1.bf16.msra.mxu1 %v11117_v26 }
 0x777   :  { %3373 = vmatprep.subr.bf16.mxu0 %v11118_v20  ;;  %3414 = vmatprep.subr.bf16.mxu1 %v9110_v22  ;;  %v11123_v22 = vld [vmem:[#allocation80_spill] sm:$0xff] }
 0x77a   :  { %3374 = vmatpush1.bf16.msra.mxu0 %v9119_v49  ;;  %3415 = vmatpush1.bf16.msra.mxu1 %v9125_v50  ;;  %v11124_v49 = vld [vmem:[#allocation81_spill] sm:$0xff]  ;;  %v11125_v50 = vld [vmem:[#allocation82_spill] sm:$0xff] }
 0x77b   :  { %3375 = vmatprep.subr.bf16.mxu0 %v9131_v46  ;;  %3416 = vmatprep.subr.bf16.mxu1 %v9137_v18  ;;  %v11126_v46 = vld [vmem:[#allocation83_spill] sm:$0xff]  ;;  %v11127_v18 = vld [vmem:[#allocation84_spill] sm:$0xff] }
 0x77e   :  { %3376 = vmatpush1.bf16.msra.mxu0 %v9143_v39  ;;  %3417 = vmatpush1.bf16.msra.mxu1 %v9149_v54  ;;  %v11128_v39 = vld [vmem:[#allocation85_spill] sm:$0xff]  ;;  %v11129_v54 = vld [vmem:[#allocation87_spill] sm:$0xff] }
 0x77f   :  { %3377 = vmatprep.subr.bf16.mxu0 %v11119_v51  ;;  %3418 = vmatprep.subr.bf16.mxu1 %v11120_v57  ;;  %v9479_v57 = vld [vmem:[%s10045_s5] sm:$0xff] }
 0x780   :  { %11146 = vst [vmem:[#allocation56_spill] sm:$0xff] %v9479_v57 }
 0x782   :  { %3378 = vmatpush1.bf16.msra.mxu0 %v11121_v3  ;;  %3419 = vmatpush1.bf16.msra.mxu1 %v11122_v31 }
 0x783   :  { %3379 = vmatprep.subr.bf16.mxu0 %v11123_v22  ;;  %3420 = vmatprep.subr.bf16.mxu1 %v11124_v49  ;;  %v9485_v49 = vld [vmem:[%s10045_s5 + $0x8] sm:$0xff] }
 0x784   :  { %11147 = vst [vmem:[#allocation57_spill] sm:$0xff] %v9485_v49 }
 0x786   :  { %3380 = vmatpush1.bf16.msra.mxu0 %v11125_v50  ;;  %3421 = vmatpush1.bf16.msra.mxu1 %v11126_v46 }
 0x787   :  { %3381 = vmatprep.subr.bf16.mxu0 %v9204_v58  ;;  %3422 = vmatprep.subr.bf16.mxu1 %v9210_v36  ;;  %v11134_v58 = vld [vmem:[#allocation66_spill] sm:$0xff]  ;;  %v11135_v36 = vld [vmem:[#allocation68_spill] sm:$0xff] }
 0x78a   :  { %3382 = vmatpush1.bf16.msra.mxu0 %v9216_v42  ;;  %3423 = vmatpush1.bf16.msra.mxu1 %v9222_v59  ;;  %v11136_v42 = vld [vmem:[#allocation67_spill] sm:$0xff] }
 0x78b   :  { %3383 = vmatprep.subr.bf16.mxu0 %v11127_v18  ;;  %3424 = vmatprep.subr.bf16.mxu1 %v11128_v39  ;;  %v11137_v59 = vld [vmem:[#allocation3_spill] sm:$0xff]  ;;  %v9491_v39 = vld [vmem:[%s10045_s5 + $0x18] sm:$0xff] }
 0x78c   :  { %v204_v35 = vadd.f32 %v11138_v6, %v11137_v59  ;;  %11148 = vst [vmem:[#allocation91_spill] sm:$0xff] %v9491_v39 }
 0x78e   :  { %3384 = vmatpush1.bf16.msra.mxu0 %v11129_v54  ;;  %3425 = vmatpush1.bf16.msra.mxu1 %v11130_v19 }
 0x78f   :  { %3385 = vmatprep.subr.bf16.mxu0 %v11131_v30  ;;  %3426 = vmatprep.subr.bf16.mxu1 %v11132_v62  ;;  %v9497_v62 = vld [vmem:[%s10045_s5 + $0x10] sm:$0xff] }
 0x790   :  { %11149 = vst [vmem:[#allocation92_spill] sm:$0xff] %v9497_v62 }
 0x792   :  { %3386 = vmatpush1.bf16.msra.mxu0 %v11133_v63  ;;  %3427 = vmatpush1.bf16.msra.mxu1 %v11134_v58 }
 0x793   :  { %3387 = vmatprep.subr.bf16.mxu0 %v11135_v36  ;;  %3428 = vmatprep.subr.bf16.mxu1 %v11136_v42 }
 0x796   :  { %3388 = vmatpush1.bf16.msra.mxu0 %v9292_v41  ;;  %3429 = vmatpush1.bf16.msra.mxu1 %v9298_v55 }
 0x797   :  { %3455 = vmatprep.subr.bf16.mxu0 %v8398_v47  ;;  %3496 = vmatprep.subr.bf16.mxu1 %v8404_v25 }
 0x7a6   :  { %v3092_v23 = vpop.f32.mrb[84].mxu0  ;;  %v3133_v41 = vpop.f32.mrb[84].mxu1 }
 0x7a7   :  { %v3140_v2 = vadd.f32 %v3092_v23, %v204_v35  ;;  %v3142_v55 = vadd.f32 %v3133_v41, %v317_v27  ;;  %v3094_v13 = vpop.f32.mrb[85].mxu0  ;;  %v3135_v47 = vpop.f32.mrb[85].mxu1  ;;  %v11150_v27 = vld [vmem:[#allocation86_spill] sm:$0xff] }
 0x7a8   :  { %v3141_v43 = vadd.f32 %v3094_v13, %v206_v0  ;;  %v3143_v25 = vadd.f32 %v3135_v47, %v319_v11  ;;  %v3096_v28 = vpop.f32.mrb[86].mxu0  ;;  %v3137_v15 = vpop.f32.mrb[86].mxu1  ;;  %v9517_v13 = vld [vmem:[%s10044_s6 + $0x8] ss:$16 sps:$4 sm:$0xff]   ;;  %v9523_v47 = vld [vmem:[%s10044_s6 + $0x24] ss:$16 sps:$4 sm:$0xff]  }
 0x7a9   :  { %4426 = vtanh.f32 %v3140_v2  ;;  %v3097_v8 = vpop.f32.mrb[87].mxu0  ;;  %v3138_v52 = vpop.f32.mrb[87].mxu1  ;;  %v9541_v28 = vld [vmem:[%s10044_s6 + $0x28] ss:$16 sps:$4 sm:$0xff]   ;;  %v9547_v15 = vld [vmem:[%s10044_s6 + $0x44] ss:$16 sps:$4 sm:$0xff]  }
 0x7aa   :  { %4428 = vtanh.f32 %v3141_v43  ;;  %v9529_v43 = vld [vmem:[%s10044_s6 + $0x2c] ss:$16 sps:$4 sm:$0xff]   ;;  %v9559_v52 = vld [vmem:[%s10044_s6 + $0x40] ss:$16 sps:$4 sm:$0xff]  }
 0x7ab   :  { %4430 = vtanh.f32 %v3143_v25  ;;  %v9535_v25 = vld [vmem:[%s10044_s6 + $0x20] ss:$16 sps:$4 sm:$0xff]   ;;  %v9553_v8 = vld [vmem:[%s10044_s6 + $0x4c] ss:$16 sps:$4 sm:$0xff]  }
 0x7ac   :  { %4432 = vtanh.f32 %v3142_v55  ;;  %v9511_v55 = vld [vmem:[%s10044_s6] ss:$16 sps:$4 sm:$0xff]  }
 0x7b3   :  { %v4427_v12 = vpop.eup %4426 }
 0x7b4   :  { %v3148_v4 = vmul.f32 0.5, %v4427_v12  ;;  %v4429_v1 = vpop.eup %4428  ;;  %v9565_v12 = vld [vmem:[%s10044_s6 + $0x48] ss:$16 sps:$4 sm:$0xff]  }
 0x7b5   :  { %v3150_v37 = vmul.f32 0.5, %v4429_v1  ;;  %v4431_v9 = vpop.eup %4430  ;;  %v9577_v1 = vld [vmem:[%s10044_s6 + $0x6c] ss:$16 sps:$4 sm:$0xff]  }
 0x7b6   :  { %v3149_v38 = vadd.f32 0.5, %v3148_v4  ;;  %v4433_v60 = vpop.eup %4432  ;;  %v9571_v4 = vld [vmem:[%s10044_s6 + $0x64] ss:$16 sps:$4 sm:$0xff]  }
 0x7b7   :  { %v3151_v21 = vadd.f32 0.5, %v3150_v37  ;;  %v3152_v33 = vmul.f32 0.5, %v4433_v60  ;;  %v9589_v37 = vld [vmem:[%s10044_s6 + $0x68] ss:$16 sps:$4 sm:$0xff]   ;;  %v9631_v60 = vld [vmem:[%s10044_s6 + $0xa0] ss:$16 sps:$4 sm:$0xff]  }
 0x7b8   :  { %v3155_v40 = vmul.f32 %v4431_v9, %v3149_v38  ;;  %v9583_v38 = vld [vmem:[%s10044_s6 + $0x60] ss:$16 sps:$4 sm:$0xff]   ;;  %v9595_v9 = vld [vmem:[%s10044_s6 + $0x84] ss:$16 sps:$4 sm:$0xff]  }
 0x7b9   :  { %v3154_v44 = vmul.f32 %v3151_v21, %v11145_v10  ;;  %v3153_v5 = vadd.f32 0.5, %v3152_v33  ;;  %v9601_v21 = vld [vmem:[%s10044_s6 + $0x8c] ss:$16 sps:$4 sm:$0xff]   ;;  %v9613_v10 = vld [vmem:[%s10044_s6 + $0x88] ss:$16 sps:$4 sm:$0xff]  }
 0x7ba   :  { %v9637_v33 = vld [vmem:[%s10044_s6 + $0xa8] ss:$16 sps:$4 sm:$0xff]  }
 0x7bb   :  { %v3156_v29 = vadd.f32 %v3155_v40, %v3154_v44  ;;  %v9607_v40 = vld [vmem:[%s10044_s6 + $0x80] ss:$16 sps:$4 sm:$0xff]   ;;  %v9619_v44 = vld [vmem:[%s10044_s6 + $0xa4] ss:$16 sps:$4 sm:$0xff]  }
 0x7bd   :  { %4434 = vtanh.f32 %v3156_v29  ;;  %v9625_v29 = vld [vmem:[%s10044_s6 + $0xac] ss:$16 sps:$4 sm:$0xff]  }
 0x7c7   :  { %v4435_v34 = vpop.eup %4434 }
 0x7c8   :  { %v3158_v26 = vmul.f32 %v4435_v34, %v3153_v5  ;;  %v9643_v5 = vld [vmem:[%s10044_s6 + $0xc4] ss:$16 sps:$4 sm:$0xff]   ;;  %v9649_v34 = vld [vmem:[%s10044_s6 + $0xcc] ss:$16 sps:$4 sm:$0xff]  }
 0x7ca   :  { %v3355_v2 = vpack.c.bf16 %v3158_v26, %v3158_v26 }
 0x7ec   :  { %v3194_v20 = vpop.f32.mrb[88].mxu0  ;;  %v3235_v51 = vpop.f32.mrb[88].mxu1 }
 0x7ed   :  { %v3195_v3 = vadd.f32 %v9479_v57, %v3194_v20  ;;  %v3196_v31 = vpop.f32.mrb[89].mxu0  ;;  %v3237_v22 = vpop.f32.mrb[89].mxu1  ;;  %v3236_v63 = vadd.f32 %v9497_v62, %v3235_v51  ;;  %v9861_v62 = vld [vmem:[%s10044_s6 + $0x1c8] ss:$16 sps:$4 sm:$0xff]  }
 0x7ee   :  { %v3197_v50 = vadd.f32 %v9485_v49, %v3196_v31  ;;  %v3198_v46 = vpop.f32.mrb[90].mxu0  ;;  %v3239_v18 = vpop.f32.mrb[90].mxu1  ;;  %v3238_v54 = vadd.f32 %v9491_v39, %v3237_v22  ;;  %v9662_v31 = vld [vmem:[%s10044_s6 + $0xc8] ss:$16 sps:$4 sm:$0xff]   ;;  %11154 = vst [vmem:[#allocation96_spill] sm:$0xff] %v9861_v62 }
 0x7ef   :  { %4436 = vtanh.f32 %v3195_v3  ;;  %v3199_v19 = vpop.f32.mrb[91].mxu0  ;;  %v3240_v30 = vpop.f32.mrb[91].mxu1  ;;  %v9656_v3 = vld [vmem:[%s10044_s6 + $0xc0] ss:$16 sps:$4 sm:$0xff]   ;;  %v9867_v49 = vld [vmem:[%s10044_s6 + $0x1e4] ss:$16 sps:$4 sm:$0xff]  }
 0x7f0   :  { %4438 = vtanh.f32 %v3197_v50  ;;  %v9669_v19 = vld [vmem:[%s10044_s6 + $0xe4] ss:$16 sps:$4 sm:$0xff]   ;;  %v9675_v30 = vld [vmem:[%s10044_s6 + $0xec] ss:$16 sps:$4 sm:$0xff]   ;;  %11155 = vst [vmem:[#allocation97_spill] sm:$0xff] %v9867_v49 }
 0x7f1   :  { %4440 = vtanh.f32 %v3238_v54 }
 0x7f2   :  { %4442 = vtanh.f32 %v3236_v63 }
 0x7f9   :  { %v4437_v58 = vpop.eup %4436 }
 0x7fa   :  { %v3246_v36 = vmul.f32 0.5, %v4437_v58  ;;  %v4439_v42 = vpop.eup %4438 }
 0x7fb   :  { %v3248_v6 = vmul.f32 0.5, %v4439_v42  ;;  %v4441_v35 = vpop.eup %4440  ;;  %v9682_v42 = vld [vmem:[%s10044_s6 + $0xe0] ss:$16 sps:$4 sm:$0xff]  }
 0x7fc   :  { %v3247_v59 = vadd.f32 0.5, %v3246_v36  ;;  %v4443_v0 = vpop.eup %4442 }
 0x7fd   :  { %v3249_v56 = vadd.f32 0.5, %v3248_v6  ;;  %v3250_v17 = vmul.f32 0.5, %v4443_v0  ;;  %v9694_v6 = vld [vmem:[%s10044_s6 + $0x104] ss:$16 sps:$4 sm:$0xff]  }
 0x7fe   :  { %v3253_v53 = vmul.f32 %v4441_v35, %v3247_v59  ;;  %v9688_v59 = vld [vmem:[%s10044_s6 + $0xe8] ss:$16 sps:$4 sm:$0xff]   ;;  %v9700_v35 = vld [vmem:[%s10044_s6 + $0x10c] ss:$16 sps:$4 sm:$0xff]  }
 0x7ff   :  { %v3252_v24 = vmul.f32 %v3249_v56, %v11150_v27  ;;  %v3251_v48 = vadd.f32 0.5, %v3250_v17  ;;  %v9706_v56 = vld [vmem:[%s10044_s6 + $0x100] ss:$16 sps:$4 sm:$0xff]   ;;  %v9718_v27 = vld [vmem:[%s10044_s6 + $0x124] ss:$16 sps:$4 sm:$0xff]  }
 0x801   :  { %v9501_v16 = vadd.f32 %v3253_v53, %v3252_v24  ;;  %v9712_v53 = vld [vmem:[%s10044_s6 + $0x108] ss:$16 sps:$4 sm:$0xff]   ;;  %v9724_v24 = vld [vmem:[%s10044_s6 + $0x12c] ss:$16 sps:$4 sm:$0xff]  }
 0x803   :  { %11151 = vst [vmem:[#allocation93_spill] sm:$0xff] %v9501_v16  ;;  %4444 = vtanh.f32 %v9501_v16  ;;  %v9855_v16 = vld [vmem:[%s10044_s6 + $0x1c0] ss:$16 sps:$4 sm:$0xff]  }
 0x804   :  { %11153 = vst [vmem:[#allocation95_spill] sm:$0xff] %v9855_v16 }
 0x80d   :  { %v4445_v11 = vpop.eup %4444 }
 0x80e   :  { %v3256_v23 = vmul.f32 %v4445_v11, %v3251_v48  ;;  %v9731_v48 = vld [vmem:[%s10044_s6 + $0x120] ss:$16 sps:$4 sm:$0xff]   ;;  %v9737_v11 = vld [vmem:[%s10044_s6 + $0x128] ss:$16 sps:$4 sm:$0xff]  }
 0x810   :  { %v9504_v41 = vpack.c.bf16 %v3256_v23, %v3256_v23 }
 0x812   :  { %3389 = vmatprep.mubr.bf16.mxu0 %v9504_v41  ;;  %3430 = vmatprep.mubr.bf16.mxu1 %v9504_v41 }
 0x813   :  { %3390 = vmatmul.mubr.bf16.vlgmr.msra.gmra.mrb[96].mxu0 %v3355_v2  ;;  %3431 = vmatmul.mubr.bf16.vlgmr.msra.gmra.mrb[96].mxu1 %v3355_v2  ;;  %v9743_v2 = vld [vmem:[%s10044_s6 + $0x144] ss:$16 sps:$4 sm:$0xff]  }
 0x814   :  { %3456 = vmatpush1.bf16.msra.mxu0 %v9511_v55  ;;  %3497 = vmatpush1.bf16.msra.mxu1 %v9517_v13 }
 0x815   :  { %3457 = vmatprep.subr.bf16.mxu0 %v9523_v47  ;;  %3498 = vmatprep.subr.bf16.mxu1 %v9529_v43 }
 0x818   :  { %3458 = vmatpush1.bf16.msra.mxu0 %v9535_v25  ;;  %3499 = vmatpush1.bf16.msra.mxu1 %v9541_v28 }
 0x819   :  { %3459 = vmatprep.subr.bf16.mxu0 %v9547_v15  ;;  %3500 = vmatprep.subr.bf16.mxu1 %v9553_v8 }
 0x81c   :  { %3460 = vmatpush1.bf16.msra.mxu0 %v9559_v52  ;;  %3501 = vmatpush1.bf16.msra.mxu1 %v9565_v12 }
 0x81d   :  { %3461 = vmatprep.subr.bf16.mxu0 %v9571_v4  ;;  %3502 = vmatprep.subr.bf16.mxu1 %v9577_v1 }
 0x820   :  { %3462 = vmatpush1.bf16.msra.mxu0 %v9583_v38  ;;  %3503 = vmatpush1.bf16.msra.mxu1 %v9589_v37 }
 0x821   :  { %3463 = vmatprep.subr.bf16.mxu0 %v9595_v9  ;;  %3504 = vmatprep.subr.bf16.mxu1 %v9601_v21 }
 0x824   :  { %3464 = vmatpush1.bf16.msra.mxu0 %v9607_v40  ;;  %3505 = vmatpush1.bf16.msra.mxu1 %v9613_v10 }
 0x825   :  { %3465 = vmatprep.subr.bf16.mxu0 %v9619_v44  ;;  %3506 = vmatprep.subr.bf16.mxu1 %v9625_v29 }
 0x828   :  { %3466 = vmatpush1.bf16.msra.mxu0 %v9631_v60  ;;  %3507 = vmatpush1.bf16.msra.mxu1 %v9637_v33 }
 0x829   :  { %3467 = vmatprep.subr.bf16.mxu0 %v9643_v5  ;;  %3508 = vmatprep.subr.bf16.mxu1 %v9649_v34 }
 0x82c   :  { %v3292_v26 = vpop.f32.mrb[92].mxu0  ;;  %v3333_v20 = vpop.f32.mrb[92].mxu1  ;;  %3468 = vmatpush1.bf16.msra.mxu0 %v9656_v3  ;;  %3509 = vmatpush1.bf16.msra.mxu1 %v9662_v31 }
 0x82d   :  { %v3293_v51 = vadd.f32 %v9336_v32, %v3292_v26  ;;  %v3294_v22 = vpop.f32.mrb[93].mxu0  ;;  %v3335_v50 = vpop.f32.mrb[93].mxu1  ;;  %3469 = vmatprep.subr.bf16.mxu0 %v9669_v19  ;;  %3510 = vmatprep.subr.bf16.mxu1 %v9675_v30  ;;  %v3334_v0 = vadd.f32 %v9366_v14, %v3333_v20  ;;  %v9749_v26 = vld [vmem:[%s10044_s6 + $0x14c] ss:$16 sps:$4 sm:$0xff]   ;;  %v9831_v14 = vld [vmem:[%s10044_s6 + $0x1a0] ss:$16 sps:$4 sm:$0xff]  }
 0x82e   :  { %v3295_v46 = vadd.f32 %v9344_v61, %v3294_v22  ;;  %v3296_v18 = vpop.f32.mrb[94].mxu0  ;;  %v3337_v54 = vpop.f32.mrb[94].mxu1  ;;  %v3336_v63 = vadd.f32 %v9352_v7, %v3335_v50  ;;  %v9837_v7 = vld [vmem:[%s10044_s6 + $0x1a8] ss:$16 sps:$4 sm:$0xff]   ;;  %v9843_v61 = vld [vmem:[%s10044_s6 + $0x1c4] ss:$16 sps:$4 sm:$0xff]  }
 0x82f   :  { %4446 = vtanh.f32 %v3293_v51  ;;  %v3297_v58 = vpop.f32.mrb[95].mxu0  ;;  %v3338_v36 = vpop.f32.mrb[95].mxu1  ;;  %v9761_v18 = vld [vmem:[%s10044_s6 + $0x148] ss:$16 sps:$4 sm:$0xff]  }
 0x830   :  { %4448 = vtanh.f32 %v3295_v46  ;;  %3470 = vmatpush1.bf16.msra.mxu0 %v9682_v42  ;;  %3511 = vmatpush1.bf16.msra.mxu1 %v9688_v59  ;;  %v9755_v46 = vld [vmem:[%s10044_s6 + $0x140] ss:$16 sps:$4 sm:$0xff]   ;;  %v9767_v58 = vld [vmem:[%s10044_s6 + $0x164] ss:$16 sps:$4 sm:$0xff]   ;;  %v9773_v36 = vld [vmem:[%s10044_s6 + $0x16c] ss:$16 sps:$4 sm:$0xff]  }
 0x831   :  { %3471 = vmatprep.subr.bf16.mxu0 %v9694_v6  ;;  %3512 = vmatprep.subr.bf16.mxu1 %v9700_v35  ;;  %4450 = vtanh.f32 %v3336_v63 }
 0x832   :  { %4452 = vtanh.f32 %v3334_v0 }
 0x834   :  { %3472 = vmatpush1.bf16.msra.mxu0 %v9706_v56  ;;  %3513 = vmatpush1.bf16.msra.mxu1 %v9712_v53 }
 0x835   :  { %3473 = vmatprep.subr.bf16.mxu0 %v9718_v27  ;;  %3514 = vmatprep.subr.bf16.mxu1 %v9724_v24 }
 0x838   :  { %3474 = vmatpush1.bf16.msra.mxu0 %v9731_v48  ;;  %3515 = vmatpush1.bf16.msra.mxu1 %v9737_v11 }
 0x839   :  { %v4447_v17 = vpop.eup %4446  ;;  %3475 = vmatprep.subr.bf16.mxu0 %v9743_v2  ;;  %3516 = vmatprep.subr.bf16.mxu1 %v9749_v26 }
 0x83a   :  { %v3344_v23 = vmul.f32 0.5, %v4447_v17  ;;  %v4449_v20 = vpop.eup %4448  ;;  %v9780_v17 = vld [vmem:[%s10044_s6 + $0x160] ss:$16 sps:$4 sm:$0xff]  }
 0x83b   :  { %v3346_v22 = vmul.f32 0.5, %v4449_v20  ;;  %v4451_v50 = vpop.eup %4450 }
 0x83c   :  { %v3345_v51 = vadd.f32 0.5, %v3344_v23  ;;  %3476 = vmatpush1.bf16.msra.mxu0 %v9755_v46  ;;  %3517 = vmatpush1.bf16.msra.mxu1 %v9761_v18  ;;  %v9786_v23 = vld [vmem:[%s10044_s6 + $0x168] ss:$16 sps:$4 sm:$0xff]  }
 0x83d   :  { %v3347_v54 = vadd.f32 0.5, %v3346_v22  ;;  %3477 = vmatprep.subr.bf16.mxu0 %v9767_v58  ;;  %3518 = vmatprep.subr.bf16.mxu1 %v9773_v36  ;;  %v9807_v22 = vld [vmem:[%s10044_s6 + $0x180] ss:$16 sps:$4 sm:$0xff]  }
 0x83e   :  { %v3351_v63 = vmul.f32 %v4451_v50, %v3345_v51  ;;  %v9800_v51 = vld [vmem:[%s10044_s6 + $0x18c] ss:$16 sps:$4 sm:$0xff]   ;;  %v9813_v50 = vld [vmem:[%s10044_s6 + $0x188] ss:$16 sps:$4 sm:$0xff]  }
 0x83f   :  { %v3350_v0 = vmul.f32 %v3347_v54, %v9380_v45  ;;  %v9794_v45 = vld [vmem:[%s10044_s6 + $0x184] ss:$16 sps:$4 sm:$0xff]   ;;  %v4453_v54 = vpop.eup %4452 }
 0x840   :  { %3478 = vmatpush1.bf16.msra.mxu0 %v9780_v17  ;;  %3519 = vmatpush1.bf16.msra.mxu1 %v9786_v23 }
 0x841   :  { %v9789_v20 = vadd.f32 %v3351_v63, %v3350_v0  ;;  %3479 = vmatprep.subr.bf16.mxu0 %v9794_v45  ;;  %3520 = vmatprep.subr.bf16.mxu1 %v9800_v51  ;;  %v9819_v63 = vld [vmem:[%s10044_s6 + $0x1a4] ss:$16 sps:$4 sm:$0xff]   ;;  %v9825_v0 = vld [vmem:[%s10044_s6 + $0x1ac] ss:$16 sps:$4 sm:$0xff]  }
 0x843   :  { %11152 = vst [vmem:[#allocation94_spill] sm:$0xff] %v9789_v20  ;;  %4454 = vtanh.f32 %v9789_v20  ;;  %v3348_v20 = vmul.f32 0.5, %v4453_v54  ;;  %v9849_v54 = vld [vmem:[%s10044_s6 + $0x1cc] ss:$16 sps:$4 sm:$0xff]  }
 0x844   :  { %3480 = vmatpush1.bf16.msra.mxu0 %v9807_v22  ;;  %3521 = vmatpush1.bf16.msra.mxu1 %v9813_v50 }
 0x845   :  { %3481 = vmatprep.subr.bf16.mxu0 %v9819_v63  ;;  %3522 = vmatprep.subr.bf16.mxu1 %v9825_v0  ;;  %v3349_v32 = vadd.f32 0.5, %v3348_v20  ;;  %v9873_v20 = vld [vmem:[%s10044_s6 + $0x1ec] ss:$16 sps:$4 sm:$0xff]  }
 0x846   :  { %11156 = vst [vmem:[#allocation98_spill] sm:$0xff] %v9873_v20 }
 0x848   :  { %3482 = vmatpush1.bf16.msra.mxu0 %v9831_v14  ;;  %3523 = vmatpush1.bf16.msra.mxu1 %v9837_v7 }
 0x849   :  { %3483 = vmatprep.subr.bf16.mxu0 %v9843_v61  ;;  %3524 = vmatprep.subr.bf16.mxu1 %v9849_v54 }
 0x84c   :  { %3484 = vmatpush1.bf16.msra.mxu0 %v9855_v16  ;;  %3525 = vmatpush1.bf16.msra.mxu1 %v9861_v62  ;;  %v9879_v62 = vld [vmem:[%s10044_s6 + $0x1e0] ss:$16 sps:$4 sm:$0xff]   ;;  %v9885_v16 = vld [vmem:[%s10044_s6 + $0x1e8] ss:$16 sps:$4 sm:$0xff]  }
 0x84d   :  { %v4455_v39 = vpop.eup %4454  ;;  %3485 = vmatprep.subr.bf16.mxu0 %v9867_v49  ;;  %3526 = vmatprep.subr.bf16.mxu1 %v9873_v20  ;;  %v4984_v20 = vld [vmem:[%s10044_s6 + $0x4] ss:$16 sps:$4 sm:$0xff]  }
 0x84e   :  { %v3354_v57 = vmul.f32 %v4455_v39, %v3349_v32  ;;  %v4985_v32 = vld [vmem:[%s10044_s6 + $0xc] ss:$16 sps:$4 sm:$0xff]   ;;  %v11159_v39 = vld [vmem:[#allocation97_spill] sm:$0xff] }
 0x850   :  { %3486 = vmatpush1.bf16.msra.mxu0 %v9879_v62  ;;  %3527 = vmatpush1.bf16.msra.mxu1 %v9885_v16  ;;  %v3454_v49 = vpack.c.bf16 %v3354_v57, %v3354_v57  ;;  %v11157_v57 = vld [vmem:[#allocation95_spill] sm:$0xff] }
 0x851   :  { %3554 = vmatprep.subr.bf16.mxu0 %v4984_v20  ;;  %3595 = vmatprep.subr.bf16.mxu1 %v4985_v32 }
 0x852   :  { %3487 = vmatprep.mubr.bf16.mxu0 %v3454_v49  ;;  %3528 = vmatprep.mubr.bf16.mxu1 %v3454_v49  ;;  %v11158_v49 = vld [vmem:[#allocation96_spill] sm:$0xff] }
 0x853   :  { %3488 = vmatmul.mubr.bf16.vlgmr.msra.gmra.mrb[100].mxu0 %v9504_v41  ;;  %3529 = vmatmul.mubr.bf16.vlgmr.msra.gmra.mrb[100].mxu1 %v9504_v41  ;;  %v11160_v41 = vld [vmem:[#allocation98_spill] sm:$0xff] }
 0x854   :  { %3555 = vmatpush1.bf16.msra.mxu0 %v9511_v55  ;;  %3596 = vmatpush1.bf16.msra.mxu1 %v9517_v13  ;;  %v11161_v55 = vmov 0.0|0.0   ;;  %v11162_v13 = vld [vmem:[#allocation56_spill] sm:$0xff] }
 0x855   :  { %3556 = vmatprep.subr.bf16.mxu0 %v9523_v47  ;;  %3597 = vmatprep.subr.bf16.mxu1 %v9529_v43 }
 0x858   :  { %3557 = vmatpush1.bf16.msra.mxu0 %v9535_v25  ;;  %3598 = vmatpush1.bf16.msra.mxu1 %v9541_v28  ;;  %v11163_v25 = vld [vmem:[#allocation57_spill] sm:$0xff] }
 0x859   :  { %3558 = vmatprep.subr.bf16.mxu0 %v9547_v15  ;;  %3599 = vmatprep.subr.bf16.mxu1 %v9553_v8 }
 0x85c   :  { %3559 = vmatpush1.bf16.msra.mxu0 %v9559_v52  ;;  %3600 = vmatpush1.bf16.msra.mxu1 %v9565_v12  ;;  %v11164_v52 = vld [vmem:[#allocation91_spill] sm:$0xff] }
 0x85d   :  { %3560 = vmatprep.subr.bf16.mxu0 %v9571_v4  ;;  %3601 = vmatprep.subr.bf16.mxu1 %v9577_v1 }
 0x860   :  { %3561 = vmatpush1.bf16.msra.mxu0 %v9583_v38  ;;  %3602 = vmatpush1.bf16.msra.mxu1 %v9589_v37 }
 0x861   :  { %3562 = vmatprep.subr.bf16.mxu0 %v9595_v9  ;;  %3603 = vmatprep.subr.bf16.mxu1 %v9601_v21 }
 0x864   :  { %3563 = vmatpush1.bf16.msra.mxu0 %v9607_v40  ;;  %3604 = vmatpush1.bf16.msra.mxu1 %v9613_v10 }
 0x865   :  { %3564 = vmatprep.subr.bf16.mxu0 %v9619_v44  ;;  %3605 = vmatprep.subr.bf16.mxu1 %v9625_v29 }
 0x868   :  { %3565 = vmatpush1.bf16.msra.mxu0 %v9631_v60  ;;  %3606 = vmatpush1.bf16.msra.mxu1 %v9637_v33  ;;  %v11166_v60 = vld [vmem:[#allocation93_spill] sm:$0xff] }
 0x869   :  { %3566 = vmatprep.subr.bf16.mxu0 %v9643_v5  ;;  %3607 = vmatprep.subr.bf16.mxu1 %v9649_v34 }
 0x86c   :  { %3567 = vmatpush1.bf16.msra.mxu0 %v9656_v3  ;;  %3608 = vmatpush1.bf16.msra.mxu1 %v9662_v31 }
 0x86d   :  { %3568 = vmatprep.subr.bf16.mxu0 %v9669_v19  ;;  %3609 = vmatprep.subr.bf16.mxu1 %v9675_v30 }
 0x870   :  { %3569 = vmatpush1.bf16.msra.mxu0 %v9682_v42  ;;  %3610 = vmatpush1.bf16.msra.mxu1 %v9688_v59 }
 0x871   :  { %3570 = vmatprep.subr.bf16.mxu0 %v9694_v6  ;;  %3611 = vmatprep.subr.bf16.mxu1 %v9700_v35  ;;  %v11167_v6 = vld [vmem:[#allocation69_spill] sm:$0xff] }
 0x874   :  { %3571 = vmatpush1.bf16.msra.mxu0 %v9706_v56  ;;  %3612 = vmatpush1.bf16.msra.mxu1 %v9712_v53 }
 0x875   :  { %3572 = vmatprep.subr.bf16.mxu0 %v9718_v27  ;;  %3613 = vmatprep.subr.bf16.mxu1 %v9724_v24  ;;  %v11168_v27 = vld [vmem:[#allocation60_spill] sm:$0xff] }
 0x878   :  { %3573 = vmatpush1.bf16.msra.mxu0 %v9731_v48  ;;  %3614 = vmatpush1.bf16.msra.mxu1 %v9737_v11 }
 0x879   :  { %3574 = vmatprep.subr.bf16.mxu0 %v9743_v2  ;;  %3615 = vmatprep.subr.bf16.mxu1 %v9749_v26  ;;  %v11169_v2 = vld [vmem:[#allocation59_spill] sm:$0xff] }
 0x87c   :  { %3575 = vmatpush1.bf16.msra.mxu0 %v9755_v46  ;;  %3616 = vmatpush1.bf16.msra.mxu1 %v9761_v18 }
 0x87d   :  { %3576 = vmatprep.subr.bf16.mxu0 %v9767_v58  ;;  %3617 = vmatprep.subr.bf16.mxu1 %v9773_v36  ;;  %v11170_v58 = vld [vmem:[#allocation61_spill] sm:$0xff] }
 0x880   :  { %3577 = vmatpush1.bf16.msra.mxu0 %v9780_v17  ;;  %3618 = vmatpush1.bf16.msra.mxu1 %v9786_v23 }
 0x881   :  { %3578 = vmatprep.subr.bf16.mxu0 %v9794_v45  ;;  %3619 = vmatprep.subr.bf16.mxu1 %v9800_v51 }
 0x884   :  { %3579 = vmatpush1.bf16.msra.mxu0 %v9807_v22  ;;  %3620 = vmatpush1.bf16.msra.mxu1 %v9813_v50 }
 0x885   :  { %3580 = vmatprep.subr.bf16.mxu0 %v9819_v63  ;;  %3621 = vmatprep.subr.bf16.mxu1 %v9825_v0 }
 0x888   :  { %3581 = vmatpush1.bf16.msra.mxu0 %v9831_v14  ;;  %3622 = vmatpush1.bf16.msra.mxu1 %v9837_v7 }
 0x889   :  { %3582 = vmatprep.subr.bf16.mxu0 %v9843_v61  ;;  %3623 = vmatprep.subr.bf16.mxu1 %v9849_v54  ;;  %v11171_v54 = vld [vmem:[#allocation94_spill] sm:$0xff] }
 0x88c   :  { %3583 = vmatpush1.bf16.msra.mxu0 %v11157_v57  ;;  %3624 = vmatpush1.bf16.msra.mxu1 %v11158_v49 }
 0x88d   :  { %3584 = vmatprep.subr.bf16.mxu0 %v11159_v39  ;;  %3625 = vmatprep.subr.bf16.mxu1 %v11160_v41 }
 0x890   :  { %3585 = vmatpush1.bf16.msra.mxu0 %v9879_v62  ;;  %3626 = vmatpush1.bf16.msra.mxu1 %v9885_v16  ;;  %v11165_v62 = vld [vmem:[#allocation92_spill] sm:$0xff] }
 0x891   :  { %3978 = vmatprep.subr.bf16.mxu0 %v11161_v55 }
 0x8e6   :  { %v3391_v14 = vpop.f32.mrb[96].mxu0  ;;  %v3432_v7 = vpop.f32.mrb[96].mxu1 }
 0x8e7   :  { %v3392_v61 = vadd.f32 %v11162_v13, %v3391_v14  ;;  %v3393_v47 = vpop.f32.mrb[97].mxu0  ;;  %v3434_v43 = vpop.f32.mrb[97].mxu1  ;;  %v3433_v16 = vadd.f32 %v11165_v62, %v3432_v7 }
 0x8e8   :  { %v3394_v28 = vadd.f32 %v11163_v25, %v3393_v47  ;;  %v3395_v15 = vpop.f32.mrb[98].mxu0  ;;  %v3436_v8 = vpop.f32.mrb[98].mxu1  ;;  %v3435_v12 = vadd.f32 %v11164_v52, %v3434_v43  ;;  %v3652_v47 = vld [vmem:[%s10047_s8 + $0x8] sm:$0xff]  ;;  %v3653_v25 = vld [vmem:[%s10047_s8 + $0x10] sm:$0xff] }
 0x8e9   :  { %4456 = vtanh.f32 %v3392_v61  ;;  %v3396_v4 = vpop.f32.mrb[99].mxu0  ;;  %v3437_v1 = vpop.f32.mrb[99].mxu1  ;;  %v3651_v61 = vld [vmem:[%s10047_s8] sm:$0xff]  ;;  %v3656_v52 = vld [vmem:[%s10047_s8 + $0x28] sm:$0xff] }
 0x8ea   :  { %4458 = vtanh.f32 %v3394_v28  ;;  %v3979_v43 = vpack.c.bf16 %v3652_v47, %v3651_v61  ;;  %v3654_v28 = vld [vmem:[%s10047_s8 + $0x18] sm:$0xff]  ;;  %v3655_v8 = vld [vmem:[%s10047_s8 + $0x20] sm:$0xff]  ;;  %v3657_v4 = vld [vmem:[%s10047_s8 + $0x30] sm:$0xff] }
 0x8eb   :  { %4460 = vtanh.f32 %v3435_v12  ;;  %v3982_v15 = vpack.c.bf16 %v3654_v28, %v3653_v25  ;;  %v3985_v12 = vpack.c.bf16 %v3656_v52, %v3655_v8  ;;  %v3658_v1 = vld [vmem:[%s10047_s8 + $0x38] sm:$0xff] }
 0x8ec   :  { %4462 = vtanh.f32 %v3433_v16  ;;  %v3988_v62 = vpack.c.bf16 %v3658_v1, %v3657_v4  ;;  %v3659_v16 = vld [vmem:[%s10047_s8 + $0x40] sm:$0xff] }
 0x8f3   :  { %v4457_v38 = vpop.eup %4456 }
 0x8f4   :  { %v3443_v37 = vmul.f32 0.5, %v4457_v38  ;;  %v4459_v9 = vpop.eup %4458  ;;  %v3660_v38 = vld [vmem:[%s10047_s8 + $0x48] sm:$0xff] }
 0x8f5   :  { %v3445_v40 = vmul.f32 0.5, %v4459_v9  ;;  %v4461_v10 = vpop.eup %4460  ;;  %v3661_v9 = vld [vmem:[%s10047_s8 + $0x50] sm:$0xff] }
 0x8f6   :  { %v3444_v21 = vadd.f32 0.5, %v3443_v37  ;;  %v4463_v34 = vpop.eup %4462  ;;  %v3991_v37 = vpack.c.bf16 %v3660_v38, %v3659_v16 }
 0x8f7   :  { %v3446_v44 = vadd.f32 0.5, %v3445_v40  ;;  %v3447_v3 = vmul.f32 0.5, %v4463_v34  ;;  %v3663_v40 = vld [vmem:[%s10047_s8 + $0x60] sm:$0xff] }
 0x8f8   :  { %v3450_v29 = vmul.f32 %v4461_v10, %v3444_v21  ;;  %v3662_v21 = vld [vmem:[%s10047_s8 + $0x58] sm:$0xff] }
 0x8f9   :  { %v3449_v33 = vmul.f32 %v3446_v44, %v11166_v60  ;;  %v3448_v31 = vadd.f32 0.5, %v3447_v3  ;;  %v3994_v10 = vpack.c.bf16 %v3662_v21, %v3661_v9  ;;  %v3664_v44 = vld [vmem:[%s10047_s8 + $0x68] sm:$0xff] }
 0x8fa   :  { %v3997_v60 = vpack.c.bf16 %v3664_v44, %v3663_v40 }
 0x8fb   :  { %v3451_v5 = vadd.f32 %v3450_v29, %v3449_v33  ;;  %v11172_v29 = vmov 0.0   ;;  %v3665_v33 = vld [vmem:[%s10047_s8 + $0x70] sm:$0xff] }
 0x8fd   :  { %4464 = vtanh.f32 %v3451_v5  ;;  %v3666_v5 = vld [vmem:[%s10047_s8 + $0x78] sm:$0xff] }
 0x8fe   :  { %v4000_v34 = vpack.c.bf16 %v3666_v5, %v3665_v33 }
 0x907   :  { %v4465_v19 = vpop.eup %4464 }
 0x908   :  { %v3453_v30 = vmul.f32 %v4465_v19, %v3448_v31 }
 0x90a   :  { %v3552_v13 = vpack.c.bf16 %v3453_v30, %v3453_v30 }
 0x926   :  { %v3489_v42 = vpop.f32.mrb[100].mxu0  ;;  %v3530_v59 = vpop.f32.mrb[100].mxu1 }
 0x927   :  { %v3490_v35 = vadd.f32 %v11167_v6, %v3489_v42  ;;  %v3491_v56 = vpop.f32.mrb[101].mxu0  ;;  %v3532_v53 = vpop.f32.mrb[101].mxu1  ;;  %v3531_v36 = vadd.f32 %v11170_v58, %v3530_v59 }
 0x928   :  { %v3492_v24 = vadd.f32 %v11168_v27, %v3491_v56  ;;  %v3493_v48 = vpop.f32.mrb[102].mxu0  ;;  %v3534_v11 = vpop.f32.mrb[102].mxu1  ;;  %v3533_v26 = vadd.f32 %v11169_v2, %v3532_v53 }
 0x929   :  { %4466 = vtanh.f32 %v3490_v35  ;;  %v3494_v46 = vpop.f32.mrb[103].mxu0  ;;  %v3535_v18 = vpop.f32.mrb[103].mxu1 }
 0x92a   :  { %4468 = vtanh.f32 %v3492_v24 }
 0x92b   :  { %4470 = vtanh.f32 %v3533_v26 }
 0x92c   :  { %4472 = vtanh.f32 %v3531_v36 }
 0x933   :  { %v4467_v17 = vpop.eup %4466 }
 0x934   :  { %v3541_v23 = vmul.f32 0.5, %v4467_v17  ;;  %v4469_v45 = vpop.eup %4468 }
 0x935   :  { %v3543_v22 = vmul.f32 0.5, %v4469_v45  ;;  %v4471_v50 = vpop.eup %4470 }
 0x936   :  { %v3542_v51 = vadd.f32 0.5, %v3541_v23  ;;  %v4473_v57 = vpop.eup %4472 }
 0x937   :  { %v3544_v63 = vadd.f32 0.5, %v3543_v22  ;;  %v3545_v49 = vmul.f32 0.5, %v4473_v57 }
 0x938   :  { %v3548_v0 = vmul.f32 %v4471_v50, %v3542_v51 }
 0x939   :  { %v3547_v20 = vmul.f32 %v3544_v63, %v11171_v54  ;;  %v3546_v39 = vadd.f32 0.5, %v3545_v49 }
 0x93b   :  { %v9969_v32 = vadd.f32 %v3548_v0, %v3547_v20 }
 0x93d   :  { %4474 = vtanh.f32 %v9969_v32 }
 0x947   :  { %v4475_v41 = vpop.eup %4474 }
 0x948   :  { %v3551_v14 = vmul.f32 %v4475_v41, %v3546_v39 }
 0x94a   :  { %v3553_v7 = vpack.c.bf16 %v3551_v14, %v3551_v14 }
 0x94c   :  { %3586 = vmatprep.mubr.bf16.mxu0 %v3553_v7  ;;  %3627 = vmatprep.mubr.bf16.mxu1 %v3553_v7 }
 0x94d   :  { %3587 = vmatmul.mubr.bf16.vlgmr.msra.gmra.mrb[104].mxu0 %v3552_v13  ;;  %3628 = vmatmul.mubr.bf16.vlgmr.msra.gmra.mrb[104].mxu1 %v3552_v13 }
 0x94e   :  { %3980 = vmatpush3.bf16.msra.mxu0 %v3979_v43  ;;  %3975 = vmatprep.mubr.msk.f32.mxu0 %vm4989_vm1, %v11172_v29 }
 0x94f   :  { %3981 = vmatprep.subr.bf16.mxu0 %v11161_v55 }
 0x952   :  { %3983 = vmatpush3.bf16.msra.mxu0 %v3982_v15 }
 0x953   :  { %3984 = vmatprep.subr.bf16.mxu0 %v11161_v55 }
 0x956   :  { %3986 = vmatpush3.bf16.msra.mxu0 %v3985_v12 }
 0x957   :  { %3987 = vmatprep.subr.bf16.mxu0 %v11161_v55 }
 0x95a   :  { %3989 = vmatpush3.bf16.msra.mxu0 %v3988_v62 }
 0x95b   :  { %3990 = vmatprep.subr.bf16.mxu0 %v11161_v55 }
 0x95e   :  { %3992 = vmatpush3.bf16.msra.mxu0 %v3991_v37 }
 0x95f   :  { %3993 = vmatprep.subr.bf16.mxu0 %v11161_v55 }
 0x962   :  { %3995 = vmatpush3.bf16.msra.mxu0 %v3994_v10 }
 0x963   :  { %3996 = vmatprep.subr.bf16.mxu0 %v11161_v55 }
 0x966   :  { %3998 = vmatpush3.bf16.msra.mxu0 %v3997_v60 }
 0x967   :  { %3999 = vmatprep.subr.bf16.mxu0 %v11161_v55 }
 0x96a   :  { %4001 = vmatpush3.bf16.msra.mxu0 %v4000_v34 }
 0xa20   :  { %v3588_v3 = vpop.f32.mrb[104].mxu0  ;;  %v3629_v31 = vpop.f32.mrb[104].mxu1 }
 0xa21   :  { %v3589_v19 = vadd.f32 %v11167_v6, %v3588_v3  ;;  %v3590_v30 = vpop.f32.mrb[105].mxu0  ;;  %v3631_v42 = vpop.f32.mrb[105].mxu1  ;;  %v3630_v55 = vadd.f32 %v11170_v58, %v3629_v31  ;;  %v3925_v58 = vld [vmem:[%s10048_s9] ss:$0 sm:$0xff] }
 0xa22   :  { %v3591_v59 = vadd.f32 %v11168_v27, %v3590_v30  ;;  %v3592_v35 = vpop.f32.mrb[106].mxu0  ;;  %v3633_v56 = vpop.f32.mrb[106].mxu1  ;;  %v3632_v53 = vadd.f32 %v11169_v2, %v3631_v42 }
 0xa23   :  { %4476 = vtanh.f32 %v3589_v19  ;;  %v3593_v24 = vpop.f32.mrb[107].mxu0  ;;  %v3634_v48 = vpop.f32.mrb[107].mxu1 }
 0xa24   :  { %4478 = vtanh.f32 %v3591_v59 }
 0xa25   :  { %4480 = vtanh.f32 %v3632_v53 }
 0xa26   :  { %4482 = vtanh.f32 %v3630_v55 }
 0xa2d   :  { %v4477_v11 = vpop.eup %4476 }
 0xa2e   :  { %v3640_v26 = vmul.f32 0.5, %v4477_v11  ;;  %v4479_v46 = vpop.eup %4478 }
 0xa2f   :  { %v3642_v6 = vmul.f32 0.5, %v4479_v46  ;;  %v4481_v36 = vpop.eup %4480 }
 0xa30   :  { %v3641_v18 = vadd.f32 0.5, %v3640_v26  ;;  %v4483_v2 = vpop.eup %4482 }
 0xa31   :  { %v3643_v17 = vadd.f32 0.5, %v3642_v6  ;;  %v3644_v51 = vmul.f32 0.5, %v4483_v2 }
 0xa32   :  { %v3647_v27 = vmul.f32 %v4481_v36, %v3641_v18 }
 0xa33   :  { %v3646_v23 = vmul.f32 %v3643_v17, %v9969_v32  ;;  %v3645_v22 = vadd.f32 0.5, %v3644_v51 }
 0xa35   :  { %v3648_v45 = vadd.f32 %v3647_v27, %v3646_v23 }
 0xa37   :  { %4484 = vtanh.f32 %v3648_v45 }
 0xa41   :  { %v4485_v50 = vpop.eup %4484 }
 0xa42   :  { %v3650_v63 = vmul.f32 %v4485_v50, %v3645_v22 }
 0xa44   :  { %3976 = vmatmul.mubr.f32.vlgmr.msra.gmra.mrb[108].mxu0 %v3650_v63 }
 0xb17   :  { %v3740_v0 = vpop.f32.mrb[108].mxu0 }
 0xb18   :  { %v3741_v54 = vadd.f32 %v3925_v58, %v3740_v0  ;;  %v3977_v20 = vpop.f32.mrb[109].mxu0 }
 0xb1a   :  { %3744 = vst [vmem:[%s10049_s10] sm:$0xff] %v3741_v54 }

</bundles_post_ra>
